<compile_context>
chip_gen: v5e
topology: v5e:2x2
jax: 0.10.0
libtpu: 0.0.40
codegen_flags: <defaults>
</compile_context>

<pallas_src>
import functools

import jax
import jax.numpy as jnp
from jax import lax
from jax.experimental import pallas as pl
from jax.experimental.pallas import tpu as pltpu

V_THRESHOLD = 1.0
BN_EPS = 1e-5


# ----------------------------------------------------------------------------
# Tile-size helpers.
# ----------------------------------------------------------------------------
def _largest_divisor(n, cap):
    """Largest divisor of n that is <= cap, preferring multiples of 128."""
    if n <= cap:
        return n
    best = 1
    for d in range(cap, 0, -1):
        if n % d == 0:
            if d % 128 == 0:
                return d
            if best == 1:
                best = d
    return best


def _choose_layer_tiles(K, O, T, B, x_bytes_per_elem):
    """Pick (tk, tn) so W.T and x tiles stay around <=1 MiB each (VMEM-safe on
    v5e/v6e/v7x with double-buffering) while keeping per-step DMA chunky."""
    tn = _largest_divisor(O, 512)
    cap_k = min(
        8192,
        max(128, (1 << 20) // max(1, 2 * tn)),                      # bf16 W.T tile
        max(128, (1 << 20) // max(1, T * B * x_bytes_per_elem)),    # x tile
    )
    tk = _largest_divisor(K, cap_k)
    return tk, tn


# ----------------------------------------------------------------------------
# Kernel 1: layer 0 = fused sn0-IFNode + Linear (BN folded) + IFNode.
# Grid: (O tiles [parallel], K tiles [arbitrary/reduction]).
# ----------------------------------------------------------------------------
def _layer0_kernel(x_ref, wt_ref, b_ref, out_ref, acc_ref, spk_ref, *, T, B):
    # x_ref:   (T, B, tk)  f32   raw (resized, flattened) input, K-tile
    # wt_ref:  (tk, tn)    bf16  folded W.T tile
    # b_ref:   (1, tn)     f32   folded bias (linear bias + BN)
    # out_ref: (T*B, tn)   f32   output spikes
    # acc_ref: (T*B, tn)   f32   pre-activation accumulator (VMEM scratch)
    # spk_ref: (T*B, tk)   f32   sn0 spikes for this K-tile (VMEM scratch)
    k = pl.program_id(1)
    tk = x_ref.shape[2]

    @pl.when(k == 0)
    def _():
        acc_ref[...] = jnp.zeros_like(acc_ref)

    # sn0 IFNode: membrane recursion over time, elementwise per feature.
    v = jnp.zeros((B, tk), jnp.float32)
    for t in range(T):
        v = v + x_ref[t]
        s = (v >= V_THRESHOLD).astype(jnp.float32)
        spk_ref[pl.ds(t * B, B), :] = s
        v = v * (1.0 - s)  # hard reset to v_reset = 0

    # Single (T*B, tk) x (tk, tn) matmul per grid step (bf16 in, f32 acc).
    acc_ref[...] += jnp.dot(spk_ref[...].astype(jnp.bfloat16), wt_ref[...],
                            preferred_element_type=jnp.float32)

    @pl.when(k == pl.num_programs(1) - 1)
    def _():
        tn = out_ref.shape[1]
        v = jnp.zeros((B, tn), jnp.float32)
        for t in range(T):
            y = acc_ref[pl.ds(t * B, B), :] + b_ref[...]
            v = v + y
            s = (v >= V_THRESHOLD).astype(jnp.float32)
            out_ref[pl.ds(t * B, B), :] = s.astype(out_ref.dtype)
            v = v * (1.0 - s)


def spiking_layer0(x, wt, b):
    """x: (T, B, K) f32; wt: (K, O) bf16 folded W.T; b: (O,) f32.
    Returns (T*B, O) f32 spike train."""
    T, B, K = x.shape
    O = wt.shape[1]
    TB = T * B
    tk, tn = _choose_layer_tiles(K, O, T, B, x.dtype.itemsize)
    kernel = functools.partial(_layer0_kernel, T=T, B=B)
    return pl.pallas_call(
        kernel,
        out_shape=jax.ShapeDtypeStruct((TB, O), jnp.float32),
        grid=(O // tn, K // tk),
        in_specs=[
            pl.BlockSpec((T, B, tk), lambda j, k: (0, 0, k)),
            pl.BlockSpec((tk, tn), lambda j, k: (k, j)),
            pl.BlockSpec((1, tn), lambda j, k: (0, j)),
        ],
        out_specs=pl.BlockSpec((TB, tn), lambda j, k: (0, j)),
        scratch_shapes=[pltpu.VMEM((TB, tn), jnp.float32),
                        pltpu.VMEM((TB, tk), jnp.float32)],
        compiler_params=pltpu.CompilerParams(
            dimension_semantics=("parallel", "arbitrary")),
    )(x, wt, b.reshape(1, O))


# ----------------------------------------------------------------------------
# Kernel 2: hidden layer = Linear (BN folded) + IFNode on an existing spike
# train.  Grid: (O tiles [parallel], K tiles [arbitrary]).
# ----------------------------------------------------------------------------
def _hidden_kernel(x_ref, wt_ref, b_ref, out_ref, acc_ref, *, T, B):
    # x_ref:   (T*B, tk) f32 spikes   wt_ref: (tk, tn) bf16   b_ref: (1, tn) f32
    # out_ref: (T*B, tn) f32 spikes   acc_ref: (T*B, tn) f32 scratch
    k = pl.program_id(1)

    @pl.when(k == 0)
    def _():
        acc_ref[...] = jnp.zeros_like(acc_ref)

    acc_ref[...] += jnp.dot(x_ref[...].astype(jnp.bfloat16), wt_ref[...],
                            preferred_element_type=jnp.float32)

    @pl.when(k == pl.num_programs(1) - 1)
    def _():
        tn = out_ref.shape[1]
        v = jnp.zeros((B, tn), jnp.float32)
        for t in range(T):
            y = acc_ref[pl.ds(t * B, B), :] + b_ref[...]
            v = v + y
            s = (v >= V_THRESHOLD).astype(jnp.float32)
            out_ref[pl.ds(t * B, B), :] = s.astype(out_ref.dtype)
            v = v * (1.0 - s)


def spiking_hidden(x, wt, b, *, T, B):
    TB, K = x.shape
    O = wt.shape[1]
    tk, tn = _choose_layer_tiles(K, O, T, B, x.dtype.itemsize)
    kernel = functools.partial(_hidden_kernel, T=T, B=B)
    return pl.pallas_call(
        kernel,
        out_shape=jax.ShapeDtypeStruct((TB, O), jnp.float32),
        grid=(O // tn, K // tk),
        in_specs=[
            pl.BlockSpec((TB, tk), lambda j, k: (0, k)),
            pl.BlockSpec((tk, tn), lambda j, k: (k, j)),
            pl.BlockSpec((1, tn), lambda j, k: (0, j)),
        ],
        out_specs=pl.BlockSpec((TB, tn), lambda j, k: (0, j)),
        scratch_shapes=[pltpu.VMEM((TB, tn), jnp.float32)],
        compiler_params=pltpu.CompilerParams(
            dimension_semantics=("parallel", "arbitrary")),
    )(x, wt, b.reshape(1, O))


# ----------------------------------------------------------------------------
# Kernel 3: output head.  mean_t(x_t @ W + b) = (sum_t x_t) @ W / T + b.
# ----------------------------------------------------------------------------
def _head_kernel(x_ref, wt_ref, b_ref, out_ref, *, T, B):
    # x_ref: (T*B, H) f32 spikes, wt_ref: (H, C) bf16, b_ref: (1, C) f32
    acc = jnp.zeros((B, x_ref.shape[1]), jnp.float32)
    for t in range(T):
        acc = acc + x_ref[pl.ds(t * B, B), :]
    counts = acc.astype(wt_ref.dtype)  # spike counts, exact in bf16 for T <= 256
    logits = jnp.dot(counts, wt_ref[...], preferred_element_type=jnp.float32)
    out_ref[...] = (logits * (1.0 / T) + b_ref[...]).astype(out_ref.dtype)


def head(x, wt, b, *, T, B):
    TB, H = x.shape
    C = wt.shape[1]
    kernel = functools.partial(_head_kernel, T=T, B=B)
    return pl.pallas_call(
        kernel,
        out_shape=jax.ShapeDtypeStruct((B, C), jnp.float32),
        grid=(1,),
        in_specs=[
            pl.BlockSpec((TB, H), lambda i: (0, 0)),
            pl.BlockSpec((H, C), lambda i: (0, 0)),
            pl.BlockSpec((1, C), lambda i: (0, 0)),
        ],
        out_specs=pl.BlockSpec((B, C), lambda i: (0, 0)),
    )(x, wt, b.reshape(1, C))


# ----------------------------------------------------------------------------
# Parameters: same init as the module, with BN folded into (W, b), weights
# pre-transposed to (K, O) and cast to bf16 once at init time.
# ----------------------------------------------------------------------------
def fold_linear_bn(w, b, gamma, beta, mean, var, eps=BN_EPS):
    scale = gamma * lax.rsqrt(var + eps)
    w_f = w * scale[:, None]
    b_f = (b - mean) * scale + beta
    return jnp.asarray(w_f.T, jnp.bfloat16), jnp.asarray(b_f, jnp.float32)


def init_params(key, cfg_layers, num_classes, in_channels=2):
    params = {"layers": [], "out": None}
    in_features = 128 * 128 * in_channels
    for out_features in cfg_layers:
        key, kw, kb = jax.random.split(key, 3)
        # nn.init.kaiming_normal_(weight, mode='fan_out', nonlinearity='relu')
        std = (2.0 / out_features) ** 0.5
        w = jax.random.normal(kw, (out_features, in_features), jnp.float32) * std
        bound = 1.0 / (in_features ** 0.5)  # default nn.Linear bias init
        b = jax.random.uniform(kb, (out_features,), jnp.float32, -bound, bound)
        # BatchNorm1d default params / running stats (eval mode), folded in.
        gamma = jnp.ones((out_features,), jnp.float32)
        beta = jnp.zeros((out_features,), jnp.float32)
        mean = jnp.zeros((out_features,), jnp.float32)
        var = jnp.ones((out_features,), jnp.float32)
        params["layers"].append(fold_linear_bn(w, b, gamma, beta, mean, var))
        in_features = out_features
    key, kw, kb = jax.random.split(key, 3)
    std = (2.0 / num_classes) ** 0.5
    w = jax.random.normal(kw, (num_classes, in_features), jnp.float32) * std
    bound = 1.0 / (in_features ** 0.5)
    b = jax.random.uniform(kb, (num_classes,), jnp.float32, -bound, bound)
    params["out"] = (jnp.asarray(w.T, jnp.bfloat16), jnp.asarray(b, jnp.float32))
    return params


# ----------------------------------------------------------------------------
# Full forward (mirrors SpikingMLP._forward_impl).
# ----------------------------------------------------------------------------
def spiking_mlp_forward(params, x):
    # x: (T, B, C, H, W) -- NCHW per time step
    T, B, C, H, W = x.shape
    if H < 128 or W < 128:
        # F.interpolate(..., size=(128,128), mode='bilinear', align_corners=False)
        x = x.reshape(T * B, C, H, W)
        x = jax.image.resize(x, (T * B, C, 128, 128), method="bilinear")
    elif H > 128 or W > 128:
        x = x.reshape(T * B, C, H, W)
        x = jax.image.resize(x, (T * B, C, 128, 128), method="bilinear")
        # TODO(synk): exact AdaptiveAvgPool2d((128,128)) not implemented here.
    x = x.reshape(T, B, C * 128 * 128).astype(jnp.float32)  # flatten C,H,W

    wt0, b0 = params["layers"][0]
    s = spiking_layer0(x, wt0, b0)                # fused sn0 + Linear/BN + IF
    for (wt, b) in params["layers"][1:]:
        s = spiking_hidden(s, wt, b, T=T, B=B)    # Linear/BN + IF
    wt_out, b_out = params["out"]
    return head(s, wt_out, b_out, T=T, B=B)       # mean over T + Linear


if __name__ == "__main__":
    cfg_layers = [32, 32]
    num_classes = 16
    T, B, C, H, W = 8, 2, 2, 16, 16   # in_features = 128*128*2 => C = 2

    key = jax.random.PRNGKey(0)
    kx, kp = jax.random.split(key)
    x = jax.random.normal(kx, (T, B, C, H, W), jnp.float32)
    params = init_params(kp, cfg_layers, num_classes, in_channels=C)

    fwd = jax.jit(functools.partial(spiking_mlp_forward, params))
    out = fwd(x)
    jax.block_until_ready(out)
    assert out.shape == (B, num_classes), out.shape
    assert out.dtype == jnp.float32
    print("KERNEL_OK")
</pallas_src>

<mosaic_0001>
module attributes {stable_mosaic.version = 11 : i64} {
  func.func @_layer0_kernel(%arg0: i32, %arg1: i32, %arg2: memref<8x2x8192xf32, #tpu.memory_space<vmem>>, %arg3: memref<8192x32xbf16, #tpu.memory_space<vmem>>, %arg4: memref<1x32xf32, #tpu.memory_space<vmem>>, %arg5: memref<16x32xf32, #tpu.memory_space<vmem>>, %arg6: memref<16x32xf32, #tpu.memory_space<vmem>>, %arg7: memref<16x8192xf32, #tpu.memory_space<vmem>>) attributes {dimension_semantics = [#tpu.dimension_semantics<parallel>, #tpu.dimension_semantics<arbitrary>], iteration_bounds = array<i64: 1, 4>, scalar_prefetch = 0 : i64, scratch_operands = 2 : i64, tpu.core_type = #tpu.core_type<tc>, window_params = [{transform_indices = @transform_0, window_bounds = array<i64: 8, 2, 8192>}, {transform_indices = @transform_1, window_bounds = array<i64: 8192, 32>}, {transform_indices = @transform_2, window_bounds = array<i64: 1, 32>}, {transform_indices = @transform_3, window_bounds = array<i64: 16, 32>}]} {
    %c0_i32 = arith.constant 0 : i32
    %0 = arith.cmpi eq, %arg1, %c0_i32 : i32
    %1 = arith.extui %0 : i1 to i32
    %c0_i32_0 = arith.constant 0 : i32
    %2 = arith.cmpi ne, %1, %c0_i32_0 : i32
    scf.if %2 {
      %cst_54 = arith.constant 0.000000e+00 : f32
      %99 = vector.broadcast %cst_54 : f32 to vector<16x32xf32>
      %c0_55 = arith.constant 0 : index
      %c0_56 = arith.constant 0 : index
      %100 = vector.load %arg6[%c0_55, %c0_56] : memref<16x32xf32, #tpu.memory_space<vmem>>, vector<16x32xf32>
      tpu.vector_store %arg6[%c0_55, %c0_56], %99 {strides = array<i32>} : memref<16x32xf32, #tpu.memory_space<vmem>>, vector<16x32xf32>,
    } else {
    }
    %cst = arith.constant 0.000000e+00 : f32
    %3 = vector.broadcast %cst : f32 to vector<2x8192xf32>
    %c0 = arith.constant 0 : index
    %c0_1 = arith.constant 0 : index
    %c0_2 = arith.constant 0 : index
    %4 = vector.load %arg2[%c0, %c0_1, %c0_2] : memref<8x2x8192xf32, #tpu.memory_space<vmem>>, vector<1x2x8192xf32>
    %5 = vector.shape_cast %4 : vector<1x2x8192xf32> to vector<2x8192xf32>
    %6 = arith.addf %3, %5 : vector<2x8192xf32>
    %cst_3 = arith.constant 1.000000e+00 : f32
    %7 = vector.broadcast %cst_3 : f32 to vector<2x8192xf32>
    %8 = arith.cmpf oge, %6, %7 : vector<2x8192xf32>
    %9 = arith.extui %8 : vector<2x8192xi1> to vector<2x8192xi32>
    %10 = arith.sitofp %9 : vector<2x8192xi32> to vector<2x8192xf32>
    %c0_4 = arith.constant 0 : index
    %c0_5 = arith.constant 0 : index
    %11 = vector.load %arg7[%c0_4, %c0_5] : memref<16x8192xf32, #tpu.memory_space<vmem>>, vector<2x8192xf32>
    tpu.vector_store %arg7[%c0_4, %c0_5], %10 {strides = array<i32>} : memref<16x8192xf32, #tpu.memory_space<vmem>>, vector<2x8192xf32>,
    %cst_6 = arith.constant 1.000000e+00 : f32
    %12 = vector.broadcast %cst_6 : f32 to vector<2x8192xf32>
    %13 = arith.subf %12, %10 : vector<2x8192xf32>
    %14 = arith.mulf %6, %13 : vector<2x8192xf32>
    %c1 = arith.constant 1 : index
    %c0_7 = arith.constant 0 : index
    %c0_8 = arith.constant 0 : index
    %15 = vector.load %arg2[%c1, %c0_7, %c0_8] : memref<8x2x8192xf32, #tpu.memory_space<vmem>>, vector<1x2x8192xf32>
    %16 = vector.shape_cast %15 : vector<1x2x8192xf32> to vector<2x8192xf32>
    %17 = arith.addf %14, %16 : vector<2x8192xf32>
    %cst_9 = arith.constant 1.000000e+00 : f32
    %18 = vector.broadcast %cst_9 : f32 to vector<2x8192xf32>
    %19 = arith.cmpf oge, %17, %18 : vector<2x8192xf32>
    %20 = arith.extui %19 : vector<2x8192xi1> to vector<2x8192xi32>
    %21 = arith.sitofp %20 : vector<2x8192xi32> to vector<2x8192xf32>
    %c2 = arith.constant 2 : index
    %c0_10 = arith.constant 0 : index
    %22 = vector.load %arg7[%c2, %c0_10] : memref<16x8192xf32, #tpu.memory_space<vmem>>, vector<2x8192xf32>
    tpu.vector_store %arg7[%c2, %c0_10], %21 {strides = array<i32>} : memref<16x8192xf32, #tpu.memory_space<vmem>>, vector<2x8192xf32>,
    %cst_11 = arith.constant 1.000000e+00 : f32
    %23 = vector.broadcast %cst_11 : f32 to vector<2x8192xf32>
    %24 = arith.subf %23, %21 : vector<2x8192xf32>
    %25 = arith.mulf %17, %24 : vector<2x8192xf32>
    %c2_12 = arith.constant 2 : index
    %c0_13 = arith.constant 0 : index
    %c0_14 = arith.constant 0 : index
    %26 = vector.load %arg2[%c2_12, %c0_13, %c0_14] : memref<8x2x8192xf32, #tpu.memory_space<vmem>>, vector<1x2x8192xf32>
    %27 = vector.shape_cast %26 : vector<1x2x8192xf32> to vector<2x8192xf32>
    %28 = arith.addf %25, %27 : vector<2x8192xf32>
    %cst_15 = arith.constant 1.000000e+00 : f32
    %29 = vector.broadcast %cst_15 : f32 to vector<2x8192xf32>
    %30 = arith.cmpf oge, %28, %29 : vector<2x8192xf32>
    %31 = arith.extui %30 : vector<2x8192xi1> to vector<2x8192xi32>
    %32 = arith.sitofp %31 : vector<2x8192xi32> to vector<2x8192xf32>
    %c4 = arith.constant 4 : index
    %c0_16 = arith.constant 0 : index
    %33 = vector.load %arg7[%c4, %c0_16] : memref<16x8192xf32, #tpu.memory_space<vmem>>, vector<2x8192xf32>
    tpu.vector_store %arg7[%c4, %c0_16], %32 {strides = array<i32>} : memref<16x8192xf32, #tpu.memory_space<vmem>>, vector<2x8192xf32>,
    %cst_17 = arith.constant 1.000000e+00 : f32
    %34 = vector.broadcast %cst_17 : f32 to vector<2x8192xf32>
    %35 = arith.subf %34, %32 : vector<2x8192xf32>
    %36 = arith.mulf %28, %35 : vector<2x8192xf32>
    %c3 = arith.constant 3 : index
    %c0_18 = arith.constant 0 : index
    %c0_19 = arith.constant 0 : index
    %37 = vector.load %arg2[%c3, %c0_18, %c0_19] : memref<8x2x8192xf32, #tpu.memory_space<vmem>>, vector<1x2x8192xf32>
    %38 = vector.shape_cast %37 : vector<1x2x8192xf32> to vector<2x8192xf32>
    %39 = arith.addf %36, %38 : vector<2x8192xf32>
    %cst_20 = arith.constant 1.000000e+00 : f32
    %40 = vector.broadcast %cst_20 : f32 to vector<2x8192xf32>
    %41 = arith.cmpf oge, %39, %40 : vector<2x8192xf32>
    %42 = arith.extui %41 : vector<2x8192xi1> to vector<2x8192xi32>
    %43 = arith.sitofp %42 : vector<2x8192xi32> to vector<2x8192xf32>
    %c6 = arith.constant 6 : index
    %c0_21 = arith.constant 0 : index
    %44 = vector.load %arg7[%c6, %c0_21] : memref<16x8192xf32, #tpu.memory_space<vmem>>, vector<2x8192xf32>
    tpu.vector_store %arg7[%c6, %c0_21], %43 {strides = array<i32>} : memref<16x8192xf32, #tpu.memory_space<vmem>>, vector<2x8192xf32>,
    %cst_22 = arith.constant 1.000000e+00 : f32
    %45 = vector.broadcast %cst_22 : f32 to vector<2x8192xf32>
    %46 = arith.subf %45, %43 : vector<2x8192xf32>
    %47 = arith.mulf %39, %46 : vector<2x8192xf32>
    %c4_23 = arith.constant 4 : index
    %c0_24 = arith.constant 0 : index
    %c0_25 = arith.constant 0 : index
    %48 = vector.load %arg2[%c4_23, %c0_24, %c0_25] : memref<8x2x8192xf32, #tpu.memory_space<vmem>>, vector<1x2x8192xf32>
    %49 = vector.shape_cast %48 : vector<1x2x8192xf32> to vector<2x8192xf32>
    %50 = arith.addf %47, %49 : vector<2x8192xf32>
    %cst_26 = arith.constant 1.000000e+00 : f32
    %51 = vector.broadcast %cst_26 : f32 to vector<2x8192xf32>
    %52 = arith.cmpf oge, %50, %51 : vector<2x8192xf32>
    %53 = arith.extui %52 : vector<2x8192xi1> to vector<2x8192xi32>
    %54 = arith.sitofp %53 : vector<2x8192xi32> to vector<2x8192xf32>
    %c8 = arith.constant 8 : index
    %c0_27 = arith.constant 0 : index
    %55 = vector.load %arg7[%c8, %c0_27] : memref<16x8192xf32, #tpu.memory_space<vmem>>, vector<2x8192xf32>
    tpu.vector_store %arg7[%c8, %c0_27], %54 {strides = array<i32>} : memref<16x8192xf32, #tpu.memory_space<vmem>>, vector<2x8192xf32>,
    %cst_28 = arith.constant 1.000000e+00 : f32
    %56 = vector.broadcast %cst_28 : f32 to vector<2x8192xf32>
    %57 = arith.subf %56, %54 : vector<2x8192xf32>
    %58 = arith.mulf %50, %57 : vector<2x8192xf32>
    %c5 = arith.constant 5 : index
    %c0_29 = arith.constant 0 : index
    %c0_30 = arith.constant 0 : index
    %59 = vector.load %arg2[%c5, %c0_29, %c0_30] : memref<8x2x8192xf32, #tpu.memory_space<vmem>>, vector<1x2x8192xf32>
    %60 = vector.shape_cast %59 : vector<1x2x8192xf32> to vector<2x8192xf32>
    %61 = arith.addf %58, %60 : vector<2x8192xf32>
    %cst_31 = arith.constant 1.000000e+00 : f32
    %62 = vector.broadcast %cst_31 : f32 to vector<2x8192xf32>
    %63 = arith.cmpf oge, %61, %62 : vector<2x8192xf32>
    %64 = arith.extui %63 : vector<2x8192xi1> to vector<2x8192xi32>
    %65 = arith.sitofp %64 : vector<2x8192xi32> to vector<2x8192xf32>
    %c10 = arith.constant 10 : index
    %c0_32 = arith.constant 0 : index
    %66 = vector.load %arg7[%c10, %c0_32] : memref<16x8192xf32, #tpu.memory_space<vmem>>, vector<2x8192xf32>
    tpu.vector_store %arg7[%c10, %c0_32], %65 {strides = array<i32>} : memref<16x8192xf32, #tpu.memory_space<vmem>>, vector<2x8192xf32>,
    %cst_33 = arith.constant 1.000000e+00 : f32
    %67 = vector.broadcast %cst_33 : f32 to vector<2x8192xf32>
    %68 = arith.subf %67, %65 : vector<2x8192xf32>
    %69 = arith.mulf %61, %68 : vector<2x8192xf32>
    %c6_34 = arith.constant 6 : index
    %c0_35 = arith.constant 0 : index
    %c0_36 = arith.constant 0 : index
    %70 = vector.load %arg2[%c6_34, %c0_35, %c0_36] : memref<8x2x8192xf32, #tpu.memory_space<vmem>>, vector<1x2x8192xf32>
    %71 = vector.shape_cast %70 : vector<1x2x8192xf32> to vector<2x8192xf32>
    %72 = arith.addf %69, %71 : vector<2x8192xf32>
    %cst_37 = arith.constant 1.000000e+00 : f32
    %73 = vector.broadcast %cst_37 : f32 to vector<2x8192xf32>
    %74 = arith.cmpf oge, %72, %73 : vector<2x8192xf32>
    %75 = arith.extui %74 : vector<2x8192xi1> to vector<2x8192xi32>
    %76 = arith.sitofp %75 : vector<2x8192xi32> to vector<2x8192xf32>
    %c12 = arith.constant 12 : index
    %c0_38 = arith.constant 0 : index
    %77 = vector.load %arg7[%c12, %c0_38] : memref<16x8192xf32, #tpu.memory_space<vmem>>, vector<2x8192xf32>
    tpu.vector_store %arg7[%c12, %c0_38], %76 {strides = array<i32>} : memref<16x8192xf32, #tpu.memory_space<vmem>>, vector<2x8192xf32>,
    %cst_39 = arith.constant 1.000000e+00 : f32
    %78 = vector.broadcast %cst_39 : f32 to vector<2x8192xf32>
    %79 = arith.subf %78, %76 : vector<2x8192xf32>
    %80 = arith.mulf %72, %79 : vector<2x8192xf32>
    %c7 = arith.constant 7 : index
    %c0_40 = arith.constant 0 : index
    %c0_41 = arith.constant 0 : index
    %81 = vector.load %arg2[%c7, %c0_40, %c0_41] : memref<8x2x8192xf32, #tpu.memory_space<vmem>>, vector<1x2x8192xf32>
    %82 = vector.shape_cast %81 : vector<1x2x8192xf32> to vector<2x8192xf32>
    %83 = arith.addf %80, %82 : vector<2x8192xf32>
    %cst_42 = arith.constant 1.000000e+00 : f32
    %84 = vector.broadcast %cst_42 : f32 to vector<2x8192xf32>
    %85 = arith.cmpf oge, %83, %84 : vector<2x8192xf32>
    %86 = arith.extui %85 : vector<2x8192xi1> to vector<2x8192xi32>
    %87 = arith.sitofp %86 : vector<2x8192xi32> to vector<2x8192xf32>
    %c14 = arith.constant 14 : index
    %c0_43 = arith.constant 0 : index
    %88 = vector.load %arg7[%c14, %c0_43] : memref<16x8192xf32, #tpu.memory_space<vmem>>, vector<2x8192xf32>
    tpu.vector_store %arg7[%c14, %c0_43], %87 {strides = array<i32>} : memref<16x8192xf32, #tpu.memory_space<vmem>>, vector<2x8192xf32>,
    %c0_44 = arith.constant 0 : index
    %c0_45 = arith.constant 0 : index
    %89 = vector.load %arg6[%c0_44, %c0_45] : memref<16x32xf32, #tpu.memory_space<vmem>>, vector<16x32xf32>
    %c0_46 = arith.constant 0 : index
    %c0_47 = arith.constant 0 : index
    %90 = vector.load %arg7[%c0_46, %c0_47] : memref<16x8192xf32, #tpu.memory_space<vmem>>, vector<16x8192xf32>
    %91 = arith.truncf %90 : vector<16x8192xf32> to vector<16x8192xbf16>
    %c0_48 = arith.constant 0 : index
    %c0_49 = arith.constant 0 : index
    %92 = vector.load %arg3[%c0_48, %c0_49] : memref<8192x32xbf16, #tpu.memory_space<vmem>>, vector<8192x32xbf16>
    %cst_50 = arith.constant dense<0.000000e+00> : vector<16x32xf32>
    %93 = tpu.matmul %91, %92, %cst_50 {dimension_numbers = #tpu.dot_dimension_numbers<[1], [0], [0], [1], [0, 0, 1, 1], [], []>} : vector<16x8192xbf16>, vector<8192x32xbf16>, vector<16x32xf32> -> vector<16x32xf32>
    %94 = arith.addf %89, %93 : vector<16x32xf32>
    %c0_51 = arith.constant 0 : index
    %c0_52 = arith.constant 0 : index
    %95 = vector.load %arg6[%c0_51, %c0_52] : memref<16x32xf32, #tpu.memory_space<vmem>>, vector<16x32xf32>
    tpu.vector_store %arg6[%c0_51, %c0_52], %94 {strides = array<i32>} : memref<16x32xf32, #tpu.memory_space<vmem>>, vector<16x32xf32>,
    %c3_i32 = arith.constant 3 : i32
    %96 = arith.cmpi eq, %arg1, %c3_i32 : i32
    %97 = arith.extui %96 : i1 to i32
    %c0_i32_53 = arith.constant 0 : i32
    %98 = arith.cmpi ne, %97, %c0_i32_53 : i32
    scf.if %98 {
      %cst_54 = arith.constant 0.000000e+00 : f32
      %99 = vector.broadcast %cst_54 : f32 to vector<2x32xf32>
      %c0_55 = arith.constant 0 : index
      %c0_56 = arith.constant 0 : index
      %100 = vector.load %arg6[%c0_55, %c0_56] : memref<16x32xf32, #tpu.memory_space<vmem>>, vector<2x32xf32>
      %c0_57 = arith.constant 0 : index
      %c0_58 = arith.constant 0 : index
      %101 = vector.load %arg4[%c0_57, %c0_58] : memref<1x32xf32, #tpu.memory_space<vmem>>, vector<1x32xf32>
      %102 = vector.broadcast %101 : vector<1x32xf32> to vector<2x32xf32>
      %103 = arith.addf %100, %102 : vector<2x32xf32>
      %104 = arith.addf %99, %103 : vector<2x32xf32>
      %cst_59 = arith.constant 1.000000e+00 : f32
      %105 = vector.broadcast %cst_59 : f32 to vector<2x32xf32>
      %106 = arith.cmpf oge, %104, %105 : vector<2x32xf32>
      %107 = arith.extui %106 : vector<2x32xi1> to vector<2x32xi32>
      %108 = arith.sitofp %107 : vector<2x32xi32> to vector<2x32xf32>
      %c0_60 = arith.constant 0 : index
      %c0_61 = arith.constant 0 : index
      %109 = vector.load %arg5[%c0_60, %c0_61] : memref<16x32xf32, #tpu.memory_space<vmem>>, vector<2x32xf32>
      tpu.vector_store %arg5[%c0_60, %c0_61], %108 {strides = array<i32>} : memref<16x32xf32, #tpu.memory_space<vmem>>, vector<2x32xf32>,
      %cst_62 = arith.constant 1.000000e+00 : f32
      %110 = vector.broadcast %cst_62 : f32 to vector<2x32xf32>
      %111 = arith.subf %110, %108 : vector<2x32xf32>
      %112 = arith.mulf %104, %111 : vector<2x32xf32>
      %c2_63 = arith.constant 2 : index
      %c0_64 = arith.constant 0 : index
      %113 = vector.load %arg6[%c2_63, %c0_64] : memref<16x32xf32, #tpu.memory_space<vmem>>, vector<2x32xf32>
      %c0_65 = arith.constant 0 : index
      %c0_66 = arith.constant 0 : index
      %114 = vector.load %arg4[%c0_65, %c0_66] : memref<1x32xf32, #tpu.memory_space<vmem>>, vector<1x32xf32>
      %115 = vector.broadcast %114 : vector<1x32xf32> to vector<2x32xf32>
      %116 = arith.addf %113, %115 : vector<2x32xf32>
      %117 = arith.addf %112, %116 : vector<2x32xf32>
      %cst_67 = arith.constant 1.000000e+00 : f32
      %118 = vector.broadcast %cst_67 : f32 to vector<2x32xf32>
      %119 = arith.cmpf oge, %117, %118 : vector<2x32xf32>
      %120 = arith.extui %119 : vector<2x32xi1> to vector<2x32xi32>
      %121 = arith.sitofp %120 : vector<2x32xi32> to vector<2x32xf32>
      %c2_68 = arith.constant 2 : index
      %c0_69 = arith.constant 0 : index
      %122 = vector.load %arg5[%c2_68, %c0_69] : memref<16x32xf32, #tpu.memory_space<vmem>>, vector<2x32xf32>
      tpu.vector_store %arg5[%c2_68, %c0_69], %121 {strides = array<i32>} : memref<16x32xf32, #tpu.memory_space<vmem>>, vector<2x32xf32>,
      %cst_70 = arith.constant 1.000000e+00 : f32
      %123 = vector.broadcast %cst_70 : f32 to vector<2x32xf32>
      %124 = arith.subf %123, %121 : vector<2x32xf32>
      %125 = arith.mulf %117, %124 : vector<2x32xf32>
      %c4_71 = arith.constant 4 : index
      %c0_72 = arith.constant 0 : index
      %126 = vector.load %arg6[%c4_71, %c0_72] : memref<16x32xf32, #tpu.memory_space<vmem>>, vector<2x32xf32>
      %c0_73 = arith.constant 0 : index
      %c0_74 = arith.constant 0 : index
      %127 = vector.load %arg4[%c0_73, %c0_74] : memref<1x32xf32, #tpu.memory_space<vmem>>, vector<1x32xf32>
      %128 = vector.broadcast %127 : vector<1x32xf32> to vector<2x32xf32>
      %129 = arith.addf %126, %128 : vector<2x32xf32>
      %130 = arith.addf %125, %129 : vector<2x32xf32>
      %cst_75 = arith.constant 1.000000e+00 : f32
      %131 = vector.broadcast %cst_75 : f32 to vector<2x32xf32>
      %132 = arith.cmpf oge, %130, %131 : vector<2x32xf32>
      %133 = arith.extui %132 : vector<2x32xi1> to vector<2x32xi32>
      %134 = arith.sitofp %133 : vector<2x32xi32> to vector<2x32xf32>
      %c4_76 = arith.constant 4 : index
      %c0_77 = arith.constant 0 : index
      %135 = vector.load %arg5[%c4_76, %c0_77] : memref<16x32xf32, #tpu.memory_space<vmem>>, vector<2x32xf32>
      tpu.vector_store %arg5[%c4_76, %c0_77], %134 {strides = array<i32>} : memref<16x32xf32, #tpu.memory_space<vmem>>, vector<2x32xf32>,
      %cst_78 = arith.constant 1.000000e+00 : f32
      %136 = vector.broadcast %cst_78 : f32 to vector<2x32xf32>
      %137 = arith.subf %136, %134 : vector<2x32xf32>
      %138 = arith.mulf %130, %137 : vector<2x32xf32>
      %c6_79 = arith.constant 6 : index
      %c0_80 = arith.constant 0 : index
      %139 = vector.load %arg6[%c6_79, %c0_80] : memref<16x32xf32, #tpu.memory_space<vmem>>, vector<2x32xf32>
      %c0_81 = arith.constant 0 : index
      %c0_82 = arith.constant 0 : index
      %140 = vector.load %arg4[%c0_81, %c0_82] : memref<1x32xf32, #tpu.memory_space<vmem>>, vector<1x32xf32>
      %141 = vector.broadcast %140 : vector<1x32xf32> to vector<2x32xf32>
      %142 = arith.addf %139, %141 : vector<2x32xf32>
      %143 = arith.addf %138, %142 : vector<2x32xf32>
      %cst_83 = arith.constant 1.000000e+00 : f32
      %144 = vector.broadcast %cst_83 : f32 to vector<2x32xf32>
      %145 = arith.cmpf oge, %143, %144 : vector<2x32xf32>
      %146 = arith.extui %145 : vector<2x32xi1> to vector<2x32xi32>
      %147 = arith.sitofp %146 : vector<2x32xi32> to vector<2x32xf32>
      %c6_84 = arith.constant 6 : index
      %c0_85 = arith.constant 0 : index
      %148 = vector.load %arg5[%c6_84, %c0_85] : memref<16x32xf32, #tpu.memory_space<vmem>>, vector<2x32xf32>
      tpu.vector_store %arg5[%c6_84, %c0_85], %147 {strides = array<i32>} : memref<16x32xf32, #tpu.memory_space<vmem>>, vector<2x32xf32>,
      %cst_86 = arith.constant 1.000000e+00 : f32
      %149 = vector.broadcast %cst_86 : f32 to vector<2x32xf32>
      %150 = arith.subf %149, %147 : vector<2x32xf32>
      %151 = arith.mulf %143, %150 : vector<2x32xf32>
      %c8_87 = arith.constant 8 : index
      %c0_88 = arith.constant 0 : index
      %152 = vector.load %arg6[%c8_87, %c0_88] : memref<16x32xf32, #tpu.memory_space<vmem>>, vector<2x32xf32>
      %c0_89 = arith.constant 0 : index
      %c0_90 = arith.constant 0 : index
      %153 = vector.load %arg4[%c0_89, %c0_90] : memref<1x32xf32, #tpu.memory_space<vmem>>, vector<1x32xf32>
      %154 = vector.broadcast %153 : vector<1x32xf32> to vector<2x32xf32>
      %155 = arith.addf %152, %154 : vector<2x32xf32>
      %156 = arith.addf %151, %155 : vector<2x32xf32>
      %cst_91 = arith.constant 1.000000e+00 : f32
      %157 = vector.broadcast %cst_91 : f32 to vector<2x32xf32>
      %158 = arith.cmpf oge, %156, %157 : vector<2x32xf32>
      %159 = arith.extui %158 : vector<2x32xi1> to vector<2x32xi32>
      %160 = arith.sitofp %159 : vector<2x32xi32> to vector<2x32xf32>
      %c8_92 = arith.constant 8 : index
      %c0_93 = arith.constant 0 : index
      %161 = vector.load %arg5[%c8_92, %c0_93] : memref<16x32xf32, #tpu.memory_space<vmem>>, vector<2x32xf32>
      tpu.vector_store %arg5[%c8_92, %c0_93], %160 {strides = array<i32>} : memref<16x32xf32, #tpu.memory_space<vmem>>, vector<2x32xf32>,
      %cst_94 = arith.constant 1.000000e+00 : f32
      %162 = vector.broadcast %cst_94 : f32 to vector<2x32xf32>
      %163 = arith.subf %162, %160 : vector<2x32xf32>
      %164 = arith.mulf %156, %163 : vector<2x32xf32>
      %c10_95 = arith.constant 10 : index
      %c0_96 = arith.constant 0 : index
      %165 = vector.load %arg6[%c10_95, %c0_96] : memref<16x32xf32, #tpu.memory_space<vmem>>, vector<2x32xf32>
      %c0_97 = arith.constant 0 : index
      %c0_98 = arith.constant 0 : index
      %166 = vector.load %arg4[%c0_97, %c0_98] : memref<1x32xf32, #tpu.memory_space<vmem>>, vector<1x32xf32>
      %167 = vector.broadcast %166 : vector<1x32xf32> to vector<2x32xf32>
      %168 = arith.addf %165, %167 : vector<2x32xf32>
      %169 = arith.addf %164, %168 : vector<2x32xf32>
      %cst_99 = arith.constant 1.000000e+00 : f32
      %170 = vector.broadcast %cst_99 : f32 to vector<2x32xf32>
      %171 = arith.cmpf oge, %169, %170 : vector<2x32xf32>
      %172 = arith.extui %171 : vector<2x32xi1> to vector<2x32xi32>
      %173 = arith.sitofp %172 : vector<2x32xi32> to vector<2x32xf32>
      %c10_100 = arith.constant 10 : index
      %c0_101 = arith.constant 0 : index
      %174 = vector.load %arg5[%c10_100, %c0_101] : memref<16x32xf32, #tpu.memory_space<vmem>>, vector<2x32xf32>
      tpu.vector_store %arg5[%c10_100, %c0_101], %173 {strides = array<i32>} : memref<16x32xf32, #tpu.memory_space<vmem>>, vector<2x32xf32>,
      %cst_102 = arith.constant 1.000000e+00 : f32
      %175 = vector.broadcast %cst_102 : f32 to vector<2x32xf32>
      %176 = arith.subf %175, %173 : vector<2x32xf32>
      %177 = arith.mulf %169, %176 : vector<2x32xf32>
      %c12_103 = arith.constant 12 : index
      %c0_104 = arith.constant 0 : index
      %178 = vector.load %arg6[%c12_103, %c0_104] : memref<16x32xf32, #tpu.memory_space<vmem>>, vector<2x32xf32>
      %c0_105 = arith.constant 0 : index
      %c0_106 = arith.constant 0 : index
      %179 = vector.load %arg4[%c0_105, %c0_106] : memref<1x32xf32, #tpu.memory_space<vmem>>, vector<1x32xf32>
      %180 = vector.broadcast %179 : vector<1x32xf32> to vector<2x32xf32>
      %181 = arith.addf %178, %180 : vector<2x32xf32>
      %182 = arith.addf %177, %181 : vector<2x32xf32>
      %cst_107 = arith.constant 1.000000e+00 : f32
      %183 = vector.broadcast %cst_107 : f32 to vector<2x32xf32>
      %184 = arith.cmpf oge, %182, %183 : vector<2x32xf32>
      %185 = arith.extui %184 : vector<2x32xi1> to vector<2x32xi32>
      %186 = arith.sitofp %185 : vector<2x32xi32> to vector<2x32xf32>
      %c12_108 = arith.constant 12 : index
      %c0_109 = arith.constant 0 : index
      %187 = vector.load %arg5[%c12_108, %c0_109] : memref<16x32xf32, #tpu.memory_space<vmem>>, vector<2x32xf32>
      tpu.vector_store %arg5[%c12_108, %c0_109], %186 {strides = array<i32>} : memref<16x32xf32, #tpu.memory_space<vmem>>, vector<2x32xf32>,
      %cst_110 = arith.constant 1.000000e+00 : f32
      %188 = vector.broadcast %cst_110 : f32 to vector<2x32xf32>
      %189 = arith.subf %188, %186 : vector<2x32xf32>
      %190 = arith.mulf %182, %189 : vector<2x32xf32>
      %c14_111 = arith.constant 14 : index
      %c0_112 = arith.constant 0 : index
      %191 = vector.load %arg6[%c14_111, %c0_112] : memref<16x32xf32, #tpu.memory_space<vmem>>, vector<2x32xf32>
      %c0_113 = arith.constant 0 : index
      %c0_114 = arith.constant 0 : index
      %192 = vector.load %arg4[%c0_113, %c0_114] : memref<1x32xf32, #tpu.memory_space<vmem>>, vector<1x32xf32>
      %193 = vector.broadcast %192 : vector<1x32xf32> to vector<2x32xf32>
      %194 = arith.addf %191, %193 : vector<2x32xf32>
      %195 = arith.addf %190, %194 : vector<2x32xf32>
      %cst_115 = arith.constant 1.000000e+00 : f32
      %196 = vector.broadcast %cst_115 : f32 to vector<2x32xf32>
      %197 = arith.cmpf oge, %195, %196 : vector<2x32xf32>
      %198 = arith.extui %197 : vector<2x32xi1> to vector<2x32xi32>
      %199 = arith.sitofp %198 : vector<2x32xi32> to vector<2x32xf32>
      %c14_116 = arith.constant 14 : index
      %c0_117 = arith.constant 0 : index
      %200 = vector.load %arg5[%c14_116, %c0_117] : memref<16x32xf32, #tpu.memory_space<vmem>>, vector<2x32xf32>
      tpu.vector_store %arg5[%c14_116, %c0_117], %199 {strides = array<i32>} : memref<16x32xf32, #tpu.memory_space<vmem>>, vector<2x32xf32>,
    } else {
    }
    return
  }
  func.func @transform_0(%arg0: i32, %arg1: i32) -> (i32, i32, i32) {
    %c0_i32 = arith.constant 0 : i32
    %c0_i32_0 = arith.constant 0 : i32
    %c0_i32_1 = arith.constant 0 : i32
    return %c0_i32, %c0_i32_0, %arg1 : i32, i32, i32
  }
  func.func @transform_1(%arg0: i32, %arg1: i32) -> (i32, i32) {
    %c0_i32 = arith.constant 0 : i32
    return %arg1, %arg0 : i32, i32
  }
  func.func @transform_2(%arg0: i32, %arg1: i32) -> (i32, i32) {
    %c0_i32 = arith.constant 0 : i32
    %c0_i32_0 = arith.constant 0 : i32
    return %c0_i32, %arg0 : i32, i32
  }
  func.func @transform_3(%arg0: i32, %arg1: i32) -> (i32, i32) {
    %c0_i32 = arith.constant 0 : i32
    %c0_i32_0 = arith.constant 0 : i32
    return %c0_i32, %arg0 : i32, i32
  }
}

module attributes {stable_mosaic.version = 11 : i64} {
  func.func @_hidden_kernel(%arg0: i32, %arg1: i32, %arg2: memref<16x32xf32, #tpu.memory_space<vmem>>, %arg3: memref<32x32xbf16, #tpu.memory_space<vmem>>, %arg4: memref<1x32xf32, #tpu.memory_space<vmem>>, %arg5: memref<16x32xf32, #tpu.memory_space<vmem>>, %arg6: memref<16x32xf32, #tpu.memory_space<vmem>>) attributes {dimension_semantics = [#tpu.dimension_semantics<parallel>, #tpu.dimension_semantics<arbitrary>], iteration_bounds = array<i64: 1, 1>, scalar_prefetch = 0 : i64, scratch_operands = 1 : i64, tpu.core_type = #tpu.core_type<tc>, window_params = [{transform_indices = @transform_0, window_bounds = array<i64: 16, 32>}, {transform_indices = @transform_1, window_bounds = array<i64: 32, 32>}, {transform_indices = @transform_2, window_bounds = array<i64: 1, 32>}, {transform_indices = @transform_3, window_bounds = array<i64: 16, 32>}]} {
    %c0_i32 = arith.constant 0 : i32
    %0 = arith.cmpi eq, %arg1, %c0_i32 : i32
    %1 = arith.extui %0 : i1 to i32
    %c0_i32_0 = arith.constant 0 : i32
    %2 = arith.cmpi ne, %1, %c0_i32_0 : i32
    scf.if %2 {
      %cst_10 = arith.constant 0.000000e+00 : f32
      %13 = vector.broadcast %cst_10 : f32 to vector<16x32xf32>
      %c0_11 = arith.constant 0 : index
      %c0_12 = arith.constant 0 : index
      %14 = vector.load %arg6[%c0_11, %c0_12] : memref<16x32xf32, #tpu.memory_space<vmem>>, vector<16x32xf32>
      tpu.vector_store %arg6[%c0_11, %c0_12], %13 {strides = array<i32>} : memref<16x32xf32, #tpu.memory_space<vmem>>, vector<16x32xf32>,
    } else {
    }
    %c0 = arith.constant 0 : index
    %c0_1 = arith.constant 0 : index
    %3 = vector.load %arg6[%c0, %c0_1] : memref<16x32xf32, #tpu.memory_space<vmem>>, vector<16x32xf32>
    %c0_2 = arith.constant 0 : index
    %c0_3 = arith.constant 0 : index
    %4 = vector.load %arg2[%c0_2, %c0_3] : memref<16x32xf32, #tpu.memory_space<vmem>>, vector<16x32xf32>
    %5 = arith.truncf %4 : vector<16x32xf32> to vector<16x32xbf16>
    %c0_4 = arith.constant 0 : index
    %c0_5 = arith.constant 0 : index
    %6 = vector.load %arg3[%c0_4, %c0_5] : memref<32x32xbf16, #tpu.memory_space<vmem>>, vector<32x32xbf16>
    %cst = arith.constant dense<0.000000e+00> : vector<16x32xf32>
    %7 = tpu.matmul %5, %6, %cst {dimension_numbers = #tpu.dot_dimension_numbers<[1], [0], [0], [1], [0, 0, 1, 1], [], []>} : vector<16x32xbf16>, vector<32x32xbf16>, vector<16x32xf32> -> vector<16x32xf32>
    %8 = arith.addf %3, %7 : vector<16x32xf32>
    %c0_6 = arith.constant 0 : index
    %c0_7 = arith.constant 0 : index
    %9 = vector.load %arg6[%c0_6, %c0_7] : memref<16x32xf32, #tpu.memory_space<vmem>>, vector<16x32xf32>
    tpu.vector_store %arg6[%c0_6, %c0_7], %8 {strides = array<i32>} : memref<16x32xf32, #tpu.memory_space<vmem>>, vector<16x32xf32>,
    %c0_i32_8 = arith.constant 0 : i32
    %10 = arith.cmpi eq, %arg1, %c0_i32_8 : i32
    %11 = arith.extui %10 : i1 to i32
    %c0_i32_9 = arith.constant 0 : i32
    %12 = arith.cmpi ne, %11, %c0_i32_9 : i32
    scf.if %12 {
      %cst_10 = arith.constant 0.000000e+00 : f32
      %13 = vector.broadcast %cst_10 : f32 to vector<2x32xf32>
      %c0_11 = arith.constant 0 : index
      %c0_12 = arith.constant 0 : index
      %14 = vector.load %arg6[%c0_11, %c0_12] : memref<16x32xf32, #tpu.memory_space<vmem>>, vector<2x32xf32>
      %c0_13 = arith.constant 0 : index
      %c0_14 = arith.constant 0 : index
      %15 = vector.load %arg4[%c0_13, %c0_14] : memref<1x32xf32, #tpu.memory_space<vmem>>, vector<1x32xf32>
      %16 = vector.broadcast %15 : vector<1x32xf32> to vector<2x32xf32>
      %17 = arith.addf %14, %16 : vector<2x32xf32>
      %18 = arith.addf %13, %17 : vector<2x32xf32>
      %cst_15 = arith.constant 1.000000e+00 : f32
      %19 = vector.broadcast %cst_15 : f32 to vector<2x32xf32>
      %20 = arith.cmpf oge, %18, %19 : vector<2x32xf32>
      %21 = arith.extui %20 : vector<2x32xi1> to vector<2x32xi32>
      %22 = arith.sitofp %21 : vector<2x32xi32> to vector<2x32xf32>
      %c0_16 = arith.constant 0 : index
      %c0_17 = arith.constant 0 : index
      %23 = vector.load %arg5[%c0_16, %c0_17] : memref<16x32xf32, #tpu.memory_space<vmem>>, vector<2x32xf32>
      tpu.vector_store %arg5[%c0_16, %c0_17], %22 {strides = array<i32>} : memref<16x32xf32, #tpu.memory_space<vmem>>, vector<2x32xf32>,
      %cst_18 = arith.constant 1.000000e+00 : f32
      %24 = vector.broadcast %cst_18 : f32 to vector<2x32xf32>
      %25 = arith.subf %24, %22 : vector<2x32xf32>
      %26 = arith.mulf %18, %25 : vector<2x32xf32>
      %c2 = arith.constant 2 : index
      %c0_19 = arith.constant 0 : index
      %27 = vector.load %arg6[%c2, %c0_19] : memref<16x32xf32, #tpu.memory_space<vmem>>, vector<2x32xf32>
      %c0_20 = arith.constant 0 : index
      %c0_21 = arith.constant 0 : index
      %28 = vector.load %arg4[%c0_20, %c0_21] : memref<1x32xf32, #tpu.memory_space<vmem>>, vector<1x32xf32>
      %29 = vector.broadcast %28 : vector<1x32xf32> to vector<2x32xf32>
      %30 = arith.addf %27, %29 : vector<2x32xf32>
      %31 = arith.addf %26, %30 : vector<2x32xf32>
      %cst_22 = arith.constant 1.000000e+00 : f32
      %32 = vector.broadcast %cst_22 : f32 to vector<2x32xf32>
      %33 = arith.cmpf oge, %31, %32 : vector<2x32xf32>
      %34 = arith.extui %33 : vector<2x32xi1> to vector<2x32xi32>
      %35 = arith.sitofp %34 : vector<2x32xi32> to vector<2x32xf32>
      %c2_23 = arith.constant 2 : index
      %c0_24 = arith.constant 0 : index
      %36 = vector.load %arg5[%c2_23, %c0_24] : memref<16x32xf32, #tpu.memory_space<vmem>>, vector<2x32xf32>
      tpu.vector_store %arg5[%c2_23, %c0_24], %35 {strides = array<i32>} : memref<16x32xf32, #tpu.memory_space<vmem>>, vector<2x32xf32>,
      %cst_25 = arith.constant 1.000000e+00 : f32
      %37 = vector.broadcast %cst_25 : f32 to vector<2x32xf32>
      %38 = arith.subf %37, %35 : vector<2x32xf32>
      %39 = arith.mulf %31, %38 : vector<2x32xf32>
      %c4 = arith.constant 4 : index
      %c0_26 = arith.constant 0 : index
      %40 = vector.load %arg6[%c4, %c0_26] : memref<16x32xf32, #tpu.memory_space<vmem>>, vector<2x32xf32>
      %c0_27 = arith.constant 0 : index
      %c0_28 = arith.constant 0 : index
      %41 = vector.load %arg4[%c0_27, %c0_28] : memref<1x32xf32, #tpu.memory_space<vmem>>, vector<1x32xf32>
      %42 = vector.broadcast %41 : vector<1x32xf32> to vector<2x32xf32>
      %43 = arith.addf %40, %42 : vector<2x32xf32>
      %44 = arith.addf %39, %43 : vector<2x32xf32>
      %cst_29 = arith.constant 1.000000e+00 : f32
      %45 = vector.broadcast %cst_29 : f32 to vector<2x32xf32>
      %46 = arith.cmpf oge, %44, %45 : vector<2x32xf32>
      %47 = arith.extui %46 : vector<2x32xi1> to vector<2x32xi32>
      %48 = arith.sitofp %47 : vector<2x32xi32> to vector<2x32xf32>
      %c4_30 = arith.constant 4 : index
      %c0_31 = arith.constant 0 : index
      %49 = vector.load %arg5[%c4_30, %c0_31] : memref<16x32xf32, #tpu.memory_space<vmem>>, vector<2x32xf32>
      tpu.vector_store %arg5[%c4_30, %c0_31], %48 {strides = array<i32>} : memref<16x32xf32, #tpu.memory_space<vmem>>, vector<2x32xf32>,
      %cst_32 = arith.constant 1.000000e+00 : f32
      %50 = vector.broadcast %cst_32 : f32 to vector<2x32xf32>
      %51 = arith.subf %50, %48 : vector<2x32xf32>
      %52 = arith.mulf %44, %51 : vector<2x32xf32>
      %c6 = arith.constant 6 : index
      %c0_33 = arith.constant 0 : index
      %53 = vector.load %arg6[%c6, %c0_33] : memref<16x32xf32, #tpu.memory_space<vmem>>, vector<2x32xf32>
      %c0_34 = arith.constant 0 : index
      %c0_35 = arith.constant 0 : index
      %54 = vector.load %arg4[%c0_34, %c0_35] : memref<1x32xf32, #tpu.memory_space<vmem>>, vector<1x32xf32>
      %55 = vector.broadcast %54 : vector<1x32xf32> to vector<2x32xf32>
      %56 = arith.addf %53, %55 : vector<2x32xf32>
      %57 = arith.addf %52, %56 : vector<2x32xf32>
      %cst_36 = arith.constant 1.000000e+00 : f32
      %58 = vector.broadcast %cst_36 : f32 to vector<2x32xf32>
      %59 = arith.cmpf oge, %57, %58 : vector<2x32xf32>
      %60 = arith.extui %59 : vector<2x32xi1> to vector<2x32xi32>
      %61 = arith.sitofp %60 : vector<2x32xi32> to vector<2x32xf32>
      %c6_37 = arith.constant 6 : index
      %c0_38 = arith.constant 0 : index
      %62 = vector.load %arg5[%c6_37, %c0_38] : memref<16x32xf32, #tpu.memory_space<vmem>>, vector<2x32xf32>
      tpu.vector_store %arg5[%c6_37, %c0_38], %61 {strides = array<i32>} : memref<16x32xf32, #tpu.memory_space<vmem>>, vector<2x32xf32>,
      %cst_39 = arith.constant 1.000000e+00 : f32
      %63 = vector.broadcast %cst_39 : f32 to vector<2x32xf32>
      %64 = arith.subf %63, %61 : vector<2x32xf32>
      %65 = arith.mulf %57, %64 : vector<2x32xf32>
      %c8 = arith.constant 8 : index
      %c0_40 = arith.constant 0 : index
      %66 = vector.load %arg6[%c8, %c0_40] : memref<16x32xf32, #tpu.memory_space<vmem>>, vector<2x32xf32>
      %c0_41 = arith.constant 0 : index
      %c0_42 = arith.constant 0 : index
      %67 = vector.load %arg4[%c0_41, %c0_42] : memref<1x32xf32, #tpu.memory_space<vmem>>, vector<1x32xf32>
      %68 = vector.broadcast %67 : vector<1x32xf32> to vector<2x32xf32>
      %69 = arith.addf %66, %68 : vector<2x32xf32>
      %70 = arith.addf %65, %69 : vector<2x32xf32>
      %cst_43 = arith.constant 1.000000e+00 : f32
      %71 = vector.broadcast %cst_43 : f32 to vector<2x32xf32>
      %72 = arith.cmpf oge, %70, %71 : vector<2x32xf32>
      %73 = arith.extui %72 : vector<2x32xi1> to vector<2x32xi32>
      %74 = arith.sitofp %73 : vector<2x32xi32> to vector<2x32xf32>
      %c8_44 = arith.constant 8 : index
      %c0_45 = arith.constant 0 : index
      %75 = vector.load %arg5[%c8_44, %c0_45] : memref<16x32xf32, #tpu.memory_space<vmem>>, vector<2x32xf32>
      tpu.vector_store %arg5[%c8_44, %c0_45], %74 {strides = array<i32>} : memref<16x32xf32, #tpu.memory_space<vmem>>, vector<2x32xf32>,
      %cst_46 = arith.constant 1.000000e+00 : f32
      %76 = vector.broadcast %cst_46 : f32 to vector<2x32xf32>
      %77 = arith.subf %76, %74 : vector<2x32xf32>
      %78 = arith.mulf %70, %77 : vector<2x32xf32>
      %c10 = arith.constant 10 : index
      %c0_47 = arith.constant 0 : index
      %79 = vector.load %arg6[%c10, %c0_47] : memref<16x32xf32, #tpu.memory_space<vmem>>, vector<2x32xf32>
      %c0_48 = arith.constant 0 : index
      %c0_49 = arith.constant 0 : index
      %80 = vector.load %arg4[%c0_48, %c0_49] : memref<1x32xf32, #tpu.memory_space<vmem>>, vector<1x32xf32>
      %81 = vector.broadcast %80 : vector<1x32xf32> to vector<2x32xf32>
      %82 = arith.addf %79, %81 : vector<2x32xf32>
      %83 = arith.addf %78, %82 : vector<2x32xf32>
      %cst_50 = arith.constant 1.000000e+00 : f32
      %84 = vector.broadcast %cst_50 : f32 to vector<2x32xf32>
      %85 = arith.cmpf oge, %83, %84 : vector<2x32xf32>
      %86 = arith.extui %85 : vector<2x32xi1> to vector<2x32xi32>
      %87 = arith.sitofp %86 : vector<2x32xi32> to vector<2x32xf32>
      %c10_51 = arith.constant 10 : index
      %c0_52 = arith.constant 0 : index
      %88 = vector.load %arg5[%c10_51, %c0_52] : memref<16x32xf32, #tpu.memory_space<vmem>>, vector<2x32xf32>
      tpu.vector_store %arg5[%c10_51, %c0_52], %87 {strides = array<i32>} : memref<16x32xf32, #tpu.memory_space<vmem>>, vector<2x32xf32>,
      %cst_53 = arith.constant 1.000000e+00 : f32
      %89 = vector.broadcast %cst_53 : f32 to vector<2x32xf32>
      %90 = arith.subf %89, %87 : vector<2x32xf32>
      %91 = arith.mulf %83, %90 : vector<2x32xf32>
      %c12 = arith.constant 12 : index
      %c0_54 = arith.constant 0 : index
      %92 = vector.load %arg6[%c12, %c0_54] : memref<16x32xf32, #tpu.memory_space<vmem>>, vector<2x32xf32>
      %c0_55 = arith.constant 0 : index
      %c0_56 = arith.constant 0 : index
      %93 = vector.load %arg4[%c0_55, %c0_56] : memref<1x32xf32, #tpu.memory_space<vmem>>, vector<1x32xf32>
      %94 = vector.broadcast %93 : vector<1x32xf32> to vector<2x32xf32>
      %95 = arith.addf %92, %94 : vector<2x32xf32>
      %96 = arith.addf %91, %95 : vector<2x32xf32>
      %cst_57 = arith.constant 1.000000e+00 : f32
      %97 = vector.broadcast %cst_57 : f32 to vector<2x32xf32>
      %98 = arith.cmpf oge, %96, %97 : vector<2x32xf32>
      %99 = arith.extui %98 : vector<2x32xi1> to vector<2x32xi32>
      %100 = arith.sitofp %99 : vector<2x32xi32> to vector<2x32xf32>
      %c12_58 = arith.constant 12 : index
      %c0_59 = arith.constant 0 : index
      %101 = vector.load %arg5[%c12_58, %c0_59] : memref<16x32xf32, #tpu.memory_space<vmem>>, vector<2x32xf32>
      tpu.vector_store %arg5[%c12_58, %c0_59], %100 {strides = array<i32>} : memref<16x32xf32, #tpu.memory_space<vmem>>, vector<2x32xf32>,
      %cst_60 = arith.constant 1.000000e+00 : f32
      %102 = vector.broadcast %cst_60 : f32 to vector<2x32xf32>
      %103 = arith.subf %102, %100 : vector<2x32xf32>
      %104 = arith.mulf %96, %103 : vector<2x32xf32>
      %c14 = arith.constant 14 : index
      %c0_61 = arith.constant 0 : index
      %105 = vector.load %arg6[%c14, %c0_61] : memref<16x32xf32, #tpu.memory_space<vmem>>, vector<2x32xf32>
      %c0_62 = arith.constant 0 : index
      %c0_63 = arith.constant 0 : index
      %106 = vector.load %arg4[%c0_62, %c0_63] : memref<1x32xf32, #tpu.memory_space<vmem>>, vector<1x32xf32>
      %107 = vector.broadcast %106 : vector<1x32xf32> to vector<2x32xf32>
      %108 = arith.addf %105, %107 : vector<2x32xf32>
      %109 = arith.addf %104, %108 : vector<2x32xf32>
      %cst_64 = arith.constant 1.000000e+00 : f32
      %110 = vector.broadcast %cst_64 : f32 to vector<2x32xf32>
      %111 = arith.cmpf oge, %109, %110 : vector<2x32xf32>
      %112 = arith.extui %111 : vector<2x32xi1> to vector<2x32xi32>
      %113 = arith.sitofp %112 : vector<2x32xi32> to vector<2x32xf32>
      %c14_65 = arith.constant 14 : index
      %c0_66 = arith.constant 0 : index
      %114 = vector.load %arg5[%c14_65, %c0_66] : memref<16x32xf32, #tpu.memory_space<vmem>>, vector<2x32xf32>
      tpu.vector_store %arg5[%c14_65, %c0_66], %113 {strides = array<i32>} : memref<16x32xf32, #tpu.memory_space<vmem>>, vector<2x32xf32>,
    } else {
    }
    return
  }
  func.func @transform_0(%arg0: i32, %arg1: i32) -> (i32, i32) {
    %c0_i32 = arith.constant 0 : i32
    %c0_i32_0 = arith.constant 0 : i32
    return %c0_i32, %arg1 : i32, i32
  }
  func.func @transform_1(%arg0: i32, %arg1: i32) -> (i32, i32) {
    %c0_i32 = arith.constant 0 : i32
    return %arg1, %arg0 : i32, i32
  }
  func.func @transform_2(%arg0: i32, %arg1: i32) -> (i32, i32) {
    %c0_i32 = arith.constant 0 : i32
    %c0_i32_0 = arith.constant 0 : i32
    return %c0_i32, %arg0 : i32, i32
  }
  func.func @transform_3(%arg0: i32, %arg1: i32) -> (i32, i32) {
    %c0_i32 = arith.constant 0 : i32
    %c0_i32_0 = arith.constant 0 : i32
    return %c0_i32, %arg0 : i32, i32
  }
}

module attributes {stable_mosaic.version = 11 : i64} {
  func.func @_head_kernel(%arg0: i32, %arg1: memref<16x32xf32, #tpu.memory_space<vmem>>, %arg2: memref<32x16xbf16, #tpu.memory_space<vmem>>, %arg3: memref<1x16xf32, #tpu.memory_space<vmem>>, %arg4: memref<2x16xf32, #tpu.memory_space<vmem>>) attributes {dimension_semantics = [#tpu.dimension_semantics<arbitrary>], iteration_bounds = array<i64: 1>, scalar_prefetch = 0 : i64, scratch_operands = 0 : i64, tpu.core_type = #tpu.core_type<tc>, window_params = [{pipeline_mode = #tpu.pipeline_mode<synchronous>, transform_indices = @transform_0, window_bounds = array<i64: 16, 32>}, {pipeline_mode = #tpu.pipeline_mode<synchronous>, transform_indices = @transform_1, window_bounds = array<i64: 32, 16>}, {pipeline_mode = #tpu.pipeline_mode<synchronous>, transform_indices = @transform_2, window_bounds = array<i64: 1, 16>}, {pipeline_mode = #tpu.pipeline_mode<synchronous>, transform_indices = @transform_3, window_bounds = array<i64: 2, 16>}]} {
    %cst = arith.constant 0.000000e+00 : f32
    %0 = vector.broadcast %cst : f32 to vector<2x32xf32>
    %c0 = arith.constant 0 : index
    %c0_0 = arith.constant 0 : index
    %1 = vector.load %arg1[%c0, %c0_0] : memref<16x32xf32, #tpu.memory_space<vmem>>, vector<2x32xf32>
    %2 = arith.addf %0, %1 : vector<2x32xf32>
    %c2 = arith.constant 2 : index
    %c0_1 = arith.constant 0 : index
    %3 = vector.load %arg1[%c2, %c0_1] : memref<16x32xf32, #tpu.memory_space<vmem>>, vector<2x32xf32>
    %4 = arith.addf %2, %3 : vector<2x32xf32>
    %c4 = arith.constant 4 : index
    %c0_2 = arith.constant 0 : index
    %5 = vector.load %arg1[%c4, %c0_2] : memref<16x32xf32, #tpu.memory_space<vmem>>, vector<2x32xf32>
    %6 = arith.addf %4, %5 : vector<2x32xf32>
    %c6 = arith.constant 6 : index
    %c0_3 = arith.constant 0 : index
    %7 = vector.load %arg1[%c6, %c0_3] : memref<16x32xf32, #tpu.memory_space<vmem>>, vector<2x32xf32>
    %8 = arith.addf %6, %7 : vector<2x32xf32>
    %c8 = arith.constant 8 : index
    %c0_4 = arith.constant 0 : index
    %9 = vector.load %arg1[%c8, %c0_4] : memref<16x32xf32, #tpu.memory_space<vmem>>, vector<2x32xf32>
    %10 = arith.addf %8, %9 : vector<2x32xf32>
    %c10 = arith.constant 10 : index
    %c0_5 = arith.constant 0 : index
    %11 = vector.load %arg1[%c10, %c0_5] : memref<16x32xf32, #tpu.memory_space<vmem>>, vector<2x32xf32>
    %12 = arith.addf %10, %11 : vector<2x32xf32>
    %c12 = arith.constant 12 : index
    %c0_6 = arith.constant 0 : index
    %13 = vector.load %arg1[%c12, %c0_6] : memref<16x32xf32, #tpu.memory_space<vmem>>, vector<2x32xf32>
    %14 = arith.addf %12, %13 : vector<2x32xf32>
    %c14 = arith.constant 14 : index
    %c0_7 = arith.constant 0 : index
    %15 = vector.load %arg1[%c14, %c0_7] : memref<16x32xf32, #tpu.memory_space<vmem>>, vector<2x32xf32>
    %16 = arith.addf %14, %15 : vector<2x32xf32>
    %17 = arith.truncf %16 : vector<2x32xf32> to vector<2x32xbf16>
    %c0_8 = arith.constant 0 : index
    %c0_9 = arith.constant 0 : index
    %18 = vector.load %arg2[%c0_8, %c0_9] : memref<32x16xbf16, #tpu.memory_space<vmem>>, vector<32x16xbf16>
    %cst_10 = arith.constant dense<0.000000e+00> : vector<2x16xf32>
    %19 = tpu.matmul %17, %18, %cst_10 {dimension_numbers = #tpu.dot_dimension_numbers<[1], [0], [0], [1], [0, 0, 1, 1], [], []>} : vector<2x32xbf16>, vector<32x16xbf16>, vector<2x16xf32> -> vector<2x16xf32>
    %cst_11 = arith.constant 1.250000e-01 : f32
    %20 = vector.broadcast %cst_11 : f32 to vector<2x16xf32>
    %21 = arith.mulf %19, %20 : vector<2x16xf32>
    %c0_12 = arith.constant 0 : index
    %c0_13 = arith.constant 0 : index
    %22 = vector.load %arg3[%c0_12, %c0_13] : memref<1x16xf32, #tpu.memory_space<vmem>>, vector<1x16xf32>
    %23 = vector.broadcast %22 : vector<1x16xf32> to vector<2x16xf32>
    %24 = arith.addf %21, %23 : vector<2x16xf32>
    %c0_14 = arith.constant 0 : index
    %c0_15 = arith.constant 0 : index
    %25 = vector.load %arg4[%c0_14, %c0_15] : memref<2x16xf32, #tpu.memory_space<vmem>>, vector<2x16xf32>
    tpu.vector_store %arg4[%c0_14, %c0_15], %24 {strides = array<i32>} : memref<2x16xf32, #tpu.memory_space<vmem>>, vector<2x16xf32>,
    return
  }
  func.func @transform_0(%arg0: i32) -> (i32, i32) {
    %c0_i32 = arith.constant 0 : i32
    %c0_i32_0 = arith.constant 0 : i32
    %c0_i32_1 = arith.constant 0 : i32
    return %c0_i32, %c0_i32_0 : i32, i32
  }
  func.func @transform_1(%arg0: i32) -> (i32, i32) {
    %c0_i32 = arith.constant 0 : i32
    %c0_i32_0 = arith.constant 0 : i32
    %c0_i32_1 = arith.constant 0 : i32
    return %c0_i32, %c0_i32_0 : i32, i32
  }
  func.func @transform_2(%arg0: i32) -> (i32, i32) {
    %c0_i32 = arith.constant 0 : i32
    %c0_i32_0 = arith.constant 0 : i32
    %c0_i32_1 = arith.constant 0 : i32
    return %c0_i32, %c0_i32_0 : i32, i32
  }
  func.func @transform_3(%arg0: i32) -> (i32, i32) {
    %c0_i32 = arith.constant 0 : i32
    %c0_i32_0 = arith.constant 0 : i32
    %c0_i32_1 = arith.constant 0 : i32
    return %c0_i32, %c0_i32_0 : i32, i32
  }
}

</mosaic_0001>

<bundles_post_ra>
// kernel: spiking_mlp_forward.4
= control target key start
LH: loop header
LB: loop body
LE: loop exit
PB: predicated region body
PF: predicated region fallthrough
CT: control target
= control target key end

     0   :  { %vm19_vm0 = vcmask 261120   ;;  %v203_v3 = vmov 0.0   ;;  %vm78_vm1 = vcmask 254976   ;;  %s307_s1 = inlined_call_operand.vmem [shape: bf16[32,32], index: 1, kind: input, shape index: {}]   ;;  %s308_s0 = inlined_call_operand.vmem [shape: f32[16,32], index: 0, kind: input, shape index: {}]   ;;  %s309_s2 = inlined_call_operand.vmem [shape: f32[1,32], index: 2, kind: input, shape index: {}]   ;;  %s310_s3 = inlined_call_operand.vmem [shape: f32[16,32], index: 3, kind: output, shape index: {}]  }
   0x1   :  { %v193_v0 = vld [vmem:[%s307_s1 + $0x8] sm:$0xff]  ;;  %v192_v1 = vld [vmem:[%s307_s1] sm:$0xff]  ;;  %20 = vst.msk [vmem:[#allocation2] sm:$0xff] %vm19_vm0, %v203_v3 }
   0x2   :  { %v24_v2 = vld [vmem:[%s308_s0] sm:$0xff]  ;;  %v25_v4 = vld [vmem:[%s308_s0 + $0x8] sm:$0xff]  ;;  %21 = vst.msk [vmem:[#allocation2 + $0x8] sm:$0xff] %vm19_vm0, %v203_v3  ;;  %53 = vmatpush.bf16.msra.mxu0 %v193_v0 }
   0x3   :  { %v26_v5 = vpack.c.bf16 %v25_v4, %v24_v2  ;;  %v195_v10 = vld [vmem:[%s309_s2] ss:$0 sm:$0xff] }
   0x4   :  { %v196_v15 = vld [vmem:[%s309_s2] ss:$0 sm:$0xff] }
   0x5   :  { %v197_v22 = vld [vmem:[%s309_s2] ss:$0 sm:$0xff] }
   0x6   :  { %54 = vmatpush.bf16.msra.mxu0 %v192_v1  ;;  %v198_v29 = vld [vmem:[%s309_s2] ss:$0 sm:$0xff] }
   0x7   :  { %v199_v36 = vld [vmem:[%s309_s2] ss:$0 sm:$0xff] }
   0x8   :  { %v22_v6 = vld [vmem:[#allocation2] sm:$0xff] }
   0x9   :  { %183 = vmatmul.msk.bf16.vlgmr.msra.gmra.mxu0 %vm19_vm0, %v26_v5  ;;  %v23_v9 = vld [vmem:[#allocation2 + $0x8] sm:$0xff]  ;;  %v200_v43 = vld [vmem:[%s309_s2] ss:$0 sm:$0xff] }
   0xa   :  { %v201_v50 = vld [vmem:[%s309_s2] ss:$0 sm:$0xff] }
   0xb   :  { %v202_v57 = vld [vmem:[%s309_s2] ss:$0 sm:$0xff] }
  0x86   :  { %v56_v7 = vpop.f32.mrf.mxu0 }
  0x87   :  { %v61_v8 = vadd.f32 %v56_v7, %v22_v6 }
  0x89   :  { %63 = vst.msk [vmem:[#allocation2] sm:$0xff] %vm19_vm0, %v61_v8 }
  0x8e   :  { %v58_v11 = vpop.f32.mrf.mxu0 }
  0x8f   :  { %v62_v12 = vadd.f32 %v58_v11, %v23_v9 }
  0x90   :  { %v68_v13 = vld [vmem:[#allocation2] sm:$0x3]  ;;  %v82_v17 = vld [vmem:[#allocation2 + $0x2] sm:$0x3]  ;;  %v95_v24 = vld [vmem:[#allocation2 + $0x4] sm:$0x3] }
  0x91   :  { %v73_v14 = vadd.f32 %v195_v10, %v68_v13  ;;  %64 = vst.msk [vmem:[#allocation2 + $0x8] sm:$0xff] %vm19_vm0, %v62_v12  ;;  %v87_v20 = vadd.f32 %v196_v15, %v82_v17  ;;  %v100_v27 = vadd.f32 %v197_v22, %v95_v24  ;;  %v108_v31 = vld [vmem:[#allocation2 + $0x6] sm:$0x3] }
  0x92   :  { %v113_v34 = vadd.f32 %v198_v29, %v108_v31 }
  0x93   :  { %vm75_vm2 = vcmp.ge.f32.partialorder %v73_v14, 1.0 }
  0x94   :  { %v184_v16 = vsel %vm75_vm2, 1.0, %v203_v3 }
  0x95   :  { %79 = vst.msk [vmem:[%s310_s3] sm:$0x3] %vm78_vm1, %v184_v16  ;;  %v80_v18 = vsub.f32 1.0, %v184_v16 }
  0x97   :  { %v81_v19 = vmul.f32 %v80_v18, %v73_v14 }
  0x98   :  { %v121_v38 = vld [vmem:[#allocation2 + $0x8] sm:$0x3]  ;;  %v134_v45 = vld [vmem:[#allocation2 + $0xa] sm:$0x3]  ;;  %v147_v52 = vld [vmem:[#allocation2 + $0xc] sm:$0x3] }
  0x99   :  { %v88_v21 = vadd.f32 %v87_v20, %v81_v19  ;;  %v126_v41 = vadd.f32 %v199_v36, %v121_v38  ;;  %v139_v48 = vadd.f32 %v200_v43, %v134_v45  ;;  %v152_v55 = vadd.f32 %v201_v50, %v147_v52  ;;  %v160_v59 = vld [vmem:[#allocation2 + $0xe] sm:$0x3] }
  0x9a   :  { %v165_v62 = vadd.f32 %v202_v57, %v160_v59 }
  0x9b   :  { %vm89_vm3 = vcmp.ge.f32.partialorder %v88_v21, 1.0 }
  0x9c   :  { %v185_v23 = vsel %vm89_vm3, 1.0, %v203_v3 }
  0x9d   :  { %92 = vst.msk [vmem:[%s310_s3 + $0x2] sm:$0x3] %vm78_vm1, %v185_v23  ;;  %v93_v25 = vsub.f32 1.0, %v185_v23 }
  0x9f   :  { %v94_v26 = vmul.f32 %v93_v25, %v88_v21 }
  0xa1   :  { %v101_v28 = vadd.f32 %v100_v27, %v94_v26 }
  0xa3   :  { %vm102_vm4 = vcmp.ge.f32.partialorder %v101_v28, 1.0 }
  0xa4   :  { %v186_v30 = vsel %vm102_vm4, 1.0, %v203_v3 }
  0xa5   :  { %105 = vst.msk [vmem:[%s310_s3 + $0x4] sm:$0x3] %vm78_vm1, %v186_v30  ;;  %v106_v32 = vsub.f32 1.0, %v186_v30 }
  0xa7   :  { %v107_v33 = vmul.f32 %v106_v32, %v101_v28 }
  0xa9   :  { %v114_v35 = vadd.f32 %v113_v34, %v107_v33 }
  0xab   :  { %vm115_vm5 = vcmp.ge.f32.partialorder %v114_v35, 1.0 }
  0xac   :  { %v187_v37 = vsel %vm115_vm5, 1.0, %v203_v3 }
  0xad   :  { %118 = vst.msk [vmem:[%s310_s3 + $0x6] sm:$0x3] %vm78_vm1, %v187_v37  ;;  %v119_v39 = vsub.f32 1.0, %v187_v37 }
  0xaf   :  { %v120_v40 = vmul.f32 %v119_v39, %v114_v35 }
  0xb1   :  { %v127_v42 = vadd.f32 %v126_v41, %v120_v40 }
  0xb3   :  { %vm128_vm6 = vcmp.ge.f32.partialorder %v127_v42, 1.0 }
  0xb4   :  { %v188_v44 = vsel %vm128_vm6, 1.0, %v203_v3 }
  0xb5   :  { %131 = vst.msk [vmem:[%s310_s3 + $0x8] sm:$0x3] %vm78_vm1, %v188_v44  ;;  %v132_v46 = vsub.f32 1.0, %v188_v44 }
  0xb7   :  { %v133_v47 = vmul.f32 %v132_v46, %v127_v42 }
  0xb9   :  { %v140_v49 = vadd.f32 %v139_v48, %v133_v47 }
  0xbb   :  { %vm141_vm7 = vcmp.ge.f32.partialorder %v140_v49, 1.0 }
  0xbc   :  { %v189_v51 = vsel %vm141_vm7, 1.0, %v203_v3 }
  0xbd   :  { %144 = vst.msk [vmem:[%s310_s3 + $0xa] sm:$0x3] %vm78_vm1, %v189_v51  ;;  %v145_v53 = vsub.f32 1.0, %v189_v51 }
  0xbf   :  { %v146_v54 = vmul.f32 %v145_v53, %v140_v49 }
  0xc1   :  { %v153_v56 = vadd.f32 %v152_v55, %v146_v54 }
  0xc3   :  { %vm154_vm8 = vcmp.ge.f32.partialorder %v153_v56, 1.0 }
  0xc4   :  { %v190_v58 = vsel %vm154_vm8, 1.0, %v203_v3 }
  0xc5   :  { %157 = vst.msk [vmem:[%s310_s3 + $0xc] sm:$0x3] %vm78_vm1, %v190_v58  ;;  %v158_v60 = vsub.f32 1.0, %v190_v58 }
  0xc7   :  { %v159_v61 = vmul.f32 %v158_v60, %v153_v56 }
  0xc9   :  { %v166_v63 = vadd.f32 %v165_v62, %v159_v61 }
  0xcb   :  { %vm167_vm9 = vcmp.ge.f32.partialorder %v166_v63, 1.0 }
  0xcc   :  { %v191_v0 = vsel %vm167_vm9, 1.0, %v203_v3 }
  0xcd   :  { %170 = vst.msk [vmem:[%s310_s3 + $0xe] sm:$0x3] %vm78_vm1, %v191_v0 }

// kernel: spiking_mlp_forward.5
= control target key start
LH: loop header
LB: loop body
LE: loop exit
PB: predicated region body
PF: predicated region fallthrough
CT: control target
= control target key end

     0   :  { %s186_s0 = inlined_call_operand.vmem [shape: f32[16,32], index: 0, kind: input, shape index: {}]   ;;  %s187_s1 = inlined_call_operand.vmem [shape: bf16[32,16], index: 1, kind: input, shape index: {}]   ;;  %s188_s2 = inlined_call_operand.vmem [shape: f32[1,16], index: 2, kind: input, shape index: {}]   ;;  %s189_s3 = inlined_call_operand.hbm [shape: f32[2,16], index: 3, kind: output, shape index: {}]  }
   0x1   :  { %v100_v0 = vld [vmem:[%s187_s1 + $0x8] sm:$0xff]  ;;  %v16_v1 = vld [vmem:[%s186_s0] sm:$0x3]  ;;  %v18_v2 = vld [vmem:[%s186_s0 + $0x2] sm:$0x3] }
   0x2   :  { %v20_v3 = vld [vmem:[%s186_s0 + $0x4] sm:$0x3]  ;;  %59 = vmatpush.bf16.msra.mxu0 %v100_v0  ;;  %v19_v5 = vadd.f32 %v18_v2, %v16_v1  ;;  %v22_v6 = vld [vmem:[%s186_s0 + $0x6] sm:$0x3] }
   0x3   :  { %v99_v4 = vld [vmem:[%s187_s1] sm:$0xff] }
   0x4   :  { %8 = vsyncpa [#allocation3], 0  ;;  %v21_v7 = vadd.f32 %v20_v3, %v19_v5  ;;  %v24_v8 = vld [vmem:[%s186_s0 + $0x8] sm:$0x3]  ;;  %v26_v10 = vld [vmem:[%s186_s0 + $0xa] sm:$0x3] }
   0x5   :  { %v28_v12 = vld [vmem:[%s186_s0 + $0xc] sm:$0x3]  ;;  %v30_v14 = vld [vmem:[%s186_s0 + $0xe] sm:$0x3]  ;;  %vm49_vm0 = vcmask 261120   ;;  %s129_s6 = smov [#allocation2]  }
   0x6   :  { %60 = vmatpush.bf16.msra.mxu0 %v99_v4  ;;  %v23_v9 = vadd.f32 %v22_v6, %v21_v7  ;;  %v102_v18 = vld [vmem:[%s188_s2] ss:$0 sm:$0xff]  ;;  %s79_s7 = sshll.u32 %s129_s6, 4  ;;  %s81_s10 = sshll.u32 %s189_s3, 4  ;;  %vm72_vm1 = vcmask 123904   ;;  %s80_s7 = int_to_ptr.vmem [resolvable:$true] %s79_s7  ;;  %s82_s10 = int_to_ptr.hbm [resolvable:$true] %s81_s10 }
   0x8   :  { %v25_v11 = vadd.f32 %v24_v8, %v23_v9 }
   0xa   :  { %v27_v13 = vadd.f32 %v26_v10, %v25_v11 }
   0xc   :  { %v29_v15 = vadd.f32 %v28_v12, %v27_v13 }
   0xe   :  { %v31_v16 = vadd.f32 %v30_v14, %v29_v15 }
  0x10   :  { %v32_v17 = vpack.c.bf16 %v31_v16, %v31_v16 }
  0x12   :  { %98 = vmatmul.msk.bf16.vlgmr.msra.gmra.mxu0 %vm49_vm0, %v32_v17 }
  0x8f   :  { %v62_v19 = vpop.f32.mrf.mxu0 }
  0x90   :  { %v66_v20 = vmul.f32 0.125, %v62_v19 }
  0x92   :  { %v71_v21 = vadd.f32 %v102_v18, %v66_v20 }
  0x94   :  { %73 = vst.msk [vmem:[#allocation2] sm:$0x3] %vm72_vm1, %v71_v21 }
  0x95   :  { %84 = dma.vmem_to_hbm [thread:$0]  %s80_s7, 32, %s82_s10, [#allocation3]  }
  0x97   :  { %v64_v22 = vpop.f32.mrf.mxu0 }
  0x98   :  { %127 = dma.done.wait [#allocation3], 32  }
  0x99   :  { %128 = vsyncadd [#allocation3], 4294967264 }
  0x9a   :  { %89 = vsyncpa [#allocation3], 1 }

// kernel: spiking_mlp_forward.3
= control target key start
LH: loop header
LB: loop body
LE: loop exit
PB: predicated region body
PF: predicated region fallthrough
CT: control target
= control target key end

     0   :  { %8 = vsyncpa [#allocation6], 0  ;;  %s14382_s0 = inlined_call_operand.vmem [shape: f32[8,2,32768], index: 0, kind: input, shape index: {}]   ;;  %s14383_s1 = inlined_call_operand.hbm [shape: bf16[32768,32], index: 1, kind: input, shape index: {}]   ;;  %s14384_s2 = inlined_call_operand.vmem [shape: f32[1,32], index: 2, kind: input, shape index: {}]   ;;  %s14385_s3 = inlined_call_operand.vmem [shape: f32[16,32], index: 3, kind: output, shape index: {}]  }
   0x1   :  { %10 = vsyncpa [#allocation6 + $0x1], 0  ;;  %s11596_s12 = smov 0   ;;  %s11598_s13 = smov 0  }
   0x2   :  { %s11600_s14 = smov 0   ;;  %s11602_s15 = smov 0  }
   0x3   :  { %s11604_s16 = smov 0   ;;  %s11606_s17 = smov 0  }
   0x4 LB: > { %s8600_s18 = sadd.s32 4294967295, %s11569_s17   ;;  %s25_s19 = sadd.s32 1, %s11565_s16  ;;  %s11569_s17 = sphi %s11606_s17, %s16_s17   ;;  %s11565_s16 = sphi %s11604_s16, %s14551_s16   ;;  %s11561_s15 = sphi %s11602_s15, %s14550_s15   ;;  %s11557_s14 = sphi %s11600_s14, %s14549_s14   ;;  %s11553_s13 = sphi %s11598_s13, %s14548_s13   ;;  %s11549_s12 = sphi %s11596_s12, %s14547_s12  }
   0x5   : > { %p26_p0 = scmp.ge.s32.totalorder %s25_s19, 4  ;;  %s35_s20 = sadd.s32 1, %s11557_s14 }
   0x6   : > { %p42_p1 = scmp.ne.s32.totalorder %s11557_s14, %s11553_s13  ;;  %p43_p2 = scmp.eq.s32.totalorder %s11569_s17, 0 }
   0x7   : > { %s14553_s19 = smov (%p26_p0, %s25_s19), 0  ;;  %p76_p4 = scmp.ne.s32.totalorder %s11553_s13, %s11549_s12 }
   0x8   : > { %p11632_p3 = por %p43_p2, %p42_p1  ;;  %s32_s22 = ssub.s32 %s11565_s16, %s14553_s19 }
   0x9   : > { %p77_p5 = scmp.eq.s32.totalorder %s8600_s18, 0  ;;  %p33_p6 = scmp.eq.s32.totalorder %s32_s22, 0 }
   0xa   : > { %p8603_p8 = scmp.ge.s32.totalorder %s11569_s17, 4 }
   0xb   : > { %p11639_p7 = por %p77_p5, %p76_p4 }
   0xc   : > { %s11644_s24 = scalar_select %p33_p6, %s11557_s14, %s35_s20  }
   0xd   : > { %154 = sbr.rel (%p8603_p8) target bundleno = 156 (0x9c), region = 20 }
  0x12   : > { %157 = sbr.rel (!%p11632_p3) target bundleno = 150 (0x96), region = 24  ;;  %s159_s25 = sand.u32 (%p11632_p3), 1, %s11557_s14  }
  0x13   : > { %s10914_s26 = sshll.u32 (%p11632_p3), %s11565_s16, 7  ;;  %s8604_s27 = sshll.u32 (%p11632_p3), %s159_s25, 10 }
  0x14   : > { %s11654_s30 = scalar_lea.vmem (%p11632_p3), %s14382_s0, %s10914_s26  ;;  %s11659_s4 = scalar_lea.vmem (%p11632_p3), [#allocation4], %s8604_s27 }
  0x15   : > { %v177_v0 = vld [vmem:[%s11654_s30] sm:$0xff] (%p11632_p3)  ;;  %v179_v1 = vld [vmem:[%s11654_s30 + $0x8] sm:$0xff] (%p11632_p3)  ;;  %v181_v2 = vld [vmem:[%s11654_s30 + $0x10] sm:$0xff] (%p11632_p3) }
  0x16   : > { %178 = vst [vmem:[%s11659_s4] sm:$0xff] (%p11632_p3), %v177_v0  ;;  %v183_v3 = vld [vmem:[%s11654_s30 + $0x18] sm:$0xff] (%p11632_p3)  ;;  %v185_v4 = vld [vmem:[%s11654_s30 + $0x20] sm:$0xff] (%p11632_p3)  ;;  %v187_v5 = vld [vmem:[%s11654_s30 + $0x28] sm:$0xff] (%p11632_p3) }
  0x17   : > { %180 = vst [vmem:[%s11659_s4 + $0x8] sm:$0xff] %v179_v1  ;;  %v189_v6 = vld [vmem:[%s11654_s30 + $0x30] sm:$0xff]  ;;  %v191_v7 = vld [vmem:[%s11654_s30 + $0x38] sm:$0xff]  ;;  %v193_v8 = vld [vmem:[%s11654_s30 + $0x40] sm:$0xff] }
  0x18   : > { %182 = vst [vmem:[%s11659_s4 + $0x10] sm:$0xff] %v181_v2  ;;  %v195_v9 = vld [vmem:[%s11654_s30 + $0x48] sm:$0xff]  ;;  %v197_v10 = vld [vmem:[%s11654_s30 + $0x50] sm:$0xff]  ;;  %v199_v11 = vld [vmem:[%s11654_s30 + $0x58] sm:$0xff] }
  0x19   : > { %184 = vst [vmem:[%s11659_s4 + $0x18] sm:$0xff] %v183_v3  ;;  %v201_v12 = vld [vmem:[%s11654_s30 + $0x60] sm:$0xff]  ;;  %v203_v13 = vld [vmem:[%s11654_s30 + $0x68] sm:$0xff]  ;;  %v205_v14 = vld [vmem:[%s11654_s30 + $0x70] sm:$0xff] }
  0x1a   : > { %186 = vst [vmem:[%s11659_s4 + $0x20] sm:$0xff] %v185_v4  ;;  %v207_v15 = vld [vmem:[%s11654_s30 + $0x78] sm:$0xff]  ;;  %v209_v16 = vld [vmem:[%s11654_s30 + $0x200] sm:$0xff]  ;;  %v211_v17 = vld [vmem:[%s11654_s30 + $0x208] sm:$0xff] }
  0x1b   : > { %188 = vst [vmem:[%s11659_s4 + $0x28] sm:$0xff] %v187_v5  ;;  %v213_v18 = vld [vmem:[%s11654_s30 + $0x210] sm:$0xff]  ;;  %v215_v19 = vld [vmem:[%s11654_s30 + $0x218] sm:$0xff]  ;;  %v217_v20 = vld [vmem:[%s11654_s30 + $0x220] sm:$0xff] }
  0x1c   : > { %190 = vst [vmem:[%s11659_s4 + $0x30] sm:$0xff] %v189_v6  ;;  %v219_v21 = vld [vmem:[%s11654_s30 + $0x228] sm:$0xff]  ;;  %v221_v22 = vld [vmem:[%s11654_s30 + $0x230] sm:$0xff]  ;;  %v223_v23 = vld [vmem:[%s11654_s30 + $0x238] sm:$0xff] }
  0x1d   : > { %192 = vst [vmem:[%s11659_s4 + $0x38] sm:$0xff] %v191_v7  ;;  %v225_v24 = vld [vmem:[%s11654_s30 + $0x240] sm:$0xff]  ;;  %v227_v25 = vld [vmem:[%s11654_s30 + $0x248] sm:$0xff]  ;;  %v229_v26 = vld [vmem:[%s11654_s30 + $0x250] sm:$0xff] }
  0x1e   : > { %194 = vst [vmem:[%s11659_s4 + $0x40] sm:$0xff] %v193_v8  ;;  %v231_v27 = vld [vmem:[%s11654_s30 + $0x258] sm:$0xff]  ;;  %v233_v28 = vld [vmem:[%s11654_s30 + $0x260] sm:$0xff]  ;;  %v235_v29 = vld [vmem:[%s11654_s30 + $0x268] sm:$0xff] }
  0x1f   : > { %196 = vst [vmem:[%s11659_s4 + $0x48] sm:$0xff] %v195_v9  ;;  %v237_v30 = vld [vmem:[%s11654_s30 + $0x270] sm:$0xff]  ;;  %v239_v31 = vld [vmem:[%s11654_s30 + $0x278] sm:$0xff]  ;;  %v241_v32 = vld [vmem:[%s11654_s30 + $0x400] sm:$0xff] }
  0x20   : > { %198 = vst [vmem:[%s11659_s4 + $0x50] sm:$0xff] %v197_v10  ;;  %v243_v33 = vld [vmem:[%s11654_s30 + $0x408] sm:$0xff]  ;;  %v245_v34 = vld [vmem:[%s11654_s30 + $0x410] sm:$0xff]  ;;  %v247_v35 = vld [vmem:[%s11654_s30 + $0x418] sm:$0xff] }
  0x21   : > { %200 = vst [vmem:[%s11659_s4 + $0x58] sm:$0xff] %v199_v11  ;;  %v249_v36 = vld [vmem:[%s11654_s30 + $0x420] sm:$0xff]  ;;  %v251_v37 = vld [vmem:[%s11654_s30 + $0x428] sm:$0xff]  ;;  %v253_v38 = vld [vmem:[%s11654_s30 + $0x430] sm:$0xff] }
  0x22   : > { %202 = vst [vmem:[%s11659_s4 + $0x60] sm:$0xff] %v201_v12  ;;  %v255_v39 = vld [vmem:[%s11654_s30 + $0x438] sm:$0xff]  ;;  %v257_v40 = vld [vmem:[%s11654_s30 + $0x440] sm:$0xff]  ;;  %v259_v41 = vld [vmem:[%s11654_s30 + $0x448] sm:$0xff] }
  0x23   : > { %204 = vst [vmem:[%s11659_s4 + $0x68] sm:$0xff] %v203_v13  ;;  %v261_v42 = vld [vmem:[%s11654_s30 + $0x450] sm:$0xff]  ;;  %v263_v43 = vld [vmem:[%s11654_s30 + $0x458] sm:$0xff]  ;;  %v265_v44 = vld [vmem:[%s11654_s30 + $0x460] sm:$0xff] }
  0x24   : > { %206 = vst [vmem:[%s11659_s4 + $0x70] sm:$0xff] %v205_v14  ;;  %v267_v45 = vld [vmem:[%s11654_s30 + $0x468] sm:$0xff]  ;;  %v269_v46 = vld [vmem:[%s11654_s30 + $0x470] sm:$0xff]  ;;  %v271_v47 = vld [vmem:[%s11654_s30 + $0x478] sm:$0xff] }
  0x25   : > { %208 = vst [vmem:[%s11659_s4 + $0x78] sm:$0xff] %v207_v15  ;;  %v273_v48 = vld [vmem:[%s11654_s30 + $0x600] sm:$0xff]  ;;  %v275_v49 = vld [vmem:[%s11654_s30 + $0x608] sm:$0xff]  ;;  %v277_v50 = vld [vmem:[%s11654_s30 + $0x610] sm:$0xff] }
  0x26   : > { %210 = vst [vmem:[%s11659_s4 + $0x80] sm:$0xff] %v209_v16  ;;  %v279_v51 = vld [vmem:[%s11654_s30 + $0x618] sm:$0xff]  ;;  %v281_v52 = vld [vmem:[%s11654_s30 + $0x620] sm:$0xff]  ;;  %v283_v53 = vld [vmem:[%s11654_s30 + $0x628] sm:$0xff] }
  0x27   : > { %212 = vst [vmem:[%s11659_s4 + $0x88] sm:$0xff] %v211_v17  ;;  %v285_v54 = vld [vmem:[%s11654_s30 + $0x630] sm:$0xff]  ;;  %v287_v55 = vld [vmem:[%s11654_s30 + $0x638] sm:$0xff]  ;;  %v289_v56 = vld [vmem:[%s11654_s30 + $0x640] sm:$0xff] }
  0x28   : > { %214 = vst [vmem:[%s11659_s4 + $0x90] sm:$0xff] %v213_v18  ;;  %v291_v57 = vld [vmem:[%s11654_s30 + $0x648] sm:$0xff]  ;;  %v293_v58 = vld [vmem:[%s11654_s30 + $0x650] sm:$0xff]  ;;  %v295_v59 = vld [vmem:[%s11654_s30 + $0x658] sm:$0xff] }
  0x29   : > { %216 = vst [vmem:[%s11659_s4 + $0x98] sm:$0xff] %v215_v19  ;;  %v297_v60 = vld [vmem:[%s11654_s30 + $0x660] sm:$0xff]  ;;  %v299_v61 = vld [vmem:[%s11654_s30 + $0x668] sm:$0xff]  ;;  %v301_v62 = vld [vmem:[%s11654_s30 + $0x670] sm:$0xff] }
  0x2a   : > { %218 = vst [vmem:[%s11659_s4 + $0xa0] sm:$0xff] %v217_v20  ;;  %v303_v63 = vld [vmem:[%s11654_s30 + $0x678] sm:$0xff]  ;;  %v305_v0 = vld [vmem:[%s11654_s30 + $0x800] sm:$0xff]  ;;  %v307_v1 = vld [vmem:[%s11654_s30 + $0x808] sm:$0xff] }
  0x2b   : > { %220 = vst [vmem:[%s11659_s4 + $0xa8] sm:$0xff] %v219_v21  ;;  %v309_v2 = vld [vmem:[%s11654_s30 + $0x810] sm:$0xff]  ;;  %v311_v3 = vld [vmem:[%s11654_s30 + $0x818] sm:$0xff]  ;;  %v313_v4 = vld [vmem:[%s11654_s30 + $0x820] sm:$0xff] }
  0x2c   : > { %222 = vst [vmem:[%s11659_s4 + $0xb0] sm:$0xff] %v221_v22  ;;  %v315_v5 = vld [vmem:[%s11654_s30 + $0x828] sm:$0xff]  ;;  %v317_v6 = vld [vmem:[%s11654_s30 + $0x830] sm:$0xff]  ;;  %v319_v7 = vld [vmem:[%s11654_s30 + $0x838] sm:$0xff] }
  0x2d   : > { %224 = vst [vmem:[%s11659_s4 + $0xb8] sm:$0xff] %v223_v23  ;;  %v321_v8 = vld [vmem:[%s11654_s30 + $0x840] sm:$0xff]  ;;  %v323_v9 = vld [vmem:[%s11654_s30 + $0x848] sm:$0xff]  ;;  %v325_v10 = vld [vmem:[%s11654_s30 + $0x850] sm:$0xff] }
  0x2e   : > { %226 = vst [vmem:[%s11659_s4 + $0xc0] sm:$0xff] %v225_v24  ;;  %v327_v11 = vld [vmem:[%s11654_s30 + $0x858] sm:$0xff]  ;;  %v329_v12 = vld [vmem:[%s11654_s30 + $0x860] sm:$0xff]  ;;  %v331_v13 = vld [vmem:[%s11654_s30 + $0x868] sm:$0xff] }
  0x2f   : > { %228 = vst [vmem:[%s11659_s4 + $0xc8] sm:$0xff] %v227_v25  ;;  %v333_v14 = vld [vmem:[%s11654_s30 + $0x870] sm:$0xff]  ;;  %v335_v15 = vld [vmem:[%s11654_s30 + $0x878] sm:$0xff]  ;;  %v337_v16 = vld [vmem:[%s11654_s30 + $0xa00] sm:$0xff] }
  0x30   : > { %230 = vst [vmem:[%s11659_s4 + $0xd0] sm:$0xff] %v229_v26  ;;  %v339_v17 = vld [vmem:[%s11654_s30 + $0xa08] sm:$0xff]  ;;  %v341_v18 = vld [vmem:[%s11654_s30 + $0xa10] sm:$0xff]  ;;  %v343_v19 = vld [vmem:[%s11654_s30 + $0xa18] sm:$0xff] }
  0x31   : > { %232 = vst [vmem:[%s11659_s4 + $0xd8] sm:$0xff] %v231_v27  ;;  %v345_v20 = vld [vmem:[%s11654_s30 + $0xa20] sm:$0xff]  ;;  %v347_v21 = vld [vmem:[%s11654_s30 + $0xa28] sm:$0xff]  ;;  %v349_v22 = vld [vmem:[%s11654_s30 + $0xa30] sm:$0xff] }
  0x32   : > { %234 = vst [vmem:[%s11659_s4 + $0xe0] sm:$0xff] %v233_v28  ;;  %v351_v23 = vld [vmem:[%s11654_s30 + $0xa38] sm:$0xff]  ;;  %v353_v24 = vld [vmem:[%s11654_s30 + $0xa40] sm:$0xff]  ;;  %v355_v25 = vld [vmem:[%s11654_s30 + $0xa48] sm:$0xff] }
  0x33   : > { %236 = vst [vmem:[%s11659_s4 + $0xe8] sm:$0xff] %v235_v29  ;;  %v357_v26 = vld [vmem:[%s11654_s30 + $0xa50] sm:$0xff]  ;;  %v359_v27 = vld [vmem:[%s11654_s30 + $0xa58] sm:$0xff]  ;;  %v361_v28 = vld [vmem:[%s11654_s30 + $0xa60] sm:$0xff] }
  0x34   : > { %238 = vst [vmem:[%s11659_s4 + $0xf0] sm:$0xff] %v237_v30  ;;  %v363_v29 = vld [vmem:[%s11654_s30 + $0xa68] sm:$0xff]  ;;  %v365_v30 = vld [vmem:[%s11654_s30 + $0xa70] sm:$0xff] }
  0x35   : > { %240 = vst [vmem:[%s11659_s4 + $0xf8] sm:$0xff] %v239_v31  ;;  %v367_v31 = vld [vmem:[%s11654_s30 + $0xa78] sm:$0xff] }
  0x36   : > { %242 = vst [vmem:[%s11659_s4 + $0x100] sm:$0xff] %v241_v32  ;;  %v369_v32 = vld [vmem:[%s11654_s30 + $0xc00] sm:$0xff] }
  0x37   : > { %244 = vst [vmem:[%s11659_s4 + $0x108] sm:$0xff] %v243_v33  ;;  %v371_v33 = vld [vmem:[%s11654_s30 + $0xc08] sm:$0xff] }
  0x38   : > { %246 = vst [vmem:[%s11659_s4 + $0x110] sm:$0xff] %v245_v34  ;;  %v373_v34 = vld [vmem:[%s11654_s30 + $0xc10] sm:$0xff] }
  0x39   : > { %248 = vst [vmem:[%s11659_s4 + $0x118] sm:$0xff] %v247_v35  ;;  %v375_v35 = vld [vmem:[%s11654_s30 + $0xc18] sm:$0xff] }
  0x3a   : > { %250 = vst [vmem:[%s11659_s4 + $0x120] sm:$0xff] %v249_v36  ;;  %v377_v36 = vld [vmem:[%s11654_s30 + $0xc20] sm:$0xff] }
  0x3b   : > { %252 = vst [vmem:[%s11659_s4 + $0x128] sm:$0xff] %v251_v37  ;;  %v379_v37 = vld [vmem:[%s11654_s30 + $0xc28] sm:$0xff] }
  0x3c   : > { %254 = vst [vmem:[%s11659_s4 + $0x130] sm:$0xff] %v253_v38  ;;  %v381_v38 = vld [vmem:[%s11654_s30 + $0xc30] sm:$0xff] }
  0x3d   : > { %256 = vst [vmem:[%s11659_s4 + $0x138] sm:$0xff] %v255_v39  ;;  %v383_v39 = vld [vmem:[%s11654_s30 + $0xc38] sm:$0xff] }
  0x3e   : > { %258 = vst [vmem:[%s11659_s4 + $0x140] sm:$0xff] %v257_v40  ;;  %v385_v40 = vld [vmem:[%s11654_s30 + $0xc40] sm:$0xff] }
  0x3f   : > { %260 = vst [vmem:[%s11659_s4 + $0x148] sm:$0xff] %v259_v41  ;;  %v387_v41 = vld [vmem:[%s11654_s30 + $0xc48] sm:$0xff] }
  0x40   : > { %262 = vst [vmem:[%s11659_s4 + $0x150] sm:$0xff] %v261_v42  ;;  %v389_v42 = vld [vmem:[%s11654_s30 + $0xc50] sm:$0xff] }
  0x41   : > { %264 = vst [vmem:[%s11659_s4 + $0x158] sm:$0xff] %v263_v43  ;;  %v391_v43 = vld [vmem:[%s11654_s30 + $0xc58] sm:$0xff] }
  0x42   : > { %266 = vst [vmem:[%s11659_s4 + $0x160] sm:$0xff] %v265_v44  ;;  %v393_v44 = vld [vmem:[%s11654_s30 + $0xc60] sm:$0xff] }
  0x43   : > { %268 = vst [vmem:[%s11659_s4 + $0x168] sm:$0xff] %v267_v45  ;;  %v395_v45 = vld [vmem:[%s11654_s30 + $0xc68] sm:$0xff] }
  0x44   : > { %270 = vst [vmem:[%s11659_s4 + $0x170] sm:$0xff] %v269_v46  ;;  %v397_v46 = vld [vmem:[%s11654_s30 + $0xc70] sm:$0xff] }
  0x45   : > { %272 = vst [vmem:[%s11659_s4 + $0x178] sm:$0xff] %v271_v47  ;;  %v399_v47 = vld [vmem:[%s11654_s30 + $0xc78] sm:$0xff] }
  0x46   : > { %274 = vst [vmem:[%s11659_s4 + $0x180] sm:$0xff] %v273_v48  ;;  %v401_v48 = vld [vmem:[%s11654_s30 + $0xe00] sm:$0xff] }
  0x47   : > { %276 = vst [vmem:[%s11659_s4 + $0x188] sm:$0xff] %v275_v49  ;;  %v403_v49 = vld [vmem:[%s11654_s30 + $0xe08] sm:$0xff] }
  0x48   : > { %278 = vst [vmem:[%s11659_s4 + $0x190] sm:$0xff] %v277_v50  ;;  %v405_v50 = vld [vmem:[%s11654_s30 + $0xe10] sm:$0xff] }
  0x49   : > { %280 = vst [vmem:[%s11659_s4 + $0x198] sm:$0xff] %v279_v51  ;;  %v407_v51 = vld [vmem:[%s11654_s30 + $0xe18] sm:$0xff] }
  0x4a   : > { %282 = vst [vmem:[%s11659_s4 + $0x1a0] sm:$0xff] %v281_v52  ;;  %v409_v52 = vld [vmem:[%s11654_s30 + $0xe20] sm:$0xff] }
  0x4b   : > { %284 = vst [vmem:[%s11659_s4 + $0x1a8] sm:$0xff] %v283_v53  ;;  %v411_v53 = vld [vmem:[%s11654_s30 + $0xe28] sm:$0xff] }
  0x4c   : > { %286 = vst [vmem:[%s11659_s4 + $0x1b0] sm:$0xff] %v285_v54  ;;  %v413_v54 = vld [vmem:[%s11654_s30 + $0xe30] sm:$0xff] }
  0x4d   : > { %288 = vst [vmem:[%s11659_s4 + $0x1b8] sm:$0xff] %v287_v55  ;;  %v415_v55 = vld [vmem:[%s11654_s30 + $0xe38] sm:$0xff] }
  0x4e   : > { %290 = vst [vmem:[%s11659_s4 + $0x1c0] sm:$0xff] %v289_v56  ;;  %v417_v56 = vld [vmem:[%s11654_s30 + $0xe40] sm:$0xff] }
  0x4f   : > { %292 = vst [vmem:[%s11659_s4 + $0x1c8] sm:$0xff] %v291_v57  ;;  %v419_v57 = vld [vmem:[%s11654_s30 + $0xe48] sm:$0xff] }
  0x50   : > { %294 = vst [vmem:[%s11659_s4 + $0x1d0] sm:$0xff] %v293_v58  ;;  %v421_v58 = vld [vmem:[%s11654_s30 + $0xe50] sm:$0xff] }
  0x51   : > { %296 = vst [vmem:[%s11659_s4 + $0x1d8] sm:$0xff] %v295_v59  ;;  %v423_v59 = vld [vmem:[%s11654_s30 + $0xe58] sm:$0xff] }
  0x52   : > { %298 = vst [vmem:[%s11659_s4 + $0x1e0] sm:$0xff] %v297_v60  ;;  %v425_v60 = vld [vmem:[%s11654_s30 + $0xe60] sm:$0xff] }
  0x53   : > { %300 = vst [vmem:[%s11659_s4 + $0x1e8] sm:$0xff] %v299_v61  ;;  %v427_v61 = vld [vmem:[%s11654_s30 + $0xe68] sm:$0xff] }
  0x54   : > { %302 = vst [vmem:[%s11659_s4 + $0x1f0] sm:$0xff] %v301_v62  ;;  %v429_v62 = vld [vmem:[%s11654_s30 + $0xe70] sm:$0xff] }
  0x55   : > { %304 = vst [vmem:[%s11659_s4 + $0x1f8] sm:$0xff] %v303_v63  ;;  %v431_v63 = vld [vmem:[%s11654_s30 + $0xe78] sm:$0xff] }
  0x56   : > { %306 = vst [vmem:[%s11659_s4 + $0x200] sm:$0xff] %v305_v0 }
  0x57   : > { %308 = vst [vmem:[%s11659_s4 + $0x208] sm:$0xff] %v307_v1 }
  0x58   : > { %310 = vst [vmem:[%s11659_s4 + $0x210] sm:$0xff] %v309_v2 }
  0x59   : > { %312 = vst [vmem:[%s11659_s4 + $0x218] sm:$0xff] %v311_v3 }
  0x5a   : > { %314 = vst [vmem:[%s11659_s4 + $0x220] sm:$0xff] %v313_v4 }
  0x5b   : > { %316 = vst [vmem:[%s11659_s4 + $0x228] sm:$0xff] %v315_v5 }
  0x5c   : > { %318 = vst [vmem:[%s11659_s4 + $0x230] sm:$0xff] %v317_v6 }
  0x5d   : > { %320 = vst [vmem:[%s11659_s4 + $0x238] sm:$0xff] %v319_v7 }
  0x5e   : > { %322 = vst [vmem:[%s11659_s4 + $0x240] sm:$0xff] %v321_v8 }
  0x5f   : > { %324 = vst [vmem:[%s11659_s4 + $0x248] sm:$0xff] %v323_v9 }
  0x60   : > { %326 = vst [vmem:[%s11659_s4 + $0x250] sm:$0xff] %v325_v10 }
  0x61   : > { %328 = vst [vmem:[%s11659_s4 + $0x258] sm:$0xff] %v327_v11 }
  0x62   : > { %330 = vst [vmem:[%s11659_s4 + $0x260] sm:$0xff] %v329_v12 }
  0x63   : > { %332 = vst [vmem:[%s11659_s4 + $0x268] sm:$0xff] %v331_v13 }
  0x64   : > { %334 = vst [vmem:[%s11659_s4 + $0x270] sm:$0xff] %v333_v14 }
  0x65   : > { %336 = vst [vmem:[%s11659_s4 + $0x278] sm:$0xff] %v335_v15 }
  0x66   : > { %338 = vst [vmem:[%s11659_s4 + $0x280] sm:$0xff] %v337_v16 }
  0x67   : > { %340 = vst [vmem:[%s11659_s4 + $0x288] sm:$0xff] %v339_v17 }
  0x68   : > { %342 = vst [vmem:[%s11659_s4 + $0x290] sm:$0xff] %v341_v18 }
  0x69   : > { %344 = vst [vmem:[%s11659_s4 + $0x298] sm:$0xff] %v343_v19 }
  0x6a   : > { %346 = vst [vmem:[%s11659_s4 + $0x2a0] sm:$0xff] %v345_v20 }
  0x6b   : > { %348 = vst [vmem:[%s11659_s4 + $0x2a8] sm:$0xff] %v347_v21 }
  0x6c   : > { %350 = vst [vmem:[%s11659_s4 + $0x2b0] sm:$0xff] %v349_v22 }
  0x6d   : > { %352 = vst [vmem:[%s11659_s4 + $0x2b8] sm:$0xff] %v351_v23 }
  0x6e   : > { %354 = vst [vmem:[%s11659_s4 + $0x2c0] sm:$0xff] %v353_v24 }
  0x6f   : > { %356 = vst [vmem:[%s11659_s4 + $0x2c8] sm:$0xff] %v355_v25 }
  0x70   : > { %358 = vst [vmem:[%s11659_s4 + $0x2d0] sm:$0xff] %v357_v26 }
  0x71   : > { %360 = vst [vmem:[%s11659_s4 + $0x2d8] sm:$0xff] %v359_v27 }
  0x72   : > { %362 = vst [vmem:[%s11659_s4 + $0x2e0] sm:$0xff] %v361_v28 }
  0x73   : > { %364 = vst [vmem:[%s11659_s4 + $0x2e8] sm:$0xff] %v363_v29 }
  0x74   : > { %366 = vst [vmem:[%s11659_s4 + $0x2f0] sm:$0xff] %v365_v30 }
  0x75   : > { %368 = vst [vmem:[%s11659_s4 + $0x2f8] sm:$0xff] %v367_v31 }
  0x76   : > { %370 = vst [vmem:[%s11659_s4 + $0x300] sm:$0xff] %v369_v32 }
  0x77   : > { %372 = vst [vmem:[%s11659_s4 + $0x308] sm:$0xff] %v371_v33 }
  0x78   : > { %374 = vst [vmem:[%s11659_s4 + $0x310] sm:$0xff] %v373_v34 }
  0x79   : > { %376 = vst [vmem:[%s11659_s4 + $0x318] sm:$0xff] %v375_v35 }
  0x7a   : > { %378 = vst [vmem:[%s11659_s4 + $0x320] sm:$0xff] %v377_v36 }
  0x7b   : > { %380 = vst [vmem:[%s11659_s4 + $0x328] sm:$0xff] %v379_v37 }
  0x7c   : > { %382 = vst [vmem:[%s11659_s4 + $0x330] sm:$0xff] %v381_v38 }
  0x7d   : > { %384 = vst [vmem:[%s11659_s4 + $0x338] sm:$0xff] %v383_v39 }
  0x7e   : > { %386 = vst [vmem:[%s11659_s4 + $0x340] sm:$0xff] %v385_v40 }
  0x7f   : > { %388 = vst [vmem:[%s11659_s4 + $0x348] sm:$0xff] %v387_v41 }
  0x80   : > { %390 = vst [vmem:[%s11659_s4 + $0x350] sm:$0xff] %v389_v42 }
  0x81   : > { %392 = vst [vmem:[%s11659_s4 + $0x358] sm:$0xff] %v391_v43 }
  0x82   : > { %394 = vst [vmem:[%s11659_s4 + $0x360] sm:$0xff] %v393_v44 }
  0x83   : > { %396 = vst [vmem:[%s11659_s4 + $0x368] sm:$0xff] %v395_v45 }
  0x84   : > { %398 = vst [vmem:[%s11659_s4 + $0x370] sm:$0xff] %v397_v46 }
  0x85   : > { %400 = vst [vmem:[%s11659_s4 + $0x378] sm:$0xff] %v399_v47 }
  0x86   : > { %402 = vst [vmem:[%s11659_s4 + $0x380] sm:$0xff] %v401_v48 }
  0x87   : > { %404 = vst [vmem:[%s11659_s4 + $0x388] sm:$0xff] %v403_v49 }
  0x88   : > { %406 = vst [vmem:[%s11659_s4 + $0x390] sm:$0xff] %v405_v50 }
  0x89   : > { %408 = vst [vmem:[%s11659_s4 + $0x398] sm:$0xff] %v407_v51 }
  0x8a   : > { %410 = vst [vmem:[%s11659_s4 + $0x3a0] sm:$0xff] %v409_v52 }
  0x8b   : > { %412 = vst [vmem:[%s11659_s4 + $0x3a8] sm:$0xff] %v411_v53 }
  0x8c   : > { %414 = vst [vmem:[%s11659_s4 + $0x3b0] sm:$0xff] %v413_v54 }
  0x8d   : > { %416 = vst [vmem:[%s11659_s4 + $0x3b8] sm:$0xff] %v415_v55 }
  0x8e   : > { %418 = vst [vmem:[%s11659_s4 + $0x3c0] sm:$0xff] %v417_v56 }
  0x8f   : > { %420 = vst [vmem:[%s11659_s4 + $0x3c8] sm:$0xff] %v419_v57 }
  0x90   : > { %422 = vst [vmem:[%s11659_s4 + $0x3d0] sm:$0xff] %v421_v58 }
  0x91   : > { %424 = vst [vmem:[%s11659_s4 + $0x3d8] sm:$0xff] %v423_v59 }
  0x92   : > { %426 = vst [vmem:[%s11659_s4 + $0x3e0] sm:$0xff] %v425_v60 }
  0x93   : > { %428 = vst [vmem:[%s11659_s4 + $0x3e8] sm:$0xff] %v427_v61 }
  0x94   : > { %430 = vst [vmem:[%s11659_s4 + $0x3f0] sm:$0xff] %v429_v62 }
  0x95   : > { %432 = vst [vmem:[%s11659_s4 + $0x3f8] sm:$0xff] %v431_v63 }
  0x96 PF: > { %s439_s5 = sand.u32 1, %s11557_s14   ;;  %s10915_s6 = sshll.u32 %s11565_s16, 12 }
  0x97   : > { %s8607_s7 = sshll.u32 %s439_s5, 12  ;;  %s449_s10 = scalar_lea.hbm %s14383_s1, %s10915_s6 }
  0x98   : > { %s450_s11 = sshll.u32 %s449_s10, 4  ;;  %s443_s12 = scalar_lea.vmem [#allocation5], %s8607_s7  ;;  %s451_s11 = int_to_ptr.hbm [resolvable:$true] %s450_s11 }
  0x99   : > { %s452_s18 = sshll.u32 %s443_s12, 4  ;;  %s440_s20 = scalar_lea.sflag [#allocation6], %s439_s5  ;;  %s453_s18 = int_to_ptr.vmem [resolvable:$true] %s452_s18 }
  0x9a   : > { %s11571_s22 = smov 64   ;;  %s11572_s25 = smov 4  }
  0x9b   : > { %11428 = dma.hbm_to_vmem [thread:$0]  (%p11632_p3), %s451_s11, 65536, %s453_s18, %s440_s20, %s11571_s22, %s11571_s22, %s11572_s25  }
  0x9c PF: > { %p8610_p9 = scmp.ge.s32.totalorder %s11569_s17, 1  ;;  %p460_p10 = scmp.lt.s32.totalorder %s11569_s17, 5 }
  0x9e   : > { %p461_p11 = pnand %p8610_p9, %p460_p10 }
  0xa0   : > { %464 = sbr.rel (%p461_p11) target bundleno = 1645 (0x66d), region = 51 }
  0xa5   : > { %s467_s26 = sand.u32 1, %s11553_s13  }
  0xa6   : > { %s8611_s27 = sshll.u32 %s467_s26, 10  ;;  %s8612_s28 = sshll.u32 %s467_s26, 12 }
  0xa7   : > { %s11924_s29 = scalar_lea.vmem [#allocation4], %s8611_s27  ;;  %s474_s30 = scalar_lea.sflag [#allocation6], %s467_s26 }
  0xa8   : > { %s11926_s4 = scalar_lea.vmem [#allocation5], %s8612_s28 }
  0xa9   : > { %11544 = dma.done.wait (%p11639_p7), %s474_s30, 65536  }
  0xaa   : > { %11546 = vsyncadd (%p11639_p7), %s474_s30, 4294901760  ;;  %p8613_p12 = scmp.ne.s32.totalorder %s11561_s15, 0 }
  0xac   : > { %519 = sbr.rel (%p8613_p12) target bundleno = 180 (0xb4), region = 63 }
  0xb1   : > { %vm520_vm0 = vcmask 261120   ;;  %v11573_v0 = vmov 0.0  }
  0xb2   : > { %521 = vst.msk [vmem:[#allocation2] sm:$0xff] %vm520_vm0, %v11573_v0 }
  0xb3   : > { %522 = vst.msk [vmem:[#allocation2 + $0x8] sm:$0xff] %vm520_vm0, %v11573_v0 }
  0xb4 PF: > { %v10923_v1 = vld [vmem:[%s11926_s4 + $0x38] sm:$0xff]  ;;  %v10922_v5 = vld [vmem:[%s11926_s4 + $0x30] sm:$0xff]  ;;  %v10921_v9 = vld [vmem:[%s11926_s4 + $0x28] sm:$0xff]  ;;  %v14386_v26 = vmov 0.0   ;;  %p10902_p13 = scmp.ne.s32.totalorder %s11561_s15, 3 }
  0xb5   : > { %v10931_v2 = vld [vmem:[%s11926_s4 + $0x78] sm:$0xff]  ;;  %7490 = vmatpush.bf16.msra.mxu0 %v10923_v1  ;;  %v10930_v6 = vld [vmem:[%s11926_s4 + $0x70] sm:$0xff]  ;;  %v10929_v10 = vld [vmem:[%s11926_s4 + $0x68] sm:$0xff] }
  0xb6   : > { %v10939_v3 = vld [vmem:[%s11926_s4 + $0xb8] sm:$0xff]  ;;  %7504 = vmatpush.bf16.msra.mxu1 %v10931_v2  ;;  %v10938_v7 = vld [vmem:[%s11926_s4 + $0xb0] sm:$0xff]  ;;  %v10937_v11 = vld [vmem:[%s11926_s4 + $0xa8] sm:$0xff] }
  0xb7   : > { %v10947_v4 = vld [vmem:[%s11926_s4 + $0xf8] sm:$0xff]  ;;  %7518 = vmatpush.bf16.msra.mxu2 %v10939_v3  ;;  %v10946_v8 = vld [vmem:[%s11926_s4 + $0xf0] sm:$0xff]  ;;  %v10945_v12 = vld [vmem:[%s11926_s4 + $0xe8] sm:$0xff] }
  0xb8   : > { %7532 = vmatpush.bf16.msra.mxu3 %v10947_v4  ;;  %v10920_v13 = vld [vmem:[%s11926_s4 + $0x20] sm:$0xff]  ;;  %v10919_v17 = vld [vmem:[%s11926_s4 + $0x18] sm:$0xff]  ;;  %v10918_v22 = vld [vmem:[%s11926_s4 + $0x10] sm:$0xff] }
  0xb9   : > { %7491 = vmatpush.bf16.msra.mxu0 %v10922_v5  ;;  %v10928_v14 = vld [vmem:[%s11926_s4 + $0x60] sm:$0xff]  ;;  %v10927_v18 = vld [vmem:[%s11926_s4 + $0x58] sm:$0xff]  ;;  %v10926_v23 = vld [vmem:[%s11926_s4 + $0x50] sm:$0xff] }
  0xba   : > { %7505 = vmatpush.bf16.msra.mxu1 %v10930_v6  ;;  %v10936_v15 = vld [vmem:[%s11926_s4 + $0xa0] sm:$0xff]  ;;  %v10935_v19 = vld [vmem:[%s11926_s4 + $0x98] sm:$0xff]  ;;  %v10934_v24 = vld [vmem:[%s11926_s4 + $0x90] sm:$0xff] }
  0xbb   : > { %7519 = vmatpush.bf16.msra.mxu2 %v10938_v7  ;;  %v10944_v16 = vld [vmem:[%s11926_s4 + $0xe0] sm:$0xff]  ;;  %v10943_v20 = vld [vmem:[%s11926_s4 + $0xd8] sm:$0xff]  ;;  %v10942_v25 = vld [vmem:[%s11926_s4 + $0xd0] sm:$0xff] }
  0xbc   : > { %7533 = vmatpush.bf16.msra.mxu3 %v10946_v8  ;;  %v11954_v21 = vld [vmem:[%s11924_s29] sm:$0xff]  ;;  %v10917_v28 = vld [vmem:[%s11926_s4 + $0x8] sm:$0xff]  ;;  %v11968_v30 = vld [vmem:[%s11924_s29 + $0x10] sm:$0xff] }
  0xbd   : > { %7492 = vmatpush.bf16.msra.mxu0 %v10921_v9  ;;  %vm555_vm1 = vcmp.ge.f32.partialorder %v11954_v21, 1.0  ;;  %v10925_v29 = vld [vmem:[%s11926_s4 + $0x48] sm:$0xff]  ;;  %vm557_vm2 = vcmp.ge.f32.partialorder %v11968_v30, 1.0  ;;  %v10916_v33 = vld [vmem:[%s11926_s4] sm:$0xff]  ;;  %v10955_v37 = vld [vmem:[%s11926_s4 + $0x138] sm:$0xff] }
  0xbe   : > { %7506 = vmatpush.bf16.msra.mxu1 %v10929_v10  ;;  %v11962_v27 = vsel %vm555_vm1, 1.0, %v14386_v26  ;;  %v10933_v31 = vld [vmem:[%s11926_s4 + $0x88] sm:$0xff]  ;;  %v10924_v34 = vld [vmem:[%s11926_s4 + $0x40] sm:$0xff]  ;;  %v10963_v38 = vld [vmem:[%s11926_s4 + $0x178] sm:$0xff]  ;;  %v11982_v41 = vsel %vm557_vm2, 1.0, %v14386_v26 }
  0xbf   : > { %7520 = vmatpush.bf16.msra.mxu2 %v10937_v11  ;;  %619 = vst [vmem:[#allocation1] ss:$4 sm:$0xff] %v11962_v27  ;;  %v10941_v32 = vld [vmem:[%s11926_s4 + $0xc8] sm:$0xff]  ;;  %v10932_v35 = vld [vmem:[%s11926_s4 + $0x80] sm:$0xff]  ;;  %v10971_v39 = vld [vmem:[%s11926_s4 + $0x1b8] sm:$0xff] }
  0xc0   : > { %7534 = vmatpush.bf16.msra.mxu3 %v10945_v12  ;;  %v10940_v36 = vld [vmem:[%s11926_s4 + $0xc0] sm:$0xff]  ;;  %v10979_v40 = vld [vmem:[%s11926_s4 + $0x1f8] sm:$0xff]  ;;  %v10954_v46 = vld [vmem:[%s11926_s4 + $0x130] sm:$0xff] }
  0xc1   : > { %7493 = vmatpush.bf16.msra.mxu0 %v10920_v13  ;;  %v10962_v47 = vld [vmem:[%s11926_s4 + $0x170] sm:$0xff]  ;;  %v11987_v48 = vld [vmem:[%s11924_s29 + $0x20] sm:$0xff]  ;;  %v10953_v51 = vld [vmem:[%s11926_s4 + $0x128] sm:$0xff] }
  0xc2   : > { %7507 = vmatpush.bf16.msra.mxu1 %v10928_v14  ;;  %v10970_v49 = vld [vmem:[%s11926_s4 + $0x1b0] sm:$0xff]  ;;  %vm559_vm3 = vcmp.ge.f32.partialorder %v11987_v48, 1.0  ;;  %v10961_v52 = vld [vmem:[%s11926_s4 + $0x168] sm:$0xff]  ;;  %v10952_v55 = vld [vmem:[%s11926_s4 + $0x120] sm:$0xff] }
  0xc3   : > { %7521 = vmatpush.bf16.msra.mxu2 %v10936_v15  ;;  %v10978_v50 = vld [vmem:[%s11926_s4 + $0x1f0] sm:$0xff]  ;;  %v10969_v53 = vld [vmem:[%s11926_s4 + $0x1a8] sm:$0xff]  ;;  %v10960_v56 = vld [vmem:[%s11926_s4 + $0x160] sm:$0xff]  ;;  %v12000_v57 = vsel %vm559_vm3, 1.0, %v14386_v26 }
  0xc4   : > { %7535 = vmatpush.bf16.msra.mxu3 %v10944_v16  ;;  %v10977_v54 = vld [vmem:[%s11926_s4 + $0x1e8] sm:$0xff]  ;;  %v10968_v62 = vld [vmem:[%s11926_s4 + $0x1a0] sm:$0xff]  ;;  %v12005_v0 = vld [vmem:[%s11924_s29 + $0x30] sm:$0xff] }
  0xc5   : > { %7494 = vmatpush.bf16.msra.mxu0 %v10919_v17  ;;  %v10976_v63 = vld [vmem:[%s11926_s4 + $0x1e0] sm:$0xff]  ;;  %v10951_v1 = vld [vmem:[%s11926_s4 + $0x118] sm:$0xff]  ;;  %vm561_vm4 = vcmp.ge.f32.partialorder %v12005_v0, 1.0  ;;  %v10950_v5 = vld [vmem:[%s11926_s4 + $0x110] sm:$0xff] }
  0xc6   : > { %7508 = vmatpush.bf16.msra.mxu1 %v10927_v18  ;;  %v622_v42 = vld.sshfl [vmem:[#allocation1] sm:$0xff pattern:$0x73625140]  ;;  %v623_v43 = vld.sshfl [vmem:[#allocation1 + $0x8] sm:$0xff pattern:$0x73625140] }
  0xc7   : > { %7522 = vmatpush.bf16.msra.mxu2 %v10935_v19  ;;  %v624_v44 = vld.sshfl [vmem:[#allocation1 + $0x10] sm:$0xff pattern:$0x73625140]  ;;  %v625_v45 = vld.sshfl [vmem:[#allocation1 + $0x18] sm:$0xff pattern:$0x73625140] }
  0xc8   : > { %7536 = vmatpush.bf16.msra.mxu3 %v10943_v20  ;;  %630 = vst [vmem:[#allocation1] ss:$4 sm:$0xff] %v11982_v41  ;;  %v10959_v2 = vld [vmem:[%s11926_s4 + $0x158] sm:$0xff]  ;;  %v10958_v6 = vld [vmem:[%s11926_s4 + $0x150] sm:$0xff]  ;;  %v12018_v9 = vld [vmem:[%s11924_s29 + $0x40] sm:$0xff]  ;;  %v12021_v10 = vsel %vm561_vm4, 1.0, %v14386_v26 }
  0xc9   : > { %7495 = vmatpush.bf16.msra.mxu0 %v10918_v22  ;;  %764 = vst [vmem:[#allocation3 + $0x2b0] sm:$0x3] %v622_v42  ;;  %v10967_v3 = vld [vmem:[%s11926_s4 + $0x198] sm:$0xff]  ;;  %v10966_v7 = vld [vmem:[%s11926_s4 + $0x190] sm:$0xff]  ;;  %v10949_v15 = vld [vmem:[%s11926_s4 + $0x108] sm:$0xff]  ;;  %vm563_vm5 = vcmp.ge.f32.partialorder %v12018_v9, 1.0 }
  0xca   : > { %7509 = vmatpush.bf16.msra.mxu1 %v10926_v23  ;;  %765 = vst [vmem:[#allocation3 + $0x3b0] sm:$0x3] %v623_v43  ;;  %v10975_v4 = vld [vmem:[%s11926_s4 + $0x1d8] sm:$0xff]  ;;  %v10974_v8 = vld [vmem:[%s11926_s4 + $0x1d0] sm:$0xff]  ;;  %v10957_v16 = vld [vmem:[%s11926_s4 + $0x148] sm:$0xff] }
  0xcb   : > { %7523 = vmatpush.bf16.msra.mxu2 %v10934_v24  ;;  %766 = vst [vmem:[#allocation3 + $0xd8] sm:$0x3] %v624_v44  ;;  %v10965_v17 = vld [vmem:[%s11926_s4 + $0x188] sm:$0xff]  ;;  %v533_v19 = vld [vmem:[%s11924_s29 + $0x50] sm:$0xff]  ;;  %v535_v20 = vld [vmem:[%s11924_s29 + $0x60] sm:$0xff]  ;;  %v8622_v24 = vsel %vm563_vm5, 1.0, %v14386_v26 }
  0xcc   : > { %7537 = vmatpush.bf16.msra.mxu3 %v10942_v25  ;;  %767 = vst [vmem:[#allocation3 + $0x18] sm:$0x3] %v625_v45  ;;  %v10973_v18 = vld [vmem:[%s11926_s4 + $0x1c8] sm:$0xff]  ;;  %v537_v22 = vld [vmem:[%s11924_s29 + $0x70] sm:$0xff]  ;;  %v10948_v23 = vld [vmem:[%s11926_s4 + $0x100] sm:$0xff]  ;;  %v828_v25 = vsub.f32 1.0, %v11962_v27 }
  0xcd   : > { %7496 = vmatpush.bf16.msra.mxu0 %v10917_v28  ;;  %v10956_v28 = vld [vmem:[%s11926_s4 + $0x140] sm:$0xff]  ;;  %vm565_vm6 = vcmp.ge.f32.partialorder %v533_v19, 1.0  ;;  %vm567_vm7 = vcmp.ge.f32.partialorder %v535_v20, 1.0  ;;  %vm569_vm8 = vcmp.ge.f32.partialorder %v537_v22, 1.0  ;;  %v836_v42 = vsub.f32 1.0, %v8622_v24 }
  0xce   : > { %7510 = vmatpush.bf16.msra.mxu1 %v10925_v29  ;;  %v10964_v29 = vld [vmem:[%s11926_s4 + $0x180] sm:$0xff]  ;;  %v8624_v27 = vsel %vm565_vm6, 1.0, %v14386_v26 }
  0xcf   : > { %7524 = vmatpush.bf16.msra.mxu2 %v10933_v31  ;;  %v632_v58 = vld.sshfl [vmem:[#allocation1] sm:$0xff pattern:$0x73625140]  ;;  %v633_v59 = vld.sshfl [vmem:[#allocation1 + $0x8] sm:$0xff pattern:$0x73625140] }
  0xd0   : > { %7538 = vmatpush.bf16.msra.mxu3 %v10941_v32  ;;  %v634_v60 = vld.sshfl [vmem:[#allocation1 + $0x10] sm:$0xff pattern:$0x73625140]  ;;  %v635_v61 = vld.sshfl [vmem:[#allocation1 + $0x18] sm:$0xff pattern:$0x73625140] }
  0xd1   : > { %7497 = vmatpush.bf16.msra.mxu0 %v10916_v33  ;;  %640 = vst [vmem:[#allocation1] ss:$4 sm:$0xff] %v12000_v57  ;;  %v10972_v31 = vld [vmem:[%s11926_s4 + $0x1c0] sm:$0xff]  ;;  %v838_v43 = vsub.f32 1.0, %v8624_v27 }
  0xd2   : > { %7511 = vmatpush.bf16.msra.mxu1 %v10924_v34  ;;  %772 = vst [vmem:[#allocation3 + $0x380] sm:$0x3] %v632_v58  ;;  %v844_v34 = vmul.f32 %v828_v25, %v11954_v21  ;;  %v830_v21 = vsub.f32 1.0, %v11982_v41 }
  0xd3   : > { %7525 = vmatpush.bf16.msra.mxu2 %v10932_v35  ;;  %773 = vst [vmem:[#allocation3 + $0x110] sm:$0x3] %v633_v59  ;;  %v12058_v41 = vmul.f32 %v838_v43, %v533_v19  ;;  %v8634_v19 = vld [vmem:[%s11924_s29 + $0xa0] sm:$0xff] }
  0xd4   : > { %7539 = vmatpush.bf16.msra.mxu3 %v10940_v36  ;;  %774 = vst [vmem:[#allocation3 + $0x118] sm:$0x3] %v634_v60 }
  0xd5   : > { %7546 = vmatpush.bf16.msrb.mxu0 %v10955_v37  ;;  %775 = vst [vmem:[#allocation3 + $0x98] sm:$0x3] %v635_v61  ;;  %v8626_v37 = vsel %vm567_vm7, 1.0, %v14386_v26  ;;  %v12073_v61 = vld [vmem:[%s11924_s29 + $0x18] sm:$0xff] }
  0xd6   : > { %7560 = vmatpush.bf16.msrb.mxu1 %v10963_v38  ;;  %v8628_v38 = vsel %vm569_vm8, 1.0, %v14386_v26  ;;  %v840_v44 = vsub.f32 1.0, %v8626_v37  ;;  %vm558_vm10 = vcmp.ge.f32.partialorder %v12073_v61, 1.0 }
  0xd7   : > { %7574 = vmatpush.bf16.msrb.mxu2 %v10971_v39  ;;  %v832_v39 = vsub.f32 1.0, %v12000_v57  ;;  %v842_v45 = vsub.f32 1.0, %v8628_v38 }
  0xd8   : > { %7588 = vmatpush.bf16.msrb.mxu3 %v10979_v40  ;;  %v642_v11 = vld.sshfl [vmem:[#allocation1] sm:$0xff pattern:$0x73625140]  ;;  %v643_v12 = vld.sshfl [vmem:[#allocation1 + $0x8] sm:$0xff pattern:$0x73625140] }
  0xd9   : > { %7547 = vmatpush.bf16.msrb.mxu0 %v10954_v46  ;;  %v644_v13 = vld.sshfl [vmem:[#allocation1 + $0x10] sm:$0xff pattern:$0x73625140]  ;;  %v645_v14 = vld.sshfl [vmem:[#allocation1 + $0x18] sm:$0xff pattern:$0x73625140]  ;;  %v846_v46 = vmul.f32 %v830_v21, %v11968_v30 }
  0xda   : > { %7561 = vmatpush.bf16.msrb.mxu1 %v10962_v47  ;;  %650 = vst [vmem:[#allocation1] ss:$4 sm:$0xff] %v12021_v10  ;;  %v834_v40 = vsub.f32 1.0, %v12021_v10  ;;  %v12050_v47 = vmul.f32 %v832_v39, %v11987_v48  ;;  %v12065_v48 = vld [vmem:[%s11924_s29 + $0x8] sm:$0xff] }
  0xdb   : > { %7575 = vmatpush.bf16.msrb.mxu2 %v10970_v49  ;;  %780 = vst [vmem:[#allocation3 + $0x2e0] sm:$0x3] %v642_v11  ;;  %vm556_vm9 = vcmp.ge.f32.partialorder %v12065_v48, 1.0  ;;  %v12089_v11 = vld [vmem:[%s11924_s29 + $0x28] sm:$0xff] }
  0xdc   : > { %7589 = vmatpush.bf16.msrb.mxu3 %v10978_v50  ;;  %781 = vst [vmem:[#allocation3 + $0x388] sm:$0x3] %v643_v12  ;;  %v12053_v49 = vmul.f32 %v834_v40, %v12005_v0  ;;  %v12056_v50 = vmul.f32 %v836_v42, %v12018_v9  ;;  %v8632_v9 = vld [vmem:[%s11924_s29 + $0x90] sm:$0xff]  ;;  %vm560_vm12 = vcmp.ge.f32.partialorder %v12089_v11, 1.0 }
  0xdd   : > { %7548 = vmatpush.bf16.msrb.mxu0 %v10953_v51  ;;  %782 = vst [vmem:[#allocation3 + $0x338] sm:$0x3] %v644_v13  ;;  %v12060_v51 = vmul.f32 %v840_v44, %v535_v20 }
  0xde   : > { %7562 = vmatpush.bf16.msrb.mxu1 %v10961_v52  ;;  %783 = vst [vmem:[#allocation3 + $0x340] sm:$0x3] %v645_v14  ;;  %v12062_v52 = vmul.f32 %v842_v45, %v537_v22  ;;  %v12091_v14 = vadd.f32 %v8632_v9, %v846_v46  ;;  %v8638_v45 = vld [vmem:[%s11924_s29 + $0xc0] sm:$0xff] }
  0xdf   : > { %7576 = vmatpush.bf16.msrb.mxu2 %v10969_v53 }
  0xe0   : > { %7590 = vmatpush.bf16.msrb.mxu3 %v10977_v54  ;;  %vm895_vm13 = vcmp.ge.f32.partialorder %v12091_v14, 1.0 }
  0xe1   : > { %7549 = vmatpush.bf16.msrb.mxu0 %v10952_v55  ;;  %v652_v32 = vld.sshfl [vmem:[#allocation1] sm:$0xff pattern:$0x73625140]  ;;  %v653_v33 = vld.sshfl [vmem:[#allocation1 + $0x8] sm:$0xff pattern:$0x73625140] }
  0xe2   : > { %7563 = vmatpush.bf16.msrb.mxu1 %v10960_v56  ;;  %v654_v35 = vld.sshfl [vmem:[#allocation1 + $0x10] sm:$0xff pattern:$0x73625140]  ;;  %v655_v36 = vld.sshfl [vmem:[#allocation1 + $0x18] sm:$0xff pattern:$0x73625140] }
  0xe3   : > { %7577 = vmatpush.bf16.msrb.mxu2 %v10968_v62  ;;  %660 = vst [vmem:[#allocation1] ss:$4 sm:$0xff] %v8622_v24  ;;  %v12069_v56 = vsel %vm556_vm9, 1.0, %v14386_v26  ;;  %v12103_v24 = vsel %vm895_vm13, 1.0, %v14386_v26 }
  0xe4   : > { %7591 = vmatpush.bf16.msrb.mxu3 %v10976_v63  ;;  %788 = vst [vmem:[#allocation3 + $0x3e8] sm:$0x3] %v652_v32  ;;  %v8630_v63 = vld [vmem:[%s11924_s29 + $0x80] sm:$0xff] }
  0xe5   : > { %7550 = vmatpush.bf16.msrb.mxu0 %v10951_v1  ;;  %789 = vst [vmem:[#allocation3 + $0x2f8] sm:$0x3] %v653_v33  ;;  %v12112_v33 = vld [vmem:[%s11924_s29 + $0x38] sm:$0xff] }
  0xe6   : > { %7564 = vmatpush.bf16.msrb.mxu1 %v10959_v2  ;;  %790 = vst [vmem:[#allocation3 + $0x290] sm:$0x3] %v654_v35  ;;  %vm562_vm15 = vcmp.ge.f32.partialorder %v12112_v33, 1.0 }
  0xe7   : > { %7578 = vmatpush.bf16.msrb.mxu2 %v10967_v3  ;;  %791 = vst [vmem:[#allocation3 + $0x28] sm:$0x3] %v655_v36  ;;  %v12130_v43 = vsel %vm562_vm15, 1.0, %v14386_v26 }
  0xe8   : > { %7592 = vmatpush.bf16.msrb.mxu3 %v10975_v4  ;;  %621 = vst [vmem:[#allocation1 + $0x20] ss:$4 sm:$0xff] %v12069_v56 }
  0xe9   : > { %7551 = vmatpush.bf16.msrb.mxu0 %v10950_v5  ;;  %v12077_v5 = vadd.f32 %v8630_v63, %v844_v34  ;;  %v8636_v34 = vld [vmem:[%s11924_s29 + $0xb0] sm:$0xff] }
  0xea   : > { %7565 = vmatpush.bf16.msrb.mxu1 %v10958_v6  ;;  %v662_v53 = vld.sshfl [vmem:[#allocation1] sm:$0xff pattern:$0x73625140]  ;;  %v663_v54 = vld.sshfl [vmem:[#allocation1 + $0x8] sm:$0xff pattern:$0x73625140] }
  0xeb   : > { %7579 = vmatpush.bf16.msrb.mxu2 %v10966_v7  ;;  %v664_v30 = vld.sshfl [vmem:[#allocation1 + $0x10] sm:$0xff pattern:$0x73625140]  ;;  %v665_v55 = vld.sshfl [vmem:[#allocation1 + $0x18] sm:$0xff pattern:$0x73625140] }
  0xec   : > { %7593 = vmatpush.bf16.msrb.mxu3 %v10974_v8  ;;  %670 = vst [vmem:[#allocation1] ss:$4 sm:$0xff] %v8624_v27  ;;  %v12080_v7 = vsel %vm558_vm10, 1.0, %v14386_v26  ;;  %vm893_vm11 = vcmp.ge.f32.partialorder %v12077_v5, 1.0 }
  0xed   : > { %7552 = vmatpush.bf16.msrb.mxu0 %v10949_v15  ;;  %796 = vst [vmem:[#allocation3 + $0x100] sm:$0x3] %v662_v53  ;;  %v12086_v10 = vsel %vm893_vm11, 1.0, %v14386_v26  ;;  %v12141_v53 = vadd.f32 %v8638_v45, %v12056_v50 }
  0xee   : > { %7566 = vmatpush.bf16.msrb.mxu1 %v10957_v16  ;;  %797 = vst [vmem:[#allocation3 + $0x3c0] sm:$0x3] %v663_v54 }
  0xef   : > { %7580 = vmatpush.bf16.msrb.mxu2 %v10965_v17  ;;  %798 = vst [vmem:[#allocation3 + $0x158] sm:$0x3] %v664_v30  ;;  %v626_v62 = vld.sshfl [vmem:[#allocation1 + $0x20] sm:$0xff pattern:$0x73625140]  ;;  %v12097_v17 = vsel %vm560_vm12, 1.0, %v14386_v26 }
  0xf0   : > { %7594 = vmatpush.bf16.msrb.mxu3 %v10973_v18  ;;  %799 = vst [vmem:[#allocation3 + $0x3e0] sm:$0x3] %v665_v55  ;;  %v627_v0 = vld.sshfl [vmem:[#allocation1 + $0x28] sm:$0xff pattern:$0x73625140]  ;;  %vm901_vm1 = vcmp.ge.f32.partialorder %v12141_v53, 1.0 }
  0xf1   : > { %7553 = vmatpush.bf16.msrb.mxu0 %v10948_v23  ;;  %768 = vst [vmem:[#allocation3 + $0x50] sm:$0x3] %v626_v62  ;;  %v628_v6 = vld.sshfl [vmem:[#allocation1 + $0x30] sm:$0xff pattern:$0x73625140]  ;;  %v8640_v55 = vld [vmem:[%s11924_s29 + $0xd0] sm:$0xff] }
  0xf2   : > { %7567 = vmatpush.bf16.msrb.mxu1 %v10956_v28  ;;  %769 = vst [vmem:[#allocation3 + $0x368] sm:$0x3] %v627_v0  ;;  %v629_v8 = vld.sshfl [vmem:[#allocation1 + $0x38] sm:$0xff pattern:$0x73625140]  ;;  %v12152_v62 = vadd.f32 %v8640_v55, %v12058_v41 }
  0xf3   : > { %7581 = vmatpush.bf16.msrb.mxu2 %v10964_v29  ;;  %v672_v57 = vld.sshfl [vmem:[#allocation1] sm:$0xff pattern:$0x73625140]  ;;  %v673_v58 = vld.sshfl [vmem:[#allocation1 + $0x8] sm:$0xff pattern:$0x73625140]  ;;  %v12107_v29 = vadd.f32 %v8634_v19, %v12050_v47 }
  0xf4   : > { %7595 = vmatpush.bf16.msrb.mxu3 %v10972_v31  ;;  %v674_v59 = vld.sshfl [vmem:[#allocation1 + $0x10] sm:$0xff pattern:$0x73625140]  ;;  %v675_v60 = vld.sshfl [vmem:[#allocation1 + $0x18] sm:$0xff pattern:$0x73625140] }
  0xf5   : > { %680 = vst [vmem:[#allocation1] ss:$4 sm:$0xff] %v8626_v37  ;;  %vm897_vm14 = vcmp.ge.f32.partialorder %v12107_v29, 1.0  ;;  %v12120_v37 = vadd.f32 %v8636_v34, %v12053_v49  ;;  %vm903_vm2 = vcmp.ge.f32.partialorder %v12152_v62, 1.0 }
  0xf6   : > { %804 = vst [vmem:[#allocation3 + $0x2a0] sm:$0x3] %v672_v57  ;;  %v12116_v35 = vsel %vm897_vm14, 1.0, %v14386_v26  ;;  %v1167_v57 = vsub.f32 1.0, %v12086_v10 }
  0xf7   : > { %805 = vst [vmem:[#allocation3 + $0x3f0] sm:$0x3] %v673_v58  ;;  %vm899_vm0 = vcmp.ge.f32.partialorder %v12120_v37, 1.0  ;;  %v12148_v58 = vsel %vm901_vm1, 1.0, %v14386_v26 }
  0xf8   : > { %806 = vst [vmem:[#allocation3 + $0xa0] sm:$0x3] %v674_v59  ;;  %v12138_v46 = vsel %vm899_vm0, 1.0, %v14386_v26 }
  0xf9   : > { %807 = vst [vmem:[#allocation3 + $0x2c0] sm:$0x3] %v675_v60  ;;  %v1183_v60 = vmul.f32 %v1167_v57, %v12077_v5  ;;  %v8664_v57 = vld [vmem:[%s11924_s29 + $0x110] sm:$0xff] }
  0xfa   : > { %631 = vst [vmem:[#allocation1 + $0x20] ss:$4 sm:$0xff] %v12080_v7 }
  0xfb   : > { %770 = vst [vmem:[#allocation3 + $0x330] sm:$0x3] %v628_v6 }
  0xfc   : > { %v682_v1 = vld.sshfl [vmem:[#allocation1] sm:$0xff pattern:$0x73625140]  ;;  %v683_v2 = vld.sshfl [vmem:[#allocation1 + $0x8] sm:$0xff pattern:$0x73625140] }
  0xfd   : > { %v684_v3 = vld.sshfl [vmem:[#allocation1 + $0x10] sm:$0xff pattern:$0x73625140]  ;;  %v685_v4 = vld.sshfl [vmem:[#allocation1 + $0x18] sm:$0xff pattern:$0x73625140] }
  0xfe   : > { %690 = vst [vmem:[#allocation1] ss:$4 sm:$0xff] %v8628_v38 }
  0xff   : > { %812 = vst [vmem:[#allocation3 + $0x230] sm:$0x3] %v682_v1  ;;  %v12157_v1 = vld [vmem:[%s11924_s29 + $0x48] sm:$0xff] }
 0x100   : > { %813 = vst [vmem:[#allocation3 + $0x240] sm:$0x3] %v683_v2  ;;  %v8642_v2 = vld [vmem:[%s11924_s29 + $0xe0] sm:$0xff]  ;;  %vm564_vm3 = vcmp.ge.f32.partialorder %v12157_v1, 1.0 }
 0x101   : > { %814 = vst [vmem:[#allocation3 + $0x90] sm:$0x3] %v684_v3  ;;  %v636_v18 = vld.sshfl [vmem:[#allocation1 + $0x20] sm:$0xff pattern:$0x73625140]  ;;  %v12161_v3 = vsel %vm903_vm2, 1.0, %v14386_v26  ;;  %v12165_v5 = vadd.f32 %v8642_v2, %v12060_v51 }
 0x102   : > { %815 = vst [vmem:[#allocation3 + $0x3a0] sm:$0x3] %v685_v4  ;;  %v637_v20 = vld.sshfl [vmem:[#allocation1 + $0x28] sm:$0xff pattern:$0x73625140] }
 0x103   : > { %v638_v22 = vld.sshfl [vmem:[#allocation1 + $0x30] sm:$0xff pattern:$0x73625140]  ;;  %v12100_v23 = vld.sshfl [vmem:[#allocation1 + $0x38] sm:$0xff pattern:$0x73625140] }
 0x104   : > { %641 = vst [vmem:[#allocation1 + $0x20] ss:$4 sm:$0xff] %v12097_v17  ;;  %vm905_vm4 = vcmp.ge.f32.partialorder %v12165_v5, 1.0  ;;  %v8644_v51 = vld [vmem:[%s11924_s29 + $0xf0] sm:$0xff] }
 0x105   : > { %v692_v12 = vld.sshfl [vmem:[#allocation1] sm:$0xff pattern:$0x73625140]  ;;  %v693_v13 = vld.sshfl [vmem:[#allocation1 + $0x8] sm:$0xff pattern:$0x73625140]  ;;  %v12190_v19 = vadd.f32 %v8644_v51, %v12062_v52 }
 0x106   : > { %v694_v15 = vld.sshfl [vmem:[#allocation1 + $0x10] sm:$0xff pattern:$0x73625140]  ;;  %v695_v16 = vld.sshfl [vmem:[#allocation1 + $0x18] sm:$0xff pattern:$0x73625140] }
 0x107   : > { %958 = vst [vmem:[#allocation1 + $0x1] ss:$4 sm:$0xff] %v12086_v10  ;;  %vm907_vm6 = vcmp.ge.f32.partialorder %v12190_v19, 1.0  ;;  %v8662_v52 = vld [vmem:[%s11924_s29 + $0x100] sm:$0xff] }
 0x108   : > { %820 = vst [vmem:[#allocation3 + $0x358] sm:$0x3] %v692_v12  ;;  %v8666_v51 = vld [vmem:[%s11924_s29 + $0x120] sm:$0xff] }
 0x109   : > { %821 = vst [vmem:[#allocation3 + $0x268] sm:$0x3] %v693_v13  ;;  %v12175_v13 = vsel %vm564_vm3, 1.0, %v14386_v26 }
 0x10a   : > { %822 = vst [vmem:[#allocation3 + $0x350] sm:$0x3] %v694_v15 }
 0x10b   : > { %823 = vst [vmem:[#allocation3 + $0x188] sm:$0x3] %v695_v16  ;;  %v12123_v39 = vld.sshfl [vmem:[#allocation1 + $0x20] sm:$0xff pattern:$0x73625140]  ;;  %v12183_v16 = vsel %vm905_vm4, 1.0, %v14386_v26 }
 0x10c   : > { %771 = vst [vmem:[#allocation3 + $0x48] sm:$0x3] %v629_v8  ;;  %v12125_v40 = vld.sshfl [vmem:[#allocation1 + $0x28] sm:$0xff pattern:$0x73625140] }
 0x10d   : > { %v12127_v42 = vld.sshfl [vmem:[#allocation1 + $0x30] sm:$0xff pattern:$0x73625140]  ;;  %v12132_v44 = vld.sshfl [vmem:[#allocation1 + $0x38] sm:$0xff pattern:$0x73625140] }
 0x10e   : > { %v961_v25 = vld.sshfl [vmem:[#allocation1] sm:$0xff pattern:$0x73625140]  ;;  %v962_v28 = vld.sshfl [vmem:[#allocation1 + $0x8] sm:$0xff pattern:$0x73625140] }
 0x10f   : > { %v963_v31 = vld.sshfl [vmem:[#allocation1 + $0x10] sm:$0xff pattern:$0x73625140]  ;;  %v964_v32 = vld.sshfl [vmem:[#allocation1 + $0x18] sm:$0xff pattern:$0x73625140] }
 0x110   : > { %969 = vst [vmem:[#allocation1 + $0x1] ss:$4 sm:$0xff] %v12103_v24 }
 0x111   : > { %1103 = vst [vmem:[#allocation3 + $0x2b0] sm:$0xc] %v961_v25 }
 0x112   : > { %1104 = vst [vmem:[#allocation3 + $0x3b0] sm:$0xc] %v962_v28 }
 0x113   : > { %1105 = vst [vmem:[#allocation3 + $0xd8] sm:$0xc] %v963_v31 }
 0x114   : > { %1106 = vst [vmem:[#allocation3 + $0x18] sm:$0xc] %v964_v32 }
 0x115   : > { %651 = vst [vmem:[#allocation1 + $0x20] ss:$4 sm:$0xff] %v12130_v43 }
 0x116   : > { %776 = vst [vmem:[#allocation3 + $0x320] sm:$0x3] %v636_v18  ;;  %v12186_v18 = vld [vmem:[%s11924_s29 + $0x58] sm:$0xff] }
 0x117   : > { %v971_v36 = vld.sshfl [vmem:[#allocation1] sm:$0xff pattern:$0x73625140]  ;;  %v972_v27 = vld.sshfl [vmem:[#allocation1 + $0x8] sm:$0xff pattern:$0x73625140] }
 0x118   : > { %v973_v38 = vld.sshfl [vmem:[#allocation1 + $0x10] sm:$0xff pattern:$0x73625140]  ;;  %v974_v21 = vld.sshfl [vmem:[#allocation1 + $0x18] sm:$0xff pattern:$0x73625140] }
 0x119   : > { %979 = vst [vmem:[#allocation1 + $0x1] ss:$4 sm:$0xff] %v12116_v35  ;;  %vm566_vm5 = vcmp.ge.f32.partialorder %v12186_v18, 1.0 }
 0x11a   : > { %1111 = vst [vmem:[#allocation3 + $0x380] sm:$0xc] %v971_v36  ;;  %v12196_v31 = vsel %vm566_vm5, 1.0, %v14386_v26 }
 0x11b   : > { %1112 = vst [vmem:[#allocation3 + $0x110] sm:$0xc] %v972_v27  ;;  %v12208_v27 = vsel %vm907_vm6, 1.0, %v14386_v26 }
 0x11c   : > { %1113 = vst [vmem:[#allocation3 + $0x118] sm:$0xc] %v973_v38  ;;  %v12168_v9 = vld.sshfl [vmem:[#allocation1 + $0x20] sm:$0xff pattern:$0x73625140] }
 0x11d   : > { %1114 = vst [vmem:[#allocation3 + $0x98] sm:$0xc] %v974_v21  ;;  %v12170_v10 = vld.sshfl [vmem:[#allocation1 + $0x28] sm:$0xff pattern:$0x73625140] }
 0x11e   : > { %777 = vst [vmem:[#allocation3 + $0x150] sm:$0x3] %v637_v20  ;;  %v12172_v12 = vld.sshfl [vmem:[#allocation1 + $0x30] sm:$0xff pattern:$0x73625140] }
 0x11f   : > { %778 = vst [vmem:[#allocation3 + $0x108] sm:$0x3] %v638_v22  ;;  %v12177_v15 = vld.sshfl [vmem:[#allocation1 + $0x38] sm:$0xff pattern:$0x73625140] }
 0x120   : > { %v981_v47 = vld.sshfl [vmem:[#allocation1] sm:$0xff pattern:$0x73625140]  ;;  %v982_v49 = vld.sshfl [vmem:[#allocation1 + $0x8] sm:$0xff pattern:$0x73625140] }
 0x121   : > { %v983_v54 = vld.sshfl [vmem:[#allocation1 + $0x10] sm:$0xff pattern:$0x73625140]  ;;  %v984_v30 = vld.sshfl [vmem:[#allocation1 + $0x18] sm:$0xff pattern:$0x73625140] }
 0x122   : > { %989 = vst [vmem:[#allocation1 + $0x1] ss:$4 sm:$0xff] %v12138_v46 }
 0x123   : > { %1119 = vst [vmem:[#allocation3 + $0x2e0] sm:$0xc] %v981_v47 }
 0x124   : > { %1120 = vst [vmem:[#allocation3 + $0x388] sm:$0xc] %v982_v49  ;;  %v12211_v49 = vadd.f32 %v8662_v52, %v1183_v60 }
 0x125   : > { %1121 = vst [vmem:[#allocation3 + $0x338] sm:$0xc] %v983_v54  ;;  %v1169_v54 = vsub.f32 1.0, %v12103_v24 }
 0x126   : > { %1122 = vst [vmem:[#allocation3 + $0x340] sm:$0xc] %v984_v30  ;;  %vm1232_vm7 = vcmp.ge.f32.partialorder %v12211_v49, 1.0  ;;  %v12217_v30 = vld [vmem:[%s11924_s29 + $0x68] sm:$0xff] }
 0x127   : > { %661 = vst [vmem:[#allocation1 + $0x20] ss:$4 sm:$0xff] %v12175_v13  ;;  %v1185_v55 = vmul.f32 %v1169_v54, %v12091_v14  ;;  %vm568_vm8 = vcmp.ge.f32.partialorder %v12217_v30, 1.0  ;;  %v8668_v54 = vld [vmem:[%s11924_s29 + $0x130] sm:$0xff] }
 0x128   : > { %779 = vst [vmem:[#allocation3 + $0x60] sm:$0x3] %v12100_v23 }
 0x129   : > { %v991_v50 = vld.sshfl [vmem:[#allocation1] sm:$0xff pattern:$0x73625140]  ;;  %v992_v59 = vld.sshfl [vmem:[#allocation1 + $0x8] sm:$0xff pattern:$0x73625140]  ;;  %v12227_v2 = vadd.f32 %v8664_v57, %v1185_v55 }
 0x12a   : > { %v993_v63 = vld.sshfl [vmem:[#allocation1 + $0x10] sm:$0xff pattern:$0x73625140]  ;;  %v994_v0 = vld.sshfl [vmem:[#allocation1 + $0x18] sm:$0xff pattern:$0x73625140] }
 0x12b   : > { %999 = vst [vmem:[#allocation1 + $0x1] ss:$4 sm:$0xff] %v12148_v58  ;;  %vm1234_vm9 = vcmp.ge.f32.partialorder %v12227_v2, 1.0 }
 0x12c   : > { %1127 = vst [vmem:[#allocation3 + $0x3e8] sm:$0xc] %v991_v50  ;;  %v1171_v50 = vsub.f32 1.0, %v12116_v35 }
 0x12d   : > { %1128 = vst [vmem:[#allocation3 + $0x2f8] sm:$0xc] %v992_v59  ;;  %v12223_v59 = vsel %vm1232_vm7, 1.0, %v14386_v26 }
 0x12e   : > { %1129 = vst [vmem:[#allocation3 + $0x290] sm:$0xc] %v993_v63  ;;  %v12198_v23 = vld.sshfl [vmem:[#allocation1 + $0x20] sm:$0xff pattern:$0x73625140] }
 0x12f   : > { %1130 = vst [vmem:[#allocation3 + $0x28] sm:$0xc] %v994_v0  ;;  %v12201_v32 = vld.sshfl [vmem:[#allocation1 + $0x28] sm:$0xff pattern:$0x73625140] }
 0x130   : > { %v12203_v34 = vld.sshfl [vmem:[#allocation1 + $0x30] sm:$0xff pattern:$0x73625140]  ;;  %v12205_v36 = vld.sshfl [vmem:[#allocation1 + $0x38] sm:$0xff pattern:$0x73625140] }
 0x131   : > { %671 = vst [vmem:[#allocation1 + $0x20] ss:$4 sm:$0xff] %v12196_v31 }
 0x132   : > { %v1001_v41 = vld.sshfl [vmem:[#allocation1] sm:$0xff pattern:$0x73625140]  ;;  %v1002_v4 = vld.sshfl [vmem:[#allocation1 + $0x8] sm:$0xff pattern:$0x73625140] }
 0x133   : > { %v1003_v6 = vld.sshfl [vmem:[#allocation1 + $0x10] sm:$0xff pattern:$0x73625140]  ;;  %v1004_v8 = vld.sshfl [vmem:[#allocation1 + $0x18] sm:$0xff pattern:$0x73625140] }
 0x134   : > { %1009 = vst [vmem:[#allocation1 + $0x1] ss:$4 sm:$0xff] %v12161_v3 }
 0x135   : > { %1135 = vst [vmem:[#allocation3 + $0x100] sm:$0xc] %v1001_v41 }
 0x136   : > { %1136 = vst [vmem:[#allocation3 + $0x3c0] sm:$0xc] %v1002_v4 }
 0x137   : > { %1137 = vst [vmem:[#allocation3 + $0x158] sm:$0xc] %v1003_v6  ;;  %v1187_v6 = vmul.f32 %v1171_v50, %v12107_v29 }
 0x138   : > { %1138 = vst [vmem:[#allocation3 + $0x3e0] sm:$0xc] %v1004_v8  ;;  %v12230_v14 = vld.sshfl [vmem:[#allocation1 + $0x20] sm:$0xff pattern:$0x73625140]  ;;  %v12244_v8 = vld [vmem:[%s11924_s29 + $0x78] sm:$0xff] }
 0x139   : > { %784 = vst [vmem:[#allocation3 + $0x80] sm:$0x3] %v12123_v39  ;;  %v12232_v35 = vld.sshfl [vmem:[#allocation1 + $0x28] sm:$0xff pattern:$0x73625140]  ;;  %v12237_v39 = vsel %vm568_vm8, 1.0, %v14386_v26 }
 0x13a   : > { %v12234_v41 = vld.sshfl [vmem:[#allocation1 + $0x30] sm:$0xff pattern:$0x73625140]  ;;  %v12239_v4 = vld.sshfl [vmem:[#allocation1 + $0x38] sm:$0xff pattern:$0x73625140] }
 0x13b   : > { %v1011_v20 = vld.sshfl [vmem:[#allocation1] sm:$0xff pattern:$0x73625140]  ;;  %v1012_v22 = vld.sshfl [vmem:[#allocation1 + $0x8] sm:$0xff pattern:$0x73625140] }
 0x13c   : > { %v1013_v25 = vld.sshfl [vmem:[#allocation1 + $0x10] sm:$0xff pattern:$0x73625140]  ;;  %v1014_v28 = vld.sshfl [vmem:[#allocation1 + $0x18] sm:$0xff pattern:$0x73625140] }
 0x13d   : > { %1019 = vst [vmem:[#allocation1 + $0x1] ss:$4 sm:$0xff] %v12183_v16  ;;  %vm570_vm10 = vcmp.ge.f32.partialorder %v12244_v8, 1.0 }
 0x13e   : > { %1143 = vst [vmem:[#allocation3 + $0x2a0] sm:$0xc] %v1011_v20  ;;  %v12249_v20 = vsel %vm1234_vm9, 1.0, %v14386_v26 }
 0x13f   : > { %1144 = vst [vmem:[#allocation3 + $0x3f0] sm:$0xc] %v1012_v22  ;;  %v12253_v22 = vadd.f32 %v8666_v51, %v1187_v6  ;;  %v1175_v51 = vsub.f32 1.0, %v12148_v58 }
 0x140   : > { %1145 = vst [vmem:[#allocation3 + $0xa0] sm:$0xc] %v1013_v25 }
 0x141   : > { %1146 = vst [vmem:[#allocation3 + $0x2c0] sm:$0xc] %v1014_v28  ;;  %vm1236_vm11 = vcmp.ge.f32.partialorder %v12253_v22, 1.0 }
 0x142   : > { %681 = vst [vmem:[#allocation1 + $0x20] ss:$4 sm:$0xff] %v12237_v39  ;;  %v12273_v50 = vsel %vm1236_vm11, 1.0, %v14386_v26 }
 0x143   : > { %785 = vst [vmem:[#allocation3 + $0x1a8] sm:$0x3] %v12125_v40 }
 0x144   : > { %v1021_v38 = vld.sshfl [vmem:[#allocation1] sm:$0xff pattern:$0x73625140]  ;;  %v1022_v21 = vld.sshfl [vmem:[#allocation1 + $0x8] sm:$0xff pattern:$0x73625140] }
 0x145   : > { %v1023_v45 = vld.sshfl [vmem:[#allocation1 + $0x10] sm:$0xff pattern:$0x73625140]  ;;  %v1024_v47 = vld.sshfl [vmem:[#allocation1 + $0x18] sm:$0xff pattern:$0x73625140] }
 0x146   : > { %1029 = vst [vmem:[#allocation1 + $0x1] ss:$4 sm:$0xff] %v12208_v27 }
 0x147   : > { %1151 = vst [vmem:[#allocation3 + $0x230] sm:$0xc] %v1021_v38  ;;  %v1173_v38 = vsub.f32 1.0, %v12138_v46 }
 0x148   : > { %1152 = vst [vmem:[#allocation3 + $0x240] sm:$0xc] %v1022_v21  ;;  %v12259_v21 = vsel %vm570_vm10, 1.0, %v14386_v26 }
 0x149   : > { %1153 = vst [vmem:[#allocation3 + $0x90] sm:$0xc] %v1023_v45  ;;  %v12261_v40 = vld.sshfl [vmem:[#allocation1 + $0x20] sm:$0xff pattern:$0x73625140]  ;;  %v829_v45 = vsub.f32 1.0, %v12069_v56 }
 0x14a   : > { %1154 = vst [vmem:[#allocation3 + $0x3a0] sm:$0xc] %v1024_v47  ;;  %v1189_v47 = vmul.f32 %v1173_v38, %v12120_v37  ;;  %v12266_v46 = vld.sshfl [vmem:[#allocation1 + $0x28] sm:$0xff pattern:$0x73625140] }
 0x14b   : > { %v12268_v55 = vld.sshfl [vmem:[#allocation1 + $0x30] sm:$0xff pattern:$0x73625140]  ;;  %v12270_v57 = vld.sshfl [vmem:[#allocation1 + $0x38] sm:$0xff pattern:$0x73625140]  ;;  %v845_v56 = vmul.f32 %v829_v45, %v12065_v48 }
 0x14c   : > { %691 = vst [vmem:[#allocation1 + $0x20] ss:$4 sm:$0xff] %v12259_v21  ;;  %v12278_v37 = vadd.f32 %v8668_v54, %v1189_v47  ;;  %v1177_v54 = vsub.f32 1.0, %v12161_v3 }
 0x14d   : > { %v1031_v24 = vld.sshfl [vmem:[#allocation1] sm:$0xff pattern:$0x73625140]  ;;  %v1032_v60 = vld.sshfl [vmem:[#allocation1 + $0x8] sm:$0xff pattern:$0x73625140] }
 0x14e   : > { %v1033_v63 = vld.sshfl [vmem:[#allocation1 + $0x10] sm:$0xff pattern:$0x73625140]  ;;  %v1034_v0 = vld.sshfl [vmem:[#allocation1 + $0x18] sm:$0xff pattern:$0x73625140]  ;;  %v1193_v3 = vmul.f32 %v1177_v54, %v12152_v62 }
 0x14f   : > { %1297 = vst [vmem:[#allocation1 + $0x2] ss:$4 sm:$0xff] %v12223_v59  ;;  %vm1238_vm12 = vcmp.ge.f32.partialorder %v12278_v37, 1.0  ;;  %v8633_v54 = vld [vmem:[%s11924_s29 + $0x98] sm:$0xff] }
 0x150   : > { %1159 = vst [vmem:[#allocation3 + $0x358] sm:$0xc] %v1031_v24  ;;  %v8631_v24 = vld [vmem:[%s11924_s29 + $0x88] sm:$0xff]  ;;  %v12288_v48 = vsel %vm1238_vm12, 1.0, %v14386_v26 }
 0x151   : > { %1160 = vst [vmem:[#allocation3 + $0x268] sm:$0xc] %v1032_v60 }
 0x152   : > { %1161 = vst [vmem:[#allocation3 + $0x350] sm:$0xc] %v1033_v63 }
 0x153   : > { %1162 = vst [vmem:[#allocation3 + $0x188] sm:$0xc] %v1034_v0 }
 0x154   : > { %786 = vst [vmem:[#allocation3 + $0x1b8] sm:$0x3] %v12127_v42  ;;  %v12302_v42 = vld.sshfl [vmem:[#allocation1 + $0x38] sm:$0xff pattern:$0x73625140] }
 0x155   : > { %787 = vst [vmem:[#allocation3 + $0x168] sm:$0x3] %v12132_v44  ;;  %v831_v44 = vsub.f32 1.0, %v12080_v7  ;;  %v1181_v7 = vsub.f32 1.0, %v12208_v27  ;;  %v8635_v27 = vld [vmem:[%s11924_s29 + $0xa8] sm:$0xff] }
 0x156   : > { %v1300_v29 = vld.sshfl [vmem:[#allocation1] sm:$0xff pattern:$0x73625140]  ;;  %v1301_v25 = vld.sshfl [vmem:[#allocation1 + $0x8] sm:$0xff pattern:$0x73625140] }
 0x157   : > { %v1302_v28 = vld.sshfl [vmem:[#allocation1 + $0x10] sm:$0xff pattern:$0x73625140]  ;;  %v1303_v52 = vld.sshfl [vmem:[#allocation1 + $0x18] sm:$0xff pattern:$0x73625140] }
 0x158   : > { %1308 = vst [vmem:[#allocation1 + $0x2] ss:$4 sm:$0xff] %v12249_v20 }
 0x159   : > { %1442 = vst [vmem:[#allocation3 + $0x2b0] sm:$0x30] %v1300_v29  ;;  %v12282_v29 = vadd.f32 %v8631_v24, %v845_v56  ;;  %v12298_v24 = vld.sshfl [vmem:[#allocation1 + $0x28] sm:$0xff pattern:$0x73625140] }
 0x15a   : > { %1443 = vst [vmem:[#allocation3 + $0x3b0] sm:$0x30] %v1301_v25  ;;  %v1191_v25 = vmul.f32 %v1175_v51, %v12141_v53  ;;  %v12296_v53 = vld.sshfl [vmem:[#allocation1 + $0x20] sm:$0xff pattern:$0x73625140]  ;;  %v8672_v56 = vld [vmem:[%s11924_s29 + $0x150] sm:$0xff] }
 0x15b   : > { %1444 = vst [vmem:[#allocation3 + $0xd8] sm:$0x30] %v1302_v28  ;;  %v8670_v28 = vld [vmem:[%s11924_s29 + $0x140] sm:$0xff]  ;;  %vm894_vm13 = vcmp.ge.f32.partialorder %v12282_v29, 1.0 }
 0x15c   : > { %1445 = vst [vmem:[#allocation3 + $0x18] sm:$0x30] %v1303_v52  ;;  %v12292_v38 = vadd.f32 %v8670_v28, %v1191_v25 }
 0x15d   : > { %792 = vst [vmem:[#allocation3 + $0x138] sm:$0x3] %v12168_v9 }
 0x15e   : > { %vm1240_vm14 = vcmp.ge.f32.partialorder %v12292_v38, 1.0  ;;  %793 = vst [vmem:[#allocation3 + $0xc0] sm:$0x3] %v12170_v10 }
 0x15f   : > { %v1310_v60 = vld.sshfl [vmem:[#allocation1] sm:$0xff pattern:$0x73625140]  ;;  %v1311_v63 = vld.sshfl [vmem:[#allocation1 + $0x8] sm:$0xff pattern:$0x73625140] }
 0x160   : > { %v1312_v0 = vld.sshfl [vmem:[#allocation1 + $0x10] sm:$0xff pattern:$0x73625140]  ;;  %v1313_v6 = vld.sshfl [vmem:[#allocation1 + $0x18] sm:$0xff pattern:$0x73625140] }
 0x161   : > { %1318 = vst [vmem:[#allocation1 + $0x2] ss:$4 sm:$0xff] %v12273_v50 }
 0x162   : > { %1450 = vst [vmem:[#allocation3 + $0x380] sm:$0x30] %v1310_v60  ;;  %v12300_v60 = vld.sshfl [vmem:[#allocation1 + $0x30] sm:$0xff pattern:$0x73625140] }
 0x163   : > { %1451 = vst [vmem:[#allocation3 + $0x110] sm:$0x30] %v1311_v63  ;;  %v12305_v63 = vsel %vm894_vm13, 1.0, %v14386_v26 }
 0x164   : > { %1452 = vst [vmem:[#allocation3 + $0x118] sm:$0x30] %v1312_v0  ;;  %v1506_v0 = vsub.f32 1.0, %v12223_v59  ;;  %v1179_v59 = vsub.f32 1.0, %v12183_v16  ;;  %v847_v16 = vmul.f32 %v831_v44, %v12073_v61  ;;  %v1197_v61 = vmul.f32 %v1181_v7, %v12190_v19 }
 0x165   : > { %1453 = vst [vmem:[#allocation3 + $0x98] sm:$0x30] %v1313_v6  ;;  %v12313_v6 = vsel %vm1240_vm14, 1.0, %v14386_v26 }
 0x166   : > { %960 = vst [vmem:[#allocation1 + $0x21] ss:$4 sm:$0xff] %v12305_v63  ;;  %v12317_v28 = vmul.f32 %v1506_v0, %v12211_v49 }
 0x167   : > { %794 = vst [vmem:[#allocation3 + $0x1c0] sm:$0x3] %v12172_v12 }
 0x168   : > { %v1320_v58 = vld.sshfl [vmem:[#allocation1] sm:$0xff pattern:$0x73625140]  ;;  %v1321_v52 = vld.sshfl [vmem:[#allocation1 + $0x8] sm:$0xff pattern:$0x73625140] }
 0x169   : > { %v1322_v45 = vld.sshfl [vmem:[#allocation1 + $0x10] sm:$0xff pattern:$0x73625140]  ;;  %v1323_v47 = vld.sshfl [vmem:[#allocation1 + $0x18] sm:$0xff pattern:$0x73625140] }
 0x16a   : > { %1328 = vst [vmem:[#allocation1 + $0x2] ss:$4 sm:$0xff] %v12288_v48 }
 0x16b   : > { %1458 = vst [vmem:[#allocation3 + $0x2e0] sm:$0x30] %v1320_v58  ;;  %v12319_v58 = vadd.f32 %v8672_v56, %v1193_v3 }
 0x16c   : > { %1459 = vst [vmem:[#allocation3 + $0x388] sm:$0x30] %v1321_v52 }
 0x16d   : > { %1460 = vst [vmem:[#allocation3 + $0x338] sm:$0x30] %v1322_v45  ;;  %vm1242_vm15 = vcmp.ge.f32.partialorder %v12319_v58, 1.0  ;;  %v1195_v45 = vmul.f32 %v1179_v59, %v12165_v5  ;;  %v12336_v5 = vadd.f32 %v8633_v54, %v847_v16  ;;  %v8676_v59 = vld [vmem:[%s11924_s29 + $0x170] sm:$0xff] }
 0x16e   : > { %1461 = vst [vmem:[#allocation3 + $0x340] sm:$0x30] %v1323_v47  ;;  %v8674_v47 = vld [vmem:[%s11924_s29 + $0x160] sm:$0xff]  ;;  %v12328_v49 = vsel %vm1242_vm15, 1.0, %v14386_v26 }
 0x16f   : > { %v12332_v0 = vadd.f32 %v8674_v47, %v1195_v45  ;;  %vm896_vm1 = vcmp.ge.f32.partialorder %v12336_v5, 1.0  ;;  %v12351_v19 = vld.sshfl [vmem:[#allocation1 + $0x28] sm:$0xff pattern:$0x73625140]  ;;  %795 = vst [vmem:[#allocation3 + $0x280] sm:$0x3] %v12177_v15 }
 0x170   : > { %v12353_v16 = vld.sshfl [vmem:[#allocation1 + $0x30] sm:$0xff pattern:$0x73625140]  ;;  %v12360_v7 = vld.sshfl [vmem:[#allocation1 + $0x38] sm:$0xff pattern:$0x73625140] }
 0x171   : > { %v1330_v51 = vld.sshfl [vmem:[#allocation1] sm:$0xff pattern:$0x73625140]  ;;  %v1331_v25 = vld.sshfl [vmem:[#allocation1 + $0x8] sm:$0xff pattern:$0x73625140] }
 0x172   : > { %v1332_v62 = vld.sshfl [vmem:[#allocation1 + $0x10] sm:$0xff pattern:$0x73625140]  ;;  %v1333_v52 = vld.sshfl [vmem:[#allocation1 + $0x18] sm:$0xff pattern:$0x73625140] }
 0x173   : > { %1338 = vst [vmem:[#allocation1 + $0x2] ss:$4 sm:$0xff] %v12313_v6  ;;  %vm1244_vm0 = vcmp.ge.f32.partialorder %v12332_v0, 1.0 }
 0x174   : > { %1466 = vst [vmem:[#allocation3 + $0x3e8] sm:$0x30] %v1330_v51  ;;  %v12343_v44 = vsel %vm1244_vm0, 1.0, %v14386_v26 }
 0x175   : > { %1467 = vst [vmem:[#allocation3 + $0x2f8] sm:$0x30] %v1331_v25 }
 0x176   : > { %1468 = vst [vmem:[#allocation3 + $0x290] sm:$0x30] %v1332_v62  ;;  %v833_v62 = vsub.f32 1.0, %v12097_v17 }
 0x177   : > { %1469 = vst [vmem:[#allocation3 + $0x28] sm:$0x30] %v1333_v52  ;;  %v965_v52 = vld.sshfl [vmem:[#allocation1 + $0x20] sm:$0xff pattern:$0x73625140] }
 0x178   : > { %1107 = vst [vmem:[#allocation3 + $0x50] sm:$0xc] %v965_v52  ;;  %v849_v54 = vmul.f32 %v833_v62, %v12089_v11  ;;  %v8694_v11 = vld [vmem:[%s11924_s29 + $0x180] sm:$0xff] }
 0x179   : > { %14402 = vst [vmem:[#allocation8_spill] sm:$0xff] %v12360_v7 }
 0x17a   : > { %v1340_v3 = vld.sshfl [vmem:[#allocation1] sm:$0xff pattern:$0x73625140]  ;;  %v1341_v56 = vld.sshfl [vmem:[#allocation1 + $0x8] sm:$0xff pattern:$0x73625140] }
 0x17b   : > { %v1342_v51 = vld.sshfl [vmem:[#allocation1 + $0x10] sm:$0xff pattern:$0x73625140]  ;;  %v1343_v25 = vld.sshfl [vmem:[#allocation1 + $0x18] sm:$0xff pattern:$0x73625140] }
 0x17c   : > { %1348 = vst [vmem:[#allocation1 + $0x2] ss:$4 sm:$0xff] %v12328_v49 }
 0x17d   : > { %1474 = vst [vmem:[#allocation3 + $0x100] sm:$0x30] %v1340_v3  ;;  %v12348_v3 = vadd.f32 %v8676_v59, %v1197_v61 }
 0x17e   : > { %1475 = vst [vmem:[#allocation3 + $0x3c0] sm:$0x30] %v1341_v56 }
 0x17f   : > { %1476 = vst [vmem:[#allocation3 + $0x158] sm:$0x30] %v1342_v51  ;;  %v12355_v51 = vadd.f32 %v8635_v27, %v849_v54  ;;  %vm1246_vm2 = vcmp.ge.f32.partialorder %v12348_v3, 1.0  ;;  %v835_v54 = vsub.f32 1.0, %v12130_v43 }
 0x180   : > { %1477 = vst [vmem:[#allocation3 + $0x3e0] sm:$0x30] %v1343_v25  ;;  %v12358_v25 = vsel %vm896_vm1, 1.0, %v14386_v26  ;;  %v12366_v62 = vsel %vm1246_vm2, 1.0, %v14386_v26 }
 0x181   : > { %970 = vst [vmem:[#allocation1 + $0x21] ss:$4 sm:$0xff] %v12358_v25  ;;  %vm898_vm3 = vcmp.ge.f32.partialorder %v12355_v51, 1.0 }
 0x182   : > { %800 = vst [vmem:[#allocation3 + $0x218] sm:$0x3] %v12198_v23 }
 0x183   : > { %v1350_v45 = vld.sshfl [vmem:[#allocation1] sm:$0xff pattern:$0x73625140]  ;;  %v1351_v47 = vld.sshfl [vmem:[#allocation1 + $0x8] sm:$0xff pattern:$0x73625140] }
 0x184   : > { %v1352_v17 = vld.sshfl [vmem:[#allocation1 + $0x10] sm:$0xff pattern:$0x73625140]  ;;  %v1353_v56 = vld.sshfl [vmem:[#allocation1 + $0x18] sm:$0xff pattern:$0x73625140] }
 0x185   : > { %1358 = vst [vmem:[#allocation1 + $0x2] ss:$4 sm:$0xff] %v12343_v44 }
 0x186   : > { %1482 = vst [vmem:[#allocation3 + $0x2a0] sm:$0x30] %v1350_v45  ;;  %v12371_v45 = vadd.f32 %v8694_v11, %v12317_v28 }
 0x187   : > { %1483 = vst [vmem:[#allocation3 + $0x3f0] sm:$0x30] %v1351_v47  ;;  %v1508_v47 = vsub.f32 1.0, %v12249_v20 }
 0x188   : > { %1484 = vst [vmem:[#allocation3 + $0xa0] sm:$0x30] %v1352_v17  ;;  %v12377_v17 = vsel %vm898_vm3, 1.0, %v14386_v26  ;;  %vm1571_vm4 = vcmp.ge.f32.partialorder %v12371_v45, 1.0 }
 0x189   : > { %1485 = vst [vmem:[#allocation3 + $0x2c0] sm:$0x30] %v1353_v56  ;;  %v12380_v9 = vld.sshfl [vmem:[#allocation1 + $0x20] sm:$0xff pattern:$0x73625140]  ;;  %v1524_v28 = vmul.f32 %v1508_v47, %v12227_v2  ;;  %v8696_v56 = vld [vmem:[%s11924_s29 + $0x190] sm:$0xff] }
 0x18a   : > { %14403 = vst [vmem:[#allocation9_spill] sm:$0xff] %v12380_v9  ;;  %v12384_v11 = vld.sshfl [vmem:[#allocation1 + $0x28] sm:$0xff pattern:$0x73625140]  ;;  %v12391_v43 = vsel %vm1571_vm4, 1.0, %v14386_v26  ;;  %v851_v9 = vmul.f32 %v835_v54, %v12112_v33  ;;  %v8698_v54 = vld [vmem:[%s11924_s29 + $0x1a0] sm:$0xff] }
 0x18b   : > { %14404 = vst [vmem:[#allocation10_spill] sm:$0xff] %v12384_v11  ;;  %v12386_v7 = vld.sshfl [vmem:[#allocation1 + $0x30] sm:$0xff pattern:$0x73625140]  ;;  %v12396_v47 = vadd.f32 %v8696_v56, %v1524_v28  ;;  %v14407_v11 = vmov 0.0   ;;  %v8639_v56 = vld [vmem:[%s11924_s29 + $0xc8] sm:$0xff] }
 0x18c   : > { %v1360_v61 = vld.sshfl [vmem:[#allocation1] sm:$0xff pattern:$0x73625140]  ;;  %v1361_v52 = vld.sshfl [vmem:[#allocation1 + $0x8] sm:$0xff pattern:$0x73625140] }
 0x18d   : > { %v1362_v59 = vld.sshfl [vmem:[#allocation1 + $0x10] sm:$0xff pattern:$0x73625140]  ;;  %v1363_v27 = vld.sshfl [vmem:[#allocation1 + $0x18] sm:$0xff pattern:$0x73625140] }
 0x18e   : > { %1368 = vst [vmem:[#allocation1 + $0x2] ss:$4 sm:$0xff] %v12366_v62  ;;  %v12388_v20 = vld.sshfl [vmem:[#allocation1 + $0x38] sm:$0xff pattern:$0x73625140]  ;;  %vm1573_vm5 = vcmp.ge.f32.partialorder %v12396_v47, 1.0 }
 0x18f   : > { %1490 = vst [vmem:[#allocation3 + $0x230] sm:$0x30] %v1360_v61  ;;  %v8637_v61 = vld [vmem:[%s11924_s29 + $0xb8] sm:$0xff]  ;;  %v12407_v28 = vsel %vm1573_vm5, 1.0, %v14407_v11 }
 0x190   : > { %1491 = vst [vmem:[#allocation3 + $0x240] sm:$0x30] %v1361_v52  ;;  %v12400_v26 = vadd.f32 %v8637_v61, %v851_v9 }
 0x191   : > { %1492 = vst [vmem:[#allocation3 + $0x90] sm:$0x30] %v1362_v59 }
 0x192   : > { %1493 = vst [vmem:[#allocation3 + $0x3a0] sm:$0x30] %v1363_v27  ;;  %vm900_vm6 = vcmp.ge.f32.partialorder %v12400_v26, 1.0 }
 0x193   : > { %14405 = vst [vmem:[#allocation11_spill] sm:$0xff] %v12386_v7  ;;  %v1510_v7 = vsub.f32 1.0, %v12273_v50 }
 0x194   : > { %14406 = vst [vmem:[#allocation12_spill] sm:$0xff] %v12388_v20  ;;  %v837_v20 = vsub.f32 1.0, %v12175_v13 }
 0x195   : > { %980 = vst [vmem:[#allocation1 + $0x21] ss:$4 sm:$0xff] %v12377_v17  ;;  %v1370_v52 = vld.sshfl [vmem:[#allocation1] sm:$0xff pattern:$0x73625140]  ;;  %v1526_v33 = vmul.f32 %v1510_v7, %v12253_v22  ;;  %v1512_v22 = vsub.f32 1.0, %v12288_v48 }
 0x196   : > { %v1371_v59 = vld.sshfl [vmem:[#allocation1 + $0x8] sm:$0xff pattern:$0x73625140]  ;;  %v1372_v2 = vld.sshfl [vmem:[#allocation1 + $0x10] sm:$0xff pattern:$0x73625140]  ;;  %v853_v61 = vmul.f32 %v837_v20, %v12157_v1 }
 0x197   : > { %v1373_v27 = vld.sshfl [vmem:[#allocation1 + $0x18] sm:$0xff pattern:$0x73625140]  ;;  %1498 = vst [vmem:[#allocation3 + $0x358] sm:$0x30] %v1370_v52  ;;  %v12413_v52 = vadd.f32 %v8698_v54, %v1526_v33  ;;  %v12428_v1 = vsel %vm900_vm6, 1.0, %v14407_v11  ;;  %v1528_v48 = vmul.f32 %v1512_v22, %v12278_v37 }
 0x198   : > { %1636 = vst [vmem:[#allocation1 + $0x3] ss:$4 sm:$0xff] %v12391_v43  ;;  %v12423_v10 = vadd.f32 %v8639_v56, %v853_v61  ;;  %v8700_v33 = vld [vmem:[%s11924_s29 + $0x1b0] sm:$0xff]  ;;  %v1514_v37 = vsub.f32 1.0, %v12313_v6 }
 0x199   : > { %1499 = vst [vmem:[#allocation3 + $0x268] sm:$0x30] %v1371_v59  ;;  %vm1575_vm7 = vcmp.ge.f32.partialorder %v12413_v52, 1.0 }
 0x19a   : > { %1500 = vst [vmem:[#allocation3 + $0x350] sm:$0x30] %v1372_v2  ;;  %v12437_v54 = vsel %vm1575_vm7, 1.0, %v14407_v11  ;;  %vm902_vm8 = vcmp.ge.f32.partialorder %v12423_v10, 1.0  ;;  %v1530_v12 = vmul.f32 %v1514_v37, %v12292_v38 }
 0x19b   : > { %1501 = vst [vmem:[#allocation3 + $0x188] sm:$0x30] %v1373_v27 }
 0x19c   : > { %v12417_v7 = vld.sshfl [vmem:[#allocation1 + $0x20] sm:$0xff pattern:$0x73625140]  ;;  %v12419_v2 = vld.sshfl [vmem:[#allocation1 + $0x28] sm:$0xff pattern:$0x73625140] }
 0x19d   : > { %v12421_v27 = vld.sshfl [vmem:[#allocation1 + $0x30] sm:$0xff pattern:$0x73625140]  ;;  %v12430_v20 = vld.sshfl [vmem:[#allocation1 + $0x38] sm:$0xff pattern:$0x73625140] }
 0x19e   : > { %14408 = vst [vmem:[#allocation13_spill] sm:$0xff] %v12421_v27 }
 0x19f   : > { %v1639_v50 = vld.sshfl [vmem:[#allocation1] sm:$0xff pattern:$0x73625140]  ;;  %v1640_v9 = vld.sshfl [vmem:[#allocation1 + $0x8] sm:$0xff pattern:$0x73625140] }
 0x1a0   : > { %v1641_v59 = vld.sshfl [vmem:[#allocation1 + $0x10] sm:$0xff pattern:$0x73625140]  ;;  %v1642_v13 = vld.sshfl [vmem:[#allocation1 + $0x18] sm:$0xff pattern:$0x73625140] }
 0x1a1   : > { %1647 = vst [vmem:[#allocation1 + $0x3] ss:$4 sm:$0xff] %v12407_v28 }
 0x1a2   : > { %1781 = vst [vmem:[#allocation3 + $0x2b0] sm:$0xc0] %v1639_v50 }
 0x1a3   : > { %1782 = vst [vmem:[#allocation3 + $0x3b0] sm:$0xc0] %v1640_v9  ;;  %v12441_v9 = vadd.f32 %v8700_v33, %v1528_v48  ;;  %v8702_v48 = vld [vmem:[%s11924_s29 + $0x1c0] sm:$0xff] }
 0x1a4   : > { %14409 = vst [vmem:[#allocation14_spill] sm:$0xff] %v12430_v20  ;;  %v12463_v27 = vadd.f32 %v8702_v48, %v1530_v12  ;;  %v1845_v12 = vsub.f32 1.0, %v12391_v43  ;;  %v1518_v43 = vsub.f32 1.0, %v12343_v44  ;;  %v841_v44 = vsub.f32 1.0, %v12237_v39 }
 0x1a5   : > { %1783 = vst [vmem:[#allocation3 + $0xd8] sm:$0xc0] %v1641_v59  ;;  %vm1577_vm9 = vcmp.ge.f32.partialorder %v12441_v9, 1.0 }
 0x1a6   : > { %1784 = vst [vmem:[#allocation3 + $0x18] sm:$0xc0] %v1642_v13  ;;  %v12446_v13 = vsel %vm902_vm8, 1.0, %v14407_v11  ;;  %vm1579_vm10 = vcmp.ge.f32.partialorder %v12463_v27, 1.0 }
 0x1a7   : > { %990 = vst [vmem:[#allocation1 + $0x21] ss:$4 sm:$0xff] %v12428_v1  ;;  %v12474_v48 = vsel %vm1579_vm10, 1.0, %v14407_v11 }
 0x1a8   : > { %v1649_v56 = vld.sshfl [vmem:[#allocation1] sm:$0xff pattern:$0x73625140]  ;;  %v1650_v50 = vld.sshfl [vmem:[#allocation1 + $0x8] sm:$0xff pattern:$0x73625140] }
 0x1a9   : > { %v1651_v61 = vld.sshfl [vmem:[#allocation1 + $0x10] sm:$0xff pattern:$0x73625140]  ;;  %v1652_v59 = vld.sshfl [vmem:[#allocation1 + $0x18] sm:$0xff pattern:$0x73625140] }
 0x1aa   : > { %1657 = vst [vmem:[#allocation1 + $0x3] ss:$4 sm:$0xff] %v12437_v54 }
 0x1ab   : > { %1789 = vst [vmem:[#allocation3 + $0x380] sm:$0xc0] %v1649_v56  ;;  %v12460_v56 = vsel %vm1577_vm9, 1.0, %v14407_v11 }
 0x1ac   : > { %1790 = vst [vmem:[#allocation3 + $0x110] sm:$0xc0] %v1650_v50 }
 0x1ad   : > { %1791 = vst [vmem:[#allocation3 + $0x118] sm:$0xc0] %v1651_v61 }
 0x1ae   : > { %v12449_v22 = vld.sshfl [vmem:[#allocation1 + $0x20] sm:$0xff pattern:$0x73625140]  ;;  %1792 = vst [vmem:[#allocation3 + $0x98] sm:$0xc0] %v1652_v59  ;;  %v1516_v59 = vsub.f32 1.0, %v12328_v49 }
 0x1af   : > { %14410 = vst [vmem:[#allocation15_spill] sm:$0xff] %v12449_v22  ;;  %v12453_v33 = vld.sshfl [vmem:[#allocation1 + $0x28] sm:$0xff pattern:$0x73625140]  ;;  %v8641_v49 = vld [vmem:[%s11924_s29 + $0xd8] sm:$0xff]  ;;  %v12478_v22 = vmul.f32 %v1845_v12, %v12371_v45  ;;  %v8706_v45 = vld [vmem:[%s11924_s29 + $0x1e0] sm:$0xff] }
 0x1b0   : > { %14411 = vst [vmem:[#allocation16_spill] sm:$0xff] %v12453_v33  ;;  %v12455_v20 = vld.sshfl [vmem:[#allocation1 + $0x30] sm:$0xff pattern:$0x73625140]  ;;  %v8704_v33 = vld [vmem:[%s11924_s29 + $0x1d0] sm:$0xff] }
 0x1b1   : > { %14412 = vst [vmem:[#allocation17_spill] sm:$0xff] %v12455_v20  ;;  %v12457_v6 = vld.sshfl [vmem:[#allocation1 + $0x38] sm:$0xff pattern:$0x73625140]  ;;  %v1532_v20 = vmul.f32 %v1516_v59, %v12319_v58  ;;  %v1534_v59 = vmul.f32 %v1518_v43, %v12332_v0 }
 0x1b2   : > { %14413 = vst [vmem:[#allocation18_spill] sm:$0xff] %v12457_v6  ;;  %v1659_v50 = vld.sshfl [vmem:[#allocation1] sm:$0xff pattern:$0x73625140]  ;;  %v839_v6 = vsub.f32 1.0, %v12196_v31 }
 0x1b3   : > { %1000 = vst [vmem:[#allocation1 + $0x21] ss:$4 sm:$0xff] %v12446_v13  ;;  %v1660_v61 = vld.sshfl [vmem:[#allocation1 + $0x8] sm:$0xff pattern:$0x73625140]  ;;  %v12496_v12 = vadd.f32 %v8706_v45, %v1534_v59 }
 0x1b4   : > { %v1661_v38 = vld.sshfl [vmem:[#allocation1 + $0x10] sm:$0xff pattern:$0x73625140]  ;;  %v1662_v37 = vld.sshfl [vmem:[#allocation1 + $0x18] sm:$0xff pattern:$0x73625140]  ;;  %v855_v31 = vmul.f32 %v839_v6, %v12186_v18 }
 0x1b5   : > { %1667 = vst [vmem:[#allocation1 + $0x3] ss:$4 sm:$0xff] %v12460_v56  ;;  %v1520_v18 = vsub.f32 1.0, %v12366_v62  ;;  %vm1583_vm13 = vcmp.ge.f32.partialorder %v12496_v12, 1.0  ;;  %v8708_v59 = vld [vmem:[%s11924_s29 + $0x1f0] sm:$0xff] }
 0x1b6   : > { %1797 = vst [vmem:[#allocation3 + $0x2e0] sm:$0xc0] %v1659_v50  ;;  %v12485_v15 = vadd.f32 %v8641_v49, %v855_v31  ;;  %v8643_v31 = vld [vmem:[%s11924_s29 + $0xe8] sm:$0xff] }
 0x1b7   : > { %1798 = vst [vmem:[#allocation3 + $0x388] sm:$0xc0] %v1660_v61  ;;  %v1536_v43 = vmul.f32 %v1520_v18, %v12348_v3 }
 0x1b8   : > { %1799 = vst [vmem:[#allocation3 + $0x338] sm:$0xc0] %v1661_v38  ;;  %v12481_v38 = vadd.f32 %v8704_v33, %v1532_v20  ;;  %vm904_vm12 = vcmp.ge.f32.partialorder %v12485_v15, 1.0 }
 0x1b9   : > { %1800 = vst [vmem:[#allocation3 + $0x340] sm:$0xc0] %v1662_v37 }
 0x1ba   : > { %vm1581_vm11 = vcmp.ge.f32.partialorder %v12481_v38, 1.0  ;;  %v12501_v62 = vld.sshfl [vmem:[#allocation1 + $0x28] sm:$0xff pattern:$0x73625140]  ;;  %801 = vst [vmem:[#allocation3 + $0x3f8] sm:$0x3] %v12201_v32 }
 0x1bb   : > { %v12492_v20 = vsel %vm1581_vm11, 1.0, %v14407_v11  ;;  %v12505_v39 = vld.sshfl [vmem:[#allocation1 + $0x30] sm:$0xff pattern:$0x73625140]  ;;  %802 = vst [vmem:[#allocation3 + $0x8] sm:$0x3] %v12203_v34 }
 0x1bc   : > { %v1669_v50 = vld.sshfl [vmem:[#allocation1] sm:$0xff pattern:$0x73625140]  ;;  %v1670_v61 = vld.sshfl [vmem:[#allocation1 + $0x8] sm:$0xff pattern:$0x73625140] }
 0x1bd   : > { %v1671_v58 = vld.sshfl [vmem:[#allocation1 + $0x10] sm:$0xff pattern:$0x73625140]  ;;  %v1672_v37 = vld.sshfl [vmem:[#allocation1 + $0x18] sm:$0xff pattern:$0x73625140] }
 0x1be   : > { %1677 = vst [vmem:[#allocation1 + $0x3] ss:$4 sm:$0xff] %v12474_v48  ;;  %v1170_v34 = vsub.f32 1.0, %v12358_v25  ;;  %v8665_v25 = vld [vmem:[%s11924_s29 + $0x118] sm:$0xff] }
 0x1bf   : > { %1805 = vst [vmem:[#allocation3 + $0x3e8] sm:$0xc0] %v1669_v50  ;;  %v12499_v50 = vld.sshfl [vmem:[#allocation1 + $0x20] sm:$0xff pattern:$0x73625140] }
 0x1c0   : > { %1806 = vst [vmem:[#allocation3 + $0x2f8] sm:$0xc0] %v1670_v61  ;;  %v857_v61 = vmul.f32 %v841_v44, %v12217_v30  ;;  %v12519_v30 = vsel %vm1583_vm13, 1.0, %v14407_v11  ;;  %v12522_v44 = vadd.f32 %v8708_v59, %v1536_v43 }
 0x1c1   : > { %1807 = vst [vmem:[#allocation3 + $0x290] sm:$0xc0] %v1671_v58  ;;  %v12508_v58 = vsel %vm904_vm12, 1.0, %v14407_v11 }
 0x1c2   : > { %1808 = vst [vmem:[#allocation3 + $0x28] sm:$0xc0] %v1672_v37  ;;  %v12510_v37 = vld.sshfl [vmem:[#allocation1 + $0x38] sm:$0xff pattern:$0x73625140]  ;;  %v12515_v45 = vadd.f32 %v8643_v31, %v857_v61  ;;  %vm1585_vm15 = vcmp.ge.f32.partialorder %v12522_v44, 1.0 }
 0x1c3   : > { %14414 = vst [vmem:[#allocation19_spill] sm:$0xff] %v12505_v39  ;;  %v8726_v61 = vld [vmem:[%s11924_s29 + $0x200] sm:$0xff] }
 0x1c4   : > { %14415 = vst [vmem:[#allocation20_spill] sm:$0xff] %v12510_v37  ;;  %vm906_vm14 = vcmp.ge.f32.partialorder %v12515_v45, 1.0 }
 0x1c5   : > { %v1679_v33 = vld.sshfl [vmem:[#allocation1] sm:$0xff pattern:$0x73625140]  ;;  %v1680_v6 = vld.sshfl [vmem:[#allocation1 + $0x8] sm:$0xff pattern:$0x73625140] }
 0x1c6   : > { %v1681_v49 = vld.sshfl [vmem:[#allocation1 + $0x10] sm:$0xff pattern:$0x73625140]  ;;  %v1682_v0 = vld.sshfl [vmem:[#allocation1 + $0x18] sm:$0xff pattern:$0x73625140] }
 0x1c7   : > { %1687 = vst [vmem:[#allocation1 + $0x3] ss:$4 sm:$0xff] %v12492_v20  ;;  %v12529_v23 = vsel %vm906_vm14, 1.0, %v14407_v11 }
 0x1c8   : > { %1813 = vst [vmem:[#allocation3 + $0x100] sm:$0xc0] %v1679_v33 }
 0x1c9   : > { %1814 = vst [vmem:[#allocation3 + $0x3c0] sm:$0xc0] %v1680_v6 }
 0x1ca   : > { %1815 = vst [vmem:[#allocation3 + $0x158] sm:$0xc0] %v1681_v49  ;;  %v843_v49 = vsub.f32 1.0, %v12259_v21 }
 0x1cb   : > { %1816 = vst [vmem:[#allocation3 + $0x3e0] sm:$0xc0] %v1682_v0 }
 0x1cc   : > { %1010 = vst [vmem:[#allocation1 + $0x21] ss:$4 sm:$0xff] %v12508_v58  ;;  %v859_v37 = vmul.f32 %v843_v49, %v12244_v8  ;;  %v8728_v8 = vld [vmem:[%s11924_s29 + $0x210] sm:$0xff]  ;;  %v1849_v49 = vsub.f32 1.0, %v12437_v54 }
 0x1cd   : > { %803 = vst [vmem:[#allocation3 + $0x128] sm:$0x3] %v12205_v36  ;;  %v8738_v36 = vld [vmem:[%s11924_s29 + $0x260] sm:$0xff] }
 0x1ce   : > { %v1689_v33 = vld.sshfl [vmem:[#allocation1] sm:$0xff pattern:$0x73625140]  ;;  %v1690_v6 = vld.sshfl [vmem:[#allocation1 + $0x8] sm:$0xff pattern:$0x73625140] }
 0x1cf   : > { %v1691_v3 = vld.sshfl [vmem:[#allocation1 + $0x10] sm:$0xff pattern:$0x73625140]  ;;  %v1692_v18 = vld.sshfl [vmem:[#allocation1 + $0x18] sm:$0xff pattern:$0x73625140] }
 0x1d0   : > { %1697 = vst [vmem:[#allocation1 + $0x3] ss:$4 sm:$0xff] %v12519_v30 }
 0x1d1   : > { %1821 = vst [vmem:[#allocation3 + $0x2a0] sm:$0xc0] %v1689_v33  ;;  %v12541_v33 = vsel %vm1585_vm15, 1.0, %v14407_v11 }
 0x1d2   : > { %1822 = vst [vmem:[#allocation3 + $0x3f0] sm:$0xc0] %v1690_v6  ;;  %v8645_v6 = vld [vmem:[%s11924_s29 + $0xf8] sm:$0xff] }
 0x1d3   : > { %1823 = vst [vmem:[#allocation3 + $0xa0] sm:$0xc0] %v1691_v3  ;;  %v12531_v0 = vld.sshfl [vmem:[#allocation1 + $0x20] sm:$0xff pattern:$0x73625140] }
 0x1d4   : > { %14416 = vst [vmem:[#allocation21_spill] sm:$0xff] %v12531_v0  ;;  %v12534_v31 = vld.sshfl [vmem:[#allocation1 + $0x28] sm:$0xff pattern:$0x73625140] }
 0x1d5   : > { %1824 = vst [vmem:[#allocation3 + $0x2c0] sm:$0xc0] %v1692_v18  ;;  %v12536_v43 = vld.sshfl [vmem:[#allocation1 + $0x30] sm:$0xff pattern:$0x73625140]  ;;  %v12547_v18 = vadd.f32 %v8726_v61, %v12478_v22 }
 0x1d6   : > { %14417 = vst [vmem:[#allocation22_spill] sm:$0xff] %v12534_v31  ;;  %v12538_v59 = vld.sshfl [vmem:[#allocation1 + $0x38] sm:$0xff pattern:$0x73625140] }
 0x1d7   : > { %14418 = vst [vmem:[#allocation23_spill] sm:$0xff] %v12536_v43  ;;  %v1699_v21 = vld.sshfl [vmem:[#allocation1] sm:$0xff pattern:$0x73625140]  ;;  %v12551_v43 = vadd.f32 %v8645_v6, %v859_v37  ;;  %vm1910_vm0 = vcmp.ge.f32.partialorder %v12547_v18, 1.0 }
 0x1d8   : > { %14419 = vst [vmem:[#allocation24_spill] sm:$0xff] %v12538_v59  ;;  %v1700_v3 = vld.sshfl [vmem:[#allocation1 + $0x8] sm:$0xff pattern:$0x73625140]  ;;  %v1847_v59 = vsub.f32 1.0, %v12407_v28  ;;  %v12558_v22 = vsel %vm1910_vm0, 1.0, %v14407_v11 }
 0x1d9   : > { %1020 = vst [vmem:[#allocation1 + $0x21] ss:$4 sm:$0xff] %v12529_v23  ;;  %v1701_v0 = vld.sshfl [vmem:[#allocation1 + $0x10] sm:$0xff pattern:$0x73625140]  ;;  %vm908_vm1 = vcmp.ge.f32.partialorder %v12551_v43, 1.0 }
 0x1da   : > { %v1702_v39 = vld.sshfl [vmem:[#allocation1 + $0x18] sm:$0xff pattern:$0x73625140]  ;;  %1829 = vst [vmem:[#allocation3 + $0x230] sm:$0xc0] %v1699_v21  ;;  %v1863_v31 = vmul.f32 %v1847_v59, %v12396_v47  ;;  %v1168_v28 = vsub.f32 1.0, %v12305_v63 }
 0x1db   : > { %1707 = vst [vmem:[#allocation1 + $0x3] ss:$4 sm:$0xff] %v12541_v33  ;;  %v12571_v59 = vsel %vm908_vm1, 1.0, %v14407_v11 }
 0x1dc   : > { %1830 = vst [vmem:[#allocation3 + $0x240] sm:$0xc0] %v1700_v3  ;;  %v12563_v47 = vadd.f32 %v8728_v8, %v1863_v31  ;;  %v1184_v32 = vmul.f32 %v1168_v28, %v12282_v29  ;;  %v8663_v3 = vld [vmem:[%s11924_s29 + $0x108] sm:$0xff]  ;;  %v1865_v31 = vmul.f32 %v1849_v49, %v12413_v52  ;;  %v8730_v8 = vld [vmem:[%s11924_s29 + $0x220] sm:$0xff] }
 0x1dd   : > { %1831 = vst [vmem:[#allocation3 + $0x90] sm:$0xc0] %v1701_v0 }
 0x1de   : > { %1832 = vst [vmem:[#allocation3 + $0x3a0] sm:$0xc0] %v1702_v39  ;;  %vm1912_vm2 = vcmp.ge.f32.partialorder %v12563_v47, 1.0  ;;  %v12589_v29 = vadd.f32 %v8730_v8, %v1865_v31 }
 0x1df   : > { %808 = vst [vmem:[#allocation3 + $0xb0] sm:$0x3] %v12230_v14 }
 0x1e0   : > { %v12566_v54 = vld.sshfl [vmem:[#allocation1 + $0x20] sm:$0xff pattern:$0x73625140]  ;;  %v12568_v39 = vld.sshfl [vmem:[#allocation1 + $0x28] sm:$0xff pattern:$0x73625140] }
 0x1e1   : > { %14420 = vst [vmem:[#allocation25_spill] sm:$0xff] %v12568_v39  ;;  %v12573_v63 = vld.sshfl [vmem:[#allocation1 + $0x30] sm:$0xff pattern:$0x73625140]  ;;  %v12586_v39 = vsel %vm1912_vm2, 1.0, %v14407_v11  ;;  %vm1914_vm4 = vcmp.ge.f32.partialorder %v12589_v29, 1.0 }
 0x1e2   : > { %v1709_v37 = vld.sshfl [vmem:[#allocation1] sm:$0xff pattern:$0x73625140]  ;;  %v1710_v61 = vld.sshfl [vmem:[#allocation1 + $0x8] sm:$0xff pattern:$0x73625140] }
 0x1e3   : > { %v1711_v6 = vld.sshfl [vmem:[#allocation1 + $0x10] sm:$0xff pattern:$0x73625140]  ;;  %v1712_v0 = vld.sshfl [vmem:[#allocation1 + $0x18] sm:$0xff pattern:$0x73625140] }
 0x1e4   : > { %1974 = vst [vmem:[#allocation1] ss:$4 sm:$0xff] %v12558_v22  ;;  %v12576_v21 = vld.sshfl [vmem:[#allocation1 + $0x38] sm:$0xff pattern:$0x73625140] }
 0x1e5   : > { %1837 = vst [vmem:[#allocation3 + $0x358] sm:$0xc0] %v1709_v37  ;;  %v12583_v37 = vadd.f32 %v8663_v3, %v1184_v32 }
 0x1e6   : > { %14421 = vst [vmem:[#allocation26_spill] sm:$0xff] %v12573_v63 }
 0x1e7   : > { %1838 = vst [vmem:[#allocation3 + $0x268] sm:$0xc0] %v1710_v61  ;;  %vm1233_vm3 = vcmp.ge.f32.partialorder %v12583_v37, 1.0 }
 0x1e8   : > { %14422 = vst [vmem:[#allocation27_spill] sm:$0xff] %v12576_v21  ;;  %v12599_v32 = vsel %vm1233_vm3, 1.0, %v14407_v11  ;;  %v1186_v21 = vmul.f32 %v1170_v34, %v12336_v5  ;;  %v8734_v5 = vld [vmem:[%s11924_s29 + $0x240] sm:$0xff] }
 0x1e9   : > { %1839 = vst [vmem:[#allocation3 + $0x350] sm:$0xc0] %v1711_v6  ;;  %v1851_v6 = vsub.f32 1.0, %v12460_v56  ;;  %v8732_v56 = vld [vmem:[%s11924_s29 + $0x230] sm:$0xff] }
 0x1ea   : > { %1840 = vst [vmem:[#allocation3 + $0x188] sm:$0xc0] %v1712_v0 }
 0x1eb   : > { %1030 = vst [vmem:[#allocation1 + $0x21] ss:$4 sm:$0xff] %v12571_v59  ;;  %v1977_v28 = vld.sshfl [vmem:[#allocation1] sm:$0xff pattern:$0x73625140]  ;;  %v1867_v3 = vmul.f32 %v1851_v6, %v12441_v9 }
 0x1ec   : > { %v1978_v61 = vld.sshfl [vmem:[#allocation1 + $0x8] sm:$0xff pattern:$0x73625140]  ;;  %v1979_v52 = vld.sshfl [vmem:[#allocation1 + $0x10] sm:$0xff pattern:$0x73625140] }
 0x1ed   : > { %v1980_v49 = vld.sshfl [vmem:[#allocation1 + $0x18] sm:$0xff pattern:$0x73625140]  ;;  %2119 = vst [vmem:[#allocation3 + $0x130] sm:$0x3] %v1977_v28  ;;  %v12615_v9 = vadd.f32 %v8732_v56, %v1867_v3 }
 0x1ee   : > { %1985 = vst [vmem:[#allocation1] ss:$4 sm:$0xff] %v12586_v39 }
 0x1ef   : > { %2120 = vst [vmem:[#allocation3 + $0x200] sm:$0x3] %v1978_v61  ;;  %v12610_v61 = vsel %vm1914_vm4, 1.0, %v14407_v11  ;;  %vm1916_vm5 = vcmp.ge.f32.partialorder %v12615_v9, 1.0 }
 0x1f0   : > { %2121 = vst [vmem:[#allocation3 + $0x318] sm:$0x3] %v1979_v52  ;;  %v12625_v34 = vsel %vm1916_vm5, 1.0, %v14407_v11 }
 0x1f1   : > { %2122 = vst [vmem:[#allocation3 + $0x220] sm:$0x3] %v1980_v49 }
 0x1f2   : > { %v12596_v0 = vld.sshfl [vmem:[#allocation1 + $0x20] sm:$0xff pattern:$0x73625140]  ;;  %v12603_v31 = vld.sshfl [vmem:[#allocation1 + $0x28] sm:$0xff pattern:$0x73625140] }
 0x1f3   : > { %14423 = vst [vmem:[#allocation28_spill] sm:$0xff] %v12596_v0  ;;  %v12605_v8 = vld.sshfl [vmem:[#allocation1 + $0x30] sm:$0xff pattern:$0x73625140] }
 0x1f4   : > { %14424 = vst [vmem:[#allocation29_spill] sm:$0xff] %v12603_v31  ;;  %v12607_v28 = vld.sshfl [vmem:[#allocation1 + $0x38] sm:$0xff pattern:$0x73625140]  ;;  %v1853_v31 = vsub.f32 1.0, %v12474_v48 }
 0x1f5   : > { %14425 = vst [vmem:[#allocation30_spill] sm:$0xff] %v12605_v8  ;;  %v1987_v52 = vld.sshfl [vmem:[#allocation1] sm:$0xff pattern:$0x73625140] }
 0x1f6   : > { %14426 = vst [vmem:[#allocation31_spill] sm:$0xff] %v12607_v28  ;;  %v1988_v0 = vld.sshfl [vmem:[#allocation1 + $0x8] sm:$0xff pattern:$0x73625140]  ;;  %v12619_v28 = vadd.f32 %v8665_v25, %v1186_v21  ;;  %v1869_v8 = vmul.f32 %v1853_v31, %v12463_v27  ;;  %v1855_v25 = vsub.f32 1.0, %v12492_v20 }
 0x1f7   : > { %1299 = vst [vmem:[#allocation1 + $0x22] ss:$4 sm:$0xff] %v12599_v32  ;;  %v1989_v49 = vld.sshfl [vmem:[#allocation1 + $0x10] sm:$0xff pattern:$0x73625140]  ;;  %v8736_v20 = vld [vmem:[%s11924_s29 + $0x250] sm:$0xff] }
 0x1f8   : > { %v1990_v6 = vld.sshfl [vmem:[#allocation1 + $0x18] sm:$0xff pattern:$0x73625140]  ;;  %2127 = vst [vmem:[#allocation3 + $0x328] sm:$0x3] %v1987_v52  ;;  %vm1235_vm6 = vcmp.ge.f32.partialorder %v12619_v28, 1.0 }
 0x1f9   : > { %1995 = vst [vmem:[#allocation1] ss:$4 sm:$0xff] %v12610_v61  ;;  %v12637_v31 = vsel %vm1235_vm6, 1.0, %v14407_v11 }
 0x1fa   : > { %2128 = vst [vmem:[#allocation3 + $0x260] sm:$0x3] %v1988_v0  ;;  %v12628_v0 = vadd.f32 %v8734_v5, %v1869_v8  ;;  %v1871_v8 = vmul.f32 %v1855_v25, %v12481_v38 }
 0x1fb   : > { %2129 = vst [vmem:[#allocation3 + $0x3b8] sm:$0x3] %v1989_v49  ;;  %v2183_v49 = vsub.f32 1.0, %v12558_v22 }
 0x1fc   : > { %2130 = vst [vmem:[#allocation3 + $0x2b8] sm:$0x3] %v1990_v6  ;;  %vm1918_vm7 = vcmp.ge.f32.partialorder %v12628_v0, 1.0  ;;  %v1857_v6 = vsub.f32 1.0, %v12519_v30 }
 0x1fd   : > { %v12648_v5 = vsel %vm1918_vm7, 1.0, %v14407_v11  ;;  %v12653_v38 = vmul.f32 %v2183_v49, %v12547_v18  ;;  %809 = vst [vmem:[#allocation3 + $0x1e0] sm:$0x3] %v12232_v35 }
 0x1fe   : > { %v1304_v63 = vld.sshfl [vmem:[#allocation1 + $0x20] sm:$0xff pattern:$0x73625140]  ;;  %v12632_v27 = vld.sshfl [vmem:[#allocation1 + $0x28] sm:$0xff pattern:$0x73625140] }
 0x1ff   : > { %1446 = vst [vmem:[#allocation3 + $0x50] sm:$0x30] %v1304_v63  ;;  %v12634_v63 = vld.sshfl [vmem:[#allocation1 + $0x30] sm:$0xff pattern:$0x73625140] }
 0x200   : > { %v1997_v48 = vld.sshfl [vmem:[#allocation1] sm:$0xff pattern:$0x73625140]  ;;  %v1998_v3 = vld.sshfl [vmem:[#allocation1 + $0x8] sm:$0xff pattern:$0x73625140] }
 0x201   : > { %v1999_v21 = vld.sshfl [vmem:[#allocation1 + $0x10] sm:$0xff pattern:$0x73625140]  ;;  %v2000_v56 = vld.sshfl [vmem:[#allocation1 + $0x18] sm:$0xff pattern:$0x73625140] }
 0x202   : > { %2005 = vst [vmem:[#allocation1] ss:$4 sm:$0xff] %v12625_v34  ;;  %v12639_v52 = vld.sshfl [vmem:[#allocation1 + $0x38] sm:$0xff pattern:$0x73625140] }
 0x203   : > { %2135 = vst [vmem:[#allocation3 + $0x288] sm:$0x3] %v1997_v48  ;;  %v1172_v48 = vsub.f32 1.0, %v12377_v17  ;;  %v1873_v17 = vmul.f32 %v1857_v6, %v12496_v12  ;;  %v1174_v12 = vsub.f32 1.0, %v12428_v1  ;;  %v8669_v1 = vld [vmem:[%s11924_s29 + $0x138] sm:$0xff] }
 0x204   : > { %14427 = vst [vmem:[#allocation32_spill] sm:$0xff] %v12634_v63 }
 0x205   : > { %2136 = vst [vmem:[#allocation3 + $0x3a8] sm:$0x3] %v1998_v3  ;;  %v1188_v30 = vmul.f32 %v1172_v48, %v12355_v51 }
 0x206   : > { %14428 = vst [vmem:[#allocation33_spill] sm:$0xff] %v12639_v52  ;;  %v8667_v52 = vld [vmem:[%s11924_s29 + $0x128] sm:$0xff] }
 0x207   : > { %2137 = vst [vmem:[#allocation3 + $0x3c8] sm:$0x3] %v1999_v21  ;;  %v12663_v63 = vadd.f32 %v8667_v52, %v1188_v30 }
 0x208   : > { %2138 = vst [vmem:[#allocation3 + $0x160] sm:$0x3] %v2000_v56  ;;  %v12655_v56 = vadd.f32 %v8736_v20, %v1871_v8  ;;  %v12668_v8 = vadd.f32 %v8738_v36, %v1873_v17 }
 0x209   : > { %1309 = vst [vmem:[#allocation1 + $0x22] ss:$4 sm:$0xff] %v12637_v31  ;;  %v2007_v3 = vld.sshfl [vmem:[#allocation1] sm:$0xff pattern:$0x73625140]  ;;  %vm1237_vm9 = vcmp.ge.f32.partialorder %v12663_v63, 1.0 }
 0x20a   : > { %v2008_v21 = vld.sshfl [vmem:[#allocation1 + $0x8] sm:$0xff pattern:$0x73625140]  ;;  %v2009_v22 = vld.sshfl [vmem:[#allocation1 + $0x10] sm:$0xff pattern:$0x73625140] }
 0x20b   : > { %v2010_v25 = vld.sshfl [vmem:[#allocation1 + $0x18] sm:$0xff pattern:$0x73625140]  ;;  %2143 = vst [vmem:[#allocation3 + $0x1b0] sm:$0x3] %v2007_v3  ;;  %vm1920_vm8 = vcmp.ge.f32.partialorder %v12655_v56, 1.0 }
 0x20c   : > { %2015 = vst [vmem:[#allocation1] ss:$4 sm:$0xff] %v12648_v5  ;;  %v12666_v18 = vsel %vm1920_vm8, 1.0, %v14407_v11  ;;  %v1859_v3 = vsub.f32 1.0, %v12541_v33  ;;  %vm1922_vm10 = vcmp.ge.f32.partialorder %v12668_v8, 1.0  ;;  %v12676_v52 = vsel %vm1237_vm9, 1.0, %v14407_v11 }
 0x20d   : > { %2144 = vst [vmem:[#allocation3 + $0x1c8] sm:$0x3] %v2008_v21  ;;  %v8740_v33 = vld [vmem:[%s11924_s29 + $0x270] sm:$0xff]  ;;  %v12689_v17 = vsel %vm1922_vm10, 1.0, %v14407_v11 }
 0x20e   : > { %2145 = vst [vmem:[#allocation3 + $0x2d0] sm:$0x3] %v2009_v22  ;;  %v1875_v21 = vmul.f32 %v1859_v3, %v12522_v44  ;;  %v1190_v44 = vmul.f32 %v1174_v12, %v12400_v26  ;;  %v8671_v26 = vld [vmem:[%s11924_s29 + $0x148] sm:$0xff] }
 0x20f   : > { %2146 = vst [vmem:[#allocation3 + $0x1d0] sm:$0x3] %v2010_v25 }
 0x210   : > { %v12678_v6 = vld.sshfl [vmem:[#allocation1 + $0x20] sm:$0xff pattern:$0x73625140]  ;;  %v12682_v22 = vld.sshfl [vmem:[#allocation1 + $0x28] sm:$0xff pattern:$0x73625140]  ;;  %v12697_v3 = vadd.f32 %v8669_v1, %v1190_v44 }
 0x211   : > { %14429 = vst [vmem:[#allocation34_spill] sm:$0xff] %v12682_v22  ;;  %v12684_v25 = vld.sshfl [vmem:[#allocation1 + $0x30] sm:$0xff pattern:$0x73625140] }
 0x212   : > { %14430 = vst [vmem:[#allocation35_spill] sm:$0xff] %v12684_v25  ;;  %v12686_v30 = vld.sshfl [vmem:[#allocation1 + $0x38] sm:$0xff pattern:$0x73625140]  ;;  %vm1239_vm12 = vcmp.ge.f32.partialorder %v12697_v3, 1.0 }
 0x213   : > { %v2017_v20 = vld.sshfl [vmem:[#allocation1] sm:$0xff pattern:$0x73625140]  ;;  %v2018_v49 = vld.sshfl [vmem:[#allocation1 + $0x8] sm:$0xff pattern:$0x73625140] }
 0x214   : > { %v2019_v51 = vld.sshfl [vmem:[#allocation1 + $0x10] sm:$0xff pattern:$0x73625140]  ;;  %v2020_v48 = vld.sshfl [vmem:[#allocation1 + $0x18] sm:$0xff pattern:$0x73625140] }
 0x215   : > { %2025 = vst [vmem:[#allocation1] ss:$4 sm:$0xff] %v12666_v18  ;;  %v8758_v25 = vld [vmem:[%s11924_s29 + $0x280] sm:$0xff] }
 0x216   : > { %2151 = vst [vmem:[#allocation3 + $0x1f8] sm:$0x3] %v2017_v20 }
 0x217   : > { %2152 = vst [vmem:[#allocation3 + $0x238] sm:$0x3] %v2018_v49  ;;  %v12694_v49 = vadd.f32 %v8740_v33, %v1875_v21 }
 0x218   : > { %2153 = vst [vmem:[#allocation3 + $0x398] sm:$0x3] %v2019_v51 }
 0x219   : > { %2154 = vst [vmem:[#allocation3 + $0x390] sm:$0x3] %v2020_v48  ;;  %vm1924_vm11 = vcmp.ge.f32.partialorder %v12694_v49, 1.0 }
 0x21a   : > { %14431 = vst [vmem:[#allocation36_spill] sm:$0xff] %v12686_v30  ;;  %v1176_v30 = vsub.f32 1.0, %v12446_v13  ;;  %v12703_v22 = vsel %vm1924_vm11, 1.0, %v14407_v11  ;;  %v2185_v13 = vsub.f32 1.0, %v12586_v39 }
 0x21b   : > { %1319 = vst [vmem:[#allocation1 + $0x22] ss:$4 sm:$0xff] %v12676_v52 }
 0x21c   : > { %v2027_v36 = vld.sshfl [vmem:[#allocation1] sm:$0xff pattern:$0x73625140]  ;;  %v2028_v20 = vld.sshfl [vmem:[#allocation1 + $0x8] sm:$0xff pattern:$0x73625140]  ;;  %v1192_v33 = vmul.f32 %v1176_v30, %v12423_v10  ;;  %v2201_v39 = vmul.f32 %v2185_v13, %v12563_v47 }
 0x21d   : > { %v2029_v51 = vld.sshfl [vmem:[#allocation1 + $0x10] sm:$0xff pattern:$0x73625140]  ;;  %v2030_v48 = vld.sshfl [vmem:[#allocation1 + $0x18] sm:$0xff pattern:$0x73625140] }
 0x21e   : > { %2035 = vst [vmem:[#allocation1] ss:$4 sm:$0xff] %v12689_v17  ;;  %v12725_v10 = vsel %vm1239_vm12, 1.0, %v14407_v11  ;;  %v2187_v47 = vsub.f32 1.0, %v12610_v61 }
 0x21f   : > { %2159 = vst [vmem:[#allocation3 + $0xf0] sm:$0x3] %v2027_v36 }
 0x220   : > { %2160 = vst [vmem:[#allocation3 + $0x180] sm:$0x3] %v2028_v20  ;;  %v12710_v20 = vadd.f32 %v8758_v25, %v12653_v38  ;;  %v8760_v25 = vld [vmem:[%s11924_s29 + $0x290] sm:$0xff]  ;;  %v2203_v13 = vmul.f32 %v2187_v47, %v12589_v29 }
 0x221   : > { %2161 = vst [vmem:[#allocation3 + $0x170] sm:$0x3] %v2029_v51 }
 0x222   : > { %2162 = vst [vmem:[#allocation3 + $0x3d0] sm:$0x3] %v2030_v48  ;;  %v12714_v44 = vld.sshfl [vmem:[#allocation1 + $0x20] sm:$0xff pattern:$0x73625140]  ;;  %v12720_v48 = vadd.f32 %v8671_v26, %v1192_v33  ;;  %vm2248_vm13 = vcmp.ge.f32.partialorder %v12710_v20, 1.0 }
 0x223   : > { %v12716_v51 = vld.sshfl [vmem:[#allocation1 + $0x28] sm:$0xff pattern:$0x73625140]  ;;  %v12718_v14 = vld.sshfl [vmem:[#allocation1 + $0x30] sm:$0xff pattern:$0x73625140] }
 0x224   : > { %14432 = vst [vmem:[#allocation37_spill] sm:$0xff] %v12716_v51  ;;  %v12727_v38 = vld.sshfl [vmem:[#allocation1 + $0x38] sm:$0xff pattern:$0x73625140]  ;;  %v12734_v30 = vsel %vm2248_vm13, 1.0, %v14407_v11  ;;  %vm1241_vm14 = vcmp.ge.f32.partialorder %v12720_v48, 1.0 }
 0x225   : > { %v2037_v12 = vld.sshfl [vmem:[#allocation1] sm:$0xff pattern:$0x73625140]  ;;  %v2038_v21 = vld.sshfl [vmem:[#allocation1 + $0x8] sm:$0xff pattern:$0x73625140] }
 0x226   : > { %v2039_v1 = vld.sshfl [vmem:[#allocation1 + $0x10] sm:$0xff pattern:$0x73625140]  ;;  %v2040_v36 = vld.sshfl [vmem:[#allocation1 + $0x18] sm:$0xff pattern:$0x73625140] }
 0x227   : > { %2045 = vst [vmem:[#allocation1] ss:$4 sm:$0xff] %v12703_v22  ;;  %v8764_v51 = vld [vmem:[%s11924_s29 + $0x2b0] sm:$0xff] }
 0x228   : > { %2167 = vst [vmem:[#allocation3 + $0x78] sm:$0x3] %v2037_v12 }
 0x229   : > { %14433 = vst [vmem:[#allocation38_spill] sm:$0xff] %v12718_v14 }
 0x22a   : > { %2168 = vst [vmem:[#allocation3 + $0x308] sm:$0x3] %v2038_v21 }
 0x22b   : > { %14434 = vst [vmem:[#allocation39_spill] sm:$0xff] %v12727_v38  ;;  %v12738_v38 = vadd.f32 %v8760_v25, %v2201_v39  ;;  %v8762_v39 = vld [vmem:[%s11924_s29 + $0x2a0] sm:$0xff] }
 0x22c   : > { %2169 = vst [vmem:[#allocation3 + $0x370] sm:$0x3] %v2039_v1  ;;  %v1178_v1 = vsub.f32 1.0, %v12508_v58  ;;  %v12763_v29 = vadd.f32 %v8762_v39, %v2203_v13  ;;  %v2191_v39 = vsub.f32 1.0, %v12648_v5 }
 0x22d   : > { %2170 = vst [vmem:[#allocation3 + $0xc8] sm:$0x3] %v2040_v36  ;;  %v12744_v36 = vsel %vm1241_vm14, 1.0, %v14407_v11  ;;  %vm2250_vm15 = vcmp.ge.f32.partialorder %v12738_v38, 1.0 }
 0x22e   : > { %1329 = vst [vmem:[#allocation1 + $0x22] ss:$4 sm:$0xff] %v12725_v10  ;;  %v2047_v26 = vld.sshfl [vmem:[#allocation1] sm:$0xff pattern:$0x73625140]  ;;  %v12758_v58 = vsel %vm2250_vm15, 1.0, %v14407_v11  ;;  %v2207_v5 = vmul.f32 %v2191_v39, %v12628_v0 }
 0x22f   : > { %v2048_v12 = vld.sshfl [vmem:[#allocation1 + $0x8] sm:$0xff pattern:$0x73625140]  ;;  %v2049_v21 = vld.sshfl [vmem:[#allocation1 + $0x10] sm:$0xff pattern:$0x73625140] }
 0x230   : > { %v2050_v33 = vld.sshfl [vmem:[#allocation1 + $0x18] sm:$0xff pattern:$0x73625140]  ;;  %2175 = vst [vmem:[#allocation3 + $0x148] sm:$0x3] %v2047_v26  ;;  %vm2252_vm0 = vcmp.ge.f32.partialorder %v12763_v29, 1.0 }
 0x231   : > { %2313 = vst [vmem:[#allocation1 + $0x1] ss:$4 sm:$0xff] %v12734_v30  ;;  %v1180_v0 = vsub.f32 1.0, %v12529_v23  ;;  %v2522_v39 = vsub.f32 1.0, %v12734_v30 }
 0x232   : > { %2176 = vst [vmem:[#allocation3 + $0xf8] sm:$0x3] %v2048_v12  ;;  %v8673_v12 = vld [vmem:[%s11924_s29 + $0x158] sm:$0xff] }
 0x233   : > { %2177 = vst [vmem:[#allocation3 + $0x68] sm:$0x3] %v2049_v21  ;;  %v1196_v23 = vmul.f32 %v1180_v0, %v12515_v45  ;;  %v8770_v45 = vld [vmem:[%s11924_s29 + $0x2e0] sm:$0xff] }
 0x234   : > { %2178 = vst [vmem:[#allocation3] sm:$0x3] %v2050_v33 }
 0x235   : > { %v12747_v35 = vld.sshfl [vmem:[#allocation1 + $0x20] sm:$0xff pattern:$0x73625140]  ;;  %v12751_v61 = vld.sshfl [vmem:[#allocation1 + $0x28] sm:$0xff pattern:$0x73625140] }
 0x236   : > { %14435 = vst [vmem:[#allocation40_spill] sm:$0xff] %v12747_v35  ;;  %v12753_v25 = vld.sshfl [vmem:[#allocation1 + $0x30] sm:$0xff pattern:$0x73625140]  ;;  %v1194_v35 = vmul.f32 %v1178_v1, %v12485_v15  ;;  %v12773_v15 = vsel %vm2252_vm0, 1.0, %v14407_v11 }
 0x237   : > { %14436 = vst [vmem:[#allocation41_spill] sm:$0xff] %v12751_v61  ;;  %v12755_v26 = vld.sshfl [vmem:[#allocation1 + $0x38] sm:$0xff pattern:$0x73625140]  ;;  %v2189_v61 = vsub.f32 1.0, %v12625_v34 }
 0x238   : > { %14437 = vst [vmem:[#allocation42_spill] sm:$0xff] %v12753_v25  ;;  %v2316_v21 = vld.sshfl [vmem:[#allocation1] sm:$0xff pattern:$0x73625140] }
 0x239   : > { %14438 = vst [vmem:[#allocation43_spill] sm:$0xff] %v12755_v26  ;;  %v2317_v14 = vld.sshfl [vmem:[#allocation1 + $0x8] sm:$0xff pattern:$0x73625140]  ;;  %v12767_v26 = vadd.f32 %v8673_v12, %v1194_v35  ;;  %v2205_v25 = vmul.f32 %v2189_v61, %v12615_v9 }
 0x23a   : > { %1339 = vst [vmem:[#allocation1 + $0x22] ss:$4 sm:$0xff] %v12744_v36  ;;  %v2318_v33 = vld.sshfl [vmem:[#allocation1 + $0x10] sm:$0xff pattern:$0x73625140] }
 0x23b   : > { %v2319_v47 = vld.sshfl [vmem:[#allocation1 + $0x18] sm:$0xff pattern:$0x73625140]  ;;  %2458 = vst [vmem:[#allocation3 + $0x130] sm:$0xc] %v2316_v21  ;;  %vm1243_vm1 = vcmp.ge.f32.partialorder %v12767_v26, 1.0  ;;  %v12777_v13 = vadd.f32 %v8764_v51, %v2205_v25 }
 0x23c   : > { %2324 = vst [vmem:[#allocation1 + $0x1] ss:$4 sm:$0xff] %v12758_v58  ;;  %v8766_v25 = vld [vmem:[%s11924_s29 + $0x2c0] sm:$0xff] }
 0x23d   : > { %2459 = vst [vmem:[#allocation3 + $0x200] sm:$0xc] %v2317_v14  ;;  %vm2254_vm2 = vcmp.ge.f32.partialorder %v12777_v13, 1.0 }
 0x23e   : > { %2460 = vst [vmem:[#allocation3 + $0x318] sm:$0xc] %v2318_v33  ;;  %v12797_v21 = vsel %vm2254_vm2, 1.0, %v14407_v11 }
 0x23f   : > { %2461 = vst [vmem:[#allocation3 + $0x220] sm:$0xc] %v2319_v47 }
 0x240   : > { %810 = vst [vmem:[#allocation3 + $0x1f0] sm:$0x3] %v12234_v41  ;;  %v12788_v41 = vsel %vm1243_vm1, 1.0, %v14407_v11 }
 0x241   : > { %v12781_v9 = vld.sshfl [vmem:[#allocation1 + $0x20] sm:$0xff pattern:$0x73625140]  ;;  %v12783_v61 = vld.sshfl [vmem:[#allocation1 + $0x28] sm:$0xff pattern:$0x73625140] }
 0x242   : > { %v12785_v12 = vld.sshfl [vmem:[#allocation1 + $0x30] sm:$0xff pattern:$0x73625140]  ;;  %v12790_v51 = vld.sshfl [vmem:[#allocation1 + $0x38] sm:$0xff pattern:$0x73625140] }
 0x243   : > { %v2326_v34 = vld.sshfl [vmem:[#allocation1] sm:$0xff pattern:$0x73625140]  ;;  %v2327_v1 = vld.sshfl [vmem:[#allocation1 + $0x8] sm:$0xff pattern:$0x73625140] }
 0x244   : > { %v2328_v14 = vld.sshfl [vmem:[#allocation1 + $0x10] sm:$0xff pattern:$0x73625140]  ;;  %v2329_v35 = vld.sshfl [vmem:[#allocation1 + $0x18] sm:$0xff pattern:$0x73625140] }
 0x245   : > { %2334 = vst [vmem:[#allocation1 + $0x1] ss:$4 sm:$0xff] %v12773_v15 }
 0x246   : > { %2466 = vst [vmem:[#allocation3 + $0x328] sm:$0xc] %v2326_v34  ;;  %v12800_v34 = vadd.f32 %v8766_v25, %v2207_v5 }
 0x247   : > { %2467 = vst [vmem:[#allocation3 + $0x260] sm:$0xc] %v2327_v1 }
 0x248   : > { %14439 = vst [vmem:[#allocation44_spill] sm:$0xff] %v12790_v51  ;;  %vm2256_vm3 = vcmp.ge.f32.partialorder %v12800_v34, 1.0 }
 0x249   : > { %2468 = vst [vmem:[#allocation3 + $0x3b8] sm:$0xc] %v2328_v14  ;;  %v2193_v14 = vsub.f32 1.0, %v12666_v18  ;;  %v12811_v5 = vsel %vm2256_vm3, 1.0, %v14407_v11  ;;  %v8675_v18 = vld [vmem:[%s11924_s29 + $0x168] sm:$0xff] }
 0x24a   : > { %2469 = vst [vmem:[#allocation3 + $0x2b8] sm:$0xc] %v2329_v35  ;;  %v8768_v35 = vld [vmem:[%s11924_s29 + $0x2d0] sm:$0xff] }
 0x24b   : > { %1349 = vst [vmem:[#allocation1 + $0x22] ss:$4 sm:$0xff] %v12788_v41 }
 0x24c   : > { %811 = vst [vmem:[#allocation3 + $0x10] sm:$0x3] %v12239_v4  ;;  %v2336_v33 = vld.sshfl [vmem:[#allocation1] sm:$0xff pattern:$0x73625140]  ;;  %v2209_v4 = vmul.f32 %v2193_v14, %v12655_v56  ;;  %v2197_v14 = vsub.f32 1.0, %v12703_v22 }
 0x24d   : > { %v2337_v47 = vld.sshfl [vmem:[#allocation1 + $0x8] sm:$0xff pattern:$0x73625140]  ;;  %v2338_v1 = vld.sshfl [vmem:[#allocation1 + $0x10] sm:$0xff pattern:$0x73625140] }
 0x24e   : > { %v2339_v51 = vld.sshfl [vmem:[#allocation1 + $0x18] sm:$0xff pattern:$0x73625140]  ;;  %2474 = vst [vmem:[#allocation3 + $0x288] sm:$0xc] %v2336_v33  ;;  %v12819_v56 = vadd.f32 %v8768_v35, %v2209_v4 }
 0x24f   : > { %2344 = vst [vmem:[#allocation1 + $0x1] ss:$4 sm:$0xff] %v12797_v21 }
 0x250   : > { %2475 = vst [vmem:[#allocation3 + $0x3a8] sm:$0xc] %v2337_v47  ;;  %v12816_v47 = vmul.f32 %v2522_v39, %v12710_v20  ;;  %vm2258_vm4 = vcmp.ge.f32.partialorder %v12819_v56, 1.0  ;;  %v1182_v20 = vsub.f32 1.0, %v12571_v59 }
 0x251   : > { %2476 = vst [vmem:[#allocation3 + $0x3c8] sm:$0xc] %v2338_v1  ;;  %v12831_v0 = vsel %vm2258_vm4, 1.0, %v14407_v11 }
 0x252   : > { %2477 = vst [vmem:[#allocation3 + $0x160] sm:$0xc] %v2339_v51  ;;  %v1198_v39 = vmul.f32 %v1182_v20, %v12551_v43  ;;  %v12841_v22 = vld.sshfl [vmem:[#allocation1 + $0x28] sm:$0xff pattern:$0x73625140] }
 0x253   : > { %816 = vst [vmem:[#allocation3 + $0x208] sm:$0x3] %v12261_v40  ;;  %v2195_v40 = vsub.f32 1.0, %v12689_v17  ;;  %v8677_v17 = vld [vmem:[%s11924_s29 + $0x178] sm:$0xff] }
 0x254   : > { %817 = vst [vmem:[#allocation3 + $0xd0] sm:$0x3] %v12266_v46  ;;  %v12823_v46 = vadd.f32 %v8675_v18, %v1196_v23  ;;  %v12845_v23 = vadd.f32 %v8677_v17, %v1198_v39  ;;  %v12850_v43 = vld.sshfl [vmem:[#allocation1 + $0x38] sm:$0xff pattern:$0x73625140] }
 0x255   : > { %v2211_v1 = vmul.f32 %v2195_v40, %v12668_v8  ;;  %14440 = vst [vmem:[#allocation45_spill] sm:$0xff] %v12850_v43  ;;  %v8772_v40 = vld [vmem:[%s11924_s29 + $0x2f0] sm:$0xff]  ;;  %v8790_v39 = vld [vmem:[%s11924_s29 + $0x300] sm:$0xff] }
 0x256   : > { %v2346_v25 = vld.sshfl [vmem:[#allocation1] sm:$0xff pattern:$0x73625140]  ;;  %v2347_v33 = vld.sshfl [vmem:[#allocation1 + $0x8] sm:$0xff pattern:$0x73625140] }
 0x257   : > { %v2348_v30 = vld.sshfl [vmem:[#allocation1 + $0x10] sm:$0xff pattern:$0x73625140]  ;;  %v2349_v51 = vld.sshfl [vmem:[#allocation1 + $0x18] sm:$0xff pattern:$0x73625140]  ;;  %v12836_v18 = vadd.f32 %v8770_v45, %v2211_v1 }
 0x258   : > { %2354 = vst [vmem:[#allocation1 + $0x1] ss:$4 sm:$0xff] %v12811_v5  ;;  %vm1245_vm5 = vcmp.ge.f32.partialorder %v12823_v46, 1.0  ;;  %vm1247_vm7 = vcmp.ge.f32.partialorder %v12845_v23, 1.0 }
 0x259   : > { %2482 = vst [vmem:[#allocation3 + $0x1b0] sm:$0xc] %v2346_v25  ;;  %v12839_v25 = vld.sshfl [vmem:[#allocation1 + $0x20] sm:$0xff pattern:$0x73625140]  ;;  %vm2260_vm6 = vcmp.ge.f32.partialorder %v12836_v18, 1.0 }
 0x25a   : > { %2483 = vst [vmem:[#allocation3 + $0x1c8] sm:$0xc] %v2347_v33  ;;  %v12843_v33 = vld.sshfl [vmem:[#allocation1 + $0x30] sm:$0xff pattern:$0x73625140]  ;;  %v12857_v20 = vsel %vm2260_vm6, 1.0, %v14407_v11 }
 0x25b   : > { %2484 = vst [vmem:[#allocation3 + $0x2d0] sm:$0xc] %v2348_v30  ;;  %v12848_v30 = vsel %vm1245_vm5, 1.0, %v14407_v11 }
 0x25c   : > { %2485 = vst [vmem:[#allocation3 + $0x1d0] sm:$0xc] %v2349_v51  ;;  %v2213_v51 = vmul.f32 %v2197_v14, %v12694_v49 }
 0x25d   : > { %1359 = vst [vmem:[#allocation1 + $0x22] ss:$4 sm:$0xff] %v12848_v30 }
 0x25e   : > { %818 = vst [vmem:[#allocation3 + $0x88] sm:$0x3] %v12268_v55  ;;  %v12861_v1 = vadd.f32 %v8772_v40, %v2213_v51  ;;  %v1507_v55 = vsub.f32 1.0, %v12599_v32 }
 0x25f   : > { %v2356_v4 = vld.sshfl [vmem:[#allocation1] sm:$0xff pattern:$0x73625140]  ;;  %v2357_v35 = vld.sshfl [vmem:[#allocation1 + $0x8] sm:$0xff pattern:$0x73625140] }
 0x260   : > { %v2358_v59 = vld.sshfl [vmem:[#allocation1 + $0x10] sm:$0xff pattern:$0x73625140]  ;;  %v2359_v8 = vld.sshfl [vmem:[#allocation1 + $0x18] sm:$0xff pattern:$0x73625140] }
 0x261   : > { %2364 = vst [vmem:[#allocation1 + $0x1] ss:$4 sm:$0xff] %v12831_v0  ;;  %vm2262_vm8 = vcmp.ge.f32.partialorder %v12861_v1, 1.0 }
 0x262   : > { %2490 = vst [vmem:[#allocation3 + $0x1f8] sm:$0xc] %v2356_v4  ;;  %v12866_v4 = vsel %vm1247_vm7, 1.0, %v14407_v11  ;;  %v12879_v40 = vsel %vm2262_vm8, 1.0, %v14407_v11 }
 0x263   : > { %2491 = vst [vmem:[#allocation3 + $0x238] sm:$0xc] %v2357_v35 }
 0x264   : > { %2492 = vst [vmem:[#allocation3 + $0x398] sm:$0xc] %v2358_v59  ;;  %v12868_v35 = vld.sshfl [vmem:[#allocation1 + $0x20] sm:$0xff pattern:$0x73625140] }
 0x265   : > { %2493 = vst [vmem:[#allocation3 + $0x390] sm:$0xc] %v2359_v8  ;;  %v12872_v59 = vld.sshfl [vmem:[#allocation1 + $0x28] sm:$0xff pattern:$0x73625140] }
 0x266   : > { %14441 = vst [vmem:[#allocation46_spill] sm:$0xff] %v12868_v35  ;;  %v12874_v8 = vld.sshfl [vmem:[#allocation1 + $0x30] sm:$0xff pattern:$0x73625140]  ;;  %v1523_v35 = vmul.f32 %v1507_v55, %v12583_v37  ;;  %v8792_v37 = vld [vmem:[%s11924_s29 + $0x310] sm:$0xff] }
 0x267   : > { %14442 = vst [vmem:[#allocation47_spill] sm:$0xff] %v12872_v59  ;;  %v12876_v51 = vld.sshfl [vmem:[#allocation1 + $0x38] sm:$0xff pattern:$0x73625140] }
 0x268   : > { %v2366_v45 = vld.sshfl [vmem:[#allocation1] sm:$0xff pattern:$0x73625140]  ;;  %v2367_v17 = vld.sshfl [vmem:[#allocation1 + $0x8] sm:$0xff pattern:$0x73625140] }
 0x269   : > { %v2368_v49 = vld.sshfl [vmem:[#allocation1 + $0x10] sm:$0xff pattern:$0x73625140]  ;;  %v2369_v14 = vld.sshfl [vmem:[#allocation1 + $0x18] sm:$0xff pattern:$0x73625140] }
 0x26a   : > { %2374 = vst [vmem:[#allocation1 + $0x1] ss:$4 sm:$0xff] %v12857_v20 }
 0x26b   : > { %2498 = vst [vmem:[#allocation3 + $0xf0] sm:$0xc] %v2366_v45  ;;  %v8695_v45 = vld [vmem:[%s11924_s29 + $0x188] sm:$0xff] }
 0x26c   : > { %2499 = vst [vmem:[#allocation3 + $0x180] sm:$0xc] %v2367_v17 }
 0x26d   : > { %2500 = vst [vmem:[#allocation3 + $0x170] sm:$0xc] %v2368_v49 }
 0x26e   : > { %2501 = vst [vmem:[#allocation3 + $0x3d0] sm:$0xc] %v2369_v14  ;;  %v12885_v14 = vadd.f32 %v8790_v39, %v12816_v47 }
 0x26f   : > { %14443 = vst [vmem:[#allocation48_spill] sm:$0xff] %v12874_v8  ;;  %v12889_v8 = vadd.f32 %v8695_v45, %v1523_v35  ;;  %v2526_v45 = vsub.f32 1.0, %v12773_v15  ;;  %v1509_v15 = vsub.f32 1.0, %v12637_v31 }
 0x270   : > { %14444 = vst [vmem:[#allocation49_spill] sm:$0xff] %v12876_v51  ;;  %v2524_v51 = vsub.f32 1.0, %v12758_v58  ;;  %vm2587_vm9 = vcmp.ge.f32.partialorder %v12885_v14, 1.0 }
 0x271   : > { %1369 = vst [vmem:[#allocation1 + $0x22] ss:$4 sm:$0xff] %v12866_v4  ;;  %v2376_v17 = vld.sshfl [vmem:[#allocation1] sm:$0xff pattern:$0x73625140]  ;;  %v12895_v55 = vsel %vm2587_vm9, 1.0, %v14407_v11 }
 0x272   : > { %v2377_v49 = vld.sshfl [vmem:[#allocation1 + $0x8] sm:$0xff pattern:$0x73625140]  ;;  %v2378_v32 = vld.sshfl [vmem:[#allocation1 + $0x10] sm:$0xff pattern:$0x73625140]  ;;  %v2540_v59 = vmul.f32 %v2524_v51, %v12738_v38 }
 0x273   : > { %v2379_v43 = vld.sshfl [vmem:[#allocation1 + $0x18] sm:$0xff pattern:$0x73625140]  ;;  %2506 = vst [vmem:[#allocation3 + $0x78] sm:$0xc] %v2376_v17  ;;  %vm1572_vm10 = vcmp.ge.f32.partialorder %v12889_v8, 1.0 }
 0x274   : > { %2384 = vst [vmem:[#allocation1 + $0x1] ss:$4 sm:$0xff] %v12879_v40  ;;  %v12899_v35 = vadd.f32 %v8792_v37, %v2540_v59  ;;  %v2542_v59 = vmul.f32 %v2526_v45, %v12763_v29  ;;  %v2528_v29 = vsub.f32 1.0, %v12797_v21 }
 0x275   : > { %2507 = vst [vmem:[#allocation3 + $0x308] sm:$0xc] %v2377_v49  ;;  %v12912_v49 = vsel %vm1572_vm10, 1.0, %v14407_v11 }
 0x276   : > { %2508 = vst [vmem:[#allocation3 + $0x370] sm:$0xc] %v2378_v32  ;;  %vm2589_vm11 = vcmp.ge.f32.partialorder %v12899_v35, 1.0  ;;  %v8794_v32 = vld [vmem:[%s11924_s29 + $0x320] sm:$0xff] }
 0x277   : > { %2509 = vst [vmem:[#allocation3 + $0xc8] sm:$0xc] %v2379_v43  ;;  %v12920_v37 = vsel %vm2589_vm11, 1.0, %v14407_v11 }
 0x278   : > { %819 = vst [vmem:[#allocation3 + $0x2f0] sm:$0x3] %v12270_v57  ;;  %v12903_v38 = vld.sshfl [vmem:[#allocation1 + $0x20] sm:$0xff pattern:$0x73625140] }
 0x279   : > { %v12905_v43 = vld.sshfl [vmem:[#allocation1 + $0x28] sm:$0xff pattern:$0x73625140]  ;;  %v12907_v51 = vld.sshfl [vmem:[#allocation1 + $0x30] sm:$0xff pattern:$0x73625140] }
 0x27a   : > { %14445 = vst [vmem:[#allocation50_spill] sm:$0xff] %v12905_v43  ;;  %v12909_v57 = vld.sshfl [vmem:[#allocation1 + $0x38] sm:$0xff pattern:$0x73625140] }
 0x27b   : > { %v2386_v47 = vld.sshfl [vmem:[#allocation1] sm:$0xff pattern:$0x73625140]  ;;  %v2387_v58 = vld.sshfl [vmem:[#allocation1 + $0x8] sm:$0xff pattern:$0x73625140] }
 0x27c   : > { %v2388_v39 = vld.sshfl [vmem:[#allocation1 + $0x10] sm:$0xff pattern:$0x73625140]  ;;  %v2389_v17 = vld.sshfl [vmem:[#allocation1 + $0x18] sm:$0xff pattern:$0x73625140] }
 0x27d   : > { %2652 = vst [vmem:[#allocation1 + $0x2] ss:$4 sm:$0xff] %v12895_v55 }
 0x27e   : > { %2514 = vst [vmem:[#allocation3 + $0x148] sm:$0xc] %v2386_v47  ;;  %v8697_v47 = vld [vmem:[%s11924_s29 + $0x198] sm:$0xff] }
 0x27f   : > { %14446 = vst [vmem:[#allocation51_spill] sm:$0xff] %v12907_v51  ;;  %v1525_v51 = vmul.f32 %v1509_v15, %v12619_v28  ;;  %v8796_v28 = vld [vmem:[%s11924_s29 + $0x330] sm:$0xff] }
 0x280   : > { %2515 = vst [vmem:[#allocation3 + $0xf8] sm:$0xc] %v2387_v58 }
 0x281   : > { %14447 = vst [vmem:[#allocation52_spill] sm:$0xff] %v12909_v57 }
 0x282   : > { %2516 = vst [vmem:[#allocation3 + $0x68] sm:$0xc] %v2388_v39  ;;  %v12925_v39 = vadd.f32 %v8794_v32, %v2542_v59 }
 0x283   : > { %2517 = vst [vmem:[#allocation3] sm:$0xc] %v2389_v17  ;;  %v12929_v17 = vadd.f32 %v8697_v47, %v1525_v51 }
 0x284   : > { %1638 = vst [vmem:[#allocation1 + $0x23] ss:$4 sm:$0xff] %v12912_v49  ;;  %v2655_v58 = vld.sshfl [vmem:[#allocation1] sm:$0xff pattern:$0x73625140]  ;;  %vm2591_vm12 = vcmp.ge.f32.partialorder %v12925_v39, 1.0 }
 0x285   : > { %824 = vst [vmem:[#allocation3 + $0x1d8] sm:$0x3] %v12296_v53  ;;  %v2656_v57 = vld.sshfl [vmem:[#allocation1 + $0x8] sm:$0xff pattern:$0x73625140]  ;;  %v2544_v53 = vmul.f32 %v2528_v29, %v12777_v13  ;;  %v12935_v15 = vsel %vm2591_vm12, 1.0, %v14407_v11 }
 0x286   : > { %14448 = vst [vmem:[#allocation53_spill] sm:$0xff] %v12925_v39  ;;  %v2657_v31 = vld.sshfl [vmem:[#allocation1 + $0x10] sm:$0xff pattern:$0x73625140]  ;;  %vm1574_vm13 = vcmp.ge.f32.partialorder %v12929_v17, 1.0  ;;  %v2530_v13 = vsub.f32 1.0, %v12811_v5 }
 0x287   : > { %v2658_v43 = vld.sshfl [vmem:[#allocation1 + $0x18] sm:$0xff pattern:$0x73625140]  ;;  %2797 = vst [vmem:[#allocation3 + $0x130] sm:$0x30] %v2655_v58  ;;  %v12939_v51 = vadd.f32 %v8796_v28, %v2544_v53  ;;  %v12948_v58 = vsel %vm1574_vm13, 1.0, %v14407_v11 }
 0x288   : > { %2663 = vst [vmem:[#allocation1 + $0x2] ss:$4 sm:$0xff] %v12920_v37  ;;  %v8798_v5 = vld [vmem:[%s11924_s29 + $0x340] sm:$0xff]  ;;  %v10995_v39 = vld [vmem:[%s11926_s4 + $0x278] sm:$0xff] }
 0x289   : > { %2798 = vst [vmem:[#allocation3 + $0x200] sm:$0x30] %v2656_v57  ;;  %vm2593_vm14 = vcmp.ge.f32.partialorder %v12939_v51, 1.0 }
 0x28a   : > { %2799 = vst [vmem:[#allocation3 + $0x318] sm:$0x30] %v2657_v31  ;;  %v2546_v31 = vmul.f32 %v2530_v13, %v12800_v34  ;;  %v12957_v29 = vsel %vm2593_vm14, 1.0, %v14407_v11  ;;  %v1511_v34 = vsub.f32 1.0, %v12676_v52  ;;  %v2861_v13 = vsub.f32 1.0, %v12895_v55 }
 0x28b   : > { %2800 = vst [vmem:[#allocation3 + $0x220] sm:$0x30] %v2658_v43  ;;  %v1643_v45 = vld.sshfl [vmem:[#allocation1 + $0x20] sm:$0xff pattern:$0x73625140] }
 0x28c   : > { %1785 = vst [vmem:[#allocation3 + $0x50] sm:$0xc0] %v1643_v45  ;;  %v12943_v43 = vld.sshfl [vmem:[#allocation1 + $0x28] sm:$0xff pattern:$0x73625140]  ;;  %v12960_v28 = vadd.f32 %v8798_v5, %v2546_v31  ;;  %v1527_v52 = vmul.f32 %v1511_v34, %v12663_v63 }
 0x28d   : > { %14449 = vst [vmem:[#allocation54_spill] sm:$0xff] %v12935_v15  ;;  %v12945_v47 = vld.sshfl [vmem:[#allocation1 + $0x30] sm:$0xff pattern:$0x73625140] }
 0x28e   : > { %825 = vst [vmem:[#allocation3 + $0x30] sm:$0x3] %v12298_v24  ;;  %v12950_v24 = vld.sshfl [vmem:[#allocation1 + $0x38] sm:$0xff pattern:$0x73625140]  ;;  %vm2595_vm15 = vcmp.ge.f32.partialorder %v12960_v28, 1.0 }
 0x28f   : > { %v2665_v21 = vld.sshfl [vmem:[#allocation1] sm:$0xff pattern:$0x73625140]  ;;  %v2666_v57 = vld.sshfl [vmem:[#allocation1 + $0x8] sm:$0xff pattern:$0x73625140] }
 0x290   : > { %14450 = vst [vmem:[#allocation55_spill] sm:$0xff] %v12939_v51  ;;  %v2667_v59 = vld.sshfl [vmem:[#allocation1 + $0x10] sm:$0xff pattern:$0x73625140]  ;;  %v12971_v31 = vsel %vm2595_vm15, 1.0, %v14407_v11 }
 0x291   : > { %v2668_v32 = vld.sshfl [vmem:[#allocation1 + $0x18] sm:$0xff pattern:$0x73625140]  ;;  %2805 = vst [vmem:[#allocation3 + $0x328] sm:$0x30] %v2665_v21 }
 0x292   : > { %2673 = vst [vmem:[#allocation1 + $0x2] ss:$4 sm:$0xff] %v12935_v15  ;;  %v14466_v15 = vld [vmem:[#allocation11_spill] sm:$0xff] }
 0x293   : > { %2806 = vst [vmem:[#allocation3 + $0x260] sm:$0x30] %v2666_v57 }
 0x294   : > { %2807 = vst [vmem:[#allocation3 + $0x3b8] sm:$0x30] %v2667_v59  ;;  %v2532_v59 = vsub.f32 1.0, %v12831_v0  ;;  %v8699_v0 = vld [vmem:[%s11924_s29 + $0x1a8] sm:$0xff] }
 0x295   : > { %2808 = vst [vmem:[#allocation3 + $0x2b8] sm:$0x30] %v2668_v32  ;;  %v8800_v32 = vld [vmem:[%s11924_s29 + $0x350] sm:$0xff] }
 0x296   : > { %1648 = vst [vmem:[#allocation1 + $0x23] ss:$4 sm:$0xff] %v12948_v58 }
 0x297   : > { %14451 = vst [vmem:[#allocation56_spill] sm:$0xff] %v12957_v29 }
 0x298   : > { %826 = vst [vmem:[#allocation3 + $0x140] sm:$0x3] %v12300_v60  ;;  %v2548_v60 = vmul.f32 %v2532_v59, %v12819_v56 }
 0x299   : > { %v2675_v53 = vld.sshfl [vmem:[#allocation1] sm:$0xff pattern:$0x73625140]  ;;  %v2676_v45 = vld.sshfl [vmem:[#allocation1 + $0x8] sm:$0xff pattern:$0x73625140] }
 0x29a   : > { %14452 = vst [vmem:[#allocation57_spill] sm:$0xff] %v12960_v28  ;;  %v2677_v21 = vld.sshfl [vmem:[#allocation1 + $0x10] sm:$0xff pattern:$0x73625140]  ;;  %v12979_v56 = vadd.f32 %v8800_v32, %v2548_v60 }
 0x29b   : > { %v2678_v57 = vld.sshfl [vmem:[#allocation1 + $0x18] sm:$0xff pattern:$0x73625140]  ;;  %2813 = vst [vmem:[#allocation3 + $0x288] sm:$0x30] %v2675_v53 }
 0x29c   : > { %2683 = vst [vmem:[#allocation1 + $0x2] ss:$4 sm:$0xff] %v12957_v29  ;;  %vm2597_vm0 = vcmp.ge.f32.partialorder %v12979_v56, 1.0  ;;  %v3205_v29 = vld [vmem:[#allocation3 + $0x18] sm:$0xff] }
 0x29d   : > { %2814 = vst [vmem:[#allocation3 + $0x3a8] sm:$0x30] %v2676_v45  ;;  %v12976_v45 = vmul.f32 %v2861_v13, %v12885_v14  ;;  %v8802_v14 = vld [vmem:[%s11924_s29 + $0x360] sm:$0xff]  ;;  %v12989_v63 = vsel %vm2597_vm0, 1.0, %v14407_v11  ;;  %v2536_v13 = vsub.f32 1.0, %v12879_v40  ;;  %v1513_v40 = vsub.f32 1.0, %v12725_v10 }
 0x29e   : > { %2815 = vst [vmem:[#allocation3 + $0x3c8] sm:$0x30] %v2677_v21 }
 0x29f   : > { %2816 = vst [vmem:[#allocation3 + $0x160] sm:$0x30] %v2678_v57  ;;  %v12983_v57 = vadd.f32 %v8699_v0, %v1527_v52  ;;  %v12998_v0 = vld.sshfl [vmem:[#allocation1 + $0x28] sm:$0xff pattern:$0x73625140] }
 0x2a0   : > { %827 = vst [vmem:[#allocation3 + $0x2a8] sm:$0x3] %v12302_v42  ;;  %v2534_v42 = vsub.f32 1.0, %v12857_v20  ;;  %v13005_v52 = vld.sshfl [vmem:[#allocation1 + $0x38] sm:$0xff pattern:$0x73625140] }
 0x2a1   : > { %14453 = vst [vmem:[#allocation58_spill] sm:$0xff] %v12971_v31  ;;  %vm1576_vm1 = vcmp.ge.f32.partialorder %v12983_v57, 1.0 }
 0x2a2   : > { %1108 = vst [vmem:[#allocation3 + $0x368] sm:$0xc] %v12351_v19  ;;  %v2550_v19 = vmul.f32 %v2534_v42, %v12836_v18  ;;  %v12996_v18 = vld.sshfl [vmem:[#allocation1 + $0x20] sm:$0xff pattern:$0x73625140] }
 0x2a3   : > { %v2685_v5 = vld.sshfl [vmem:[#allocation1] sm:$0xff pattern:$0x73625140]  ;;  %v2686_v53 = vld.sshfl [vmem:[#allocation1 + $0x8] sm:$0xff pattern:$0x73625140] }
 0x2a4   : > { %14454 = vst [vmem:[#allocation59_spill] sm:$0xff] %v12979_v56  ;;  %v2687_v21 = vld.sshfl [vmem:[#allocation1 + $0x10] sm:$0xff pattern:$0x73625140]  ;;  %v12992_v34 = vadd.f32 %v8802_v14, %v2550_v19 }
 0x2a5   : > { %v2688_v55 = vld.sshfl [vmem:[#allocation1 + $0x18] sm:$0xff pattern:$0x73625140]  ;;  %2821 = vst [vmem:[#allocation3 + $0x1b0] sm:$0x30] %v2685_v5  ;;  %v8701_v19 = vld [vmem:[%s11924_s29 + $0x1b8] sm:$0xff] }
 0x2a6   : > { %2693 = vst [vmem:[#allocation1 + $0x2] ss:$4 sm:$0xff] %v12971_v31  ;;  %v13000_v5 = vld.sshfl [vmem:[#allocation1 + $0x30] sm:$0xff pattern:$0x73625140]  ;;  %vm2599_vm2 = vcmp.ge.f32.partialorder %v12992_v34, 1.0 }
 0x2a7   : > { %2822 = vst [vmem:[#allocation3 + $0x1c8] sm:$0x30] %v2686_v53  ;;  %v13003_v53 = vsel %vm1576_vm1, 1.0, %v14407_v11  ;;  %v13013_v42 = vsel %vm2599_vm2, 1.0, %v14407_v11 }
 0x2a8   : > { %2823 = vst [vmem:[#allocation3 + $0x2d0] sm:$0x30] %v2687_v21  ;;  %v2552_v21 = vmul.f32 %v2536_v13, %v12861_v1 }
 0x2a9   : > { %14455 = vst [vmem:[#allocation60_spill] sm:$0xff] %v12989_v63 }
 0x2aa   : > { %2824 = vst [vmem:[#allocation3 + $0x1d0] sm:$0x30] %v2688_v55  ;;  %v8804_v55 = vld [vmem:[%s11924_s29 + $0x370] sm:$0xff] }
 0x2ab   : > { %14456 = vst [vmem:[#allocation61_spill] sm:$0xff] %v12992_v34 }
 0x2ac   : > { %1658 = vst [vmem:[#allocation1 + $0x23] ss:$4 sm:$0xff] %v13003_v53 }
 0x2ad   : > { %v2695_v59 = vld.sshfl [vmem:[#allocation1] sm:$0xff pattern:$0x73625140]  ;;  %v2696_v20 = vld.sshfl [vmem:[#allocation1 + $0x8] sm:$0xff pattern:$0x73625140] }
 0x2ae   : > { %v2697_v60 = vld.sshfl [vmem:[#allocation1 + $0x10] sm:$0xff pattern:$0x73625140]  ;;  %v2698_v32 = vld.sshfl [vmem:[#allocation1 + $0x18] sm:$0xff pattern:$0x73625140] }
 0x2af   : > { %2703 = vst [vmem:[#allocation1 + $0x2] ss:$4 sm:$0xff] %v12989_v63 }
 0x2b0   : > { %2829 = vst [vmem:[#allocation3 + $0x1f8] sm:$0x30] %v2695_v59 }
 0x2b1   : > { %2830 = vst [vmem:[#allocation3 + $0x238] sm:$0x30] %v2696_v20  ;;  %v1529_v20 = vmul.f32 %v1513_v40, %v12697_v3  ;;  %v1515_v3 = vsub.f32 1.0, %v12744_v36  ;;  %v14461_v40 = vld [vmem:[#allocation9_spill] sm:$0xff] }
 0x2b2   : > { %2831 = vst [vmem:[#allocation3 + $0x398] sm:$0x30] %v2697_v60  ;;  %v13018_v60 = vadd.f32 %v8804_v55, %v2552_v21 }
 0x2b3   : > { %2832 = vst [vmem:[#allocation3 + $0x390] sm:$0x30] %v2698_v32  ;;  %v13021_v1 = vadd.f32 %v8701_v19, %v1529_v20  ;;  %v8822_v32 = vld [vmem:[%s11924_s29 + $0x380] sm:$0xff]  ;;  %v13036_v20 = vld.sshfl [vmem:[#allocation1 + $0x28] sm:$0xff pattern:$0x73625140]  ;;  %v1531_v36 = vmul.f32 %v1515_v3, %v12720_v48 }
 0x2b4   : > { %14457 = vst [vmem:[#allocation62_spill] sm:$0xff] %v13013_v42  ;;  %vm2601_vm3 = vcmp.ge.f32.partialorder %v13018_v60, 1.0  ;;  %v8824_v3 = vld [vmem:[%s11924_s29 + $0x390] sm:$0xff] }
 0x2b5   : > { %1109 = vst [vmem:[#allocation3 + $0x330] sm:$0xc] %v12353_v16  ;;  %v14459_v16 = vld [vmem:[#allocation8_spill] sm:$0xff]  ;;  %v13027_v13 = vsel %vm2601_vm3, 1.0, %v14407_v11  ;;  %vm1578_vm4 = vcmp.ge.f32.partialorder %v13021_v1, 1.0 }
 0x2b6   : > { %v2705_v14 = vld.sshfl [vmem:[#allocation1] sm:$0xff pattern:$0x73625140]  ;;  %v2706_v59 = vld.sshfl [vmem:[#allocation1 + $0x8] sm:$0xff pattern:$0x73625140] }
 0x2b7   : > { %14458 = vst [vmem:[#allocation63_spill] sm:$0xff] %v13018_v60  ;;  %v2707_v10 = vld.sshfl [vmem:[#allocation1 + $0x10] sm:$0xff pattern:$0x73625140] }
 0x2b8   : > { %v2708_v34 = vld.sshfl [vmem:[#allocation1 + $0x18] sm:$0xff pattern:$0x73625140]  ;;  %2837 = vst [vmem:[#allocation3 + $0xf0] sm:$0x30] %v2705_v14 }
 0x2b9   : > { %2713 = vst [vmem:[#allocation1 + $0x2] ss:$4 sm:$0xff] %v13013_v42  ;;  %v13045_v60 = vld.sshfl [vmem:[#allocation1 + $0x38] sm:$0xff pattern:$0x73625140]  ;;  %v14462_v42 = vld [vmem:[#allocation10_spill] sm:$0xff] }
 0x2ba   : > { %2838 = vst [vmem:[#allocation3 + $0x180] sm:$0x30] %v2706_v59  ;;  %v2910_v59 = vadd.f32 %v8822_v32, %v12976_v45  ;;  %v2863_v45 = vsub.f32 1.0, %v12920_v37  ;;  %v1521_v32 = vsub.f32 1.0, %v12866_v4 }
 0x2bb   : > { %2839 = vst [vmem:[#allocation3 + $0x170] sm:$0x30] %v2707_v10  ;;  %v13040_v10 = vsel %vm1578_vm4, 1.0, %v14407_v11 }
 0x2bc   : > { %2840 = vst [vmem:[#allocation3 + $0x3d0] sm:$0x30] %v2708_v34  ;;  %v13034_v34 = vld.sshfl [vmem:[#allocation1 + $0x20] sm:$0xff pattern:$0x73625140]  ;;  %vm2926_vm5 = vcmp.ge.f32.partialorder %v2910_v59, 1.0  ;;  %v1537_v4 = vmul.f32 %v1521_v32, %v12845_v23 }
 0x2bd   : > { %1110 = vst [vmem:[#allocation3 + $0x48] sm:$0xc] %v14459_v16  ;;  %v13042_v16 = vld.sshfl [vmem:[#allocation1 + $0x30] sm:$0xff pattern:$0x73625140] }
 0x2be   : > { %14460 = vst [vmem:[#allocation8_spill] sm:$0xff] %v13027_v13 }
 0x2bf   : > { %1115 = vst [vmem:[#allocation3 + $0x320] sm:$0xc] %v14461_v40  ;;  %v8703_v40 = vld [vmem:[%s11924_s29 + $0x1c8] sm:$0xff] }
 0x2c0   : > { %v2715_v21 = vld.sshfl [vmem:[#allocation1] sm:$0xff pattern:$0x73625140]  ;;  %v2716_v55 = vld.sshfl [vmem:[#allocation1 + $0x8] sm:$0xff pattern:$0x73625140]  ;;  %v13050_v48 = vadd.f32 %v8703_v40, %v1531_v36 }
 0x2c1   : > { %v2717_v19 = vld.sshfl [vmem:[#allocation1 + $0x10] sm:$0xff pattern:$0x73625140]  ;;  %v2718_v14 = vld.sshfl [vmem:[#allocation1 + $0x18] sm:$0xff pattern:$0x73625140] }
 0x2c2   : > { %2723 = vst [vmem:[#allocation1 + $0x2] ss:$4 sm:$0xff] %v13027_v13  ;;  %v8709_v13 = vld [vmem:[%s11924_s29 + $0x1f8] sm:$0xff]  ;;  %vm1580_vm6 = vcmp.ge.f32.partialorder %v13050_v48, 1.0 }
 0x2c3   : > { %2845 = vst [vmem:[#allocation3 + $0x78] sm:$0x30] %v2715_v21  ;;  %v1517_v21 = vsub.f32 1.0, %v12788_v41  ;;  %v8705_v36 = vld [vmem:[%s11924_s29 + $0x1d8] sm:$0xff]  ;;  %v1570_v63 = vadd.f32 %v8709_v13, %v1537_v4 }
 0x2c4   : > { %2846 = vst [vmem:[#allocation3 + $0x308] sm:$0x30] %v2716_v55  ;;  %v8838_v55 = vsel %vm2926_vm5, 1.0, %v14407_v11 }
 0x2c5   : > { %2847 = vst [vmem:[#allocation3 + $0x370] sm:$0x30] %v2717_v19  ;;  %v2879_v19 = vmul.f32 %v2863_v45, %v12899_v35  ;;  %v1533_v41 = vmul.f32 %v1517_v21, %v12767_v26  ;;  %vm1586_vm8 = vcmp.ge.f32.partialorder %v1570_v63, 1.0 }
 0x2c6   : > { %2848 = vst [vmem:[#allocation3 + $0xc8] sm:$0x30] %v2718_v14 }
 0x2c7   : > { %1668 = vst [vmem:[#allocation1 + $0x23] ss:$4 sm:$0xff] %v13040_v10  ;;  %v2912_v40 = vadd.f32 %v8824_v3, %v2879_v19  ;;  %v13067_v23 = vadd.f32 %v8705_v36, %v1533_v41  ;;  %v13081_v19 = vsel %vm1586_vm8, 1.0, %v14407_v11 }
 0x2c8   : > { %1116 = vst [vmem:[#allocation3 + $0x150] sm:$0xc] %v14462_v42  ;;  %v13063_v42 = vsel %vm1580_vm6, 1.0, %v14407_v11  ;;  %v1860_v4 = vsub.f32 1.0, %v13081_v19 }
 0x2c9   : > { %v2725_v56 = vld.sshfl [vmem:[#allocation1] sm:$0xff pattern:$0x73625140]  ;;  %v2726_v37 = vld.sshfl [vmem:[#allocation1 + $0x8] sm:$0xff pattern:$0x73625140] }
 0x2ca   : > { %v2727_v14 = vld.sshfl [vmem:[#allocation1 + $0x10] sm:$0xff pattern:$0x73625140]  ;;  %v2728_v59 = vld.sshfl [vmem:[#allocation1 + $0x18] sm:$0xff pattern:$0x73625140] }
 0x2cb   : > { %2991 = vst [vmem:[#allocation1 + $0x3] ss:$4 sm:$0xff] %v8838_v55  ;;  %vm2928_vm7 = vcmp.ge.f32.partialorder %v2912_v40, 1.0  ;;  %vm1582_vm9 = vcmp.ge.f32.partialorder %v13067_v23, 1.0 }
 0x2cc   : > { %2853 = vst [vmem:[#allocation3 + $0x148] sm:$0x30] %v2725_v56  ;;  %v1519_v56 = vsub.f32 1.0, %v12848_v30  ;;  %v8840_v3 = vsel %vm2928_vm7, 1.0, %v14407_v11  ;;  %v8707_v30 = vld [vmem:[%s11924_s29 + $0x1e8] sm:$0xff]  ;;  %v13086_v41 = vsel %vm1582_vm9, 1.0, %v14407_v11 }
 0x2cd   : > { %2854 = vst [vmem:[#allocation3 + $0xf8] sm:$0x30] %v2726_v37 }
 0x2ce   : > { %2855 = vst [vmem:[#allocation3 + $0x68] sm:$0x30] %v2727_v14  ;;  %v13065_v28 = vld.sshfl [vmem:[#allocation1 + $0x20] sm:$0xff pattern:$0x73625140]  ;;  %v1535_v37 = vmul.f32 %v1519_v56, %v12823_v46  ;;  %v3202_v14 = vld [vmem:[#allocation3 + $0x2b0] sm:$0xff]  ;;  %v13092_v46 = vmul.f32 %v1860_v4, %v1570_v63 }
 0x2cf   : > { %2856 = vst [vmem:[#allocation3] sm:$0x30] %v2728_v59  ;;  %v13069_v35 = vld.sshfl [vmem:[#allocation1 + $0x28] sm:$0xff pattern:$0x73625140]  ;;  %v14467_v4 = vld [vmem:[#allocation12_spill] sm:$0xff] }
 0x2d0   : > { %v13071_v45 = vld.sshfl [vmem:[#allocation1 + $0x30] sm:$0xff pattern:$0x73625140]  ;;  %v13073_v26 = vld.sshfl [vmem:[#allocation1 + $0x38] sm:$0xff pattern:$0x73625140]  ;;  %v13094_v56 = vadd.f32 %v8707_v30, %v1535_v37 }
 0x2d1   : > { %1678 = vst [vmem:[#allocation1 + $0x23] ss:$4 sm:$0xff] %v13063_v42  ;;  %v3203_v59 = vld [vmem:[#allocation3 + $0x3b0] sm:$0xff]  ;;  %v11003_v30 = vld [vmem:[%s11926_s4 + $0x2b8] sm:$0xff] }
 0x2d2   : > { %v2994_v13 = vld.sshfl [vmem:[#allocation1] sm:$0xff pattern:$0x73625140]  ;;  %v2995_v32 = vld.sshfl [vmem:[#allocation1 + $0x8] sm:$0xff pattern:$0x73625140] }
 0x2d3   : > { %3136 = vst [vmem:[#allocation3 + $0x130] sm:$0xc0] %v2994_v13  ;;  %v2996_v21 = vld.sshfl [vmem:[#allocation1 + $0x10] sm:$0xff pattern:$0x73625140]  ;;  %vm1584_vm10 = vcmp.ge.f32.partialorder %v13094_v56, 1.0 }
 0x2d4   : > { %3137 = vst [vmem:[#allocation3 + $0x200] sm:$0xc0] %v2995_v32  ;;  %v2997_v55 = vld.sshfl [vmem:[#allocation1 + $0x18] sm:$0xff pattern:$0x73625140] }
 0x2d5   : > { %3138 = vst [vmem:[#allocation3 + $0x318] sm:$0xc0] %v2996_v21 }
 0x2d6   : > { %3139 = vst [vmem:[#allocation3 + $0x220] sm:$0xc0] %v2997_v55  ;;  %v3204_v55 = vld [vmem:[#allocation3 + $0xd8] sm:$0xff] }
 0x2d7   : > { %3002 = vst [vmem:[#allocation1 + $0x3] ss:$4 sm:$0xff] %v8840_v3  ;;  %v10987_v3 = vld [vmem:[%s11926_s4 + $0x238] sm:$0xff] }
 0x2d8   : > { %v13088_v36 = vld.sshfl [vmem:[#allocation1 + $0x20] sm:$0xff pattern:$0x73625140]  ;;  %v13090_v40 = vld.sshfl [vmem:[#allocation1 + $0x28] sm:$0xff pattern:$0x73625140] }
 0x2d9   : > { %14463 = vst [vmem:[#allocation9_spill] sm:$0xff] %v13090_v40  ;;  %v13096_v13 = vld.sshfl [vmem:[#allocation1 + $0x30] sm:$0xff pattern:$0x73625140] }
 0x2da   : > { %14464 = vst [vmem:[#allocation10_spill] sm:$0xff] %v13096_v13  ;;  %v13098_v32 = vld.sshfl [vmem:[#allocation1 + $0x38] sm:$0xff pattern:$0x73625140]  ;;  %v3266_v21 = vld [vmem:[#allocation3 + $0x130] sm:$0xff]  ;;  %v11011_v40 = vld [vmem:[%s11926_s4 + $0x2f8] sm:$0xff] }
 0x2db   : > { %14465 = vst [vmem:[#allocation64_spill] sm:$0xff] %v13098_v32  ;;  %v3330_v31 = vpack.c.bf16 %v3266_v21, %v3202_v14  ;;  %v3267_v51 = vld [vmem:[#allocation3 + $0x200] sm:$0xff]  ;;  %v11010_v21 = vld [vmem:[%s11926_s4 + $0x2f0] sm:$0xff] }
 0x2dc   : > { %1688 = vst [vmem:[#allocation1 + $0x23] ss:$4 sm:$0xff] %v13086_v41  ;;  %v3331_v63 = vpack.c.bf16 %v3267_v51, %v3203_v59  ;;  %v3268_v37 = vld [vmem:[#allocation3 + $0x318] sm:$0xff]  ;;  %v10994_v51 = vld [vmem:[%s11926_s4 + $0x270] sm:$0xff] }
 0x2dd   : > { %1117 = vst [vmem:[#allocation3 + $0x108] sm:$0xc] %v14466_v15  ;;  %7498 = vmatmul.bf16.vlgmr.msra.gmra.mxu0 %v3330_v31  ;;  %v3332_v32 = vpack.c.bf16 %v3268_v37, %v3204_v55  ;;  %v3269_v13 = vld [vmem:[#allocation3 + $0x220] sm:$0xff]  ;;  %v10986_v15 = vld [vmem:[%s11926_s4 + $0x230] sm:$0xff]  ;;  %v14468_v31 = vld [vmem:[#allocation13_spill] sm:$0xff] }
 0x2de   : > { %1118 = vst [vmem:[#allocation3 + $0x60] sm:$0xc] %v14467_v4  ;;  %7512 = vmatmul.bf16.vlgmr.msra.gmra.mxu1 %v3331_v63  ;;  %v3333_v14 = vpack.c.bf16 %v3269_v13, %v3205_v29  ;;  %7602 = vmatpush.bf16.msra.mxu0 %v10987_v3  ;;  %v11002_v59 = vld [vmem:[%s11926_s4 + $0x2b0] sm:$0xff]  ;;  %v10985_v55 = vld [vmem:[%s11926_s4 + $0x228] sm:$0xff]  ;;  %v1846_v63 = vsub.f32 1.0, %v12912_v49  ;;  %v14470_v37 = vld [vmem:[#allocation15_spill] sm:$0xff] }
 0x2df   : > { %1123 = vst [vmem:[#allocation3 + $0x80] sm:$0xc] %v12417_v7  ;;  %7526 = vmatmul.bf16.vlgmr.msra.gmra.mxu2 %v3332_v32  ;;  %7616 = vmatpush.bf16.msra.mxu1 %v10995_v39  ;;  %v13119_v7 = vsel %vm1584_vm10, 1.0, %v14407_v11  ;;  %v14469_v29 = vld [vmem:[#allocation14_spill] sm:$0xff]  ;;  %v10993_v3 = vld [vmem:[%s11926_s4 + $0x268] sm:$0xff]  ;;  %v14471_v4 = vld [vmem:[#allocation16_spill] sm:$0xff] }
 0x2e0   : > { %1124 = vst [vmem:[#allocation3 + $0x1a8] sm:$0xc] %v12419_v2  ;;  %7540 = vmatmul.bf16.vlgmr.msra.gmra.mxu3 %v3333_v14  ;;  %7630 = vmatpush.bf16.msra.mxu2 %v11003_v30  ;;  %v11009_v30 = vld [vmem:[%s11926_s4 + $0x2e8] sm:$0xff]  ;;  %v10984_v14 = vld [vmem:[%s11926_s4 + $0x220] sm:$0xff] }
 0x2e1   : > { %1125 = vst [vmem:[#allocation3 + $0x1b8] sm:$0xc] %v14468_v31  ;;  %7644 = vmatpush.bf16.msra.mxu3 %v11011_v40  ;;  %v11001_v40 = vld [vmem:[%s11926_s4 + $0x2a8] sm:$0xff]  ;;  %v1862_v31 = vmul.f32 %v1846_v63, %v12889_v8  ;;  %v11000_v49 = vld [vmem:[%s11926_s4 + $0x2a0] sm:$0xff] }
 0x2e2   : > { %1126 = vst [vmem:[#allocation3 + $0x168] sm:$0xc] %v14469_v29  ;;  %7603 = vmatpush.bf16.msra.mxu0 %v10986_v15  ;;  %v14472_v15 = vld [vmem:[#allocation17_spill] sm:$0xff]  ;;  %v14473_v29 = vld [vmem:[#allocation18_spill] sm:$0xff] }
 0x2e3   : > { %v13122_v2 = vld.sshfl [vmem:[#allocation1 + $0x20] sm:$0xff pattern:$0x73625140]  ;;  %v13124_v39 = vld.sshfl [vmem:[#allocation1 + $0x28] sm:$0xff pattern:$0x73625140]  ;;  %7617 = vmatpush.bf16.msra.mxu1 %v10994_v51 }
 0x2e4   : > { %v13126_v13 = vld.sshfl [vmem:[#allocation1 + $0x30] sm:$0xff pattern:$0x73625140]  ;;  %v13128_v32 = vld.sshfl [vmem:[#allocation1 + $0x38] sm:$0xff pattern:$0x73625140]  ;;  %7631 = vmatpush.bf16.msra.mxu2 %v11002_v59 }
 0x2e5   : > { %1698 = vst [vmem:[#allocation1 + $0x23] ss:$4 sm:$0xff] %v13119_v7  ;;  %7645 = vmatpush.bf16.msra.mxu3 %v11010_v21  ;;  %v10992_v51 = vld [vmem:[%s11926_s4 + $0x260] sm:$0xff]  ;;  %v8727_v59 = vld [vmem:[%s11924_s29 + $0x208] sm:$0xff] }
 0x2e6   : > { %1131 = vst [vmem:[#allocation3 + $0x138] sm:$0xc] %v14470_v37  ;;  %7604 = vmatpush.bf16.msra.mxu0 %v10985_v55  ;;  %v11008_v21 = vld [vmem:[%s11926_s4 + $0x2e0] sm:$0xff]  ;;  %v13155_v63 = vadd.f32 %v8727_v59, %v1862_v31 }
 0x2e7   : > { %1132 = vst [vmem:[#allocation3 + $0xc0] sm:$0xc] %v14471_v4  ;;  %7618 = vmatpush.bf16.msra.mxu1 %v10993_v3 }
 0x2e8   : > { %1133 = vst [vmem:[#allocation3 + $0x1c0] sm:$0xc] %v14472_v15  ;;  %7632 = vmatpush.bf16.msra.mxu2 %v11001_v40  ;;  %v14475_v40 = vld [vmem:[#allocation20_spill] sm:$0xff]  ;;  %vm1911_vm11 = vcmp.ge.f32.partialorder %v13155_v63, 1.0  ;;  %v8729_v15 = vld [vmem:[%s11924_s29 + $0x218] sm:$0xff] }
 0x2e9   : > { %1134 = vst [vmem:[#allocation3 + $0x280] sm:$0xc] %v14473_v29  ;;  %7646 = vmatpush.bf16.msra.mxu3 %v11009_v30  ;;  %v14476_v30 = vld [vmem:[#allocation21_spill] sm:$0xff] }
 0x2ea   : > { %1139 = vst [vmem:[#allocation3 + $0x218] sm:$0xc] %v12499_v50  ;;  %7605 = vmatpush.bf16.msra.mxu0 %v10984_v14  ;;  %v1848_v50 = vsub.f32 1.0, %v12948_v58  ;;  %v14477_v14 = vld [vmem:[#allocation22_spill] sm:$0xff]  ;;  %v14479_v58 = vld [vmem:[#allocation24_spill] sm:$0xff] }
 0x2eb   : > { %1140 = vst [vmem:[#allocation3 + $0x3f8] sm:$0xc] %v12501_v62  ;;  %7619 = vmatpush.bf16.msra.mxu1 %v10992_v51  ;;  %v14474_v62 = vld [vmem:[#allocation19_spill] sm:$0xff] }
 0x2ec   : > { %v13147_v55 = vld.sshfl [vmem:[#allocation1 + $0x20] sm:$0xff pattern:$0x73625140]  ;;  %v13149_v37 = vld.sshfl [vmem:[#allocation1 + $0x28] sm:$0xff pattern:$0x73625140]  ;;  %7633 = vmatpush.bf16.msra.mxu2 %v11000_v49  ;;  %v1864_v4 = vmul.f32 %v1848_v50, %v12929_v17 }
 0x2ed   : > { %v13151_v3 = vld.sshfl [vmem:[#allocation1 + $0x30] sm:$0xff pattern:$0x73625140]  ;;  %v13153_v8 = vld.sshfl [vmem:[#allocation1 + $0x38] sm:$0xff pattern:$0x73625140]  ;;  %7647 = vmatpush.bf16.msra.mxu3 %v11008_v21 }
 0x2ee   : > { %1708 = vst [vmem:[#allocation1 + $0x23] ss:$4 sm:$0xff] %v13081_v19  ;;  %v14478_v51 = vld [vmem:[#allocation23_spill] sm:$0xff]  ;;  %v13168_v19 = vsel %vm1911_vm11, 1.0, %v14407_v11  ;;  %v13179_v17 = vadd.f32 %v8729_v15, %v1864_v4  ;;  %v1850_v21 = vsub.f32 1.0, %v13003_v53  ;;  %v14480_v50 = vld [vmem:[#allocation25_spill] sm:$0xff] }
 0x2ef   : > { %1141 = vst [vmem:[#allocation3 + $0x8] sm:$0xc] %v14474_v62  ;;  %v14481_v62 = vld [vmem:[#allocation26_spill] sm:$0xff]  ;;  %v14484_v4 = vld [vmem:[#allocation29_spill] sm:$0xff] }
 0x2f0   : > { %1142 = vst [vmem:[#allocation3 + $0x128] sm:$0xc] %v14475_v40  ;;  %vm1913_vm12 = vcmp.ge.f32.partialorder %v13179_v17, 1.0  ;;  %v1866_v40 = vmul.f32 %v1850_v21, %v12983_v57  ;;  %v1852_v57 = vsub.f32 1.0, %v13040_v10  ;;  %v14486_v21 = vld [vmem:[#allocation30_spill] sm:$0xff]  ;;  %v14489_v10 = vld [vmem:[#allocation33_spill] sm:$0xff] }
 0x2f1   : > { %1147 = vst [vmem:[#allocation3 + $0xb0] sm:$0xc] %v14476_v30  ;;  %v14482_v30 = vld [vmem:[#allocation27_spill] sm:$0xff]  ;;  %v13192_v53 = vsel %vm1913_vm12, 1.0, %v14407_v11 }
 0x2f2   : > { %1148 = vst [vmem:[#allocation3 + $0x1e0] sm:$0xc] %v14477_v14  ;;  %v8731_v14 = vld [vmem:[%s11924_s29 + $0x228] sm:$0xff] }
 0x2f3   : > { %1149 = vst [vmem:[#allocation3 + $0x1f0] sm:$0xc] %v14478_v51  ;;  %v14483_v51 = vld [vmem:[#allocation28_spill] sm:$0xff] }
 0x2f4   : > { %1150 = vst [vmem:[#allocation3 + $0x10] sm:$0xc] %v14479_v58  ;;  %v13197_v58 = vadd.f32 %v8731_v14, %v1866_v40  ;;  %v8733_v40 = vld [vmem:[%s11924_s29 + $0x238] sm:$0xff]  ;;  %v14488_v14 = vld [vmem:[#allocation32_spill] sm:$0xff] }
 0x2f5   : > { %v13171_v31 = vld.sshfl [vmem:[#allocation1 + $0x20] sm:$0xff pattern:$0x73625140]  ;;  %v13173_v29 = vld.sshfl [vmem:[#allocation1 + $0x28] sm:$0xff pattern:$0x73625140] }
 0x2f6   : > { %v13175_v49 = vld.sshfl [vmem:[#allocation1 + $0x30] sm:$0xff pattern:$0x73625140]  ;;  %v13177_v59 = vld.sshfl [vmem:[#allocation1 + $0x38] sm:$0xff pattern:$0x73625140] }
 0x2f7   : > { %1976 = vst [vmem:[#allocation1 + $0x20] ss:$4 sm:$0xff] %v13168_v19  ;;  %vm1915_vm13 = vcmp.ge.f32.partialorder %v13197_v58, 1.0 }
 0x2f8   : > { %1155 = vst [vmem:[#allocation3 + $0x208] sm:$0xc] %v12566_v54 }
 0x2f9   : > { %1156 = vst [vmem:[#allocation3 + $0xd0] sm:$0xc] %v14480_v50 }
 0x2fa   : > { %1157 = vst [vmem:[#allocation3 + $0x88] sm:$0xc] %v14481_v62 }
 0x2fb   : > { %1158 = vst [vmem:[#allocation3 + $0x2f0] sm:$0xc] %v14482_v30  ;;  %v14487_v30 = vld [vmem:[#allocation31_spill] sm:$0xff] }
 0x2fc   : > { %1163 = vst [vmem:[#allocation3 + $0x1d8] sm:$0xc] %v14483_v51  ;;  %v1868_v51 = vmul.f32 %v1852_v57, %v13021_v1  ;;  %v14492_v57 = vld [vmem:[#allocation34_spill] sm:$0xff] }
 0x2fd   : > { %1164 = vst [vmem:[#allocation3 + $0x30] sm:$0xc] %v14484_v4  ;;  %v13213_v4 = vsel %vm1915_vm13, 1.0, %v14407_v11 }
 0x2fe   : > { %v1981_v54 = vld.sshfl [vmem:[#allocation1 + $0x20] sm:$0xff pattern:$0x73625140]  ;;  %v13195_v15 = vld.sshfl [vmem:[#allocation1 + $0x28] sm:$0xff pattern:$0x73625140] }
 0x2ff   : > { %v13199_v50 = vld.sshfl [vmem:[#allocation1 + $0x30] sm:$0xff pattern:$0x73625140]  ;;  %v13201_v62 = vld.sshfl [vmem:[#allocation1 + $0x38] sm:$0xff pattern:$0x73625140] }
 0x300   : > { %14485 = vst [vmem:[#allocation11_spill] sm:$0xff] %v13201_v62  ;;  %v13220_v62 = vadd.f32 %v8733_v40, %v1868_v51  ;;  %v14494_v51 = vld [vmem:[#allocation36_spill] sm:$0xff]  ;;  %v8735_v40 = vld [vmem:[%s11924_s29 + $0x248] sm:$0xff] }
 0x301   : > { %1986 = vst [vmem:[#allocation1 + $0x20] ss:$4 sm:$0xff] %v13192_v53 }
 0x302   : > { %2123 = vst [vmem:[#allocation3 + $0x70] sm:$0x3] %v1981_v54  ;;  %vm1917_vm14 = vcmp.ge.f32.partialorder %v13220_v62, 1.0 }
 0x303   : > { %1165 = vst [vmem:[#allocation3 + $0x140] sm:$0xc] %v14486_v21 }
 0x304   : > { %1166 = vst [vmem:[#allocation3 + $0x2a8] sm:$0xc] %v14487_v30 }
 0x305   : > { %1447 = vst [vmem:[#allocation3 + $0x368] sm:$0x30] %v12632_v27  ;;  %v1854_v27 = vsub.f32 1.0, %v13063_v42  ;;  %v13237_v42 = vsel %vm1917_vm14, 1.0, %v14407_v11 }
 0x306   : > { %1448 = vst [vmem:[#allocation3 + $0x330] sm:$0x30] %v14488_v14  ;;  %v14493_v14 = vld [vmem:[#allocation35_spill] sm:$0xff] }
 0x307   : > { %1449 = vst [vmem:[#allocation3 + $0x48] sm:$0x30] %v14489_v10  ;;  %v1870_v10 = vmul.f32 %v1854_v27, %v13050_v48  ;;  %v1856_v27 = vsub.f32 1.0, %v13086_v41 }
 0x308   : > { %v13216_v54 = vld.sshfl [vmem:[#allocation1 + $0x20] sm:$0xff pattern:$0x73625140]  ;;  %v13218_v21 = vld.sshfl [vmem:[#allocation1 + $0x28] sm:$0xff pattern:$0x73625140] }
 0x309   : > { %v13222_v30 = vld.sshfl [vmem:[#allocation1 + $0x30] sm:$0xff pattern:$0x73625140]  ;;  %v13224_v1 = vld.sshfl [vmem:[#allocation1 + $0x38] sm:$0xff pattern:$0x73625140] }
 0x30a   : > { %14490 = vst [vmem:[#allocation12_spill] sm:$0xff] %v13222_v30  ;;  %v13244_v30 = vadd.f32 %v8735_v40, %v1870_v10  ;;  %v14503_v10 = vld [vmem:[#allocation41_spill] sm:$0xff]  ;;  %v8737_v40 = vld [vmem:[%s11924_s29 + $0x258] sm:$0xff] }
 0x30b   : > { %14491 = vst [vmem:[#allocation13_spill] sm:$0xff] %v13224_v1  ;;  %v14495_v1 = vld [vmem:[#allocation37_spill] sm:$0xff] }
 0x30c   : > { %1996 = vst [vmem:[#allocation1 + $0x20] ss:$4 sm:$0xff] %v13213_v4  ;;  %vm1919_vm15 = vcmp.ge.f32.partialorder %v13244_v30, 1.0 }
 0x30d   : > { %1454 = vst [vmem:[#allocation3 + $0x320] sm:$0x30] %v12678_v6  ;;  %v13262_v41 = vsel %vm1919_vm15, 1.0, %v14407_v11 }
 0x30e   : > { %1455 = vst [vmem:[#allocation3 + $0x150] sm:$0x30] %v14492_v57 }
 0x30f   : > { %1456 = vst [vmem:[#allocation3 + $0x108] sm:$0x30] %v14493_v14 }
 0x310   : > { %1457 = vst [vmem:[#allocation3 + $0x60] sm:$0x30] %v14494_v51  ;;  %v14501_v51 = vld [vmem:[#allocation39_spill] sm:$0xff] }
 0x311   : > { %1462 = vst [vmem:[#allocation3 + $0x80] sm:$0x30] %v12714_v44  ;;  %v14500_v44 = vld [vmem:[#allocation38_spill] sm:$0xff] }
 0x312   : > { %1463 = vst [vmem:[#allocation3 + $0x1a8] sm:$0x30] %v14495_v1  ;;  %v14502_v1 = vld [vmem:[#allocation40_spill] sm:$0xff] }
 0x313   : > { %v13240_v6 = vld.sshfl [vmem:[#allocation1 + $0x20] sm:$0xff pattern:$0x73625140]  ;;  %v13242_v57 = vld.sshfl [vmem:[#allocation1 + $0x28] sm:$0xff pattern:$0x73625140] }
 0x314   : > { %14496 = vst [vmem:[#allocation14_spill] sm:$0xff] %v13240_v6  ;;  %v13246_v14 = vld.sshfl [vmem:[#allocation1 + $0x30] sm:$0xff pattern:$0x73625140] }
 0x315   : > { %14497 = vst [vmem:[#allocation15_spill] sm:$0xff] %v13242_v57  ;;  %v13248_v48 = vld.sshfl [vmem:[#allocation1 + $0x38] sm:$0xff pattern:$0x73625140]  ;;  %v1872_v57 = vmul.f32 %v1856_v27, %v13067_v23 }
 0x316   : > { %14498 = vst [vmem:[#allocation16_spill] sm:$0xff] %v13246_v14  ;;  %v2184_v14 = vsub.f32 1.0, %v13168_v19  ;;  %v1858_v19 = vsub.f32 1.0, %v13119_v7 }
 0x317   : > { %14499 = vst [vmem:[#allocation17_spill] sm:$0xff] %v13248_v48  ;;  %v14504_v48 = vld [vmem:[#allocation42_spill] sm:$0xff]  ;;  %v13270_v23 = vadd.f32 %v8737_v40, %v1872_v57 }
 0x318   : > { %2006 = vst [vmem:[#allocation1 + $0x20] ss:$4 sm:$0xff] %v13237_v42 }
 0x319   : > { %1464 = vst [vmem:[#allocation3 + $0x1b8] sm:$0x30] %v14500_v44  ;;  %v14505_v44 = vld [vmem:[#allocation43_spill] sm:$0xff]  ;;  %vm1921_vm0 = vcmp.ge.f32.partialorder %v13270_v23, 1.0 }
 0x31a   : > { %1465 = vst [vmem:[#allocation3 + $0x168] sm:$0x30] %v14501_v51  ;;  %v13285_v57 = vsel %vm1921_vm0, 1.0, %v14407_v11 }
 0x31b   : > { %1470 = vst [vmem:[#allocation3 + $0x138] sm:$0x30] %v14502_v1  ;;  %v2200_v1 = vmul.f32 %v2184_v14, %v13155_v63  ;;  %v8739_v63 = vld [vmem:[%s11924_s29 + $0x268] sm:$0xff]  ;;  %v14506_v14 = vld [vmem:[#allocation44_spill] sm:$0xff] }
 0x31c   : > { %1471 = vst [vmem:[#allocation3 + $0xc0] sm:$0x30] %v14503_v10 }
 0x31d   : > { %1472 = vst [vmem:[#allocation3 + $0x1c0] sm:$0x30] %v14504_v48  ;;  %v1874_v48 = vmul.f32 %v1858_v19, %v13094_v56  ;;  %v8741_v56 = vld [vmem:[%s11924_s29 + $0x278] sm:$0xff]  ;;  %v14509_v19 = vld [vmem:[#allocation46_spill] sm:$0xff] }
 0x31e   : > { %1473 = vst [vmem:[#allocation3 + $0x280] sm:$0x30] %v14505_v44 }
 0x31f   : > { %v13265_v51 = vld.sshfl [vmem:[#allocation1 + $0x20] sm:$0xff pattern:$0x73625140]  ;;  %v13267_v6 = vld.sshfl [vmem:[#allocation1 + $0x28] sm:$0xff pattern:$0x73625140] }
 0x320   : > { %v13272_v27 = vld.sshfl [vmem:[#allocation1 + $0x30] sm:$0xff pattern:$0x73625140]  ;;  %v13274_v10 = vld.sshfl [vmem:[#allocation1 + $0x38] sm:$0xff pattern:$0x73625140] }
 0x321   : > { %2016 = vst [vmem:[#allocation1 + $0x20] ss:$4 sm:$0xff] %v13262_v41 }
 0x322   : > { %1478 = vst [vmem:[#allocation3 + $0x218] sm:$0x30] %v12781_v9  ;;  %v13292_v9 = vadd.f32 %v8739_v63, %v1874_v48  ;;  %v14510_v63 = vld [vmem:[#allocation47_spill] sm:$0xff] }
 0x323   : > { %1479 = vst [vmem:[#allocation3 + $0x3f8] sm:$0x30] %v12783_v61 }
 0x324   : > { %1480 = vst [vmem:[#allocation3 + $0x8] sm:$0x30] %v12785_v12  ;;  %vm1923_vm1 = vcmp.ge.f32.partialorder %v13292_v9, 1.0  ;;  %v14508_v12 = vld [vmem:[#allocation45_spill] sm:$0xff] }
 0x325   : > { %1481 = vst [vmem:[#allocation3 + $0x128] sm:$0x30] %v14506_v14  ;;  %v13307_v48 = vsel %vm1923_vm1, 1.0, %v14407_v11 }
 0x326   : > { %1486 = vst [vmem:[#allocation3 + $0xb0] sm:$0x30] %v12839_v25 }
 0x327   : > { %1487 = vst [vmem:[#allocation3 + $0x1e0] sm:$0x30] %v12841_v22  ;;  %v13315_v22 = vadd.f32 %v8741_v56, %v13092_v46  ;;  %v14519_v56 = vld [vmem:[#allocation52_spill] sm:$0xff] }
 0x328   : > { %v13288_v7 = vld.sshfl [vmem:[#allocation1 + $0x20] sm:$0xff pattern:$0x73625140]  ;;  %v13290_v40 = vld.sshfl [vmem:[#allocation1 + $0x28] sm:$0xff pattern:$0x73625140] }
 0x329   : > { %v13294_v61 = vld.sshfl [vmem:[#allocation1 + $0x30] sm:$0xff pattern:$0x73625140]  ;;  %v13296_v44 = vld.sshfl [vmem:[#allocation1 + $0x38] sm:$0xff pattern:$0x73625140] }
 0x32a   : > { %14507 = vst [vmem:[#allocation18_spill] sm:$0xff] %v13296_v44  ;;  %vm1925_vm2 = vcmp.ge.f32.partialorder %v13315_v22, 1.0 }
 0x32b   : > { %2026 = vst [vmem:[#allocation1 + $0x20] ss:$4 sm:$0xff] %v13285_v57  ;;  %v13330_v46 = vsel %vm1925_vm2, 1.0, %v14407_v11 }
 0x32c   : > { %1488 = vst [vmem:[#allocation3 + $0x1f0] sm:$0x30] %v12843_v33 }
 0x32d   : > { %1489 = vst [vmem:[#allocation3 + $0x10] sm:$0x30] %v14508_v12  ;;  %v14515_v12 = vld [vmem:[#allocation48_spill] sm:$0xff] }
 0x32e   : > { %1494 = vst [vmem:[#allocation3 + $0x208] sm:$0x30] %v14509_v19  ;;  %v14516_v19 = vld [vmem:[#allocation49_spill] sm:$0xff] }
 0x32f   : > { %1495 = vst [vmem:[#allocation3 + $0xd0] sm:$0x30] %v14510_v63  ;;  %v14517_v63 = vld [vmem:[#allocation50_spill] sm:$0xff] }
 0x330   : > { %1496 = vst [vmem:[#allocation3 + $0x88] sm:$0x30] %v14515_v12 }
 0x331   : > { %1497 = vst [vmem:[#allocation3 + $0x2f0] sm:$0x30] %v14516_v19 }
 0x332   : > { %v13310_v14 = vld.sshfl [vmem:[#allocation1 + $0x20] sm:$0xff pattern:$0x73625140]  ;;  %v13312_v25 = vld.sshfl [vmem:[#allocation1 + $0x28] sm:$0xff pattern:$0x73625140] }
 0x333   : > { %14511 = vst [vmem:[#allocation19_spill] sm:$0xff] %v13310_v14  ;;  %v13317_v44 = vld.sshfl [vmem:[#allocation1 + $0x30] sm:$0xff pattern:$0x73625140] }
 0x334   : > { %14512 = vst [vmem:[#allocation20_spill] sm:$0xff] %v13312_v25  ;;  %v13319_v33 = vld.sshfl [vmem:[#allocation1 + $0x38] sm:$0xff pattern:$0x73625140]  ;;  %v8759_v25 = vld [vmem:[%s11924_s29 + $0x288] sm:$0xff]  ;;  %v14518_v14 = vld [vmem:[#allocation51_spill] sm:$0xff] }
 0x335   : > { %14513 = vst [vmem:[#allocation21_spill] sm:$0xff] %v13317_v44 }
 0x336   : > { %14514 = vst [vmem:[#allocation22_spill] sm:$0xff] %v13319_v33 }
 0x337   : > { %2036 = vst [vmem:[#allocation1 + $0x20] ss:$4 sm:$0xff] %v13307_v48 }
 0x338   : > { %1502 = vst [vmem:[#allocation3 + $0x1d8] sm:$0x30] %v12903_v38  ;;  %v13341_v38 = vadd.f32 %v8759_v25, %v2200_v1 }
 0x339   : > { %1503 = vst [vmem:[#allocation3 + $0x30] sm:$0x30] %v14517_v63 }
 0x33a   : > { %1504 = vst [vmem:[#allocation3 + $0x140] sm:$0x30] %v14518_v14  ;;  %v2186_v14 = vsub.f32 1.0, %v13192_v53  ;;  %vm2249_vm3 = vcmp.ge.f32.partialorder %v13341_v38, 1.0 }
 0x33b   : > { %1505 = vst [vmem:[#allocation3 + $0x2a8] sm:$0x30] %v14519_v56  ;;  %v8761_v56 = vld [vmem:[%s11924_s29 + $0x298] sm:$0xff]  ;;  %v13354_v1 = vsel %vm2249_vm3, 1.0, %v14407_v11 }
 0x33c   : > { %1786 = vst [vmem:[#allocation3 + $0x368] sm:$0xc0] %v12943_v43  ;;  %v2202_v63 = vmul.f32 %v2186_v14, %v13179_v17 }
 0x33d   : > { %1787 = vst [vmem:[#allocation3 + $0x330] sm:$0xc0] %v12945_v47 }
 0x33e   : > { %v13333_v33 = vld.sshfl [vmem:[#allocation1 + $0x20] sm:$0xff pattern:$0x73625140]  ;;  %v13335_v12 = vld.sshfl [vmem:[#allocation1 + $0x28] sm:$0xff pattern:$0x73625140]  ;;  %v13365_v17 = vadd.f32 %v8761_v56, %v2202_v63 }
 0x33f   : > { %v13337_v19 = vld.sshfl [vmem:[#allocation1 + $0x30] sm:$0xff pattern:$0x73625140]  ;;  %v13339_v44 = vld.sshfl [vmem:[#allocation1 + $0x38] sm:$0xff pattern:$0x73625140] }
 0x340   : > { %2046 = vst [vmem:[#allocation1 + $0x20] ss:$4 sm:$0xff] %v13330_v46  ;;  %vm2251_vm4 = vcmp.ge.f32.partialorder %v13365_v17, 1.0 }
 0x341   : > { %1788 = vst [vmem:[#allocation3 + $0x48] sm:$0xc0] %v12950_v24 }
 0x342   : > { %1793 = vst [vmem:[#allocation3 + $0x320] sm:$0xc0] %v12996_v18  ;;  %v2188_v18 = vsub.f32 1.0, %v13213_v4  ;;  %v13378_v4 = vsel %vm2251_vm4, 1.0, %v14407_v11 }
 0x343   : > { %1794 = vst [vmem:[#allocation3 + $0x150] sm:$0xc0] %v12998_v0 }
 0x344   : > { %1795 = vst [vmem:[#allocation3 + $0x108] sm:$0xc0] %v13000_v5  ;;  %v2204_v0 = vmul.f32 %v2188_v18, %v13197_v58  ;;  %v8763_v5 = vld [vmem:[%s11924_s29 + $0x2a8] sm:$0xff]  ;;  %v14522_v18 = vld [vmem:[#allocation64_spill] sm:$0xff] }
 0x345   : > { %1796 = vst [vmem:[#allocation3 + $0x60] sm:$0xc0] %v13005_v52 }
 0x346   : > { %1801 = vst [vmem:[#allocation3 + $0x80] sm:$0xc0] %v13034_v34  ;;  %v13383_v34 = vadd.f32 %v8763_v5, %v2204_v0  ;;  %v8767_v5 = vld [vmem:[%s11924_s29 + $0x2c8] sm:$0xff] }
 0x347   : > { %v13357_v43 = vld.sshfl [vmem:[#allocation1 + $0x20] sm:$0xff pattern:$0x73625140]  ;;  %v13359_v47 = vld.sshfl [vmem:[#allocation1 + $0x28] sm:$0xff pattern:$0x73625140] }
 0x348   : > { %v13361_v53 = vld.sshfl [vmem:[#allocation1 + $0x30] sm:$0xff pattern:$0x73625140]  ;;  %v13363_v24 = vld.sshfl [vmem:[#allocation1 + $0x38] sm:$0xff pattern:$0x73625140] }
 0x349   : > { %2315 = vst [vmem:[#allocation1 + $0x21] ss:$4 sm:$0xff] %v13354_v1  ;;  %vm2253_vm5 = vcmp.ge.f32.partialorder %v13383_v34, 1.0 }
 0x34a   : > { %1802 = vst [vmem:[#allocation3 + $0x1a8] sm:$0xc0] %v13036_v20  ;;  %v13399_v58 = vsel %vm2253_vm5, 1.0, %v14407_v11 }
 0x34b   : > { %1803 = vst [vmem:[#allocation3 + $0x1b8] sm:$0xc0] %v13042_v16  ;;  %v2190_v16 = vsub.f32 1.0, %v13237_v42  ;;  %v14520_v42 = vld [vmem:[#allocation9_spill] sm:$0xff] }
 0x34c   : > { %1804 = vst [vmem:[#allocation3 + $0x168] sm:$0xc0] %v13045_v60  ;;  %v8765_v60 = vld [vmem:[%s11924_s29 + $0x2b8] sm:$0xff] }
 0x34d   : > { %1809 = vst [vmem:[#allocation3 + $0x138] sm:$0xc0] %v13065_v28  ;;  %v2206_v28 = vmul.f32 %v2190_v16, %v13220_v62 }
 0x34e   : > { %1810 = vst [vmem:[#allocation3 + $0xc0] sm:$0xc0] %v13069_v35 }
 0x34f   : > { %1811 = vst [vmem:[#allocation3 + $0x1c0] sm:$0xc0] %v13071_v45  ;;  %v13406_v56 = vadd.f32 %v8765_v60, %v2206_v28  ;;  %v2523_v60 = vsub.f32 1.0, %v13354_v1  ;;  %v2196_v1 = vsub.f32 1.0, %v13307_v48 }
 0x350   : > { %v2320_v52 = vld.sshfl [vmem:[#allocation1 + $0x20] sm:$0xff pattern:$0x73625140]  ;;  %v13381_v25 = vld.sshfl [vmem:[#allocation1 + $0x28] sm:$0xff pattern:$0x73625140] }
 0x351   : > { %v13385_v14 = vld.sshfl [vmem:[#allocation1 + $0x30] sm:$0xff pattern:$0x73625140]  ;;  %v13387_v20 = vld.sshfl [vmem:[#allocation1 + $0x38] sm:$0xff pattern:$0x73625140] }
 0x352   : > { %2325 = vst [vmem:[#allocation1 + $0x21] ss:$4 sm:$0xff] %v13378_v4  ;;  %vm2255_vm6 = vcmp.ge.f32.partialorder %v13406_v56, 1.0 }
 0x353   : > { %2462 = vst [vmem:[#allocation3 + $0x70] sm:$0xc] %v2320_v52 }
 0x354   : > { %1812 = vst [vmem:[#allocation3 + $0x280] sm:$0xc0] %v13073_v26  ;;  %v2192_v26 = vsub.f32 1.0, %v13262_v41  ;;  %v13423_v41 = vsel %vm2255_vm6, 1.0, %v14407_v11 }
 0x355   : > { %1817 = vst [vmem:[#allocation3 + $0x218] sm:$0xc0] %v13088_v36  ;;  %v14521_v36 = vld [vmem:[#allocation10_spill] sm:$0xff] }
 0x356   : > { %1818 = vst [vmem:[#allocation3 + $0x3f8] sm:$0xc0] %v14520_v42  ;;  %v2208_v0 = vmul.f32 %v2192_v26, %v13244_v30 }
 0x357   : > { %1819 = vst [vmem:[#allocation3 + $0x8] sm:$0xc0] %v14521_v36 }
 0x358   : > { %1820 = vst [vmem:[#allocation3 + $0x128] sm:$0xc0] %v14522_v18  ;;  %v13430_v28 = vadd.f32 %v8767_v5, %v2208_v0  ;;  %v14524_v18 = vld [vmem:[#allocation12_spill] sm:$0xff]  ;;  %v8773_v0 = vld [vmem:[%s11924_s29 + $0x2f8] sm:$0xff]  ;;  %v14525_v5 = vld [vmem:[#allocation13_spill] sm:$0xff] }
 0x359   : > { %v13402_v63 = vld.sshfl [vmem:[#allocation1 + $0x20] sm:$0xff pattern:$0x73625140]  ;;  %v13404_v35 = vld.sshfl [vmem:[#allocation1 + $0x28] sm:$0xff pattern:$0x73625140] }
 0x35a   : > { %v13408_v45 = vld.sshfl [vmem:[#allocation1 + $0x30] sm:$0xff pattern:$0x73625140]  ;;  %v13410_v62 = vld.sshfl [vmem:[#allocation1 + $0x38] sm:$0xff pattern:$0x73625140] }
 0x35b   : > { %2335 = vst [vmem:[#allocation1 + $0x21] ss:$4 sm:$0xff] %v13399_v58  ;;  %vm2257_vm7 = vcmp.ge.f32.partialorder %v13430_v28, 1.0 }
 0x35c   : > { %1825 = vst [vmem:[#allocation3 + $0xb0] sm:$0xc0] %v13122_v2 }
 0x35d   : > { %1826 = vst [vmem:[#allocation3 + $0x1e0] sm:$0xc0] %v13124_v39  ;;  %v2194_v39 = vsub.f32 1.0, %v13285_v57  ;;  %v13448_v57 = vsel %vm2257_vm7, 1.0, %v14407_v11 }
 0x35e   : > { %1827 = vst [vmem:[#allocation3 + $0x1f0] sm:$0xc0] %v13126_v13 }
 0x35f   : > { %1828 = vst [vmem:[#allocation3 + $0x10] sm:$0xc0] %v13128_v32  ;;  %v2210_v13 = vmul.f32 %v2194_v39, %v13270_v23  ;;  %v8769_v32 = vld [vmem:[%s11924_s29 + $0x2d8] sm:$0xff]  ;;  %v14526_v39 = vld [vmem:[#allocation14_spill] sm:$0xff] }
 0x360   : > { %1833 = vst [vmem:[#allocation3 + $0x208] sm:$0xc0] %v13147_v55 }
 0x361   : > { %1834 = vst [vmem:[#allocation3 + $0xd0] sm:$0xc0] %v13149_v37  ;;  %v13456_v23 = vadd.f32 %v8769_v32, %v2210_v13 }
 0x362   : > { %v13426_v52 = vld.sshfl [vmem:[#allocation1 + $0x20] sm:$0xff pattern:$0x73625140]  ;;  %v13428_v16 = vld.sshfl [vmem:[#allocation1 + $0x28] sm:$0xff pattern:$0x73625140] }
 0x363   : > { %v13432_v2 = vld.sshfl [vmem:[#allocation1 + $0x30] sm:$0xff pattern:$0x73625140]  ;;  %v13434_v30 = vld.sshfl [vmem:[#allocation1 + $0x38] sm:$0xff pattern:$0x73625140] }
 0x364   : > { %2345 = vst [vmem:[#allocation1 + $0x21] ss:$4 sm:$0xff] %v13423_v41  ;;  %vm2259_vm8 = vcmp.ge.f32.partialorder %v13456_v23, 1.0 }
 0x365   : > { %1835 = vst [vmem:[#allocation3 + $0x88] sm:$0xc0] %v13151_v3  ;;  %v2539_v3 = vmul.f32 %v2523_v60, %v13341_v38  ;;  %v13471_v38 = vsel %vm2259_vm8, 1.0, %v14407_v11  ;;  %v14527_v60 = vld [vmem:[#allocation15_spill] sm:$0xff] }
 0x366   : > { %1836 = vst [vmem:[#allocation3 + $0x2f0] sm:$0xc0] %v13153_v8 }
 0x367   : > { %1841 = vst [vmem:[#allocation3 + $0x1d8] sm:$0xc0] %v13171_v31  ;;  %v2212_v31 = vmul.f32 %v2196_v1, %v13292_v9  ;;  %v2198_v9 = vsub.f32 1.0, %v13330_v46  ;;  %v14528_v1 = vld [vmem:[#allocation16_spill] sm:$0xff] }
 0x368   : > { %1842 = vst [vmem:[#allocation3 + $0x30] sm:$0xc0] %v13173_v29  ;;  %v8771_v29 = vld [vmem:[%s11924_s29 + $0x2e8] sm:$0xff] }
 0x369   : > { %1843 = vst [vmem:[#allocation3 + $0x140] sm:$0xc0] %v13175_v49  ;;  %v13478_v49 = vadd.f32 %v8771_v29, %v2212_v31  ;;  %v14529_v31 = vld [vmem:[#allocation17_spill] sm:$0xff] }
 0x36a   : > { %1844 = vst [vmem:[#allocation3 + $0x2a8] sm:$0xc0] %v13177_v59  ;;  %v8791_v29 = vld [vmem:[%s11924_s29 + $0x308] sm:$0xff] }
 0x36b   : > { %v13451_v55 = vld.sshfl [vmem:[#allocation1 + $0x20] sm:$0xff pattern:$0x73625140]  ;;  %v13453_v37 = vld.sshfl [vmem:[#allocation1 + $0x28] sm:$0xff pattern:$0x73625140] }
 0x36c   : > { %v13458_v8 = vld.sshfl [vmem:[#allocation1 + $0x30] sm:$0xff pattern:$0x73625140]  ;;  %v13460_v42 = vld.sshfl [vmem:[#allocation1 + $0x38] sm:$0xff pattern:$0x73625140] }
 0x36d   : > { %2355 = vst [vmem:[#allocation1 + $0x21] ss:$4 sm:$0xff] %v13448_v57  ;;  %vm2261_vm9 = vcmp.ge.f32.partialorder %v13478_v49, 1.0 }
 0x36e   : > { %2124 = vst [vmem:[#allocation3 + $0x300] sm:$0x3] %v13195_v15  ;;  %v14523_v15 = vld [vmem:[#allocation11_spill] sm:$0xff]  ;;  %v13495_v46 = vsel %vm2261_vm9, 1.0, %v14407_v11 }
 0x36f   : > { %2125 = vst [vmem:[#allocation3 + $0xe0] sm:$0x3] %v13199_v50  ;;  %v2214_v50 = vmul.f32 %v2198_v9, %v13315_v22 }
 0x370   : > { %2126 = vst [vmem:[#allocation3 + $0x178] sm:$0x3] %v14523_v15 }
 0x371   : > { %2131 = vst [vmem:[#allocation3 + $0x248] sm:$0x3] %v13216_v54  ;;  %v13502_v32 = vadd.f32 %v8773_v0, %v2214_v50 }
 0x372   : > { %2132 = vst [vmem:[#allocation3 + $0x40] sm:$0x3] %v13218_v21 }
 0x373   : > { %2133 = vst [vmem:[#allocation3 + $0x20] sm:$0x3] %v14524_v18  ;;  %vm2263_vm10 = vcmp.ge.f32.partialorder %v13502_v32, 1.0 }
 0x374   : > { %v13474_v48 = vld.sshfl [vmem:[#allocation1 + $0x20] sm:$0xff pattern:$0x73625140]  ;;  %v13476_v26 = vld.sshfl [vmem:[#allocation1 + $0x28] sm:$0xff pattern:$0x73625140] }
 0x375   : > { %v13480_v59 = vld.sshfl [vmem:[#allocation1 + $0x30] sm:$0xff pattern:$0x73625140]  ;;  %v13482_v36 = vld.sshfl [vmem:[#allocation1 + $0x38] sm:$0xff pattern:$0x73625140] }
 0x376   : > { %2365 = vst [vmem:[#allocation1 + $0x21] ss:$4 sm:$0xff] %v13471_v38  ;;  %v13517_v9 = vsel %vm2263_vm10, 1.0, %v14407_v11 }
 0x377   : > { %2134 = vst [vmem:[#allocation3 + $0xe8] sm:$0x3] %v14525_v5  ;;  %v13528_v5 = vadd.f32 %v8791_v29, %v2539_v3  ;;  %v14534_v29 = vld [vmem:[#allocation22_spill] sm:$0xff] }
 0x378   : > { %2139 = vst [vmem:[#allocation3 + $0x2c8] sm:$0x3] %v14526_v39  ;;  %v14530_v39 = vld [vmem:[#allocation18_spill] sm:$0xff] }
 0x379   : > { %2140 = vst [vmem:[#allocation3 + $0x210] sm:$0x3] %v14527_v60  ;;  %vm2588_vm11 = vcmp.ge.f32.partialorder %v13528_v5, 1.0 }
 0x37a   : > { %2141 = vst [vmem:[#allocation3 + $0x3d8] sm:$0x3] %v14528_v1  ;;  %v13541_v3 = vsel %vm2588_vm11, 1.0, %v14407_v11  ;;  %v14532_v1 = vld [vmem:[#allocation20_spill] sm:$0xff] }
 0x37b   : > { %2142 = vst [vmem:[#allocation3 + $0x1e8] sm:$0x3] %v14529_v31  ;;  %v14533_v31 = vld [vmem:[#allocation21_spill] sm:$0xff] }
 0x37c   : > { %2147 = vst [vmem:[#allocation3 + $0x58] sm:$0x3] %v13265_v51 }
 0x37d   : > { %v13498_v13 = vld.sshfl [vmem:[#allocation1 + $0x20] sm:$0xff pattern:$0x73625140]  ;;  %v13500_v54 = vld.sshfl [vmem:[#allocation1 + $0x28] sm:$0xff pattern:$0x73625140] }
 0x37e   : > { %v13504_v21 = vld.sshfl [vmem:[#allocation1 + $0x30] sm:$0xff pattern:$0x73625140]  ;;  %v13506_v22 = vld.sshfl [vmem:[#allocation1 + $0x38] sm:$0xff pattern:$0x73625140] }
 0x37f   : > { %2375 = vst [vmem:[#allocation1 + $0x21] ss:$4 sm:$0xff] %v13495_v46 }
 0x380   : > { %2148 = vst [vmem:[#allocation3 + $0x120] sm:$0x3] %v13267_v6  ;;  %v2525_v6 = vsub.f32 1.0, %v13378_v4  ;;  %v14531_v4 = vld [vmem:[#allocation19_spill] sm:$0xff] }
 0x381   : > { %2149 = vst [vmem:[#allocation3 + $0x198] sm:$0x3] %v13272_v27  ;;  %v8793_v27 = vld [vmem:[%s11924_s29 + $0x318] sm:$0xff] }
 0x382   : > { %2150 = vst [vmem:[#allocation3 + $0x2e8] sm:$0x3] %v13274_v10  ;;  %v2541_v51 = vmul.f32 %v2525_v6, %v13365_v17 }
 0x383   : > { %2155 = vst [vmem:[#allocation3 + $0x1a0] sm:$0x3] %v13288_v7 }
 0x384   : > { %2156 = vst [vmem:[#allocation3 + $0xa8] sm:$0x3] %v13290_v40  ;;  %v13552_v17 = vadd.f32 %v8793_v27, %v2541_v51 }
 0x385   : > { %2157 = vst [vmem:[#allocation3 + $0x258] sm:$0x3] %v13294_v61  ;;  %v2527_v61 = vsub.f32 1.0, %v13399_v58 }
 0x386   : > { %v13520_v15 = vld.sshfl [vmem:[#allocation1 + $0x20] sm:$0xff pattern:$0x73625140]  ;;  %v13522_v50 = vld.sshfl [vmem:[#allocation1 + $0x28] sm:$0xff pattern:$0x73625140] }
 0x387   : > { %v13524_v18 = vld.sshfl [vmem:[#allocation1 + $0x30] sm:$0xff pattern:$0x73625140]  ;;  %v13526_v0 = vld.sshfl [vmem:[#allocation1 + $0x38] sm:$0xff pattern:$0x73625140]  ;;  %v2543_v6 = vmul.f32 %v2527_v61, %v13383_v34 }
 0x388   : > { %2385 = vst [vmem:[#allocation1 + $0x21] ss:$4 sm:$0xff] %v13517_v9  ;;  %vm2590_vm12 = vcmp.ge.f32.partialorder %v13552_v17, 1.0 }
 0x389   : > { %2158 = vst [vmem:[#allocation3 + $0x2d8] sm:$0x3] %v14530_v39  ;;  %v8795_v39 = vld [vmem:[%s11924_s29 + $0x328] sm:$0xff]  ;;  %v13565_v58 = vsel %vm2590_vm12, 1.0, %v14407_v11 }
 0x38a   : > { %2163 = vst [vmem:[#allocation3 + $0x250] sm:$0x3] %v14531_v4  ;;  %v13570_v4 = vadd.f32 %v8795_v39, %v2543_v6  ;;  %v2862_v6 = vsub.f32 1.0, %v13541_v3 }
 0x38b   : > { %2164 = vst [vmem:[#allocation3 + $0x378] sm:$0x3] %v14532_v1 }
 0x38c   : > { %2165 = vst [vmem:[#allocation3 + $0xb8] sm:$0x3] %v14533_v31  ;;  %vm2592_vm13 = vcmp.ge.f32.partialorder %v13570_v4, 1.0 }
 0x38d   : > { %2166 = vst [vmem:[#allocation3 + $0x38] sm:$0x3] %v14534_v29  ;;  %v13586_v34 = vsel %vm2592_vm13, 1.0, %v14407_v11 }
 0x38e   : > { %2171 = vst [vmem:[#allocation3 + $0x278] sm:$0x3] %v13333_v33  ;;  %v2529_v33 = vsub.f32 1.0, %v13423_v41 }
 0x38f   : > { %v13544_v10 = vld.sshfl [vmem:[#allocation1 + $0x20] sm:$0xff pattern:$0x73625140]  ;;  %v13546_v7 = vld.sshfl [vmem:[#allocation1 + $0x28] sm:$0xff pattern:$0x73625140] }
 0x390   : > { %v13548_v60 = vld.sshfl [vmem:[#allocation1 + $0x30] sm:$0xff pattern:$0x73625140]  ;;  %v13550_v40 = vld.sshfl [vmem:[#allocation1 + $0x38] sm:$0xff pattern:$0x73625140] }
 0x391   : > { %2654 = vst [vmem:[#allocation1 + $0x22] ss:$4 sm:$0xff] %v13541_v3  ;;  %v2535_v3 = vsub.f32 1.0, %v13495_v46 }
 0x392   : > { %2172 = vst [vmem:[#allocation3 + $0x360] sm:$0x3] %v13335_v12  ;;  %v2545_v12 = vmul.f32 %v2529_v33, %v13406_v56 }
 0x393   : > { %2173 = vst [vmem:[#allocation3 + $0x228] sm:$0x3] %v13337_v19  ;;  %v8797_v19 = vld [vmem:[%s11924_s29 + $0x338] sm:$0xff] }
 0x394   : > { %2174 = vst [vmem:[#allocation3 + $0x348] sm:$0x3] %v13339_v44  ;;  %v13593_v61 = vadd.f32 %v8797_v19, %v2545_v12 }
 0x395   : > { %2179 = vst [vmem:[#allocation3 + $0x298] sm:$0x3] %v13357_v43 }
 0x396   : > { %2180 = vst [vmem:[#allocation3 + $0x270] sm:$0x3] %v13359_v47  ;;  %v2531_v47 = vsub.f32 1.0, %v13448_v57  ;;  %vm2594_vm14 = vcmp.ge.f32.partialorder %v13593_v61, 1.0 }
 0x397   : > { %2181 = vst [vmem:[#allocation3 + $0x310] sm:$0x3] %v13361_v53  ;;  %v13610_v57 = vsel %vm2594_vm14, 1.0, %v14407_v11 }
 0x398   : > { %v2659_v51 = vld.sshfl [vmem:[#allocation1 + $0x20] sm:$0xff pattern:$0x73625140]  ;;  %v13568_v27 = vld.sshfl [vmem:[#allocation1 + $0x28] sm:$0xff pattern:$0x73625140]  ;;  %v2547_v53 = vmul.f32 %v2531_v47, %v13430_v28 }
 0x399   : > { %v13572_v1 = vld.sshfl [vmem:[#allocation1 + $0x30] sm:$0xff pattern:$0x73625140]  ;;  %v13574_v31 = vld.sshfl [vmem:[#allocation1 + $0x38] sm:$0xff pattern:$0x73625140] }
 0x39a   : > { %2664 = vst [vmem:[#allocation1 + $0x22] ss:$4 sm:$0xff] %v13565_v58 }
 0x39b   : > { %2801 = vst [vmem:[#allocation3 + $0x70] sm:$0x30] %v2659_v51 }
 0x39c   : > { %2182 = vst [vmem:[#allocation3 + $0x190] sm:$0x3] %v13363_v24  ;;  %v8799_v24 = vld [vmem:[%s11924_s29 + $0x348] sm:$0xff] }
 0x39d   : > { %2463 = vst [vmem:[#allocation3 + $0x300] sm:$0xc] %v13381_v25  ;;  %v13617_v29 = vadd.f32 %v8799_v24, %v2547_v53  ;;  %v10981_v53 = vld [vmem:[%s11926_s4 + $0x208] sm:$0xff]  ;;  %v3206_v24 = vld [vmem:[#allocation3 + $0x50] sm:$0xff] }
 0x39e   : > { %2464 = vst [vmem:[#allocation3 + $0xe0] sm:$0xc] %v13385_v14 }
 0x39f   : > { %2465 = vst [vmem:[#allocation3 + $0x178] sm:$0xc] %v13387_v20  ;;  %vm2596_vm15 = vcmp.ge.f32.partialorder %v13617_v29, 1.0 }
 0x3a0   : > { %2470 = vst [vmem:[#allocation3 + $0x248] sm:$0xc] %v13402_v63  ;;  %v2533_v63 = vsub.f32 1.0, %v13471_v38  ;;  %v13635_v38 = vsel %vm2596_vm15, 1.0, %v14407_v11 }
 0x3a1   : > { %v13589_v41 = vld.sshfl [vmem:[#allocation1 + $0x20] sm:$0xff pattern:$0x73625140]  ;;  %v13591_v44 = vld.sshfl [vmem:[#allocation1 + $0x28] sm:$0xff pattern:$0x73625140] }
 0x3a2   : > { %v13595_v43 = vld.sshfl [vmem:[#allocation1 + $0x30] sm:$0xff pattern:$0x73625140]  ;;  %v13597_v56 = vld.sshfl [vmem:[#allocation1 + $0x38] sm:$0xff pattern:$0x73625140] }
 0x3a3   : > { %2674 = vst [vmem:[#allocation1 + $0x22] ss:$4 sm:$0xff] %v13586_v34 }
 0x3a4   : > { %2471 = vst [vmem:[#allocation3 + $0x40] sm:$0xc] %v13404_v35  ;;  %v2549_v35 = vmul.f32 %v2533_v63, %v13456_v23 }
 0x3a5   : > { %2472 = vst [vmem:[#allocation3 + $0x20] sm:$0xc] %v13408_v45  ;;  %v8801_v45 = vld [vmem:[%s11924_s29 + $0x358] sm:$0xff] }
 0x3a6   : > { %2473 = vst [vmem:[#allocation3 + $0xe8] sm:$0xc] %v13410_v62  ;;  %v13643_v23 = vadd.f32 %v8801_v45, %v2549_v35  ;;  %v10980_v45 = vld [vmem:[%s11926_s4 + $0x200] sm:$0xff] }
 0x3a7   : > { %2478 = vst [vmem:[#allocation3 + $0x2c8] sm:$0xc] %v13426_v52 }
 0x3a8   : > { %2479 = vst [vmem:[#allocation3 + $0x210] sm:$0xc] %v13428_v16  ;;  %v2878_v16 = vmul.f32 %v2862_v6, %v13528_v5  ;;  %vm2598_vm0 = vcmp.ge.f32.partialorder %v13643_v23, 1.0  ;;  %v10988_v6 = vld [vmem:[%s11926_s4 + $0x240] sm:$0xff] }
 0x3a9   : > { %2480 = vst [vmem:[#allocation3 + $0x3d8] sm:$0xc] %v13432_v2  ;;  %v13658_v5 = vsel %vm2598_vm0, 1.0, %v14407_v11 }
 0x3aa   : > { %v13613_v25 = vld.sshfl [vmem:[#allocation1 + $0x20] sm:$0xff pattern:$0x73625140]  ;;  %v13615_v14 = vld.sshfl [vmem:[#allocation1 + $0x28] sm:$0xff pattern:$0x73625140] }
 0x3ab   : > { %v13619_v20 = vld.sshfl [vmem:[#allocation1 + $0x30] sm:$0xff pattern:$0x73625140]  ;;  %v13621_v28 = vld.sshfl [vmem:[#allocation1 + $0x38] sm:$0xff pattern:$0x73625140] }
 0x3ac   : > { %2684 = vst [vmem:[#allocation1 + $0x22] ss:$4 sm:$0xff] %v13610_v57 }
 0x3ad   : > { %2481 = vst [vmem:[#allocation3 + $0x1e8] sm:$0xc] %v13434_v30  ;;  %v2551_v30 = vmul.f32 %v2535_v3, %v13478_v49  ;;  %v2537_v49 = vsub.f32 1.0, %v13517_v9  ;;  %v8825_v3 = vld [vmem:[%s11924_s29 + $0x398] sm:$0xff] }
 0x3ae   : > { %2486 = vst [vmem:[#allocation3 + $0x58] sm:$0xc] %v13451_v55  ;;  %v8803_v55 = vld [vmem:[%s11924_s29 + $0x368] sm:$0xff] }
 0x3af   : > { %2487 = vst [vmem:[#allocation3 + $0x120] sm:$0xc] %v13453_v37  ;;  %v13665_v37 = vadd.f32 %v8803_v55, %v2551_v30  ;;  %v14536_v30 = vld [vmem:[#allocation53_spill] sm:$0xff] }
 0x3b0   : > { %2488 = vst [vmem:[#allocation3 + $0x198] sm:$0xc] %v13458_v8 }
 0x3b1   : > { %2489 = vst [vmem:[#allocation3 + $0x2e8] sm:$0xc] %v13460_v42  ;;  %vm2600_vm1 = vcmp.ge.f32.partialorder %v13665_v37, 1.0  ;;  %v2553_v42 = vmul.f32 %v2537_v49, %v13502_v32 }
 0x3b2   : > { %2494 = vst [vmem:[#allocation3 + $0x1a0] sm:$0xc] %v13474_v48  ;;  %v8805_v48 = vld [vmem:[%s11924_s29 + $0x378] sm:$0xff]  ;;  %v13682_v9 = vsel %vm2600_vm1, 1.0, %v14407_v11  ;;  %vm8388_vm1 = vcmask 261120  }
 0x3b3   : > { %v13638_v62 = vld.sshfl [vmem:[#allocation1 + $0x20] sm:$0xff pattern:$0x73625140]  ;;  %v13640_v52 = vld.sshfl [vmem:[#allocation1 + $0x28] sm:$0xff pattern:$0x73625140]  ;;  %v13689_v12 = vadd.f32 %v8805_v48, %v2553_v42 }
 0x3b4   : > { %v13645_v2 = vld.sshfl [vmem:[#allocation1 + $0x30] sm:$0xff pattern:$0x73625140]  ;;  %v13647_v39 = vld.sshfl [vmem:[#allocation1 + $0x38] sm:$0xff pattern:$0x73625140] }
 0x3b5   : > { %2694 = vst [vmem:[#allocation1 + $0x22] ss:$4 sm:$0xff] %v13635_v38  ;;  %vm2602_vm2 = vcmp.ge.f32.partialorder %v13689_v12, 1.0 }
 0x3b6   : > { %2495 = vst [vmem:[#allocation3 + $0xa8] sm:$0xc] %v13476_v26 }
 0x3b7   : > { %2496 = vst [vmem:[#allocation3 + $0x258] sm:$0xc] %v13480_v59 }
 0x3b8   : > { %2497 = vst [vmem:[#allocation3 + $0x2d8] sm:$0xc] %v13482_v36 }
 0x3b9   : > { %2502 = vst [vmem:[#allocation3 + $0x250] sm:$0xc] %v13498_v13  ;;  %v8823_v13 = vld [vmem:[%s11924_s29 + $0x388] sm:$0xff] }
 0x3ba   : > { %2503 = vst [vmem:[#allocation3 + $0x378] sm:$0xc] %v13500_v54  ;;  %v13704_v54 = vsel %vm2602_vm2, 1.0, %v14407_v11  ;;  %v2911_v47 = vadd.f32 %v8823_v13, %v2878_v16  ;;  %v14535_v16 = vld [vmem:[#allocation54_spill] sm:$0xff]  ;;  %v8827_v13 = vld [vmem:[%s11924_s29 + $0x3a8] sm:$0xff] }
 0x3bb   : > { %2504 = vst [vmem:[#allocation3 + $0xb8] sm:$0xc] %v13504_v21 }
 0x3bc   : > { %v13661_v46 = vld.sshfl [vmem:[#allocation1 + $0x20] sm:$0xff pattern:$0x73625140]  ;;  %v13663_v51 = vld.sshfl [vmem:[#allocation1 + $0x28] sm:$0xff pattern:$0x73625140] }
 0x3bd   : > { %v13667_v8 = vld.sshfl [vmem:[#allocation1 + $0x30] sm:$0xff pattern:$0x73625140]  ;;  %v13669_v33 = vld.sshfl [vmem:[#allocation1 + $0x38] sm:$0xff pattern:$0x73625140] }
 0x3be   : > { %2704 = vst [vmem:[#allocation1 + $0x22] ss:$4 sm:$0xff] %v13658_v5  ;;  %vm2927_vm3 = vcmp.ge.f32.partialorder %v2911_v47, 1.0 }
 0x3bf   : > { %2505 = vst [vmem:[#allocation3 + $0x38] sm:$0xc] %v13506_v22 }
 0x3c0   : > { %2510 = vst [vmem:[#allocation3 + $0x278] sm:$0xc] %v13520_v15 }
 0x3c1   : > { %2511 = vst [vmem:[#allocation3 + $0x360] sm:$0xc] %v13522_v50  ;;  %v8839_v50 = vsel %vm2927_vm3, 1.0, %v14407_v11 }
 0x3c2   : > { %2512 = vst [vmem:[#allocation3 + $0x228] sm:$0xc] %v13524_v18 }
 0x3c3   : > { %2513 = vst [vmem:[#allocation3 + $0x348] sm:$0xc] %v13526_v0 }
 0x3c4   : > { %2518 = vst [vmem:[#allocation3 + $0x298] sm:$0xc] %v13544_v10 }
 0x3c5   : > { %v13685_v26 = vld.sshfl [vmem:[#allocation1 + $0x20] sm:$0xff pattern:$0x73625140]  ;;  %v13687_v59 = vld.sshfl [vmem:[#allocation1 + $0x28] sm:$0xff pattern:$0x73625140] }
 0x3c6   : > { %v13691_v36 = vld.sshfl [vmem:[#allocation1 + $0x30] sm:$0xff pattern:$0x73625140]  ;;  %v13693_v32 = vld.sshfl [vmem:[#allocation1 + $0x38] sm:$0xff pattern:$0x73625140] }
 0x3c7   : > { %2714 = vst [vmem:[#allocation1 + $0x22] ss:$4 sm:$0xff] %v13682_v9 }
 0x3c8   : > { %2519 = vst [vmem:[#allocation3 + $0x270] sm:$0xc] %v13546_v7 }
 0x3c9   : > { %2520 = vst [vmem:[#allocation3 + $0x310] sm:$0xc] %v13548_v60  ;;  %v10983_v60 = vld [vmem:[%s11926_s4 + $0x218] sm:$0xff] }
 0x3ca   : > { %2521 = vst [vmem:[#allocation3 + $0x190] sm:$0xc] %v13550_v40  ;;  %v10991_v40 = vld [vmem:[%s11926_s4 + $0x258] sm:$0xff]  ;;  %7606 = vmatpush.bf16.msra.mxu0 %v10983_v60 }
 0x3cb   : > { %2802 = vst [vmem:[#allocation3 + $0x300] sm:$0x30] %v13568_v27  ;;  %v10999_v27 = vld [vmem:[%s11926_s4 + $0x298] sm:$0xff]  ;;  %7620 = vmatpush.bf16.msra.mxu1 %v10991_v40 }
 0x3cc   : > { %2803 = vst [vmem:[#allocation3 + $0xe0] sm:$0x30] %v13572_v1  ;;  %7634 = vmatpush.bf16.msra.mxu2 %v10999_v27  ;;  %v11027_v27 = vld [vmem:[%s11926_s4 + $0x378] sm:$0xff] }
 0x3cd   : > { %2804 = vst [vmem:[#allocation3 + $0x178] sm:$0x30] %v13574_v31  ;;  %v11007_v31 = vld [vmem:[%s11926_s4 + $0x2d8] sm:$0xff] }
 0x3ce   : > { %v13707_v21 = vld.sshfl [vmem:[#allocation1 + $0x20] sm:$0xff pattern:$0x73625140]  ;;  %v13709_v19 = vld.sshfl [vmem:[#allocation1 + $0x28] sm:$0xff pattern:$0x73625140]  ;;  %7648 = vmatpush.bf16.msra.mxu3 %v11007_v31 }
 0x3cf   : > { %v13711_v22 = vld.sshfl [vmem:[#allocation1 + $0x30] sm:$0xff pattern:$0x73625140]  ;;  %v13713_v15 = vld.sshfl [vmem:[#allocation1 + $0x38] sm:$0xff pattern:$0x73625140] }
 0x3d0   : > { %2724 = vst [vmem:[#allocation1 + $0x22] ss:$4 sm:$0xff] %v13704_v54 }
 0x3d1   : > { %2809 = vst [vmem:[#allocation3 + $0x248] sm:$0x30] %v13589_v41  ;;  %v10982_v41 = vld [vmem:[%s11926_s4 + $0x210] sm:$0xff] }
 0x3d2   : > { %2810 = vst [vmem:[#allocation3 + $0x40] sm:$0x30] %v13591_v44  ;;  %v10990_v44 = vld [vmem:[%s11926_s4 + $0x250] sm:$0xff]  ;;  %7607 = vmatpush.bf16.msra.mxu0 %v10982_v41 }
 0x3d3   : > { %2811 = vst [vmem:[#allocation3 + $0x20] sm:$0x30] %v13595_v43  ;;  %v10998_v43 = vld [vmem:[%s11926_s4 + $0x290] sm:$0xff]  ;;  %7621 = vmatpush.bf16.msra.mxu1 %v10990_v44  ;;  %v3210_v44 = vld [vmem:[#allocation3 + $0x380] sm:$0xff] }
 0x3d4   : > { %2812 = vst [vmem:[#allocation3 + $0xe8] sm:$0x30] %v13597_v56  ;;  %v11006_v56 = vld [vmem:[%s11926_s4 + $0x2d0] sm:$0xff]  ;;  %7635 = vmatpush.bf16.msra.mxu2 %v10998_v43 }
 0x3d5   : > { %2817 = vst [vmem:[#allocation3 + $0x2c8] sm:$0x30] %v13613_v25  ;;  %v10989_v25 = vld [vmem:[%s11926_s4 + $0x248] sm:$0xff]  ;;  %7649 = vmatpush.bf16.msra.mxu3 %v11006_v56  ;;  %v11014_v43 = vld [vmem:[%s11926_s4 + $0x310] sm:$0xff] }
 0x3d6   : > { %2818 = vst [vmem:[#allocation3 + $0x210] sm:$0x30] %v13615_v14  ;;  %v10997_v14 = vld [vmem:[%s11926_s4 + $0x288] sm:$0xff]  ;;  %7608 = vmatpush.bf16.msra.mxu0 %v10981_v53 }
 0x3d7   : > { %v13723_v18 = vld.sshfl [vmem:[#allocation1 + $0x20] sm:$0xff pattern:$0x73625140]  ;;  %v13725_v0 = vld.sshfl [vmem:[#allocation1 + $0x28] sm:$0xff pattern:$0x73625140]  ;;  %7622 = vmatpush.bf16.msra.mxu1 %v10989_v25 }
 0x3d8   : > { %v13727_v10 = vld.sshfl [vmem:[#allocation1 + $0x30] sm:$0xff pattern:$0x73625140]  ;;  %v13729_v7 = vld.sshfl [vmem:[#allocation1 + $0x38] sm:$0xff pattern:$0x73625140]  ;;  %7636 = vmatpush.bf16.msra.mxu2 %v10997_v14 }
 0x3d9   : > { %2993 = vst [vmem:[#allocation1 + $0x23] ss:$4 sm:$0xff] %v8839_v50  ;;  %v11034_v25 = vld [vmem:[%s11926_s4 + $0x3b0] sm:$0xff] }
 0x3da   : > { %2819 = vst [vmem:[#allocation3 + $0x3d8] sm:$0x30] %v13619_v20  ;;  %v11005_v20 = vld [vmem:[%s11926_s4 + $0x2c8] sm:$0xff]  ;;  %7609 = vmatpush.bf16.msra.mxu0 %v10980_v45 }
 0x3db   : > { %2820 = vst [vmem:[#allocation3 + $0x1e8] sm:$0x30] %v13621_v28  ;;  %v2864_v28 = vsub.f32 1.0, %v13565_v58  ;;  %7650 = vmatpush.bf16.msra.mxu3 %v11005_v20  ;;  %v11004_v58 = vld [vmem:[%s11926_s4 + $0x2c0] sm:$0xff]  ;;  %7623 = vmatpush.bf16.msra.mxu1 %v10988_v6  ;;  %v11013_v45 = vld [vmem:[%s11926_s4 + $0x308] sm:$0xff] }
 0x3dc   : > { %2825 = vst [vmem:[#allocation3 + $0x58] sm:$0x30] %v13638_v62  ;;  %v10996_v62 = vld [vmem:[%s11926_s4 + $0x280] sm:$0xff] }
 0x3dd   : > { %2826 = vst [vmem:[#allocation3 + $0x120] sm:$0x30] %v13640_v52  ;;  %v11019_v52 = vld [vmem:[%s11926_s4 + $0x338] sm:$0xff]  ;;  %7637 = vmatpush.bf16.msra.mxu2 %v10996_v62 }
 0x3de   : > { %2827 = vst [vmem:[#allocation3 + $0x198] sm:$0x30] %v13645_v2  ;;  %v2865_v2 = vsub.f32 1.0, %v14535_v16  ;;  %v11041_v16 = vld [vmem:[%s11926_s4 + $0x3e8] sm:$0xff] }
 0x3df   : > { %2828 = vst [vmem:[#allocation3 + $0x2e8] sm:$0x30] %v13647_v39  ;;  %v2880_v39 = vmul.f32 %v2864_v28, %v13552_v17  ;;  %7651 = vmatpush.bf16.msra.mxu3 %v11004_v58  ;;  %v11018_v17 = vld [vmem:[%s11926_s4 + $0x330] sm:$0xff]  ;;  %v11033_v58 = vld [vmem:[%s11926_s4 + $0x3a8] sm:$0xff] }
 0x3e0   : > { %v2998_v1 = vld.sshfl [vmem:[#allocation1 + $0x20] sm:$0xff pattern:$0x73625140]  ;;  %2833 = vst [vmem:[#allocation3 + $0x1a0] sm:$0x30] %v13661_v46  ;;  %v2881_v55 = vmul.f32 %v2865_v2, %v14536_v30  ;;  %v11026_v28 = vld [vmem:[%s11926_s4 + $0x370] sm:$0xff] }
 0x3e1   : > { %3140 = vst [vmem:[#allocation3 + $0x70] sm:$0xc0] %v2998_v1  ;;  %v2913_v46 = vadd.f32 %v8825_v3, %v2880_v39  ;;  %v3000_v42 = vld.sshfl [vmem:[#allocation1 + $0x30] sm:$0xff pattern:$0x73625140]  ;;  %v11012_v2 = vld [vmem:[%s11926_s4 + $0x300] sm:$0xff] }
 0x3e2   : > { %2834 = vst [vmem:[#allocation3 + $0xa8] sm:$0x30] %v13663_v51  ;;  %v8826_v51 = vld [vmem:[%s11924_s29 + $0x3a0] sm:$0xff]  ;;  %v2999_v48 = vld.sshfl [vmem:[#allocation1 + $0x28] sm:$0xff pattern:$0x73625140] }
 0x3e3   : > { %2835 = vst [vmem:[#allocation3 + $0x258] sm:$0x30] %v13667_v8  ;;  %v2866_v8 = vsub.f32 1.0, %v13586_v34  ;;  %v2914_v49 = vadd.f32 %v8826_v51, %v2881_v55  ;;  %vm2929_vm4 = vcmp.ge.f32.partialorder %v2913_v46, 1.0  ;;  %v11016_v34 = vld [vmem:[%s11926_s4 + $0x320] sm:$0xff]  ;;  %v11043_v1 = vld [vmem:[%s11926_s4 + $0x3f8] sm:$0xff] }
 0x3e4   : > { %2836 = vst [vmem:[#allocation3 + $0x2d8] sm:$0x30] %v13669_v33  ;;  %v11017_v33 = vld [vmem:[%s11926_s4 + $0x328] sm:$0xff]  ;;  %v11051_v39 = vld [vmem:[%s11926_s4 + $0x438] sm:$0xff]  ;;  %v11032_v55 = vld [vmem:[%s11926_s4 + $0x3a0] sm:$0xff] }
 0x3e5   : > { %2841 = vst [vmem:[#allocation3 + $0x250] sm:$0x30] %v13685_v26  ;;  %v3001_v26 = vld.sshfl [vmem:[#allocation1 + $0x38] sm:$0xff pattern:$0x73625140]  ;;  %vm2930_vm5 = vcmp.ge.f32.partialorder %v2914_v49, 1.0 }
 0x3e6   : > { %2842 = vst [vmem:[#allocation3 + $0x378] sm:$0x30] %v13687_v59  ;;  %v8841_v59 = vsel %vm2929_vm4, 1.0, %v14407_v11  ;;  %v8842_v47 = vsel %vm2930_vm5, 1.0, %v14407_v11  ;;  %v3212_v3 = vld [vmem:[#allocation3 + $0x118] sm:$0xff]  ;;  %v3211_v46 = vld [vmem:[#allocation3 + $0x110] sm:$0xff] }
 0x3e7   : > { %2843 = vst [vmem:[#allocation3 + $0xb8] sm:$0x30] %v13691_v36  ;;  %v2882_v36 = vmul.f32 %v2866_v8, %v13570_v4  ;;  %v3207_v4 = vld [vmem:[#allocation3 + $0x368] sm:$0xff]  ;;  %v11024_v51 = vld [vmem:[%s11926_s4 + $0x360] sm:$0xff]  ;;  %v3213_v8 = vld [vmem:[#allocation3 + $0x98] sm:$0xff] }
 0x3e8   : > { %v3270_v63 = vld [vmem:[#allocation3 + $0x70] sm:$0xff]  ;;  %2844 = vst [vmem:[#allocation3 + $0x38] sm:$0x30] %v13693_v32  ;;  %v3004_v32 = vld.sshfl [vmem:[#allocation1] sm:$0xff pattern:$0x73625140] }
 0x3e9   : > { %v3334_v35 = vpack.c.bf16 %v3270_v63, %v3206_v24  ;;  %2849 = vst [vmem:[#allocation3 + $0x278] sm:$0x30] %v13707_v21  ;;  %v3006_v21 = vld.sshfl [vmem:[#allocation1 + $0x10] sm:$0xff pattern:$0x73625140]  ;;  %v2915_v50 = vadd.f32 %v8827_v13, %v2882_v36  ;;  %v11042_v63 = vld [vmem:[%s11926_s4 + $0x3f0] sm:$0xff] }
 0x3ea   : > { %2850 = vst [vmem:[#allocation3 + $0x360] sm:$0x30] %v13709_v19  ;;  %v3005_v19 = vld.sshfl [vmem:[#allocation1 + $0x8] sm:$0xff pattern:$0x73625140]  ;;  %v11040_v49 = vld [vmem:[%s11926_s4 + $0x3e0] sm:$0xff] }
 0x3eb   : > { %7554 = vmatmul.bf16.vlgmr.msrb.gmra.mxu0 %v3334_v35  ;;  %2851 = vst [vmem:[#allocation3 + $0x228] sm:$0x30] %v13711_v22  ;;  %v3007_v22 = vld.sshfl [vmem:[#allocation1 + $0x18] sm:$0xff pattern:$0x73625140]  ;;  %vm2931_vm6 = vcmp.ge.f32.partialorder %v2915_v50, 1.0 }
 0x3ec   : > { %7658 = vmatpush.bf16.msrb.mxu0 %v11019_v52  ;;  %2852 = vst [vmem:[#allocation3 + $0x348] sm:$0x30] %v13713_v15  ;;  %v11015_v15 = vld [vmem:[%s11926_s4 + $0x318] sm:$0xff]  ;;  %v8843_v14 = vsel %vm2931_vm6, 1.0, %v14407_v11  ;;  %v11025_v52 = vld [vmem:[%s11926_s4 + $0x368] sm:$0xff] }
 0x3ed   : > { %2857 = vst [vmem:[#allocation3 + $0x298] sm:$0x30] %v13723_v18  ;;  %v3208_v18 = vld [vmem:[#allocation3 + $0x330] sm:$0xff]  ;;  %v11049_v50 = vld [vmem:[%s11926_s4 + $0x428] sm:$0xff] }
 0x3ee   : > { %2858 = vst [vmem:[#allocation3 + $0x270] sm:$0x30] %v13725_v0 }
 0x3ef   : > { %2859 = vst [vmem:[#allocation3 + $0x310] sm:$0x30] %v13727_v10  ;;  %v3209_v10 = vld [vmem:[#allocation3 + $0x48] sm:$0xff] }
 0x3f0   : > { %7659 = vmatpush.bf16.msrb.mxu0 %v11018_v17  ;;  %2860 = vst [vmem:[#allocation3 + $0x190] sm:$0x30] %v13729_v7  ;;  %v11035_v7 = vld [vmem:[%s11926_s4 + $0x3b8] sm:$0xff] }
 0x3f1   : > { %3142 = vst [vmem:[#allocation3 + $0xe0] sm:$0xc0] %v3000_v42 }
 0x3f2   : > { %3141 = vst [vmem:[#allocation3 + $0x300] sm:$0xc0] %v2999_v48  ;;  %v11050_v48 = vld [vmem:[%s11926_s4 + $0x430] sm:$0xff] }
 0x3f3   : > { %3143 = vst [vmem:[#allocation3 + $0x178] sm:$0xc0] %v3001_v26 }
 0x3f4   : > { %7660 = vmatpush.bf16.msrb.mxu0 %v11017_v33  ;;  %3003 = vst [vmem:[#allocation1 + $0x23] ss:$4 sm:$0xff] %v8841_v59  ;;  %v11031_v59 = vld [vmem:[%s11926_s4 + $0x398] sm:$0xff] }
 0x3f5   : > { %3144 = vst [vmem:[#allocation3 + $0x328] sm:$0xc0] %v3004_v32  ;;  %v14537_v32 = vld [vmem:[#allocation56_spill] sm:$0xff] }
 0x3f6   : > { %3146 = vst [vmem:[#allocation3 + $0x3b8] sm:$0xc0] %v3006_v21  ;;  %v2867_v13 = vsub.f32 1.0, %v14537_v32  ;;  %v11072_v32 = vld [vmem:[%s11926_s4 + $0x4e0] sm:$0xff] }
 0x3f7   : > { %3145 = vst [vmem:[#allocation3 + $0x260] sm:$0xc0] %v3005_v19  ;;  %v11023_v19 = vld [vmem:[%s11926_s4 + $0x358] sm:$0xff] }
 0x3f8   : > { %7661 = vmatpush.bf16.msrb.mxu0 %v11016_v34  ;;  %v3272_v0 = vld [vmem:[#allocation3 + $0xe0] sm:$0xff]  ;;  %3147 = vst [vmem:[#allocation3 + $0x2b8] sm:$0xc0] %v3007_v22  ;;  %v11039_v22 = vld [vmem:[%s11926_s4 + $0x3d8] sm:$0xff] }
 0x3f9   : > { %v3336_v60 = vpack.c.bf16 %v3272_v0, %v3208_v18  ;;  %v3271_v40 = vld [vmem:[#allocation3 + $0x300] sm:$0xff]  ;;  %3012 = vst [vmem:[#allocation1 + $0x3] ss:$4 sm:$0xff] %v8842_v47  ;;  %v11030_v47 = vld [vmem:[%s11926_s4 + $0x390] sm:$0xff]  ;;  %v14538_v18 = vld [vmem:[#allocation55_spill] sm:$0xff] }
 0x3fa   : > { %v3335_v31 = vpack.c.bf16 %v3271_v40, %v3207_v4  ;;  %v3273_v41 = vld [vmem:[#allocation3 + $0x178] sm:$0xff]  ;;  %v3214_v34 = vld [vmem:[#allocation3 + $0x320] sm:$0xff]  ;;  %v2883_v4 = vmul.f32 %v2867_v13, %v14538_v18  ;;  %v11022_v0 = vld [vmem:[%s11926_s4 + $0x350] sm:$0xff] }
 0x3fb   : > { %7582 = vmatmul.bf16.vlgmr.msrb.gmra.mxu2 %v3336_v60  ;;  %v3337_v56 = vpack.c.bf16 %v3273_v41, %v3209_v10  ;;  %v3008_v53 = vld.sshfl [vmem:[#allocation1 + $0x20] sm:$0xff pattern:$0x73625140]  ;;  %v3010_v35 = vld.sshfl [vmem:[#allocation1 + $0x30] sm:$0xff pattern:$0x73625140] }
 0x3fc   : > { %7662 = vmatpush.bf16.msrb.mxu0 %v11015_v15  ;;  %7568 = vmatmul.bf16.vlgmr.msrb.gmra.mxu1 %v3335_v31  ;;  %v3274_v24 = vld [vmem:[#allocation3 + $0x328] sm:$0xff]  ;;  %3148 = vst [vmem:[#allocation3 + $0x248] sm:$0xc0] %v3008_v53  ;;  %v3009_v6 = vld.sshfl [vmem:[#allocation1 + $0x28] sm:$0xff pattern:$0x73625140] }
 0x3fd   : > { %7686 = vmatpush.bf16.msrb.mxu2 %v11035_v7  ;;  %7596 = vmatmul.bf16.vlgmr.msrb.gmra.mxu3 %v3337_v56  ;;  %v3338_v20 = vpack.c.bf16 %v3274_v24, %v3210_v44  ;;  %3150 = vst [vmem:[#allocation3 + $0x20] sm:$0xc0] %v3010_v35  ;;  %v3011_v62 = vld.sshfl [vmem:[#allocation1 + $0x38] sm:$0xff pattern:$0x73625140]  ;;  %v3276_v30 = vld [vmem:[#allocation3 + $0x3b8] sm:$0xff] }
 0x3fe   : > { %7672 = vmatpush.bf16.msrb.mxu1 %v11027_v27  ;;  %7700 = vmatpush.bf16.msrb.mxu3 %v11043_v1  ;;  %3149 = vst [vmem:[#allocation3 + $0x40] sm:$0xc0] %v3009_v6  ;;  %v3275_v17 = vld [vmem:[#allocation3 + $0x260] sm:$0xff]  ;;  %v3340_v42 = vpack.c.bf16 %v3276_v30, %v3212_v3  ;;  %v8828_v10 = vld [vmem:[%s11924_s29 + $0x3b0] sm:$0xff]  ;;  %v11029_v60 = vld [vmem:[%s11926_s4 + $0x388] sm:$0xff] }
 0x3ff   : > { %7610 = vmatmul.bf16.vlgmr.msra.gmra.mxu0 %v3338_v20  ;;  %3151 = vst [vmem:[#allocation3 + $0xe8] sm:$0xc0] %v3011_v62  ;;  %v3277_v33 = vld [vmem:[#allocation3 + $0x2b8] sm:$0xff]  ;;  %v3339_v26 = vpack.c.bf16 %v3275_v17, %v3211_v46  ;;  %v11038_v7 = vld [vmem:[%s11926_s4 + $0x3d0] sm:$0xff]  ;;  %v11048_v40 = vld [vmem:[%s11926_s4 + $0x420] sm:$0xff]  ;;  %v2916_v27 = vadd.f32 %v8828_v10, %v2883_v4 }
 0x400   : > { %7663 = vmatpush.bf16.msrb.mxu0 %v11014_v43  ;;  %3013 = vst [vmem:[#allocation1 + $0x23] ss:$4 sm:$0xff] %v8843_v14  ;;  %v3341_v21 = vpack.c.bf16 %v3277_v33, %v3213_v8  ;;  %v11021_v1 = vld [vmem:[%s11926_s4 + $0x348] sm:$0xff]  ;;  %v11020_v41 = vld [vmem:[%s11926_s4 + $0x340] sm:$0xff]  ;;  %v11047_v24 = vld [vmem:[%s11926_s4 + $0x418] sm:$0xff] }
 0x401   : > { %7687 = vmatpush.bf16.msrb.mxu2 %v11034_v25  ;;  %v11037_v31 = vld [vmem:[%s11926_s4 + $0x3c8] sm:$0xff]  ;;  %v11028_v44 = vld [vmem:[%s11926_s4 + $0x380] sm:$0xff]  ;;  %vm2932_vm7 = vcmp.ge.f32.partialorder %v2916_v27, 1.0  ;;  %v11067_v25 = vld [vmem:[%s11926_s4 + $0x4b8] sm:$0xff] }
 0x402   : > { %7673 = vmatpush.bf16.msrb.mxu1 %v11026_v28  ;;  %7701 = vmatpush.bf16.msrb.mxu3 %v11042_v63  ;;  %v11036_v43 = vld [vmem:[%s11926_s4 + $0x3c0] sm:$0xff]  ;;  %v3216_v56 = vld [vmem:[#allocation3 + $0x108] sm:$0xff]  ;;  %v3215_v14 = vld [vmem:[#allocation3 + $0x150] sm:$0xff]  ;;  %v8844_v62 = vsel %vm2932_vm7, 1.0, %v14407_v11 }
 0x403   : > { %v3278_v36 = vld [vmem:[#allocation3 + $0x248] sm:$0xff]  ;;  %v11059_v28 = vld [vmem:[%s11926_s4 + $0x478] sm:$0xff]  ;;  %v3217_v63 = vld [vmem:[#allocation3 + $0x60] sm:$0xff] }
 0x404   : > { %7664 = vmatpush.bf16.msrb.mxu0 %v11013_v45  ;;  %v3342_v15 = vpack.c.bf16 %v3278_v36, %v3214_v34  ;;  %v3280_v53 = vld [vmem:[#allocation3 + $0x20] sm:$0xff]  ;;  %v11075_v45 = vld [vmem:[%s11926_s4 + $0x4f8] sm:$0xff]  ;;  %v11058_v30 = vld [vmem:[%s11926_s4 + $0x470] sm:$0xff] }
 0x405   : > { %7688 = vmatpush.bf16.msrb.mxu2 %v11033_v58  ;;  %v3279_v20 = vld [vmem:[#allocation3 + $0x40] sm:$0xff]  ;;  %v3344_v6 = vpack.c.bf16 %v3280_v53, %v3216_v56  ;;  %v3016_v3 = vld.sshfl [vmem:[#allocation1 + $0x10] sm:$0xff pattern:$0x73625140]  ;;  %v11074_v46 = vld [vmem:[%s11926_s4 + $0x4f0] sm:$0xff] }
 0x406   : > { %7674 = vmatpush.bf16.msrb.mxu1 %v11025_v52  ;;  %7702 = vmatpush.bf16.msrb.mxu3 %v11041_v16  ;;  %v3281_v35 = vld [vmem:[#allocation3 + $0xe8] sm:$0xff]  ;;  %v3343_v58 = vpack.c.bf16 %v3279_v20, %v3215_v14  ;;  %v11046_v52 = vld [vmem:[%s11926_s4 + $0x410] sm:$0xff]  ;;  %3154 = vst [vmem:[#allocation3 + $0x3c8] sm:$0xc0] %v3016_v3  ;;  %v11083_v34 = vld [vmem:[%s11926_s4 + $0x538] sm:$0xff] }
 0x407   : > { %v3014_v16 = vld.sshfl [vmem:[#allocation1] sm:$0xff pattern:$0x73625140]  ;;  %v3017_v17 = vld.sshfl [vmem:[#allocation1 + $0x18] sm:$0xff pattern:$0x73625140] }
 0x408   : > { %7665 = vmatpush.bf16.msrb.mxu0 %v11012_v2  ;;  %v3345_v2 = vpack.c.bf16 %v3281_v35, %v3217_v63  ;;  %3152 = vst [vmem:[#allocation3 + $0x288] sm:$0xc0] %v3014_v16  ;;  %v11065_v8 = vld [vmem:[%s11926_s4 + $0x4a8] sm:$0xff]  ;;  %v11056_v36 = vld [vmem:[%s11926_s4 + $0x460] sm:$0xff]  ;;  %v11070_v10 = vld [vmem:[%s11926_s4 + $0x4d0] sm:$0xff] }
 0x409   : > { %7689 = vmatpush.bf16.msrb.mxu2 %v11032_v55  ;;  %v3015_v55 = vld.sshfl [vmem:[#allocation1 + $0x8] sm:$0xff pattern:$0x73625140]  ;;  %3155 = vst [vmem:[#allocation3 + $0x160] sm:$0xc0] %v3017_v17  ;;  %v11057_v33 = vld [vmem:[%s11926_s4 + $0x468] sm:$0xff] }
 0x40a   : > { %7675 = vmatpush.bf16.msrb.mxu1 %v11024_v51  ;;  %7703 = vmatpush.bf16.msrb.mxu3 %v11040_v49  ;;  %3153 = vst [vmem:[#allocation3 + $0x3a8] sm:$0xc0] %v3015_v55  ;;  %v11045_v51 = vld [vmem:[%s11926_s4 + $0x408] sm:$0xff]  ;;  %v11079_v56 = vld [vmem:[%s11926_s4 + $0x518] sm:$0xff]  ;;  %v3221_v20 = vld [vmem:[#allocation3 + $0x340] sm:$0xff] }
 0x40b   : > { %7638 = vmatmul.bf16.vlgmr.msra.gmra.mxu2 %v3340_v42  ;;  %3022 = vst [vmem:[#allocation1 + $0x3] ss:$4 sm:$0xff] %v8844_v62  ;;  %v11073_v49 = vld [vmem:[%s11926_s4 + $0x4e8] sm:$0xff]  ;;  %v11044_v42 = vld [vmem:[%s11926_s4 + $0x400] sm:$0xff]  ;;  %v11099_v53 = vld [vmem:[%s11926_s4 + $0x5b8] sm:$0xff] }
 0x40c   : > { %7714 = vmatpush.bf16.msra.mxu0 %v11051_v39  ;;  %7624 = vmatmul.bf16.vlgmr.msra.gmra.mxu1 %v3339_v26  ;;  %v11066_v39 = vld [vmem:[%s11926_s4 + $0x4b0] sm:$0xff]  ;;  %v11081_v18 = vld [vmem:[%s11926_s4 + $0x528] sm:$0xff]  ;;  %v11091_v14 = vld [vmem:[%s11926_s4 + $0x578] sm:$0xff] }
 0x40d   : > { %7690 = vmatpush.bf16.msrb.mxu2 %v11031_v59  ;;  %7652 = vmatmul.bf16.vlgmr.msra.gmra.mxu3 %v3341_v21  ;;  %v11064_v59 = vld [vmem:[%s11926_s4 + $0x4a0] sm:$0xff]  ;;  %v11063_v21 = vld [vmem:[%s11926_s4 + $0x498] sm:$0xff]  ;;  %v11053_v27 = vld [vmem:[%s11926_s4 + $0x448] sm:$0xff] }
 0x40e   : > { %7676 = vmatpush.bf16.msrb.mxu1 %v11023_v19  ;;  %7704 = vmatpush.bf16.msrb.mxu3 %v11039_v22  ;;  %v11082_v19 = vld [vmem:[%s11926_s4 + $0x530] sm:$0xff]  ;;  %v2868_v22 = vsub.f32 1.0, %v13610_v57  ;;  %v8829_v57 = vld [vmem:[%s11924_s29 + $0x3b8] sm:$0xff]  ;;  %v3021_v55 = vld.sshfl [vmem:[#allocation1 + $0x38] sm:$0xff pattern:$0x73625140] }
 0x40f   : > { %7666 = vmatmul.bf16.vlgmr.msrb.gmra.mxu0 %v3342_v15  ;;  %v3282_v26 = vld [vmem:[#allocation3 + $0x288] sm:$0xff]  ;;  %v11055_v15 = vld [vmem:[%s11926_s4 + $0x458] sm:$0xff]  ;;  %v11078_v62 = vld [vmem:[%s11926_s4 + $0x510] sm:$0xff]  ;;  %3159 = vst [vmem:[#allocation3 + $0x1e8] sm:$0xc0] %v3021_v55 }
 0x410   : > { %7715 = vmatpush.bf16.msra.mxu0 %v11050_v48  ;;  %v3218_v48 = vld [vmem:[#allocation3 + $0x2e0] sm:$0xff]  ;;  %v2884_v4 = vmul.f32 %v2868_v22, %v13593_v61  ;;  %v11107_v63 = vld [vmem:[%s11926_s4 + $0x5f8] sm:$0xff]  ;;  %v11098_v16 = vld [vmem:[%s11926_s4 + $0x5b0] sm:$0xff] }
 0x411   : > { %7691 = vmatpush.bf16.msrb.mxu2 %v11030_v47  ;;  %v3346_v13 = vpack.c.bf16 %v3282_v26, %v3218_v48  ;;  %v11071_v47 = vld [vmem:[%s11926_s4 + $0x4d8] sm:$0xff]  ;;  %v11052_v61 = vld [vmem:[%s11926_s4 + $0x440] sm:$0xff]  ;;  %v3019_v3 = vld.sshfl [vmem:[#allocation1 + $0x28] sm:$0xff pattern:$0x73625140]  ;;  %v7499_v48 = vpop.f32.mrf.mxu0  ;;  %v7513_v26 = vpop.f32.mrf.mxu1 }
 0x412   : > { %7677 = vmatpush.bf16.msrb.mxu1 %v11022_v0  ;;  %7705 = vmatpush.bf16.msrb.mxu3 %v11038_v7  ;;  %v11054_v0 = vld [vmem:[%s11926_s4 + $0x450] sm:$0xff]  ;;  %v11061_v7 = vld [vmem:[%s11926_s4 + $0x488] sm:$0xff]  ;;  %3157 = vst [vmem:[#allocation3 + $0x210] sm:$0xc0] %v3019_v3  ;;  %v11095_v22 = vld [vmem:[%s11926_s4 + $0x598] sm:$0xff] }
 0x413   : > { %v11097_v17 = vld [vmem:[%s11926_s4 + $0x5a8] sm:$0xff]  ;;  %v11130_v3 = vld [vmem:[%s11926_s4 + $0x6b0] sm:$0xff] }
 0x414   : > { %7716 = vmatpush.bf16.msra.mxu0 %v11049_v50  ;;  %v11062_v50 = vld [vmem:[%s11926_s4 + $0x490] sm:$0xff] }
 0x415   : > { %7692 = vmatpush.bf16.msrb.mxu2 %v11029_v60  ;;  %v11080_v60 = vld [vmem:[%s11926_s4 + $0x520] sm:$0xff] }
 0x416   : > { %7678 = vmatpush.bf16.msrb.mxu1 %v11021_v1  ;;  %7706 = vmatpush.bf16.msrb.mxu3 %v11037_v31  ;;  %v11069_v1 = vld [vmem:[%s11926_s4 + $0x4c8] sm:$0xff]  ;;  %v11060_v31 = vld [vmem:[%s11926_s4 + $0x480] sm:$0xff] }
 0x418   : > { %7717 = vmatpush.bf16.msra.mxu0 %v11048_v40  ;;  %v2917_v40 = vadd.f32 %v8829_v57, %v2884_v4  ;;  %v11103_v4 = vld [vmem:[%s11926_s4 + $0x5d8] sm:$0xff]  ;;  %v14539_v57 = vld [vmem:[#allocation58_spill] sm:$0xff] }
 0x419   : > { %7693 = vmatpush.bf16.msrb.mxu2 %v11028_v44  ;;  %v3220_v44 = vld [vmem:[#allocation3 + $0x338] sm:$0xff] }
 0x41a   : > { %7679 = vmatpush.bf16.msrb.mxu1 %v11020_v41  ;;  %7707 = vmatpush.bf16.msrb.mxu3 %v11036_v43  ;;  %v11068_v41 = vld [vmem:[%s11926_s4 + $0x4c0] sm:$0xff]  ;;  %v3284_v43 = vld [vmem:[#allocation3 + $0x3c8] sm:$0xff]  ;;  %vm2933_vm8 = vcmp.ge.f32.partialorder %v2917_v40, 1.0  ;;  %v11086_v40 = vld [vmem:[%s11926_s4 + $0x550] sm:$0xff] }
 0x41b   : > { %v3348_v35 = vpack.c.bf16 %v3284_v43, %v3220_v44  ;;  %v11112_v44 = vld [vmem:[%s11926_s4 + $0x620] sm:$0xff]  ;;  %v11085_v43 = vld [vmem:[%s11926_s4 + $0x548] sm:$0xff] }
 0x41c   : > { %7718 = vmatpush.bf16.msra.mxu0 %v11047_v24  ;;  %7694 = vmatmul.bf16.vlgmr.msrb.gmra.mxu2 %v3344_v6  ;;  %v3219_v24 = vld [vmem:[#allocation3 + $0x388] sm:$0xff] }
 0x41d   : > { %7742 = vmatpush.bf16.msra.mxu2 %v11067_v25  ;;  %7680 = vmatmul.bf16.vlgmr.msrb.gmra.mxu1 %v3343_v58  ;;  %v3283_v25 = vld [vmem:[#allocation3 + $0x3a8] sm:$0xff] }
 0x41e   : > { %7728 = vmatpush.bf16.msra.mxu1 %v11059_v28  ;;  %7756 = vmatpush.bf16.msra.mxu3 %v11075_v45  ;;  %v3285_v28 = vld [vmem:[#allocation3 + $0x160] sm:$0xff]  ;;  %v8845_v45 = vsel %vm2933_vm8, 1.0, %v14407_v11  ;;  %v3347_v6 = vpack.c.bf16 %v3283_v25, %v3219_v24  ;;  %v3018_v58 = vld.sshfl [vmem:[#allocation1 + $0x20] sm:$0xff pattern:$0x73625140] }
 0x41f   : > { %7708 = vmatmul.bf16.vlgmr.msrb.gmra.mxu3 %v3345_v2  ;;  %3156 = vst [vmem:[#allocation3 + $0x2c8] sm:$0xc0] %v3018_v58  ;;  %v3020_v2 = vld.sshfl [vmem:[#allocation1 + $0x30] sm:$0xff pattern:$0x73625140]  ;;  %v11084_v24 = vld [vmem:[%s11926_s4 + $0x540] sm:$0xff] }
 0x420   : > { %7719 = vmatpush.bf16.msra.mxu0 %v11046_v52  ;;  %v3349_v52 = vpack.c.bf16 %v3285_v28, %v3221_v20  ;;  %3158 = vst [vmem:[#allocation3 + $0x3d8] sm:$0xc0] %v3020_v2  ;;  %v11092_v25 = vld [vmem:[%s11926_s4 + $0x580] sm:$0xff]  ;;  %v3224_v20 = vld [vmem:[#allocation3 + $0x1b8] sm:$0xff]  ;;  %v3225_v58 = vld [vmem:[#allocation3 + $0x168] sm:$0xff] }
 0x421   : > { %7743 = vmatpush.bf16.msra.mxu2 %v11066_v39  ;;  %v11090_v39 = vld [vmem:[%s11926_s4 + $0x570] sm:$0xff]  ;;  %3023 = vst [vmem:[#allocation1 + $0x23] ss:$4 sm:$0xff] %v8845_v45  ;;  %v3223_v45 = vld [vmem:[#allocation3 + $0x1a8] sm:$0xff] }
 0x422   : > { %7729 = vmatpush.bf16.msra.mxu1 %v11058_v30  ;;  %7757 = vmatpush.bf16.msra.mxu3 %v11074_v46  ;;  %v11106_v30 = vld [vmem:[%s11926_s4 + $0x5f0] sm:$0xff]  ;;  %v11077_v46 = vld [vmem:[%s11926_s4 + $0x508] sm:$0xff] }
 0x424   : > { %7720 = vmatpush.bf16.msra.mxu0 %v11045_v51  ;;  %v11089_v51 = vld [vmem:[%s11926_s4 + $0x568] sm:$0xff] }
 0x425   : > { %7744 = vmatpush.bf16.msra.mxu2 %v11065_v8  ;;  %v11105_v8 = vld [vmem:[%s11926_s4 + $0x5e8] sm:$0xff] }
 0x426   : > { %7730 = vmatpush.bf16.msra.mxu1 %v11057_v33  ;;  %7758 = vmatpush.bf16.msra.mxu3 %v11073_v49  ;;  %v11076_v33 = vld [vmem:[%s11926_s4 + $0x500] sm:$0xff] }
 0x427   : > { %v3222_v49 = vld [vmem:[#allocation3 + $0x80] sm:$0xff]  ;;  %v3288_v28 = vld [vmem:[#allocation3 + $0x3d8] sm:$0xff] }
 0x428   : > { %7721 = vmatpush.bf16.msra.mxu0 %v11044_v42  ;;  %v3286_v42 = vld [vmem:[#allocation3 + $0x2c8] sm:$0xff]  ;;  %v3352_v2 = vpack.c.bf16 %v3288_v28, %v3224_v20  ;;  %v3228_v20 = vld [vmem:[#allocation3 + $0x290] sm:$0xff]  ;;  %v11143_v28 = vld [vmem:[%s11926_s4 + $0x718] sm:$0xff] }
 0x429   : > { %7745 = vmatpush.bf16.msra.mxu2 %v11064_v59  ;;  %v11096_v59 = vld [vmem:[%s11926_s4 + $0x5a0] sm:$0xff] }
 0x42a   : > { %7731 = vmatpush.bf16.msra.mxu1 %v11056_v36  ;;  %7759 = vmatpush.bf16.msra.mxu3 %v11072_v32  ;;  %v7514_v36 = vadd.f32 %v7513_v26, %v7499_v48  ;;  %v11088_v32 = vld [vmem:[%s11926_s4 + $0x560] sm:$0xff]  ;;  %v11129_v26 = vld [vmem:[%s11926_s4 + $0x6a8] sm:$0xff] }
 0x42b   : > { %7722 = vmatmul.bf16.vlgmr.msra.gmra.mxu0 %v3346_v13  ;;  %v11104_v13 = vld [vmem:[%s11926_s4 + $0x5e0] sm:$0xff] }
 0x42c   : > { %7770 = vmatpush.bf16.msrb.mxu0 %v11083_v34  ;;  %v11115_v34 = vld [vmem:[%s11926_s4 + $0x638] sm:$0xff]  ;;  %v3027_v48 = vld.sshfl [vmem:[#allocation1 + $0x18] sm:$0xff pattern:$0x73625140] }
 0x42d   : > { %7746 = vmatpush.bf16.msra.mxu2 %v11063_v21  ;;  %v3350_v21 = vpack.c.bf16 %v3286_v42, %v3222_v49  ;;  %v3025_v49 = vld.sshfl [vmem:[#allocation1 + $0x8] sm:$0xff pattern:$0x73625140]  ;;  %v11109_v42 = vld [vmem:[%s11926_s4 + $0x608] sm:$0xff]  ;;  %3163 = vst [vmem:[#allocation3 + $0x1d0] sm:$0xc0] %v3027_v48 }
 0x42e   : > { %7732 = vmatpush.bf16.msra.mxu1 %v11055_v15  ;;  %7760 = vmatpush.bf16.msra.mxu3 %v11071_v47  ;;  %v11114_v15 = vld [vmem:[%s11926_s4 + $0x630] sm:$0xff]  ;;  %3161 = vst [vmem:[#allocation3 + $0x1c8] sm:$0xc0] %v3025_v49  ;;  %v11141_v49 = vld [vmem:[%s11926_s4 + $0x708] sm:$0xff] }
 0x430   : > { %7771 = vmatpush.bf16.msrb.mxu0 %v11082_v19  ;;  %v7527_v19 = vpop.f32.mrf.mxu2 }
 0x431   : > { %7747 = vmatpush.bf16.msra.mxu2 %v11062_v50  ;;  %v7528_v47 = vadd.f32 %v7527_v19, %v7514_v36  ;;  %v11087_v50 = vld [vmem:[%s11926_s4 + $0x558] sm:$0xff]  ;;  %v11137_v36 = vld [vmem:[%s11926_s4 + $0x6e8] sm:$0xff] }
 0x432   : > { %7733 = vmatpush.bf16.msra.mxu1 %v11054_v0  ;;  %7761 = vmatpush.bf16.msra.mxu3 %v11070_v10  ;;  %v2869_v10 = vsub.f32 1.0, %v14539_v57  ;;  %v3226_v19 = vld [vmem:[#allocation3 + $0x3e8] sm:$0xff]  ;;  %v11119_v57 = vld [vmem:[%s11926_s4 + $0x658] sm:$0xff] }
 0x434   : > { %7772 = vmatpush.bf16.msrb.mxu0 %v11081_v18  ;;  %v7541_v18 = vpop.f32.mrf.mxu3 }
 0x435   : > { %7748 = vmatpush.bf16.msra.mxu2 %v11061_v7  ;;  %v13884_v0 = vadd.f32 %v7541_v18, %v7528_v47  ;;  %v11094_v7 = vld [vmem:[%s11926_s4 + $0x590] sm:$0xff]  ;;  %v11136_v47 = vld [vmem:[%s11926_s4 + $0x6e0] sm:$0xff]  ;;  %v11127_v18 = vld [vmem:[%s11926_s4 + $0x698] sm:$0xff] }
 0x436   : > { %7734 = vmatpush.bf16.msra.mxu1 %v11053_v27  ;;  %7762 = vmatpush.bf16.msra.mxu3 %v11069_v1  ;;  %v11102_v27 = vld [vmem:[%s11926_s4 + $0x5d0] sm:$0xff]  ;;  %v14540_v1 = vld [vmem:[#allocation57_spill] sm:$0xff] }
 0x438   : > { %7773 = vmatpush.bf16.msrb.mxu0 %v11080_v60  ;;  %v11113_v60 = vld [vmem:[%s11926_s4 + $0x628] sm:$0xff]  ;;  %v13954_v48 = vpop.f32.mrf.mxu2 }
 0x439   : > { %7749 = vmatpush.bf16.msra.mxu2 %v11060_v31  ;;  %v8830_v31 = vld [vmem:[%s11924_s29 + $0x3c0] sm:$0xff] }
 0x43a   : > { %7735 = vmatpush.bf16.msra.mxu1 %v11052_v61  ;;  %7763 = vmatpush.bf16.msra.mxu3 %v11068_v41  ;;  %v2885_v61 = vmul.f32 %v2869_v10, %v14540_v1  ;;  %v11093_v41 = vld [vmem:[%s11926_s4 + $0x588] sm:$0xff]  ;;  %v11135_v10 = vld [vmem:[%s11926_s4 + $0x6d8] sm:$0xff] }
 0x43b   : > { %v11145_v1 = vld [vmem:[%s11926_s4 + $0x728] sm:$0xff] }
 0x43c   : > { %7774 = vmatpush.bf16.msrb.mxu0 %v11079_v56  ;;  %7750 = vmatmul.bf16.vlgmr.msra.gmra.mxu2 %v3348_v35  ;;  %v11101_v56 = vld [vmem:[%s11926_s4 + $0x5c8] sm:$0xff]  ;;  %v11131_v35 = vld [vmem:[%s11926_s4 + $0x6b8] sm:$0xff] }
 0x43d   : > { %7798 = vmatpush.bf16.msrb.mxu2 %v11099_v53  ;;  %7736 = vmatmul.bf16.vlgmr.msra.gmra.mxu1 %v3347_v6  ;;  %v2918_v53 = vadd.f32 %v8830_v31, %v2885_v61  ;;  %v3287_v6 = vld [vmem:[#allocation3 + $0x210] sm:$0xff] }
 0x43e   : > { %7784 = vmatpush.bf16.msrb.mxu1 %v11091_v14  ;;  %7812 = vmatpush.bf16.msrb.mxu3 %v11107_v63  ;;  %v11100_v14 = vld [vmem:[%s11926_s4 + $0x5c0] sm:$0xff]  ;;  %v11111_v63 = vld [vmem:[%s11926_s4 + $0x618] sm:$0xff]  ;;  %v11118_v61 = vld [vmem:[%s11926_s4 + $0x650] sm:$0xff] }
 0x43f   : > { %7764 = vmatmul.bf16.vlgmr.msra.gmra.mxu3 %v3349_v52  ;;  %v3289_v52 = vld [vmem:[#allocation3 + $0x1e8] sm:$0xff]  ;;  %vm2934_vm9 = vcmp.ge.f32.partialorder %v2918_v53, 1.0  ;;  %v11134_v31 = vld [vmem:[%s11926_s4 + $0x6d0] sm:$0xff]  ;;  %v11116_v53 = vld [vmem:[%s11926_s4 + $0x640] sm:$0xff] }
 0x440   : > { %7775 = vmatpush.bf16.msrb.mxu0 %v11078_v62  ;;  %v11123_v62 = vld [vmem:[%s11926_s4 + $0x678] sm:$0xff]  ;;  %v3353_v55 = vpack.c.bf16 %v3289_v52, %v3225_v58  ;;  %v3293_v58 = vld [vmem:[#allocation3 + $0x1d0] sm:$0xff] }
 0x441   : > { %7799 = vmatpush.bf16.msrb.mxu2 %v11098_v16  ;;  %v11139_v16 = vld [vmem:[%s11926_s4 + $0x6f8] sm:$0xff] }
 0x442   : > { %7785 = vmatpush.bf16.msrb.mxu1 %v11090_v39  ;;  %7813 = vmatpush.bf16.msrb.mxu3 %v11106_v30  ;;  %v3351_v39 = vpack.c.bf16 %v3287_v6, %v3223_v45  ;;  %v11110_v30 = vld [vmem:[%s11926_s4 + $0x610] sm:$0xff]  ;;  %v3291_v45 = vld [vmem:[#allocation3 + $0x1c8] sm:$0xff]  ;;  %v11155_v6 = vld [vmem:[%s11926_s4 + $0x778] sm:$0xff] }
 0x443   : > { %v11171_v52 = vld [vmem:[%s11926_s4 + $0x7f8] sm:$0xff] }
 0x444   : > { %7776 = vmatpush.bf16.msrb.mxu0 %v11077_v46  ;;  %v3024_v46 = vld.sshfl [vmem:[#allocation1] sm:$0xff pattern:$0x73625140] }
 0x445   : > { %7800 = vmatpush.bf16.msrb.mxu2 %v11097_v17  ;;  %v3026_v17 = vld.sshfl [vmem:[#allocation1 + $0x10] sm:$0xff pattern:$0x73625140]  ;;  %3160 = vst [vmem:[#allocation3 + $0x1b0] sm:$0xc0] %v3024_v46 }
 0x446   : > { %7786 = vmatpush.bf16.msrb.mxu1 %v11089_v51  ;;  %7814 = vmatpush.bf16.msrb.mxu3 %v11105_v8  ;;  %v8846_v51 = vsel %vm2934_vm9, 1.0, %v14407_v11  ;;  %v11122_v8 = vld [vmem:[%s11926_s4 + $0x670] sm:$0xff]  ;;  %3162 = vst [vmem:[#allocation3 + $0x2d0] sm:$0xc0] %v3026_v17  ;;  %v13947_v17 = vpop.f32.mrf.mxu1 }
 0x447   : > { %3032 = vst [vmem:[#allocation1 + $0x3] ss:$4 sm:$0xff] %v8846_v51  ;;  %v3030_v46 = vld.sshfl [vmem:[#allocation1 + $0x30] sm:$0xff pattern:$0x73625140]  ;;  %v11154_v51 = vld [vmem:[%s11926_s4 + $0x770] sm:$0xff] }
 0x448   : > { %7777 = vmatpush.bf16.msrb.mxu0 %v11076_v33  ;;  %v11138_v33 = vld [vmem:[%s11926_s4 + $0x6f0] sm:$0xff]  ;;  %3166 = vst [vmem:[#allocation3 + $0x198] sm:$0xc0] %v3030_v46 }
 0x449   : > { %7801 = vmatpush.bf16.msrb.mxu2 %v11096_v59  ;;  %v11121_v59 = vld [vmem:[%s11926_s4 + $0x668] sm:$0xff] }
 0x44a   : > { %7787 = vmatpush.bf16.msrb.mxu1 %v11088_v32  ;;  %7815 = vmatpush.bf16.msrb.mxu3 %v11104_v13  ;;  %v11108_v32 = vld [vmem:[%s11926_s4 + $0x600] sm:$0xff] }
 0x44b   : > { %7778 = vmatmul.bf16.vlgmr.msrb.gmra.mxu0 %v3350_v21  ;;  %v11128_v13 = vld [vmem:[%s11926_s4 + $0x6a0] sm:$0xff]  ;;  %v11147_v21 = vld [vmem:[%s11926_s4 + $0x738] sm:$0xff] }
 0x44c   : > { %7826 = vmatpush.bf16.msra.mxu0 %v11115_v34  ;;  %v13912_v34 = vpop.f32.mrf.mxu0 }
 0x44d   : > { %7802 = vmatpush.bf16.msrb.mxu2 %v11095_v22  ;;  %v11120_v22 = vld [vmem:[%s11926_s4 + $0x660] sm:$0xff] }
 0x44e   : > { %7788 = vmatpush.bf16.msrb.mxu1 %v11087_v50  ;;  %7816 = vmatpush.bf16.msrb.mxu3 %v11103_v4  ;;  %v11146_v4 = vld [vmem:[%s11926_s4 + $0x730] sm:$0xff] }
 0x44f   : > { %v3296_v46 = vld [vmem:[#allocation3 + $0x198] sm:$0xff] }
 0x450   : > { %7827 = vmatpush.bf16.msra.mxu0 %v11114_v15  ;;  %v3290_v15 = vld [vmem:[#allocation3 + $0x1b0] sm:$0xff] }
 0x451   : > { %7803 = vmatpush.bf16.msrb.mxu2 %v11094_v7  ;;  %v3354_v50 = vpack.c.bf16 %v3290_v15, %v3226_v19  ;;  %v13962_v19 = vpop.f32.mrf.mxu3  ;;  %v11179_v15 = vld [vmem:[%s11926_s4 + $0x838] sm:$0xff] }
 0x452   : > { %7789 = vmatpush.bf16.msrb.mxu1 %v11086_v40  ;;  %7817 = vmatpush.bf16.msrb.mxu3 %v11102_v27  ;;  %v11126_v40 = vld [vmem:[%s11926_s4 + $0x690] sm:$0xff] }
 0x454   : > { %7828 = vmatpush.bf16.msra.mxu0 %v11113_v60  ;;  %v2870_v60 = vsub.f32 1.0, %v13635_v38  ;;  %v11125_v38 = vld [vmem:[%s11926_s4 + $0x688] sm:$0xff] }
 0x455   : > { %7804 = vmatpush.bf16.msrb.mxu2 %v11093_v41 }
 0x456   : > { %7790 = vmatpush.bf16.msrb.mxu1 %v11085_v43  ;;  %7818 = vmatpush.bf16.msrb.mxu3 %v11101_v56  ;;  %v2886_v41 = vmul.f32 %v2870_v60, %v13617_v29  ;;  %v11117_v43 = vld [vmem:[%s11926_s4 + $0x648] sm:$0xff]  ;;  %v3292_v29 = vld [vmem:[#allocation3 + $0x2d0] sm:$0xff]  ;;  %v11159_v60 = vld [vmem:[%s11926_s4 + $0x798] sm:$0xff] }
 0x457   : > { %v11133_v56 = vld [vmem:[%s11926_s4 + $0x6c8] sm:$0xff] }
 0x458   : > { %7829 = vmatpush.bf16.msra.mxu0 %v11112_v44  ;;  %v11144_v44 = vld [vmem:[%s11926_s4 + $0x720] sm:$0xff] }
 0x459   : > { %7805 = vmatpush.bf16.msrb.mxu2 %v11092_v25 }
 0x45a   : > { %7791 = vmatpush.bf16.msrb.mxu1 %v11084_v24  ;;  %7819 = vmatpush.bf16.msrb.mxu3 %v11100_v14  ;;  %v11124_v24 = vld [vmem:[%s11926_s4 + $0x680] sm:$0xff] }
 0x45b   : > { %v11132_v14 = vld [vmem:[%s11926_s4 + $0x6c0] sm:$0xff] }
 0x45c   : > { %7830 = vmatpush.bf16.msra.mxu0 %v11111_v63  ;;  %7806 = vmatmul.bf16.vlgmr.msrb.gmra.mxu2 %v3352_v2  ;;  %v11163_v63 = vld [vmem:[%s11926_s4 + $0x7b8] sm:$0xff] }
 0x45d   : > { %7854 = vmatpush.bf16.msra.mxu2 %v11131_v35  ;;  %7792 = vmatmul.bf16.vlgmr.msrb.gmra.mxu1 %v3351_v39  ;;  %v3227_v35 = vld [vmem:[#allocation3 + $0x2f8] sm:$0xff]  ;;  %v11162_v39 = vld [vmem:[%s11926_s4 + $0x7b0] sm:$0xff] }
 0x45e   : > { %7840 = vmatpush.bf16.msra.mxu1 %v11123_v62  ;;  %7868 = vmatpush.bf16.msra.mxu3 %v11139_v16  ;;  %v3229_v62 = vld [vmem:[#allocation3 + $0x28] sm:$0xff]  ;;  %v3356_v16 = vpack.c.bf16 %v3292_v29, %v3228_v20  ;;  %v3355_v2 = vpack.c.bf16 %v3291_v45, %v3227_v35  ;;  %v11150_v20 = vld [vmem:[%s11926_s4 + $0x750] sm:$0xff]  ;;  %v11176_v45 = vld [vmem:[%s11926_s4 + $0x820] sm:$0xff] }
 0x45f   : > { %7820 = vmatmul.bf16.vlgmr.msrb.gmra.mxu3 %v3353_v55  ;;  %v3028_v55 = vld.sshfl [vmem:[#allocation1 + $0x20] sm:$0xff pattern:$0x73625140]  ;;  %v8832_v29 = vld [vmem:[%s11924_s29 + $0x3d0] sm:$0xff] }
 0x460   : > { %7831 = vmatpush.bf16.msra.mxu0 %v11110_v30  ;;  %v3357_v30 = vpack.c.bf16 %v3293_v58, %v3229_v62  ;;  %3164 = vst [vmem:[#allocation3 + $0x58] sm:$0xc0] %v3028_v55  ;;  %v11157_v35 = vld [vmem:[%s11926_s4 + $0x788] sm:$0xff]  ;;  %v3232_v55 = vld [vmem:[#allocation3 + $0x1c0] sm:$0xff] }
 0x461   : > { %7855 = vmatpush.bf16.msra.mxu2 %v11130_v3  ;;  %v11142_v3 = vld [vmem:[%s11926_s4 + $0x710] sm:$0xff]  ;;  %v11149_v62 = vld [vmem:[%s11926_s4 + $0x748] sm:$0xff] }
 0x462   : > { %7841 = vmatpush.bf16.msra.mxu1 %v11122_v8  ;;  %7869 = vmatpush.bf16.msra.mxu3 %v11138_v33  ;;  %v11170_v8 = vld [vmem:[%s11926_s4 + $0x7f0] sm:$0xff] }
 0x464   : > { %7832 = vmatpush.bf16.msra.mxu0 %v11109_v42  ;;  %v3029_v42 = vld.sshfl [vmem:[#allocation1 + $0x28] sm:$0xff pattern:$0x73625140] }
 0x465   : > { %7856 = vmatpush.bf16.msra.mxu2 %v11129_v26  ;;  %3165 = vst [vmem:[#allocation3 + $0x120] sm:$0xc0] %v3029_v42 }
 0x466   : > { %7842 = vmatpush.bf16.msra.mxu1 %v11121_v59  ;;  %7870 = vmatpush.bf16.msra.mxu3 %v11137_v36  ;;  %v11161_v59 = vld [vmem:[%s11926_s4 + $0x7a8] sm:$0xff]  ;;  %v3031_v36 = vld.sshfl [vmem:[#allocation1 + $0x38] sm:$0xff pattern:$0x73625140] }
 0x467   : > { %3167 = vst [vmem:[#allocation3 + $0x2e8] sm:$0xc0] %v3031_v36  ;;  %v11187_v36 = vld [vmem:[%s11926_s4 + $0x878] sm:$0xff] }
 0x468   : > { %7833 = vmatpush.bf16.msra.mxu0 %v11108_v32  ;;  %v7555_v7 = vpop.f32.mrf.mxu0  ;;  %v11153_v32 = vld [vmem:[%s11926_s4 + $0x768] sm:$0xff] }
 0x469   : > { %7857 = vmatpush.bf16.msra.mxu2 %v11128_v13  ;;  %v13927_v27 = vadd.f32 %v7555_v7, %v13884_v0  ;;  %v8831_v0 = vld [vmem:[%s11924_s29 + $0x3c8] sm:$0xff] }
 0x46a   : > { %7843 = vmatpush.bf16.msra.mxu1 %v11120_v22  ;;  %7871 = vmatpush.bf16.msra.mxu3 %v11136_v47  ;;  %v2919_v25 = vadd.f32 %v8831_v0, %v2886_v41  ;;  %v11169_v13 = vld [vmem:[%s11926_s4 + $0x7e8] sm:$0xff]  ;;  %v11160_v22 = vld [vmem:[%s11926_s4 + $0x7a0] sm:$0xff]  ;;  %v3230_v47 = vld [vmem:[#allocation3 + $0x138] sm:$0xff] }
 0x46b   : > { %7834 = vmatmul.bf16.vlgmr.msra.gmra.mxu0 %v3354_v50 }
 0x46c   : > { %7882 = vmatpush.bf16.msrb.mxu0 %v11147_v21  ;;  %vm2935_vm10 = vcmp.ge.f32.partialorder %v2919_v25, 1.0  ;;  %v11140_v21 = vld [vmem:[%s11926_s4 + $0x700] sm:$0xff] }
 0x46d   : > { %7858 = vmatpush.bf16.msra.mxu2 %v11127_v18  ;;  %v8847_v33 = vsel %vm2935_vm10, 1.0, %v14407_v11  ;;  %v11152_v18 = vld [vmem:[%s11926_s4 + $0x760] sm:$0xff] }
 0x46e   : > { %7844 = vmatpush.bf16.msra.mxu1 %v11119_v57  ;;  %7872 = vmatpush.bf16.msra.mxu3 %v11135_v10  ;;  %3033 = vst [vmem:[#allocation1 + $0x23] ss:$4 sm:$0xff] %v8847_v33  ;;  %v11168_v10 = vld [vmem:[%s11926_s4 + $0x7e0] sm:$0xff]  ;;  %v11195_v33 = vld [vmem:[%s11926_s4 + $0x8b8] sm:$0xff] }
 0x46f   : > { %v3295_v42 = vld [vmem:[#allocation3 + $0x120] sm:$0xff] }
 0x470   : > { %7883 = vmatpush.bf16.msrb.mxu0 %v11146_v4  ;;  %v13956_v26 = vpop.f32.mrf.mxu0  ;;  %v3294_v4 = vld [vmem:[#allocation3 + $0x58] sm:$0xff] }
 0x471   : > { %7859 = vmatpush.bf16.msra.mxu2 %v11126_v40  ;;  %v3358_v7 = vpack.c.bf16 %v3294_v4, %v3230_v47  ;;  %v11178_v40 = vld [vmem:[%s11926_s4 + $0x830] sm:$0xff] }
 0x472   : > { %7845 = vmatpush.bf16.msra.mxu1 %v11118_v61  ;;  %7873 = vmatpush.bf16.msra.mxu3 %v11134_v31  ;;  %v11151_v31 = vld [vmem:[%s11926_s4 + $0x758] sm:$0xff] }
 0x474   : > { %7884 = vmatpush.bf16.msrb.mxu0 %v11145_v1  ;;  %v14541_v1 = vld [vmem:[#allocation60_spill] sm:$0xff] }
 0x475   : > { %7860 = vmatpush.bf16.msra.mxu2 %v11125_v38  ;;  %v2871_v61 = vsub.f32 1.0, %v14541_v1  ;;  %v7516_v1 = vadd.f32 %v13947_v17, %v13912_v34  ;;  %v11193_v17 = vld [vmem:[%s11926_s4 + $0x8a8] sm:$0xff] }
 0x476   : > { %7846 = vmatpush.bf16.msra.mxu1 %v11117_v43  ;;  %7874 = vmatpush.bf16.msra.mxu3 %v11133_v56  ;;  %v11158_v43 = vld [vmem:[%s11926_s4 + $0x790] sm:$0xff]  ;;  %v11177_v56 = vld [vmem:[%s11926_s4 + $0x828] sm:$0xff] }
 0x478   : > { %7885 = vmatpush.bf16.msrb.mxu0 %v11144_v44 }
 0x479   : > { %7861 = vmatpush.bf16.msra.mxu2 %v11124_v24  ;;  %v7569_v50 = vpop.f32.mrf.mxu1 }
 0x47a   : > { %7847 = vmatpush.bf16.msra.mxu1 %v11116_v53  ;;  %7875 = vmatpush.bf16.msra.mxu3 %v11132_v14  ;;  %v7570_v57 = vadd.f32 %v7569_v50, %v13927_v27  ;;  %v11167_v27 = vld [vmem:[%s11926_s4 + $0x7d8] sm:$0xff]  ;;  %v11174_v50 = vld [vmem:[%s11926_s4 + $0x810] sm:$0xff] }
 0x47b   : > { %v14542_v53 = vld [vmem:[#allocation59_spill] sm:$0xff] }
 0x47c   : > { %7886 = vmatpush.bf16.msrb.mxu0 %v11143_v28  ;;  %7862 = vmatmul.bf16.vlgmr.msra.gmra.mxu2 %v3356_v16  ;;  %v7611_v38 = vpop.f32.mrf.mxu0  ;;  %v2887_v24 = vmul.f32 %v2871_v61, %v14542_v53  ;;  %v11166_v28 = vld [vmem:[%s11926_s4 + $0x7d0] sm:$0xff]  ;;  %v11148_v16 = vld [vmem:[%s11926_s4 + $0x740] sm:$0xff]  ;;  %v11201_v53 = vld [vmem:[%s11926_s4 + $0x8e8] sm:$0xff] }
 0x47d   : > { %7910 = vmatpush.bf16.msrb.mxu2 %v11163_v63  ;;  %7848 = vmatmul.bf16.vlgmr.msra.gmra.mxu1 %v3355_v2  ;;  %v11156_v2 = vld [vmem:[%s11926_s4 + $0x780] sm:$0xff] }
 0x47e   : > { %7896 = vmatpush.bf16.msrb.mxu1 %v11155_v6  ;;  %7924 = vmatpush.bf16.msrb.mxu3 %v11171_v52  ;;  %v7583_v41 = vpop.f32.mrf.mxu2  ;;  %v2920_v6 = vadd.f32 %v8832_v29, %v2887_v24  ;;  %v11165_v52 = vld [vmem:[%s11926_s4 + $0x7c8] sm:$0xff] }
 0x47f   : > { %7876 = vmatmul.bf16.vlgmr.msra.gmra.mxu3 %v3357_v30  ;;  %v7584_v44 = vadd.f32 %v7583_v41, %v7570_v57  ;;  %v11164_v30 = vld [vmem:[%s11926_s4 + $0x7c0] sm:$0xff]  ;;  %v11194_v57 = vld [vmem:[%s11926_s4 + $0x8b0] sm:$0xff] }
 0x480   : > { %7887 = vmatpush.bf16.msrb.mxu0 %v11142_v3  ;;  %v7597_v0 = vpop.f32.mrf.mxu3  ;;  %vm2936_vm11 = vcmp.ge.f32.partialorder %v2920_v6, 1.0  ;;  %v3037_v41 = vld.sshfl [vmem:[#allocation1 + $0x18] sm:$0xff pattern:$0x73625140] }
 0x481   : > { %7911 = vmatpush.bf16.msrb.mxu2 %v11162_v39  ;;  %v7598_v25 = vadd.f32 %v7597_v0, %v7584_v44  ;;  %v13977_v14 = vpop.f32.mrf.mxu1  ;;  %v11173_v44 = vld [vmem:[%s11926_s4 + $0x808] sm:$0xff]  ;;  %3171 = vst [vmem:[#allocation3 + $0x390] sm:$0xc0] %v3037_v41  ;;  %v7530_v0 = vadd.f32 %v13954_v48, %v7516_v1  ;;  %v11227_v41 = vld [vmem:[%s11926_s4 + $0x9b8] sm:$0xff] }
 0x482   : > { %7897 = vmatpush.bf16.msrb.mxu1 %v11154_v51  ;;  %7925 = vmatpush.bf16.msrb.mxu3 %v11170_v8  ;;  %v11175_v51 = vld [vmem:[%s11926_s4 + $0x818] sm:$0xff] }
 0x483   : > { %v7612_v63 = vadd.f32 %v7611_v38, %v7598_v25  ;;  %v11172_v25 = vld [vmem:[%s11926_s4 + $0x800] sm:$0xff]  ;;  %v7544_v29 = vadd.f32 %v13962_v19, %v7530_v0 }
 0x484   : > { %7888 = vmatpush.bf16.msrb.mxu0 %v11141_v49  ;;  %v13992_v3 = vpop.f32.mrf.mxu0  ;;  %v3231_v49 = vld [vmem:[#allocation3 + $0xc0] sm:$0xff] }
 0x485   : > { %7912 = vmatpush.bf16.msrb.mxu2 %v11161_v59  ;;  %v3359_v47 = vpack.c.bf16 %v3295_v42, %v3231_v49  ;;  %v7558_v6 = vadd.f32 %v13956_v26, %v7544_v29  ;;  %v11183_v26 = vld [vmem:[%s11926_s4 + $0x858] sm:$0xff]  ;;  %v11190_v42 = vld [vmem:[%s11926_s4 + $0x890] sm:$0xff]  ;;  %v3237_v0 = vld [vmem:[#allocation3 + $0x3e0] sm:$0xff] }
 0x486   : > { %7898 = vmatpush.bf16.msrb.mxu1 %v11153_v32  ;;  %7926 = vmatpush.bf16.msrb.mxu3 %v11169_v13  ;;  %v13985_v58 = vpop.f32.mrf.mxu2  ;;  %v3233_v32 = vld [vmem:[#allocation3 + $0x280] sm:$0xff]  ;;  %v3297_v13 = vld [vmem:[#allocation3 + $0x2e8] sm:$0xff]  ;;  %v11226_v29 = vld [vmem:[%s11926_s4 + $0x9b0] sm:$0xff] }
 0x487   : > { %v3361_v4 = vpack.c.bf16 %v3297_v13, %v3233_v32  ;;  %v8833_v32 = vld [vmem:[%s11924_s29 + $0x3d8] sm:$0xff] }
 0x488   : > { %7889 = vmatpush.bf16.msrb.mxu0 %v11140_v21  ;;  %v13990_v39 = vpop.f32.mrf.mxu3  ;;  %v11203_v21 = vld [vmem:[%s11926_s4 + $0x8f8] sm:$0xff] }
 0x489   : > { %7913 = vmatpush.bf16.msrb.mxu2 %v11160_v22  ;;  %v7625_v8 = vpop.f32.mrf.mxu1  ;;  %v3360_v22 = vpack.c.bf16 %v3296_v46, %v3232_v55  ;;  %v2872_v55 = vsub.f32 1.0, %v13658_v5  ;;  %v11209_v5 = vld [vmem:[%s11926_s4 + $0x928] sm:$0xff] }
 0x48a   : > { %7899 = vmatpush.bf16.msrb.mxu1 %v11152_v18  ;;  %7927 = vmatpush.bf16.msrb.mxu3 %v11168_v10  ;;  %v7626_v59 = vadd.f32 %v7625_v8, %v7612_v63  ;;  %v3034_v18 = vld.sshfl [vmem:[#allocation1] sm:$0xff pattern:$0x73625140]  ;;  %v3036_v10 = vld.sshfl [vmem:[#allocation1 + $0x10] sm:$0xff pattern:$0x73625140] }
 0x48b   : > { %7890 = vmatmul.bf16.vlgmr.msrb.gmra.mxu0 %v3358_v7  ;;  %3168 = vst [vmem:[#allocation3 + $0x1f8] sm:$0xc0] %v3034_v18  ;;  %v11211_v63 = vld [vmem:[%s11926_s4 + $0x938] sm:$0xff]  ;;  %v11181_v18 = vld [vmem:[%s11926_s4 + $0x848] sm:$0xff] }
 0x48c   : > { %7938 = vmatpush.bf16.msra.mxu0 %v11179_v15  ;;  %v8848_v15 = vsel %vm2936_vm11, 1.0, %v14407_v11  ;;  %3170 = vst [vmem:[#allocation3 + $0x398] sm:$0xc0] %v3036_v10  ;;  %v11199_v8 = vld [vmem:[%s11926_s4 + $0x8d8] sm:$0xff]  ;;  %v11180_v10 = vld [vmem:[%s11926_s4 + $0x840] sm:$0xff] }
 0x48d   : > { %7914 = vmatpush.bf16.msrb.mxu2 %v11159_v60  ;;  %v11186_v60 = vld [vmem:[%s11926_s4 + $0x870] sm:$0xff] }
 0x48e   : > { %7900 = vmatpush.bf16.msrb.mxu1 %v11151_v31  ;;  %7928 = vmatpush.bf16.msrb.mxu3 %v11167_v27  ;;  %v7639_v7 = vpop.f32.mrf.mxu2  ;;  %v11202_v31 = vld [vmem:[%s11926_s4 + $0x8f0] sm:$0xff]  ;;  %v7667_v27 = vpop.f32.mrf.mxu0 }
 0x48f   : > { %v7640_v61 = vadd.f32 %v7639_v7, %v7626_v59  ;;  %v2888_v59 = vmul.f32 %v2872_v55, %v13643_v23  ;;  %v11208_v23 = vld [vmem:[%s11926_s4 + $0x920] sm:$0xff]  ;;  %v11217_v55 = vld [vmem:[%s11926_s4 + $0x968] sm:$0xff] }
 0x490   : > { %7939 = vmatpush.bf16.msra.mxu0 %v11178_v40  ;;  %v3035_v40 = vld.sshfl [vmem:[#allocation1 + $0x8] sm:$0xff pattern:$0x73625140]  ;;  %v7653_v38 = vpop.f32.mrf.mxu3  ;;  %v11188_v7 = vld [vmem:[%s11926_s4 + $0x880] sm:$0xff] }
 0x491   : > { %7915 = vmatpush.bf16.msrb.mxu2 %v11158_v43  ;;  %3169 = vst [vmem:[#allocation3 + $0x238] sm:$0xc0] %v3035_v40  ;;  %v7654_v43 = vadd.f32 %v7653_v38, %v7640_v61  ;;  %v14008_v34 = vpop.f32.mrf.mxu1  ;;  %v3236_v40 = vld [vmem:[#allocation3 + $0x158] sm:$0xff] }
 0x492   : > { %7901 = vmatpush.bf16.msrb.mxu1 %v11150_v20  ;;  %7929 = vmatpush.bf16.msrb.mxu3 %v11166_v28  ;;  %3042 = vst [vmem:[#allocation1 + $0x3] ss:$4 sm:$0xff] %v8848_v15  ;;  %v3234_v20 = vld [vmem:[#allocation3 + $0x100] sm:$0xff]  ;;  %v3298_v48 = vld [vmem:[#allocation3 + $0x1f8] sm:$0xff] }
 0x493   : > { %v7668_v24 = vadd.f32 %v7667_v27, %v7654_v43  ;;  %v11192_v28 = vld [vmem:[%s11926_s4 + $0x8a0] sm:$0xff]  ;;  %v3300_v1 = vld [vmem:[#allocation3 + $0x398] sm:$0xff]  ;;  %v3301_v43 = vld [vmem:[#allocation3 + $0x390] sm:$0xff] }
 0x494   : > { %7940 = vmatpush.bf16.msra.mxu0 %v11177_v56  ;;  %v11185_v56 = vld [vmem:[%s11926_s4 + $0x868] sm:$0xff] }
 0x495   : > { %7916 = vmatpush.bf16.msrb.mxu2 %v11157_v35 }
 0x496   : > { %7902 = vmatpush.bf16.msrb.mxu1 %v11149_v62  ;;  %7930 = vmatpush.bf16.msrb.mxu3 %v11165_v52  ;;  %v14017_v35 = vpop.f32.mrf.mxu2  ;;  %v11200_v62 = vld [vmem:[%s11926_s4 + $0x8e0] sm:$0xff]  ;;  %v3362_v52 = vpack.c.bf16 %v3298_v48, %v3234_v20  ;;  %v11206_v20 = vld [vmem:[%s11926_s4 + $0x910] sm:$0xff]  ;;  %v3038_v48 = vld.sshfl [vmem:[#allocation1 + $0x20] sm:$0xff pattern:$0x73625140] }
 0x497   : > { %3172 = vst [vmem:[#allocation3 + $0x1a0] sm:$0xc0] %v3038_v48  ;;  %v11228_v48 = vld [vmem:[%s11926_s4 + $0x9c0] sm:$0xff] }
 0x498   : > { %7941 = vmatpush.bf16.msra.mxu0 %v11176_v45  ;;  %v11184_v45 = vld [vmem:[%s11926_s4 + $0x860] sm:$0xff]  ;;  %v3299_v38 = vld [vmem:[#allocation3 + $0x238] sm:$0xff] }
 0x499   : > { %7917 = vmatpush.bf16.msrb.mxu2 %v11156_v2  ;;  %v11191_v2 = vld [vmem:[%s11926_s4 + $0x898] sm:$0xff] }
 0x49a   : > { %7903 = vmatpush.bf16.msrb.mxu1 %v11148_v16  ;;  %7931 = vmatpush.bf16.msrb.mxu3 %v11164_v30  ;;  %v14022_v16 = vpop.f32.mrf.mxu3  ;;  %v7681_v19 = vpop.f32.mrf.mxu1  ;;  %v11210_v30 = vld [vmem:[%s11926_s4 + $0x930] sm:$0xff] }
 0x49b   : > { %v7682_v46 = vadd.f32 %v7681_v19, %v7668_v24 }
 0x49c   : > { %7942 = vmatpush.bf16.msra.mxu0 %v11175_v51  ;;  %7918 = vmatmul.bf16.vlgmr.msrb.gmra.mxu2 %v3360_v22  ;;  %v7572_v51 = vadd.f32 %v13977_v14, %v7558_v6  ;;  %v11182_v14 = vld [vmem:[%s11926_s4 + $0x850] sm:$0xff]  ;;  %v3041_v6 = vld.sshfl [vmem:[#allocation1 + $0x38] sm:$0xff pattern:$0x73625140] }
 0x49d   : > { %7966 = vmatpush.bf16.msra.mxu2 %v11195_v33  ;;  %7904 = vmatmul.bf16.vlgmr.msrb.gmra.mxu1 %v3359_v47  ;;  %v14030_v33 = vpop.f32.mrf.mxu0  ;;  %v11189_v47 = vld [vmem:[%s11926_s4 + $0x888] sm:$0xff]  ;;  %3175 = vst [vmem:[#allocation3 + $0x2d8] sm:$0xc0] %v3041_v6  ;;  %v3239_v6 = vld [vmem:[#allocation3 + $0x3f8] sm:$0xff] }
 0x49e   : > { %7952 = vmatpush.bf16.msra.mxu1 %v11187_v36  ;;  %7980 = vmatpush.bf16.msra.mxu3 %v11203_v21  ;;  %v7586_v49 = vadd.f32 %v13985_v58, %v7572_v51  ;;  %v11198_v21 = vld [vmem:[%s11926_s4 + $0x8d0] sm:$0xff]  ;;  %v3302_v51 = vld [vmem:[#allocation3 + $0x1a0] sm:$0xff] }
 0x49f   : > { %7932 = vmatmul.bf16.vlgmr.msrb.gmra.mxu3 %v3361_v4  ;;  %v7695_v36 = vpop.f32.mrf.mxu2 }
 0x4a0   : > { %7943 = vmatpush.bf16.msra.mxu0 %v11174_v50  ;;  %v7696_v13 = vadd.f32 %v7695_v36, %v7682_v46  ;;  %v7600_v22 = vadd.f32 %v13990_v39, %v7586_v49  ;;  %v2921_v50 = vadd.f32 %v8833_v32, %v2888_v59  ;;  %v11196_v39 = vld [vmem:[%s11926_s4 + $0x8c0] sm:$0xff] }
 0x4a1   : > { %7967 = vmatpush.bf16.msra.mxu2 %v11194_v57  ;;  %v11197_v57 = vld [vmem:[%s11926_s4 + $0x8c8] sm:$0xff]  ;;  %v11204_v46 = vld [vmem:[%s11926_s4 + $0x900] sm:$0xff] }
 0x4a2   : > { %7953 = vmatpush.bf16.msra.mxu1 %v11186_v60  ;;  %7981 = vmatpush.bf16.msra.mxu3 %v11202_v31  ;;  %v7709_v58 = vpop.f32.mrf.mxu3  ;;  %v7614_v4 = vadd.f32 %v13992_v3, %v7600_v22  ;;  %v11207_v31 = vld [vmem:[%s11926_s4 + $0x918] sm:$0xff]  ;;  %vm2937_vm12 = vcmp.ge.f32.partialorder %v2921_v50, 1.0  ;;  %v3235_v3 = vld [vmem:[#allocation3 + $0x3c0] sm:$0xff]  ;;  %v7683_v19 = vpop.f32.mrf.mxu1  ;;  %v14543_v22 = vld [vmem:[#allocation62_spill] sm:$0xff] }
 0x4a3   : > { %v7710_v15 = vadd.f32 %v7709_v58, %v7696_v13  ;;  %v11224_v49 = vld [vmem:[%s11926_s4 + $0x9a0] sm:$0xff]  ;;  %v11242_v58 = vld [vmem:[%s11926_s4 + $0xa30] sm:$0xff]  ;;  %v11231_v50 = vld [vmem:[%s11926_s4 + $0x9d8] sm:$0xff] }
 0x4a4   : > { %7944 = vmatpush.bf16.msra.mxu0 %v11173_v44  ;;  %v7628_v27 = vadd.f32 %v14008_v34, %v7614_v4  ;;  %v11219_v44 = vld [vmem:[%s11926_s4 + $0x978] sm:$0xff]  ;;  %v3365_v34 = vpack.c.bf16 %v3301_v43, %v3237_v0  ;;  %v11216_v59 = vld [vmem:[%s11926_s4 + $0x960] sm:$0xff] }
 0x4a5   : > { %7968 = vmatpush.bf16.msra.mxu2 %v11193_v17  ;;  %v11235_v17 = vld [vmem:[%s11926_s4 + $0x9f8] sm:$0xff]  ;;  %v11240_v0 = vld [vmem:[%s11926_s4 + $0xa20] sm:$0xff] }
 0x4a6   : > { %7954 = vmatpush.bf16.msra.mxu1 %v11185_v56  ;;  %7982 = vmatpush.bf16.msra.mxu3 %v11201_v53  ;;  %v3364_v56 = vpack.c.bf16 %v3300_v1, %v3236_v40  ;;  %v8849_v53 = vsel %vm2937_vm12, 1.0, %v14407_v11  ;;  %v7642_v24 = vadd.f32 %v14017_v35, %v7628_v27  ;;  %v11234_v35 = vld [vmem:[%s11926_s4 + $0x9f0] sm:$0xff] }
 0x4a7   : > { %v11214_v1 = vld [vmem:[%s11926_s4 + $0x950] sm:$0xff] }
 0x4a8   : > { %7945 = vmatpush.bf16.msra.mxu0 %v11172_v25  ;;  %v7723_v60 = vpop.f32.mrf.mxu0  ;;  %v3363_v25 = vpack.c.bf16 %v3299_v38, %v3235_v3 }
 0x4a9   : > { %7969 = vmatpush.bf16.msra.mxu2 %v11192_v28  ;;  %v14048_v61 = vadd.f32 %v7723_v60, %v7710_v15  ;;  %v3040_v28 = vld.sshfl [vmem:[#allocation1 + $0x30] sm:$0xff pattern:$0x73625140]  ;;  %v2873_v15 = vsub.f32 1.0, %v14543_v22  ;;  %v11237_v22 = vld [vmem:[%s11926_s4 + $0xa08] sm:$0xff] }
 0x4aa   : > { %7955 = vmatpush.bf16.msra.mxu1 %v11184_v45  ;;  %7983 = vmatpush.bf16.msra.mxu3 %v11200_v62  ;;  %3174 = vst [vmem:[#allocation3 + $0x258] sm:$0xc0] %v3040_v28  ;;  %v3039_v45 = vld.sshfl [vmem:[#allocation1 + $0x28] sm:$0xff pattern:$0x73625140]  ;;  %v7656_v62 = vadd.f32 %v14022_v16, %v7642_v24  ;;  %v11233_v16 = vld [vmem:[%s11926_s4 + $0x9e8] sm:$0xff]  ;;  %v7711_v32 = vpop.f32.mrf.mxu3 }
 0x4ab   : > { %7946 = vmatmul.bf16.vlgmr.msra.gmra.mxu0 %v3362_v52  ;;  %3173 = vst [vmem:[#allocation3 + $0xa8] sm:$0xc0] %v3039_v45  ;;  %v11205_v52 = vld [vmem:[%s11926_s4 + $0x908] sm:$0xff]  ;;  %v11212_v24 = vld [vmem:[%s11926_s4 + $0x940] sm:$0xff] }
 0x4ac   : > { %7994 = vmatpush.bf16.msrb.mxu0 %v11211_v63  ;;  %v11218_v63 = vld [vmem:[%s11926_s4 + $0x970] sm:$0xff]  ;;  %3043 = vst [vmem:[#allocation1 + $0x23] ss:$4 sm:$0xff] %v8849_v53  ;;  %v11229_v53 = vld [vmem:[%s11926_s4 + $0x9c8] sm:$0xff] }
 0x4ad   : > { %7970 = vmatpush.bf16.msra.mxu2 %v11191_v2  ;;  %v11225_v2 = vld [vmem:[%s11926_s4 + $0x9a8] sm:$0xff] }
 0x4ae   : > { %7956 = vmatpush.bf16.msra.mxu1 %v11183_v26  ;;  %7984 = vmatpush.bf16.msra.mxu3 %v11199_v8  ;;  %v3238_v26 = vld [vmem:[#allocation3 + $0x218] sm:$0xff]  ;;  %v7697_v8 = vpop.f32.mrf.mxu2 }
 0x4af   : > { %v3366_v36 = vpack.c.bf16 %v3302_v51, %v3238_v26 }
 0x4b0   : > { %7995 = vmatpush.bf16.msrb.mxu0 %v11210_v30  ;;  %v7670_v30 = vadd.f32 %v14030_v33, %v7656_v62  ;;  %v11232_v33 = vld [vmem:[%s11926_s4 + $0x9e0] sm:$0xff] }
 0x4b1   : > { %7971 = vmatpush.bf16.msra.mxu2 %v11190_v42  ;;  %v11243_v42 = vld [vmem:[%s11926_s4 + $0xa38] sm:$0xff] }
 0x4b2   : > { %7957 = vmatpush.bf16.msra.mxu1 %v11182_v14  ;;  %7985 = vmatpush.bf16.msra.mxu3 %v11198_v21  ;;  %v11223_v21 = vld [vmem:[%s11926_s4 + $0x998] sm:$0xff]  ;;  %v3303_v62 = vld [vmem:[#allocation3 + $0xa8] sm:$0xff] }
 0x4b4   : > { %7996 = vmatpush.bf16.msrb.mxu0 %v11209_v5  ;;  %v7684_v5 = vadd.f32 %v7683_v19, %v7670_v30  ;;  %v11251_v19 = vld [vmem:[%s11926_s4 + $0xa78] sm:$0xff] }
 0x4b5   : > { %7972 = vmatpush.bf16.msra.mxu2 %v11189_v47  ;;  %v3305_v30 = vld [vmem:[#allocation3 + $0x2d8] sm:$0xff] }
 0x4b6   : > { %7958 = vmatpush.bf16.msra.mxu1 %v11181_v18  ;;  %7986 = vmatpush.bf16.msra.mxu3 %v11197_v57  ;;  %v7698_v14 = vadd.f32 %v7697_v8, %v7684_v5  ;;  %v7725_v18 = vpop.f32.mrf.mxu0  ;;  %v11222_v57 = vld [vmem:[%s11926_s4 + $0x990] sm:$0xff]  ;;  %v3367_v8 = vpack.c.bf16 %v3303_v62, %v3239_v6  ;;  %v11260_v62 = vld [vmem:[%s11926_s4 + $0xac0] sm:$0xff] }
 0x4b8   : > { %7997 = vmatpush.bf16.msrb.mxu0 %v11208_v23  ;;  %v11215_v23 = vld [vmem:[%s11926_s4 + $0x958] sm:$0xff]  ;;  %v7712_v4 = vadd.f32 %v7711_v32, %v7698_v14  ;;  %v3045_v14 = vld.sshfl [vmem:[#allocation1 + $0x8] sm:$0xff pattern:$0x73625140] }
 0x4b9   : > { %7973 = vmatpush.bf16.msra.mxu2 %v11188_v7  ;;  %v14544_v7 = vld [vmem:[#allocation61_spill] sm:$0xff]  ;;  %v11266_v32 = vld [vmem:[%s11926_s4 + $0xaf0] sm:$0xff]  ;;  %3177 = vst [vmem:[#allocation3 + $0x180] sm:$0xc0] %v3045_v14 }
 0x4ba   : > { %7959 = vmatpush.bf16.msra.mxu1 %v11180_v10  ;;  %7987 = vmatpush.bf16.msra.mxu3 %v11196_v39  ;;  %v7737_v13 = vpop.f32.mrf.mxu1  ;;  %v11241_v10 = vld [vmem:[%s11926_s4 + $0xa28] sm:$0xff]  ;;  %v2889_v60 = vmul.f32 %v2873_v15, %v14544_v7  ;;  %v7726_v40 = vadd.f32 %v7725_v18, %v7712_v4  ;;  %v3242_v18 = vld [vmem:[#allocation3 + $0x2a0] sm:$0xff] }
 0x4bb   : > { %v7738_v47 = vadd.f32 %v7737_v13, %v14048_v61  ;;  %v8834_v61 = vld [vmem:[%s11924_s29 + $0x3e0] sm:$0xff]  ;;  %v11257_v15 = vld [vmem:[%s11926_s4 + $0xaa8] sm:$0xff] }
 0x4bc   : > { %7998 = vmatpush.bf16.msrb.mxu0 %v11207_v31  ;;  %7974 = vmatmul.bf16.vlgmr.msra.gmra.mxu2 %v3364_v56  ;;  %v2922_v43 = vadd.f32 %v8834_v61, %v2889_v60  ;;  %v11213_v56 = vld [vmem:[%s11926_s4 + $0x948] sm:$0xff]  ;;  %v11248_v7 = vld [vmem:[%s11926_s4 + $0xa60] sm:$0xff]  ;;  %v11274_v61 = vld [vmem:[%s11926_s4 + $0xb30] sm:$0xff] }
 0x4bd   : > { %8022 = vmatpush.bf16.msrb.mxu2 %v11227_v41  ;;  %7960 = vmatmul.bf16.vlgmr.msra.gmra.mxu1 %v3363_v25  ;;  %v11230_v41 = vld [vmem:[%s11926_s4 + $0x9d0] sm:$0xff]  ;;  %v11220_v25 = vld [vmem:[%s11926_s4 + $0x980] sm:$0xff] }
 0x4be   : > { %8008 = vmatpush.bf16.msrb.mxu1 %v11219_v44  ;;  %8036 = vmatpush.bf16.msrb.mxu3 %v11235_v17  ;;  %v11221_v44 = vld [vmem:[%s11926_s4 + $0x988] sm:$0xff]  ;;  %vm2938_vm13 = vcmp.ge.f32.partialorder %v2922_v43, 1.0  ;;  %v11264_v60 = vld [vmem:[%s11926_s4 + $0xae0] sm:$0xff] }
 0x4bf   : > { %7988 = vmatmul.bf16.vlgmr.msra.gmra.mxu3 %v3365_v34  ;;  %v7751_v39 = vpop.f32.mrf.mxu2  ;;  %v3240_v34 = vld [vmem:[#allocation3 + $0x8] sm:$0xff]  ;;  %v8850_v26 = vsel %vm2938_vm13, 1.0, %v14407_v11 }
 0x4c0   : > { %7999 = vmatpush.bf16.msrb.mxu0 %v11206_v20  ;;  %v7752_v31 = vadd.f32 %v7751_v39, %v7738_v47  ;;  %v11249_v47 = vld [vmem:[%s11926_s4 + $0xa68] sm:$0xff] }
 0x4c1   : > { %8023 = vmatpush.bf16.msrb.mxu2 %v11226_v29  ;;  %v3304_v29 = vld [vmem:[#allocation3 + $0x258] sm:$0xff] }
 0x4c2   : > { %8009 = vmatpush.bf16.msrb.mxu1 %v11218_v63  ;;  %8037 = vmatpush.bf16.msrb.mxu3 %v11234_v35  ;;  %v7765_v3 = vpop.f32.mrf.mxu3  ;;  %v7739_v27 = vpop.f32.mrf.mxu1  ;;  %v11239_v63 = vld [vmem:[%s11926_s4 + $0xa18] sm:$0xff] }
 0x4c3   : > { %v7766_v38 = vadd.f32 %v7765_v3, %v7752_v31  ;;  %v7740_v17 = vadd.f32 %v7739_v27, %v7726_v40  ;;  %v11259_v35 = vld [vmem:[%s11926_s4 + $0xab8] sm:$0xff]  ;;  %v2874_v31 = vsub.f32 1.0, %v13682_v9  ;;  %v11254_v27 = vld [vmem:[%s11926_s4 + $0xa90] sm:$0xff] }
 0x4c4   : > { %8000 = vmatpush.bf16.msrb.mxu0 %v11205_v52  ;;  %v11247_v3 = vld [vmem:[%s11926_s4 + $0xa58] sm:$0xff]  ;;  %v11246_v9 = vld [vmem:[%s11926_s4 + $0xa50] sm:$0xff] }
 0x4c5   : > { %8024 = vmatpush.bf16.msrb.mxu2 %v11225_v2  ;;  %v3241_v2 = vld [vmem:[#allocation3 + $0x128] sm:$0xff] }
 0x4c6   : > { %8010 = vmatpush.bf16.msrb.mxu1 %v11217_v55  ;;  %8038 = vmatpush.bf16.msrb.mxu3 %v11233_v16  ;;  %v11267_v16 = vld [vmem:[%s11926_s4 + $0xaf8] sm:$0xff]  ;;  %v3369_v5 = vpack.c.bf16 %v3305_v30, %v3241_v2 }
 0x4c7   : > { %v7753_v45 = vpop.f32.mrf.mxu2  ;;  %v11271_v30 = vld [vmem:[%s11926_s4 + $0xb18] sm:$0xff] }
 0x4c8   : > { %8001 = vmatpush.bf16.msrb.mxu0 %v11204_v46  ;;  %v7779_v20 = vpop.f32.mrf.mxu0  ;;  %v7754_v52 = vadd.f32 %v7753_v45, %v7740_v17  ;;  %v3368_v46 = vpack.c.bf16 %v3304_v29, %v3240_v34  ;;  %v8835_v17 = vld [vmem:[%s11924_s29 + $0x3e8] sm:$0xff]  ;;  %v11272_v34 = vld [vmem:[%s11926_s4 + $0xb20] sm:$0xff] }
 0x4c9   : > { %8025 = vmatpush.bf16.msrb.mxu2 %v11224_v49  ;;  %v14091_v28 = vadd.f32 %v7779_v20, %v7766_v38  ;;  %v11238_v49 = vld [vmem:[%s11926_s4 + $0xa10] sm:$0xff]  ;;  %v11263_v38 = vld [vmem:[%s11926_s4 + $0xad8] sm:$0xff]  ;;  %v11244_v45 = vld [vmem:[%s11926_s4 + $0xa40] sm:$0xff] }
 0x4ca   : > { %8011 = vmatpush.bf16.msrb.mxu1 %v11216_v59  ;;  %8039 = vmatpush.bf16.msrb.mxu3 %v11232_v33  ;;  %v7767_v55 = vpop.f32.mrf.mxu3  ;;  %v11258_v59 = vld [vmem:[%s11926_s4 + $0xab0] sm:$0xff]  ;;  %v3046_v33 = vld.sshfl [vmem:[#allocation1 + $0x10] sm:$0xff pattern:$0x73625140] }
 0x4cb   : > { %8002 = vmatmul.bf16.vlgmr.msrb.gmra.mxu0 %v3366_v36  ;;  %v7768_v51 = vadd.f32 %v7767_v55, %v7754_v52  ;;  %v11250_v36 = vld [vmem:[%s11926_s4 + $0xa70] sm:$0xff]  ;;  %3178 = vst [vmem:[#allocation3 + $0x170] sm:$0xc0] %v3046_v33  ;;  %v3244_v52 = vld [vmem:[#allocation3 + $0xa0] sm:$0xff] }
 0x4cc   : > { %8050 = vmatpush.bf16.msra.mxu0 %v11243_v42  ;;  %v3044_v42 = vld.sshfl [vmem:[#allocation1] sm:$0xff pattern:$0x73625140] }
 0x4cd   : > { %8026 = vmatpush.bf16.msrb.mxu2 %v11223_v21  ;;  %3176 = vst [vmem:[#allocation3 + $0xf0] sm:$0xc0] %v3044_v42  ;;  %v3047_v21 = vld.sshfl [vmem:[#allocation1 + $0x18] sm:$0xff pattern:$0x73625140] }
 0x4ce   : > { %8012 = vmatpush.bf16.msrb.mxu1 %v11215_v23  ;;  %8040 = vmatpush.bf16.msrb.mxu3 %v11231_v50  ;;  %3179 = vst [vmem:[#allocation3 + $0x3d0] sm:$0xc0] %v3047_v21  ;;  %v11265_v23 = vld [vmem:[%s11926_s4 + $0xae8] sm:$0xff]  ;;  %v11236_v50 = vld [vmem:[%s11926_s4 + $0xa00] sm:$0xff] }
 0x4cf   : > { %3052 = vst [vmem:[#allocation1 + $0x3] ss:$4 sm:$0xff] %v8850_v26  ;;  %v3307_v26 = vld [vmem:[#allocation3 + $0x180] sm:$0xff]  ;;  %v3048_v21 = vld.sshfl [vmem:[#allocation1 + $0x20] sm:$0xff pattern:$0x73625140] }
 0x4d0   : > { %8051 = vmatpush.bf16.msra.mxu0 %v11242_v58  ;;  %v7781_v13 = vpop.f32.mrf.mxu0  ;;  %3180 = vst [vmem:[#allocation3 + $0x250] sm:$0xc0] %v3048_v21  ;;  %v11315_v21 = vld [vmem:[%s11926_s4 + $0xc78] sm:$0xff] }
 0x4d1   : > { %8027 = vmatpush.bf16.msrb.mxu2 %v11222_v57  ;;  %v7782_v58 = vadd.f32 %v7781_v13, %v7768_v51  ;;  %v11256_v57 = vld [vmem:[%s11926_s4 + $0xaa0] sm:$0xff]  ;;  %v11270_v13 = vld [vmem:[%s11926_s4 + $0xb10] sm:$0xff] }
 0x4d2   : > { %8013 = vmatpush.bf16.msrb.mxu1 %v11214_v1  ;;  %8041 = vmatpush.bf16.msrb.mxu3 %v11230_v41  ;;  %v11255_v1 = vld [vmem:[%s11926_s4 + $0xa98] sm:$0xff] }
 0x4d4   : > { %8052 = vmatpush.bf16.msra.mxu0 %v11241_v10  ;;  %v3306_v4 = vld [vmem:[#allocation3 + $0xf0] sm:$0xff]  ;;  %v11275_v10 = vld [vmem:[%s11926_s4 + $0xb38] sm:$0xff] }
 0x4d5   : > { %8028 = vmatpush.bf16.msrb.mxu2 %v11221_v44  ;;  %v3370_v39 = vpack.c.bf16 %v3306_v4, %v3242_v18  ;;  %v11273_v44 = vld [vmem:[%s11926_s4 + $0xb28] sm:$0xff]  ;;  %v3309_v42 = vld [vmem:[#allocation3 + $0x3d0] sm:$0xff]  ;;  %v3051_v4 = vld.sshfl [vmem:[#allocation1 + $0x38] sm:$0xff pattern:$0x73625140] }
 0x4d6   : > { %8014 = vmatpush.bf16.msrb.mxu1 %v11213_v56  ;;  %8042 = vmatpush.bf16.msrb.mxu3 %v11229_v53  ;;  %v11262_v53 = vld [vmem:[%s11926_s4 + $0xad0] sm:$0xff]  ;;  %3183 = vst [vmem:[#allocation3 + $0x38] sm:$0xc0] %v3051_v4 }
 0x4d8   : > { %8053 = vmatpush.bf16.msra.mxu0 %v11240_v0  ;;  %v2890_v0 = vmul.f32 %v2874_v31, %v13665_v37  ;;  %v11288_v31 = vld [vmem:[%s11926_s4 + $0xba0] sm:$0xff] }
 0x4d9   : > { %8029 = vmatpush.bf16.msrb.mxu2 %v11220_v25 }
 0x4da   : > { %8015 = vmatpush.bf16.msrb.mxu1 %v11212_v24  ;;  %8043 = vmatpush.bf16.msrb.mxu3 %v11228_v48  ;;  %v7793_v40 = vpop.f32.mrf.mxu1  ;;  %v11253_v48 = vld [vmem:[%s11926_s4 + $0xa88] sm:$0xff]  ;;  %v2923_v37 = vadd.f32 %v8835_v17, %v2890_v0  ;;  %v11287_v0 = vld [vmem:[%s11926_s4 + $0xb98] sm:$0xff] }
 0x4db   : > { %v7794_v41 = vadd.f32 %v7793_v40, %v14091_v28  ;;  %v11245_v28 = vld [vmem:[%s11926_s4 + $0xa48] sm:$0xff]  ;;  %v11268_v40 = vld [vmem:[%s11926_s4 + $0xb00] sm:$0xff] }
 0x4dc   : > { %8054 = vmatpush.bf16.msra.mxu0 %v11239_v63  ;;  %8030 = vmatmul.bf16.vlgmr.msrb.gmra.mxu2 %v3368_v46  ;;  %v11261_v63 = vld [vmem:[%s11926_s4 + $0xac8] sm:$0xff]  ;;  %vm2939_vm14 = vcmp.ge.f32.partialorder %v2923_v37, 1.0  ;;  %v3243_v46 = vld [vmem:[#allocation3 + $0x3f0] sm:$0xff] }
 0x4dd   : > { %8078 = vmatpush.bf16.msra.mxu2 %v11259_v35  ;;  %8016 = vmatmul.bf16.vlgmr.msrb.gmra.mxu1 %v3367_v8  ;;  %v11252_v35 = vld [vmem:[%s11926_s4 + $0xa80] sm:$0xff]  ;;  %v11283_v8 = vld [vmem:[%s11926_s4 + $0xb78] sm:$0xff] }
 0x4de   : > { %8064 = vmatpush.bf16.msra.mxu1 %v11251_v19  ;;  %8092 = vmatpush.bf16.msra.mxu3 %v11267_v16  ;;  %v3308_v19 = vld [vmem:[#allocation3 + $0x170] sm:$0xff]  ;;  %v11291_v16 = vld [vmem:[%s11926_s4 + $0xbb8] sm:$0xff] }
 0x4df   : > { %8044 = vmatmul.bf16.vlgmr.msrb.gmra.mxu3 %v3369_v5  ;;  %v7807_v43 = vpop.f32.mrf.mxu2  ;;  %v3372_v33 = vpack.c.bf16 %v3308_v19, %v3244_v52  ;;  %v11285_v52 = vld [vmem:[%s11926_s4 + $0xb88] sm:$0xff]  ;;  %v11304_v19 = vld [vmem:[%s11926_s4 + $0xc20] sm:$0xff] }
 0x4e0   : > { %8055 = vmatpush.bf16.msra.mxu0 %v11238_v49  ;;  %v7808_v56 = vadd.f32 %v7807_v43, %v7794_v41  ;;  %v3245_v49 = vld [vmem:[#allocation3 + $0x2c0] sm:$0xff]  ;;  %v11307_v41 = vld [vmem:[%s11926_s4 + $0xc38] sm:$0xff]  ;;  %v11306_v43 = vld [vmem:[%s11926_s4 + $0xc30] sm:$0xff] }
 0x4e1   : > { %8079 = vmatpush.bf16.msra.mxu2 %v11258_v59  ;;  %v11299_v59 = vld [vmem:[%s11926_s4 + $0xbf8] sm:$0xff] }
 0x4e2   : > { %8065 = vmatpush.bf16.msra.mxu1 %v11250_v36  ;;  %8093 = vmatpush.bf16.msra.mxu3 %v11266_v32  ;;  %v7821_v24 = vpop.f32.mrf.mxu3  ;;  %v7795_v20 = vpop.f32.mrf.mxu1  ;;  %v8851_v36 = vsel %vm2939_vm14, 1.0, %v14407_v11  ;;  %v3371_v32 = vpack.c.bf16 %v3307_v26, %v3243_v46  ;;  %v11276_v46 = vld [vmem:[%s11926_s4 + $0xb40] sm:$0xff] }
 0x4e3   : > { %v7822_v25 = vadd.f32 %v7821_v24, %v7808_v56  ;;  %v7796_v29 = vadd.f32 %v7795_v20, %v7782_v58  ;;  %v3373_v58 = vpack.c.bf16 %v3309_v42, %v3245_v49  ;;  %v11295_v24 = vld [vmem:[%s11926_s4 + $0xbd8] sm:$0xff]  ;;  %v11305_v20 = vld [vmem:[%s11926_s4 + $0xc28] sm:$0xff]  ;;  %v11284_v26 = vld [vmem:[%s11926_s4 + $0xb80] sm:$0xff] }
 0x4e4   : > { %8056 = vmatpush.bf16.msra.mxu0 %v11237_v22  ;;  %v11290_v22 = vld [vmem:[%s11926_s4 + $0xbb0] sm:$0xff] }
 0x4e5   : > { %8080 = vmatpush.bf16.msra.mxu2 %v11257_v15  ;;  %v3050_v15 = vld.sshfl [vmem:[#allocation1 + $0x30] sm:$0xff pattern:$0x73625140]  ;;  %v3248_v49 = vld [vmem:[#allocation3 + $0x1f0] sm:$0xff] }
 0x4e6   : > { %8066 = vmatpush.bf16.msra.mxu1 %v11249_v47  ;;  %8094 = vmatpush.bf16.msra.mxu3 %v11265_v23  ;;  %v11282_v47 = vld [vmem:[%s11926_s4 + $0xb70] sm:$0xff]  ;;  %3182 = vst [vmem:[#allocation3 + $0xb8] sm:$0xc0] %v3050_v15 }
 0x4e7   : > { %v7809_v55 = vpop.f32.mrf.mxu2  ;;  %v3049_v23 = vld.sshfl [vmem:[#allocation1 + $0x28] sm:$0xff pattern:$0x73625140] }
 0x4e8   : > { %8057 = vmatpush.bf16.msra.mxu0 %v11236_v50  ;;  %v7835_v6 = vpop.f32.mrf.mxu0  ;;  %v7810_v51 = vadd.f32 %v7809_v55, %v7796_v29  ;;  %v11298_v50 = vld [vmem:[%s11926_s4 + $0xbf0] sm:$0xff]  ;;  %3181 = vst [vmem:[#allocation3 + $0x378] sm:$0xc0] %v3049_v23  ;;  %v11277_v55 = vld [vmem:[%s11926_s4 + $0xb48] sm:$0xff] }
 0x4e9   : > { %8081 = vmatpush.bf16.msra.mxu2 %v11256_v57  ;;  %v14130_v2 = vadd.f32 %v7835_v6, %v7822_v25  ;;  %3053 = vst [vmem:[#allocation1 + $0x23] ss:$4 sm:$0xff] %v8851_v36  ;;  %v11286_v25 = vld [vmem:[%s11926_s4 + $0xb90] sm:$0xff]  ;;  %v11323_v36 = vld [vmem:[%s11926_s4 + $0xcb8] sm:$0xff] }
 0x4ea   : > { %8067 = vmatpush.bf16.msra.mxu1 %v11248_v7  ;;  %8095 = vmatpush.bf16.msra.mxu3 %v11264_v60  ;;  %v7823_v5 = vpop.f32.mrf.mxu3  ;;  %v11289_v7 = vld [vmem:[%s11926_s4 + $0xba8] sm:$0xff]  ;;  %v11278_v29 = vld [vmem:[%s11926_s4 + $0xb50] sm:$0xff] }
 0x4eb   : > { %8058 = vmatmul.bf16.vlgmr.msra.gmra.mxu0 %v3370_v39  ;;  %v7824_v14 = vadd.f32 %v7823_v5, %v7810_v51  ;;  %v11281_v60 = vld [vmem:[%s11926_s4 + $0xb68] sm:$0xff] }
 0x4ec   : > { %8106 = vmatpush.bf16.msrb.mxu0 %v11275_v10  ;;  %v11269_v10 = vld [vmem:[%s11926_s4 + $0xb08] sm:$0xff] }
 0x4ed   : > { %8082 = vmatpush.bf16.msra.mxu2 %v11255_v1  ;;  %v11297_v39 = vld [vmem:[%s11926_s4 + $0xbe8] sm:$0xff]  ;;  %v3246_v1 = vld [vmem:[#allocation3 + $0xb0] sm:$0xff]  ;;  %v3312_v42 = vld [vmem:[#allocation3 + $0xb8] sm:$0xff] }
 0x4ee   : > { %8068 = vmatpush.bf16.msra.mxu1 %v11247_v3  ;;  %8096 = vmatpush.bf16.msra.mxu3 %v11263_v38  ;;  %v11280_v3 = vld [vmem:[%s11926_s4 + $0xb60] sm:$0xff]  ;;  %v3376_v23 = vpack.c.bf16 %v3312_v42, %v3248_v49  ;;  %v11309_v49 = vld [vmem:[%s11926_s4 + $0xc48] sm:$0xff] }
 0x4ef   : > { %v11296_v38 = vld [vmem:[%s11926_s4 + $0xbe0] sm:$0xff]  ;;  %v11325_v42 = vld [vmem:[%s11926_s4 + $0xcc8] sm:$0xff] }
 0x4f0   : > { %8107 = vmatpush.bf16.msrb.mxu0 %v11274_v61  ;;  %v7837_v18 = vpop.f32.mrf.mxu0  ;;  %v3310_v61 = vld [vmem:[#allocation3 + $0x250] sm:$0xff] }
 0x4f1   : > { %8083 = vmatpush.bf16.msra.mxu2 %v11254_v27  ;;  %v7838_v57 = vadd.f32 %v7837_v18, %v7824_v14  ;;  %v3374_v27 = vpack.c.bf16 %v3310_v61, %v3246_v1  ;;  %v3247_v14 = vld [vmem:[#allocation3 + $0x1e0] sm:$0xff]  ;;  %v3055_v1 = vld.sshfl [vmem:[#allocation1 + $0x8] sm:$0xff pattern:$0x73625140] }
 0x4f2   : > { %8069 = vmatpush.bf16.msra.mxu1 %v11246_v9  ;;  %8097 = vmatpush.bf16.msra.mxu3 %v11262_v53  ;;  %v14545_v9 = vld [vmem:[#allocation8_spill] sm:$0xff]  ;;  %v11279_v53 = vld [vmem:[%s11926_s4 + $0xb58] sm:$0xff]  ;;  %v11330_v61 = vld [vmem:[%s11926_s4 + $0xcf0] sm:$0xff]  ;;  %3185 = vst [vmem:[#allocation3 + $0x308] sm:$0xc0] %v3055_v1 }
 0x4f3   : > { %v2875_v17 = vsub.f32 1.0, %v14545_v9  ;;  %v3250_v9 = vld [vmem:[#allocation3 + $0x230] sm:$0xff] }
 0x4f4   : > { %8108 = vmatpush.bf16.msrb.mxu0 %v11273_v44 }
 0x4f5   : > { %8084 = vmatpush.bf16.msra.mxu2 %v11253_v48  ;;  %v14546_v48 = vld [vmem:[#allocation63_spill] sm:$0xff] }
 0x4f6   : > { %8070 = vmatpush.bf16.msra.mxu1 %v11245_v28  ;;  %8098 = vmatpush.bf16.msra.mxu3 %v11261_v63  ;;  %v8836_v28 = vld [vmem:[%s11924_s29 + $0x3f0] sm:$0xff] }
 0x4f8   : > { %8109 = vmatpush.bf16.msrb.mxu0 %v11272_v34  ;;  %v2891_v34 = vmul.f32 %v2875_v17, %v14546_v48 }
 0x4f9   : > { %8085 = vmatpush.bf16.msra.mxu2 %v11252_v35 }
 0x4fa   : > { %8071 = vmatpush.bf16.msra.mxu1 %v11244_v45  ;;  %8099 = vmatpush.bf16.msra.mxu3 %v11260_v62  ;;  %v7849_v44 = vpop.f32.mrf.mxu1  ;;  %v11294_v45 = vld [vmem:[%s11926_s4 + $0xbd0] sm:$0xff] }
 0x4fb   : > { %v7850_v56 = vadd.f32 %v7849_v44, %v14130_v2  ;;  %v2924_v2 = vadd.f32 %v8836_v28, %v2891_v34  ;;  %v11313_v44 = vld [vmem:[%s11926_s4 + $0xc68] sm:$0xff]  ;;  %v11319_v34 = vld [vmem:[%s11926_s4 + $0xc98] sm:$0xff] }
 0x4fc   : > { %8110 = vmatpush.bf16.msrb.mxu0 %v11271_v30  ;;  %8086 = vmatmul.bf16.vlgmr.msra.gmra.mxu2 %v3372_v33 }
 0x4fd   : > { %8134 = vmatpush.bf16.msrb.mxu2 %v11291_v16  ;;  %8072 = vmatmul.bf16.vlgmr.msra.gmra.mxu1 %v3371_v32  ;;  %v11293_v16 = vld [vmem:[%s11926_s4 + $0xbc8] sm:$0xff]  ;;  %vm2940_vm15 = vcmp.ge.f32.partialorder %v2924_v2, 1.0  ;;  %v3311_v32 = vld [vmem:[#allocation3 + $0x378] sm:$0xff] }
 0x4fe   : > { %8120 = vmatpush.bf16.msrb.mxu1 %v11283_v8  ;;  %8148 = vmatpush.bf16.msrb.mxu3 %v11299_v59  ;;  %v11292_v8 = vld [vmem:[%s11926_s4 + $0xbc0] sm:$0xff]  ;;  %v11303_v59 = vld [vmem:[%s11926_s4 + $0xc18] sm:$0xff]  ;;  %v3375_v4 = vpack.c.bf16 %v3311_v32, %v3247_v14 }
 0x4ff   : > { %8100 = vmatmul.bf16.vlgmr.msra.gmra.mxu3 %v3373_v58  ;;  %v7863_v37 = vpop.f32.mrf.mxu2  ;;  %v3249_v58 = vld [vmem:[#allocation3 + $0x10] sm:$0xff]  ;;  %v11335_v32 = vld [vmem:[%s11926_s4 + $0xd18] sm:$0xff] }
 0x500   : > { %8111 = vmatpush.bf16.msrb.mxu0 %v11270_v13  ;;  %v7864_v63 = vadd.f32 %v7863_v37, %v7850_v56  ;;  %v11320_v56 = vld [vmem:[%s11926_s4 + $0xca0] sm:$0xff]  ;;  %v11338_v37 = vld [vmem:[%s11926_s4 + $0xd30] sm:$0xff] }
 0x501   : > { %8135 = vmatpush.bf16.msrb.mxu2 %v11290_v22  ;;  %v3313_v22 = vld [vmem:[#allocation3 + $0x38] sm:$0xff] }
 0x502   : > { %8121 = vmatpush.bf16.msrb.mxu1 %v11282_v47  ;;  %8149 = vmatpush.bf16.msrb.mxu3 %v11298_v50  ;;  %v7877_v35 = vpop.f32.mrf.mxu3  ;;  %v7851_v62 = vpop.f32.mrf.mxu1  ;;  %v11331_v47 = vld [vmem:[%s11926_s4 + $0xcf8] sm:$0xff]  ;;  %v8852_v50 = vsel %vm2940_vm15, 1.0, %v14407_v11 }
 0x503   : > { %v7878_v6 = vadd.f32 %v7877_v35, %v7864_v63  ;;  %v7852_v30 = vadd.f32 %v7851_v62, %v7838_v57  ;;  %v11302_v57 = vld [vmem:[%s11926_s4 + $0xc10] sm:$0xff]  ;;  %v11311_v63 = vld [vmem:[%s11926_s4 + $0xc58] sm:$0xff] }
 0x504   : > { %8112 = vmatpush.bf16.msrb.mxu0 %v11269_v10  ;;  %v3054_v10 = vld.sshfl [vmem:[#allocation1] sm:$0xff pattern:$0x73625140]  ;;  %v11318_v35 = vld [vmem:[%s11926_s4 + $0xc90] sm:$0xff] }
 0x505   : > { %8136 = vmatpush.bf16.msrb.mxu2 %v11289_v7  ;;  %v3377_v7 = vpack.c.bf16 %v3313_v22, %v3249_v58  ;;  %3184 = vst [vmem:[#allocation3 + $0x78] sm:$0xc0] %v3054_v10  ;;  %v3251_v58 = vld [vmem:[#allocation3 + $0x240] sm:$0xff]  ;;  %v3315_v22 = vld [vmem:[#allocation3 + $0x308] sm:$0xff] }
 0x506   : > { %8122 = vmatpush.bf16.msrb.mxu1 %v11281_v60  ;;  %8150 = vmatpush.bf16.msrb.mxu3 %v11297_v39  ;;  %v11322_v60 = vld [vmem:[%s11926_s4 + $0xcb0] sm:$0xff]  ;;  %v3056_v39 = vld.sshfl [vmem:[#allocation1 + $0x10] sm:$0xff pattern:$0x73625140] }
 0x507   : > { %v7865_v33 = vpop.f32.mrf.mxu2  ;;  %3186 = vst [vmem:[#allocation3 + $0x370] sm:$0xc0] %v3056_v39  ;;  %v11334_v39 = vld [vmem:[%s11926_s4 + $0xd10] sm:$0xff] }
 0x508   : > { %8113 = vmatpush.bf16.msrb.mxu0 %v11268_v40  ;;  %v7891_v51 = vpop.f32.mrf.mxu0  ;;  %v7866_v13 = vadd.f32 %v7865_v33, %v7852_v30  ;;  %v11314_v40 = vld [vmem:[%s11926_s4 + $0xc70] sm:$0xff]  ;;  %v11324_v33 = vld [vmem:[%s11926_s4 + $0xcc0] sm:$0xff] }
 0x509   : > { %8137 = vmatpush.bf16.msrb.mxu2 %v11288_v31  ;;  %v14169_v5 = vadd.f32 %v7891_v51, %v7878_v6  ;;  %v11337_v6 = vld [vmem:[%s11926_s4 + $0xd28] sm:$0xff]  ;;  %v11326_v30 = vld [vmem:[%s11926_s4 + $0xcd0] sm:$0xff] }
 0x50a   : > { %8123 = vmatpush.bf16.msrb.mxu1 %v11280_v3  ;;  %8151 = vmatpush.bf16.msrb.mxu3 %v11296_v38  ;;  %v7879_v15 = vpop.f32.mrf.mxu3  ;;  %v11301_v38 = vld [vmem:[%s11926_s4 + $0xc08] sm:$0xff] }
 0x50b   : > { %8114 = vmatmul.bf16.vlgmr.msrb.gmra.mxu0 %v3374_v27  ;;  %v7880_v18 = vadd.f32 %v7879_v15, %v7866_v13  ;;  %v11321_v27 = vld [vmem:[%s11926_s4 + $0xca8] sm:$0xff] }
 0x50c   : > { %8162 = vmatpush.bf16.msra.mxu0 %v11307_v41  ;;  %v3057_v41 = vld.sshfl [vmem:[#allocation1 + $0x18] sm:$0xff pattern:$0x73625140]  ;;  %v3314_v17 = vld [vmem:[#allocation3 + $0x78] sm:$0xff] }
 0x50d   : > { %8138 = vmatpush.bf16.msrb.mxu2 %v11287_v0  ;;  %3187 = vst [vmem:[#allocation3 + $0xc8] sm:$0xc0] %v3057_v41  ;;  %v11329_v0 = vld [vmem:[%s11926_s4 + $0xce8] sm:$0xff]  ;;  %v11346_v41 = vld [vmem:[%s11926_s4 + $0xd70] sm:$0xff] }
 0x50e   : > { %8124 = vmatpush.bf16.msrb.mxu1 %v11279_v53  ;;  %8152 = vmatpush.bf16.msrb.mxu3 %v11295_v24  ;;  %3062 = vst [vmem:[#allocation1 + $0x3] ss:$4 sm:$0xff] %v8852_v50  ;;  %v11339_v53 = vld [vmem:[%s11926_s4 + $0xd38] sm:$0xff]  ;;  %v11312_v24 = vld [vmem:[%s11926_s4 + $0xc60] sm:$0xff]  ;;  %v3316_v14 = vld [vmem:[#allocation3 + $0x370] sm:$0xff] }
 0x510   : > { %8163 = vmatpush.bf16.msra.mxu0 %v11306_v43  ;;  %v7893_v31 = vpop.f32.mrf.mxu0  ;;  %v11300_v43 = vld [vmem:[%s11926_s4 + $0xc00] sm:$0xff] }
 0x511   : > { %8139 = vmatpush.bf16.msrb.mxu2 %v11286_v25  ;;  %v7894_v3 = vadd.f32 %v7893_v31, %v7880_v18  ;;  %v11328_v25 = vld [vmem:[%s11926_s4 + $0xce0] sm:$0xff]  ;;  %v3060_v31 = vld.sshfl [vmem:[#allocation1 + $0x30] sm:$0xff pattern:$0x73625140] }
 0x512   : > { %8125 = vmatpush.bf16.msrb.mxu1 %v11278_v29  ;;  %8153 = vmatpush.bf16.msrb.mxu3 %v11294_v45  ;;  %v2876_v29 = vsub.f32 1.0, %v13704_v54  ;;  %v11327_v45 = vld [vmem:[%s11926_s4 + $0xcd8] sm:$0xff]  ;;  %v11310_v54 = vld [vmem:[%s11926_s4 + $0xc50] sm:$0xff]  ;;  %3190 = vst [vmem:[#allocation3 + $0x228] sm:$0xc0] %v3060_v31  ;;  %v11376_v31 = vld [vmem:[%s11926_s4 + $0xe60] sm:$0xff] }
 0x514   : > { %8164 = vmatpush.bf16.msra.mxu0 %v11305_v20  ;;  %v3378_v20 = vpack.c.bf16 %v3314_v17, %v3250_v9  ;;  %v2892_v62 = vmul.f32 %v2876_v29, %v13689_v12  ;;  %v11336_v12 = vld [vmem:[%s11926_s4 + $0xd20] sm:$0xff]  ;;  %v3317_v50 = vld [vmem:[#allocation3 + $0xc8] sm:$0xff]  ;;  %v11343_v29 = vld [vmem:[%s11926_s4 + $0xd58] sm:$0xff] }
 0x515   : > { %8140 = vmatpush.bf16.msrb.mxu2 %v11285_v52  ;;  %v11332_v9 = vld [vmem:[%s11926_s4 + $0xd00] sm:$0xff]  ;;  %v3254_v17 = vld [vmem:[#allocation3 + $0x208] sm:$0xff] }
 0x516   : > { %8126 = vmatpush.bf16.msrb.mxu1 %v11277_v55  ;;  %8154 = vmatpush.bf16.msrb.mxu3 %v11293_v16 }
 0x518   : > { %8165 = vmatpush.bf16.msra.mxu0 %v11304_v19  ;;  %v8837_v19 = vld [vmem:[%s11924_s29 + $0x3f8] sm:$0xff] }
 0x519   : > { %8141 = vmatpush.bf16.msrb.mxu2 %v11284_v26  ;;  %v11317_v26 = vld [vmem:[%s11926_s4 + $0xc88] sm:$0xff]  ;;  %v2925_v51 = vadd.f32 %v8837_v19, %v2892_v62 }
 0x51a   : > { %8127 = vmatpush.bf16.msrb.mxu1 %v11276_v46  ;;  %8155 = vmatpush.bf16.msrb.mxu3 %v11292_v8  ;;  %v7905_v48 = vpop.f32.mrf.mxu1  ;;  %v11349_v62 = vld [vmem:[%s11926_s4 + $0xd88] sm:$0xff] }
 0x51b   : > { %v7906_v28 = vadd.f32 %v7905_v48, %v14169_v5  ;;  %v11308_v5 = vld [vmem:[%s11926_s4 + $0xc40] sm:$0xff]  ;;  %vm2941_vm0 = vcmp.ge.f32.partialorder %v2925_v51, 1.0  ;;  %v11357_v19 = vld [vmem:[%s11926_s4 + $0xdc8] sm:$0xff]  ;;  %v11387_v51 = vld [vmem:[%s11926_s4 + $0xeb8] sm:$0xff] }
 0x51c   : > { %8166 = vmatpush.bf16.msra.mxu0 %v11303_v59  ;;  %8142 = vmatmul.bf16.vlgmr.msrb.gmra.mxu2 %v3376_v23  ;;  %v11316_v59 = vld [vmem:[%s11926_s4 + $0xc80] sm:$0xff]  ;;  %v8853_v10 = vsel %vm2941_vm0, 1.0, %v14407_v11  ;;  %v3059_v11 = vld.sshfl [vmem:[#allocation1 + $0x28] sm:$0xff pattern:$0x73625140] }
 0x51d   : > { %8190 = vmatpush.bf16.msra.mxu2 %v11323_v36  ;;  %8128 = vmatmul.bf16.vlgmr.msrb.gmra.mxu1 %v3375_v4  ;;  %v3252_v36 = vld [vmem:[#allocation3 + $0x90] sm:$0xff]  ;;  %v3253_v23 = vld [vmem:[#allocation3 + $0x3a0] sm:$0xff]  ;;  %v11363_v4 = vld [vmem:[%s11926_s4 + $0xdf8] sm:$0xff]  ;;  %3189 = vst [vmem:[#allocation3 + $0x360] sm:$0xc0] %v3059_v11 }
 0x51e   : > { %8176 = vmatpush.bf16.msra.mxu1 %v11315_v21  ;;  %8204 = vmatpush.bf16.msra.mxu3 %v11331_v47  ;;  %v11355_v21 = vld [vmem:[%s11926_s4 + $0xdb8] sm:$0xff]  ;;  %v3381_v1 = vpack.c.bf16 %v3317_v50, %v3253_v23  ;;  %v11394_v23 = vld [vmem:[%s11926_s4 + $0xef0] sm:$0xff]  ;;  %v3067_v50 = vld.sshfl [vmem:[#allocation1 + $0x18] sm:$0xff pattern:$0x73625140] }
 0x51f   : > { %8156 = vmatmul.bf16.vlgmr.msrb.gmra.mxu3 %v3377_v7  ;;  %v7919_v52 = vpop.f32.mrf.mxu2  ;;  %v11347_v47 = vld [vmem:[%s11926_s4 + $0xd78] sm:$0xff]  ;;  %3195 = vst [vmem:[#allocation3] sm:$0xc0] %v3067_v50 }
 0x520   : > { %8167 = vmatpush.bf16.msra.mxu0 %v11302_v57  ;;  %v7920_v2 = vadd.f32 %v7919_v52, %v7906_v28  ;;  %v3380_v57 = vpack.c.bf16 %v3316_v14, %v3252_v36  ;;  %v11359_v28 = vld [vmem:[%s11926_s4 + $0xdd8] sm:$0xff]  ;;  %v11368_v52 = vld [vmem:[%s11926_s4 + $0xe20] sm:$0xff] }
 0x521   : > { %8191 = vmatpush.bf16.msra.mxu2 %v11322_v60  ;;  %v3379_v60 = vpack.c.bf16 %v3315_v22, %v3251_v58  ;;  %v11386_v58 = vld [vmem:[%s11926_s4 + $0xeb0] sm:$0xff]  ;;  %v3066_v22 = vld.sshfl [vmem:[#allocation1 + $0x10] sm:$0xff pattern:$0x73625140] }
 0x522   : > { %8177 = vmatpush.bf16.msra.mxu1 %v11314_v40  ;;  %8205 = vmatpush.bf16.msra.mxu3 %v11330_v61  ;;  %v7933_v55 = vpop.f32.mrf.mxu3  ;;  %v7907_v46 = vpop.f32.mrf.mxu1  ;;  %v3058_v40 = vld.sshfl [vmem:[#allocation1 + $0x20] sm:$0xff pattern:$0x73625140]  ;;  %v11354_v61 = vld [vmem:[%s11926_s4 + $0xdb0] sm:$0xff]  ;;  %3194 = vst [vmem:[#allocation3 + $0x68] sm:$0xc0] %v3066_v22 }
 0x523   : > { %v14201_v16 = vadd.f32 %v7933_v55, %v7920_v2  ;;  %v7908_v8 = vadd.f32 %v7907_v46, %v7894_v3  ;;  %3188 = vst [vmem:[#allocation3 + $0x278] sm:$0xc0] %v3058_v40  ;;  %v11362_v3 = vld [vmem:[%s11926_s4 + $0xdf0] sm:$0xff]  ;;  %v11340_v2 = vld [vmem:[%s11926_s4 + $0xd40] sm:$0xff]  ;;  %v3256_v46 = vld [vmem:[#allocation3 + $0x88] sm:$0xff] }
 0x524   : > { %8168 = vmatpush.bf16.msra.mxu0 %v11301_v38  ;;  %v3061_v38 = vld.sshfl [vmem:[#allocation1 + $0x38] sm:$0xff pattern:$0x73625140]  ;;  %v11423_v50 = vld [vmem:[%s11926_s4 + $0xfd8] sm:$0xff] }
 0x525   : > { %8192 = vmatpush.bf16.msra.mxu2 %v11321_v27  ;;  %v11333_v27 = vld [vmem:[%s11926_s4 + $0xd08] sm:$0xff]  ;;  %3191 = vst [vmem:[#allocation3 + $0x348] sm:$0xc0] %v3061_v38  ;;  %v11356_v55 = vld [vmem:[%s11926_s4 + $0xdc0] sm:$0xff]  ;;  %v11402_v38 = vld [vmem:[%s11926_s4 + $0xf30] sm:$0xff] }
 0x526   : > { %8178 = vmatpush.bf16.msra.mxu1 %v11313_v44  ;;  %8206 = vmatpush.bf16.msra.mxu3 %v11329_v0  ;;  %v11353_v44 = vld [vmem:[%s11926_s4 + $0xda8] sm:$0xff]  ;;  %3063 = vst [vmem:[#allocation1 + $0x23] ss:$4 sm:$0xff] %v8853_v10  ;;  %v11424_v22 = vld [vmem:[%s11926_s4 + $0xfe0] sm:$0xff] }
 0x527   : > { %v7921_v13 = vpop.f32.mrf.mxu2  ;;  %v11345_v0 = vld [vmem:[%s11926_s4 + $0xd68] sm:$0xff] }
 0x528   : > { %8169 = vmatpush.bf16.msra.mxu0 %v11300_v43  ;;  %v7922_v15 = vadd.f32 %v7921_v13, %v7908_v8  ;;  %v11361_v43 = vld [vmem:[%s11926_s4 + $0xde8] sm:$0xff]  ;;  %v3255_v8 = vld [vmem:[#allocation3 + $0xd0] sm:$0xff] }
 0x529   : > { %8193 = vmatpush.bf16.msra.mxu2 %v11320_v56  ;;  %v3064_v13 = vld.sshfl [vmem:[#allocation1] sm:$0xff pattern:$0x73625140] }
 0x52a   : > { %8179 = vmatpush.bf16.msra.mxu1 %v11312_v24  ;;  %8207 = vmatpush.bf16.msra.mxu3 %v11328_v25  ;;  %v7935_v18 = vpop.f32.mrf.mxu3  ;;  %v3318_v56 = vld [vmem:[#allocation3 + $0x278] sm:$0xff]  ;;  %v11344_v25 = vld [vmem:[%s11926_s4 + $0xd60] sm:$0xff]  ;;  %3192 = vst [vmem:[#allocation3 + $0x148] sm:$0xc0] %v3064_v13  ;;  %v11393_v10 = vld [vmem:[%s11926_s4 + $0xee8] sm:$0xff] }
 0x52b   : > { %8170 = vmatmul.bf16.vlgmr.msra.gmra.mxu0 %v3378_v20  ;;  %v14215_v7 = vadd.f32 %v7935_v18, %v7922_v15  ;;  %v11371_v24 = vld [vmem:[%s11926_s4 + $0xe38] sm:$0xff]  ;;  %v11360_v20 = vld [vmem:[%s11926_s4 + $0xde0] sm:$0xff]  ;;  %v3382_v48 = vpack.c.bf16 %v3318_v56, %v3254_v17  ;;  %v11378_v15 = vld [vmem:[%s11926_s4 + $0xe70] sm:$0xff] }
 0x52c   : > { %8218 = vmatpush.bf16.msrb.mxu0 %v11339_v53  ;;  %v11352_v53 = vld [vmem:[%s11926_s4 + $0xda0] sm:$0xff]  ;;  %v11365_v18 = vld [vmem:[%s11926_s4 + $0xe08] sm:$0xff]  ;;  %v11390_v17 = vld [vmem:[%s11926_s4 + $0xed0] sm:$0xff] }
 0x52d   : > { %8194 = vmatpush.bf16.msra.mxu2 %v11319_v34  ;;  %v11351_v34 = vld [vmem:[%s11926_s4 + $0xd98] sm:$0xff]  ;;  %v11381_v56 = vld [vmem:[%s11926_s4 + $0xe88] sm:$0xff] }
 0x52e   : > { %8180 = vmatpush.bf16.msra.mxu1 %v11311_v63  ;;  %8208 = vmatpush.bf16.msra.mxu3 %v11327_v45  ;;  %v11350_v63 = vld [vmem:[%s11926_s4 + $0xd90] sm:$0xff]  ;;  %v11369_v45 = vld [vmem:[%s11926_s4 + $0xe28] sm:$0xff] }
 0x530   : > { %8219 = vmatpush.bf16.msrb.mxu0 %v11338_v37  ;;  %v11370_v37 = vld [vmem:[%s11926_s4 + $0xe30] sm:$0xff] }
 0x531   : > { %8195 = vmatpush.bf16.msra.mxu2 %v11318_v35  ;;  %v11342_v35 = vld [vmem:[%s11926_s4 + $0xd50] sm:$0xff]  ;;  %v3322_v40 = vld [vmem:[#allocation3 + $0x148] sm:$0xff] }
 0x532   : > { %8181 = vmatpush.bf16.msra.mxu1 %v11310_v54  ;;  %8209 = vmatpush.bf16.msra.mxu3 %v11326_v30  ;;  %v11341_v54 = vld [vmem:[%s11926_s4 + $0xd48] sm:$0xff]  ;;  %v11348_v30 = vld [vmem:[%s11926_s4 + $0xd80] sm:$0xff] }
 0x534   : > { %8220 = vmatpush.bf16.msrb.mxu0 %v11337_v6  ;;  %v11358_v6 = vld [vmem:[%s11926_s4 + $0xdd0] sm:$0xff] }
 0x535   : > { %8196 = vmatpush.bf16.msra.mxu2 %v11317_v26  ;;  %v3320_v26 = vld [vmem:[#allocation3 + $0x228] sm:$0xff] }
 0x536   : > { %8182 = vmatpush.bf16.msra.mxu1 %v11309_v49  ;;  %8210 = vmatpush.bf16.msra.mxu3 %v11325_v42  ;;  %v3319_v49 = vld [vmem:[#allocation3 + $0x360] sm:$0xff]  ;;  %v11379_v42 = vld [vmem:[%s11926_s4 + $0xe78] sm:$0xff]  ;;  %v3384_v36 = vpack.c.bf16 %v3320_v26, %v3256_v46  ;;  %v3069_v46 = vld.sshfl [vmem:[#allocation1 + $0x28] sm:$0xff pattern:$0x73625140] }
 0x537   : > { %v3383_v14 = vpack.c.bf16 %v3319_v49, %v3255_v8  ;;  %3197 = vst [vmem:[#allocation3 + $0x270] sm:$0xc0] %v3069_v46  ;;  %v11410_v8 = vld [vmem:[%s11926_s4 + $0xf70] sm:$0xff]  ;;  %v3071_v49 = vld.sshfl [vmem:[#allocation1 + $0x38] sm:$0xff pattern:$0x73625140] }
 0x538   : > { %8221 = vmatpush.bf16.msrb.mxu0 %v11336_v12  ;;  %v11367_v12 = vld [vmem:[%s11926_s4 + $0xe18] sm:$0xff]  ;;  %3199 = vst [vmem:[#allocation3 + $0x190] sm:$0xc0] %v3071_v49 }
 0x539   : > { %8197 = vmatpush.bf16.msra.mxu2 %v11316_v59  ;;  %v3321_v59 = vld [vmem:[#allocation3 + $0x348] sm:$0xff] }
 0x53a   : > { %8183 = vmatpush.bf16.msra.mxu1 %v11308_v5  ;;  %8211 = vmatpush.bf16.msra.mxu3 %v11324_v33  ;;  %v3257_v5 = vld [vmem:[#allocation3 + $0x2f0] sm:$0xff]  ;;  %v11395_v33 = vld [vmem:[%s11926_s4 + $0xef8] sm:$0xff] }
 0x53c   : > { %8222 = vmatpush.bf16.msrb.mxu0 %v11335_v32  ;;  %8198 = vmatmul.bf16.vlgmr.msra.gmra.mxu2 %v3380_v57  ;;  %v11366_v32 = vld [vmem:[%s11926_s4 + $0xe10] sm:$0xff]  ;;  %v11377_v57 = vld [vmem:[%s11926_s4 + $0xe68] sm:$0xff] }
 0x53d   : > { %8246 = vmatpush.bf16.msrb.mxu2 %v11355_v21  ;;  %8184 = vmatmul.bf16.vlgmr.msra.gmra.mxu1 %v3379_v60  ;;  %v3385_v21 = vpack.c.bf16 %v3321_v59, %v3257_v5  ;;  %v11364_v60 = vld [vmem:[%s11926_s4 + $0xe00] sm:$0xff]  ;;  %v11397_v5 = vld [vmem:[%s11926_s4 + $0xf08] sm:$0xff] }
 0x53e   : > { %8232 = vmatpush.bf16.msrb.mxu1 %v11347_v47  ;;  %8260 = vmatpush.bf16.msrb.mxu3 %v11363_v4  ;;  %v3065_v47 = vld.sshfl [vmem:[#allocation1 + $0x8] sm:$0xff pattern:$0x73625140]  ;;  %v11385_v4 = vld [vmem:[%s11926_s4 + $0xea8] sm:$0xff] }
 0x53f   : > { %8212 = vmatmul.bf16.vlgmr.msra.gmra.mxu3 %v3381_v1  ;;  %3193 = vst [vmem:[#allocation3 + $0xf8] sm:$0xc0] %v3065_v47  ;;  %v11384_v1 = vld [vmem:[%s11926_s4 + $0xea0] sm:$0xff]  ;;  %v11417_v59 = vld [vmem:[%s11926_s4 + $0xfa8] sm:$0xff]  ;;  %v11415_v47 = vld [vmem:[%s11926_s4 + $0xf98] sm:$0xff] }
 0x540   : > { %8223 = vmatpush.bf16.msrb.mxu0 %v11334_v39  ;;  %v3258_v39 = vld [vmem:[#allocation3 + $0x358] sm:$0xff] }
 0x541   : > { %8247 = vmatpush.bf16.msrb.mxu2 %v11354_v61  ;;  %v11403_v61 = vld [vmem:[%s11926_s4 + $0xf38] sm:$0xff]  ;;  %v3386_v11 = vpack.c.bf16 %v3322_v40, %v3258_v39  ;;  %v11421_v39 = vld [vmem:[%s11926_s4 + $0xfc8] sm:$0xff]  ;;  %v11412_v40 = vld [vmem:[%s11926_s4 + $0xf80] sm:$0xff] }
 0x542   : > { %8233 = vmatpush.bf16.msrb.mxu1 %v11346_v41  ;;  %8261 = vmatpush.bf16.msrb.mxu3 %v11362_v3  ;;  %v11392_v41 = vld [vmem:[%s11926_s4 + $0xee0] sm:$0xff]  ;;  %v11383_v3 = vld [vmem:[%s11926_s4 + $0xe98] sm:$0xff] }
 0x544   : > { %8224 = vmatpush.bf16.msrb.mxu0 %v11333_v27  ;;  %v11375_v27 = vld [vmem:[%s11926_s4 + $0xe58] sm:$0xff] }
 0x545   : > { %8248 = vmatpush.bf16.msrb.mxu2 %v11353_v44  ;;  %v11391_v44 = vld [vmem:[%s11926_s4 + $0xed8] sm:$0xff] }
 0x546   : > { %8234 = vmatpush.bf16.msrb.mxu1 %v11345_v0  ;;  %8262 = vmatpush.bf16.msrb.mxu3 %v11361_v43  ;;  %v11382_v0 = vld [vmem:[%s11926_s4 + $0xe90] sm:$0xff]  ;;  %v11401_v43 = vld [vmem:[%s11926_s4 + $0xf28] sm:$0xff] }
 0x548   : > { %8225 = vmatpush.bf16.msrb.mxu0 %v11332_v9  ;;  %v11374_v9 = vld [vmem:[%s11926_s4 + $0xe50] sm:$0xff] }
 0x549   : > { %8249 = vmatpush.bf16.msrb.mxu2 %v11352_v53  ;;  %v11400_v53 = vld [vmem:[%s11926_s4 + $0xf20] sm:$0xff] }
 0x54a   : > { %8235 = vmatpush.bf16.msrb.mxu1 %v11344_v25  ;;  %8263 = vmatpush.bf16.msrb.mxu3 %v11360_v20  ;;  %v11389_v25 = vld [vmem:[%s11926_s4 + $0xec8] sm:$0xff]  ;;  %v11372_v20 = vld [vmem:[%s11926_s4 + $0xe40] sm:$0xff] }
 0x54b   : > { %8226 = vmatmul.bf16.vlgmr.msrb.gmra.mxu0 %v3382_v48  ;;  %v11380_v48 = vld [vmem:[%s11926_s4 + $0xe80] sm:$0xff] }
 0x54c   : > { %8274 = vmatpush.bf16.msra.mxu0 %v11371_v24  ;;  %v11373_v24 = vld [vmem:[%s11926_s4 + $0xe48] sm:$0xff] }
 0x54d   : > { %8250 = vmatpush.bf16.msrb.mxu2 %v11351_v34  ;;  %v11388_v34 = vld [vmem:[%s11926_s4 + $0xec0] sm:$0xff] }
 0x54e   : > { %8236 = vmatpush.bf16.msrb.mxu1 %v11343_v29  ;;  %8264 = vmatpush.bf16.msrb.mxu3 %v11359_v28  ;;  %v3324_v29 = vld [vmem:[#allocation3 + $0x68] sm:$0xff]  ;;  %v11399_v28 = vld [vmem:[%s11926_s4 + $0xf18] sm:$0xff] }
 0x550   : > { %8275 = vmatpush.bf16.msra.mxu0 %v11370_v37  ;;  %v3260_v37 = vld [vmem:[#allocation3 + $0x350] sm:$0xff] }
 0x551   : > { %8251 = vmatpush.bf16.msrb.mxu2 %v11350_v63  ;;  %v11419_v63 = vld [vmem:[%s11926_s4 + $0xfb8] sm:$0xff] }
 0x552   : > { %8237 = vmatpush.bf16.msrb.mxu1 %v11342_v35  ;;  %8265 = vmatpush.bf16.msrb.mxu3 %v11358_v6  ;;  %v3323_v35 = vld [vmem:[#allocation3 + $0xf8] sm:$0xff] }
 0x553   : > { %v11411_v6 = vld [vmem:[%s11926_s4 + $0xf78] sm:$0xff] }
 0x554   : > { %8276 = vmatpush.bf16.msra.mxu0 %v11369_v45  ;;  %v3259_v45 = vld [vmem:[#allocation3 + $0x268] sm:$0xff] }
 0x555   : > { %8252 = vmatpush.bf16.msrb.mxu2 %v11349_v62  ;;  %v3261_v62 = vld [vmem:[#allocation3 + $0x188] sm:$0xff] }
 0x556   : > { %8238 = vmatpush.bf16.msrb.mxu1 %v11341_v54  ;;  %8266 = vmatpush.bf16.msrb.mxu3 %v11357_v19  ;;  %v11427_v54 = vld [vmem:[%s11926_s4 + $0xff8] sm:$0xff]  ;;  %v3388_v19 = vpack.c.bf16 %v3324_v29, %v3260_v37 }
 0x558   : > { %8277 = vmatpush.bf16.msra.mxu0 %v11368_v52  ;;  %v3325_v52 = vld [vmem:[#allocation3] sm:$0xff] }
 0x559   : > { %8253 = vmatpush.bf16.msrb.mxu2 %v11348_v30  ;;  %v3387_v30 = vpack.c.bf16 %v3323_v35, %v3259_v45  ;;  %v3389_v26 = vpack.c.bf16 %v3325_v52, %v3261_v62 }
 0x55a   : > { %8239 = vmatpush.bf16.msrb.mxu1 %v11340_v2  ;;  %8267 = vmatpush.bf16.msrb.mxu3 %v11356_v55  ;;  %v3068_v2 = vld.sshfl [vmem:[#allocation1 + $0x20] sm:$0xff pattern:$0x73625140]  ;;  %v11398_v55 = vld [vmem:[%s11926_s4 + $0xf10] sm:$0xff] }
 0x55b   : > { %3196 = vst [vmem:[#allocation3 + $0x298] sm:$0xc0] %v3068_v2 }
 0x55c   : > { %8278 = vmatpush.bf16.msra.mxu0 %v11367_v12  ;;  %8254 = vmatmul.bf16.vlgmr.msrb.gmra.mxu2 %v3384_v36  ;;  %v11418_v12 = vld [vmem:[%s11926_s4 + $0xfb0] sm:$0xff]  ;;  %v11425_v36 = vld [vmem:[%s11926_s4 + $0xfe8] sm:$0xff] }
 0x55d   : > { %8302 = vmatpush.bf16.msra.mxu2 %v11387_v51  ;;  %8240 = vmatmul.bf16.vlgmr.msrb.gmra.mxu1 %v3383_v14  ;;  %v3070_v51 = vld.sshfl [vmem:[#allocation1 + $0x30] sm:$0xff pattern:$0x73625140]  ;;  %v11396_v14 = vld [vmem:[%s11926_s4 + $0xf00] sm:$0xff] }
 0x55e   : > { %8288 = vmatpush.bf16.msra.mxu1 %v11379_v42  ;;  %8316 = vmatpush.bf16.msra.mxu3 %v11395_v33  ;;  %3198 = vst [vmem:[#allocation3 + $0x310] sm:$0xc0] %v3070_v51  ;;  %v11426_v42 = vld [vmem:[%s11926_s4 + $0xff0] sm:$0xff]  ;;  %v11409_v33 = vld [vmem:[%s11926_s4 + $0xf68] sm:$0xff] }
 0x55f   : > { %8268 = vmatmul.bf16.vlgmr.msrb.gmra.mxu3 %v3385_v21  ;;  %v11416_v21 = vld [vmem:[%s11926_s4 + $0xfa0] sm:$0xff] }
 0x560   : > { %8279 = vmatpush.bf16.msra.mxu0 %v11366_v32  ;;  %v3262_v32 = vld [vmem:[#allocation3 + $0x1d8] sm:$0xff] }
 0x561   : > { %8303 = vmatpush.bf16.msra.mxu2 %v11386_v58  ;;  %v11408_v58 = vld [vmem:[%s11926_s4 + $0xf60] sm:$0xff] }
 0x562   : > { %8289 = vmatpush.bf16.msra.mxu1 %v11378_v15  ;;  %8317 = vmatpush.bf16.msra.mxu3 %v11394_v23  ;;  %v3326_v13 = vld [vmem:[#allocation3 + $0x298] sm:$0xff] }
 0x563   : > { %v3390_v15 = vpack.c.bf16 %v3326_v13, %v3262_v32  ;;  %v11407_v23 = vld [vmem:[%s11926_s4 + $0xf58] sm:$0xff] }
 0x564   : > { %8280 = vmatpush.bf16.msra.mxu0 %v11365_v18  ;;  %v11414_v18 = vld [vmem:[%s11926_s4 + $0xf90] sm:$0xff] }
 0x565   : > { %8304 = vmatpush.bf16.msra.mxu2 %v11385_v4  ;;  %v11406_v4 = vld [vmem:[%s11926_s4 + $0xf50] sm:$0xff] }
 0x566   : > { %8290 = vmatpush.bf16.msra.mxu1 %v11377_v57  ;;  %8318 = vmatpush.bf16.msra.mxu3 %v11393_v10  ;;  %v11422_v57 = vld [vmem:[%s11926_s4 + $0xfd0] sm:$0xff]  ;;  %v11413_v10 = vld [vmem:[%s11926_s4 + $0xf88] sm:$0xff] }
 0x568   : > { %8281 = vmatpush.bf16.msra.mxu0 %v11364_v60  ;;  %v11405_v60 = vld [vmem:[%s11926_s4 + $0xf48] sm:$0xff] }
 0x569   : > { %8305 = vmatpush.bf16.msra.mxu2 %v11384_v1  ;;  %v3264_v1 = vld [vmem:[#allocation3 + $0x140] sm:$0xff] }
 0x56a   : > { %8291 = vmatpush.bf16.msra.mxu1 %v11376_v31  ;;  %8319 = vmatpush.bf16.msra.mxu3 %v11392_v41  ;;  %v11404_v31 = vld [vmem:[%s11926_s4 + $0xf40] sm:$0xff]  ;;  %v3263_v41 = vld [vmem:[#allocation3 + $0x30] sm:$0xff] }
 0x56b   : > { %8282 = vmatmul.bf16.vlgmr.msra.gmra.mxu0 %v3386_v11  ;;  %v3327_v11 = vld [vmem:[#allocation3 + $0x270] sm:$0xff] }
 0x56c   : > { %8330 = vmatpush.bf16.msrb.mxu0 %v11403_v61  ;;  %v3328_v61 = vld [vmem:[#allocation3 + $0x310] sm:$0xff] }
 0x56d   : > { %8306 = vmatpush.bf16.msra.mxu2 %v11383_v3  ;;  %v7947_v3 = vpop.f32.mrf.mxu0 }
 0x56e   : > { %8292 = vmatpush.bf16.msra.mxu1 %v11375_v27  ;;  %8320 = vmatpush.bf16.msra.mxu3 %v11391_v44  ;;  %v3265_v27 = vld [vmem:[#allocation3 + $0x2a8] sm:$0xff]  ;;  %v3329_v44 = vld [vmem:[#allocation3 + $0x190] sm:$0xff]  ;;  %v7948_v2 = vadd.f32 %v7947_v3, %v14201_v16 }
 0x570   : > { %8331 = vmatpush.bf16.msrb.mxu0 %v11402_v38  ;;  %v11420_v38 = vld [vmem:[%s11926_s4 + $0xfc0] sm:$0xff] }
 0x571   : > { %8307 = vmatpush.bf16.msra.mxu2 %v11382_v0  ;;  %v3392_v0 = vpack.c.bf16 %v3328_v61, %v3264_v1 }
 0x572   : > { %8293 = vmatpush.bf16.msra.mxu1 %v11374_v9  ;;  %8321 = vmatpush.bf16.msra.mxu3 %v11390_v17  ;;  %v3393_v9 = vpack.c.bf16 %v3329_v44, %v3265_v27  ;;  %v7961_v17 = vpop.f32.mrf.mxu1 }
 0x574   : > { %8332 = vmatpush.bf16.msrb.mxu0 %v11401_v43  ;;  %v3391_v43 = vpack.c.bf16 %v3327_v11, %v3263_v41 }
 0x575   : > { %8308 = vmatpush.bf16.msra.mxu2 %v11381_v56  ;;  %v7975_v56 = vpop.f32.mrf.mxu2 }
 0x576   : > { %8294 = vmatpush.bf16.msra.mxu1 %v11373_v24  ;;  %8322 = vmatpush.bf16.msra.mxu3 %v11389_v25  ;;  %v7989_v24 = vpop.f32.mrf.mxu3 }
 0x578   : > { %8333 = vmatpush.bf16.msrb.mxu0 %v11400_v53  ;;  %v7949_v53 = vpop.f32.mrf.mxu0 }
 0x579   : > { %8309 = vmatpush.bf16.msra.mxu2 %v11380_v48  ;;  %v7950_v51 = vadd.f32 %v7949_v53, %v14215_v7 }
 0x57a   : > { %8295 = vmatpush.bf16.msra.mxu1 %v11372_v20  ;;  %8323 = vmatpush.bf16.msra.mxu3 %v11388_v34  ;;  %v7963_v25 = vpop.f32.mrf.mxu1 }
 0x57c   : > { %8334 = vmatpush.bf16.msrb.mxu0 %v11399_v28  ;;  %8310 = vmatmul.bf16.vlgmr.msra.gmra.mxu2 %v3388_v19 }
 0x57d   : > { %8358 = vmatpush.bf16.msrb.mxu2 %v11419_v63  ;;  %8296 = vmatmul.bf16.vlgmr.msra.gmra.mxu1 %v3387_v30  ;;  %v7977_v48 = vpop.f32.mrf.mxu2 }
 0x57e   : > { %8344 = vmatpush.bf16.msrb.mxu1 %v11411_v6  ;;  %8372 = vmatpush.bf16.msrb.mxu3 %v11427_v54  ;;  %v7991_v34 = vpop.f32.mrf.mxu3 }
 0x57f   : > { %8324 = vmatmul.bf16.vlgmr.msra.gmra.mxu3 %v3389_v26 }
 0x580   : > { %8335 = vmatpush.bf16.msrb.mxu0 %v11398_v55  ;;  %v8003_v20 = vpop.f32.mrf.mxu0  ;;  %v7962_v55 = vadd.f32 %v7961_v17, %v7948_v2 }
 0x581   : > { %8359 = vmatpush.bf16.msrb.mxu2 %v11418_v12 }
 0x582   : > { %8345 = vmatpush.bf16.msrb.mxu1 %v11410_v8  ;;  %8373 = vmatpush.bf16.msrb.mxu3 %v11426_v42  ;;  %v8017_v37 = vpop.f32.mrf.mxu1  ;;  %v7976_v26 = vadd.f32 %v7975_v56, %v7962_v55 }
 0x584   : > { %8336 = vmatpush.bf16.msrb.mxu0 %v11397_v5  ;;  %v7990_v49 = vadd.f32 %v7989_v24, %v7976_v26  ;;  %v7964_v5 = vadd.f32 %v7963_v25, %v7950_v51 }
 0x585   : > { %8360 = vmatpush.bf16.msrb.mxu2 %v11417_v59  ;;  %v8031_v29 = vpop.f32.mrf.mxu2 }
 0x586   : > { %8346 = vmatpush.bf16.msrb.mxu1 %v11409_v33  ;;  %8374 = vmatpush.bf16.msrb.mxu3 %v11425_v36  ;;  %v8045_v63 = vpop.f32.mrf.mxu3  ;;  %v8004_v59 = vadd.f32 %v8003_v20, %v7990_v49  ;;  %v7978_v36 = vadd.f32 %v7977_v48, %v7964_v5 }
 0x588   : > { %8337 = vmatpush.bf16.msrb.mxu0 %v11396_v14  ;;  %v8005_v28 = vpop.f32.mrf.mxu0  ;;  %v8018_v14 = vadd.f32 %v8017_v37, %v8004_v59 }
 0x589   : > { %8361 = vmatpush.bf16.msrb.mxu2 %v11416_v21  ;;  %v7992_v21 = vadd.f32 %v7991_v34, %v7978_v36 }
 0x58a   : > { %8347 = vmatpush.bf16.msrb.mxu1 %v11408_v58  ;;  %8375 = vmatpush.bf16.msrb.mxu3 %v11424_v22  ;;  %v8019_v45 = vpop.f32.mrf.mxu1  ;;  %v8032_v58 = vadd.f32 %v8031_v29, %v8018_v14 }
 0x58b   : > { %8338 = vmatmul.bf16.vlgmr.msrb.gmra.mxu0 %v3390_v15  ;;  %v8006_v22 = vadd.f32 %v8005_v28, %v7992_v21 }
 0x58c   : > { %v8046_v15 = vadd.f32 %v8045_v63, %v8032_v58 }
 0x58d   : > { %8362 = vmatpush.bf16.msrb.mxu2 %v11415_v47  ;;  %v8033_v6 = vpop.f32.mrf.mxu2 }
 0x58e   : > { %8348 = vmatpush.bf16.msrb.mxu1 %v11407_v23  ;;  %8376 = vmatpush.bf16.msrb.mxu3 %v11423_v50  ;;  %v8047_v62 = vpop.f32.mrf.mxu3  ;;  %v8020_v23 = vadd.f32 %v8019_v45, %v8006_v22 }
 0x590   : > { %v8059_v35 = vpop.f32.mrf.mxu0  ;;  %v8034_v7 = vadd.f32 %v8033_v6, %v8020_v23 }
 0x591   : > { %8363 = vmatpush.bf16.msrb.mxu2 %v11414_v18  ;;  %v8060_v50 = vadd.f32 %v8059_v35, %v8046_v15 }
 0x592   : > { %8349 = vmatpush.bf16.msrb.mxu1 %v11406_v4  ;;  %8377 = vmatpush.bf16.msrb.mxu3 %v11422_v57  ;;  %v8073_v52 = vpop.f32.mrf.mxu1 }
 0x593   : > { %v8074_v57 = vadd.f32 %v8073_v52, %v8060_v50 }
 0x595   : > { %8364 = vmatpush.bf16.msrb.mxu2 %v11413_v10  ;;  %v8087_v54 = vpop.f32.mrf.mxu2 }
 0x596   : > { %8350 = vmatpush.bf16.msrb.mxu1 %v11405_v60  ;;  %8378 = vmatpush.bf16.msrb.mxu3 %v11421_v39  ;;  %v8101_v30 = vpop.f32.mrf.mxu3  ;;  %v8048_v60 = vadd.f32 %v8047_v62, %v8034_v7  ;;  %v8088_v39 = vadd.f32 %v8087_v54, %v8074_v57 }
 0x598   : > { %v8061_v19 = vpop.f32.mrf.mxu0  ;;  %v8102_v61 = vadd.f32 %v8101_v30, %v8088_v39 }
 0x599   : > { %8365 = vmatpush.bf16.msrb.mxu2 %v11412_v40  ;;  %v8062_v1 = vadd.f32 %v8061_v19, %v8048_v60 }
 0x59a   : > { %8351 = vmatpush.bf16.msrb.mxu1 %v11404_v31  ;;  %8379 = vmatpush.bf16.msrb.mxu3 %v11420_v38  ;;  %v8075_v46 = vpop.f32.mrf.mxu1 }
 0x59b   : > { %v8076_v11 = vadd.f32 %v8075_v46, %v8062_v1 }
 0x59c   : > { %8366 = vmatmul.bf16.vlgmr.msrb.gmra.mxu2 %v3392_v0 }
 0x59d   : > { %8352 = vmatmul.bf16.vlgmr.msrb.gmra.mxu1 %v3391_v43  ;;  %8380 = vmatmul.bf16.vlgmr.msrb.gmra.mxu3 %v3393_v9  ;;  %v8089_v8 = vpop.f32.mrf.mxu2 }
 0x59e   : > { %v8103_v42 = vpop.f32.mrf.mxu3  ;;  %v8090_v27 = vadd.f32 %v8089_v8, %v8076_v11 }
 0x5a0   : > { %v8115_v12 = vpop.f32.mrf.mxu0  ;;  %v8104_v43 = vadd.f32 %v8103_v42, %v8090_v27 }
 0x5a1   : > { %v8116_v3 = vadd.f32 %v8115_v12, %v8102_v61 }
 0x5a2   : > { %v8129_v33 = vpop.f32.mrf.mxu1 }
 0x5a3   : > { %v8130_v44 = vadd.f32 %v8129_v33, %v8116_v3 }
 0x5a5   : > { %v8143_v32 = vpop.f32.mrf.mxu2 }
 0x5a6   : > { %v8157_v16 = vpop.f32.mrf.mxu3  ;;  %v8144_v9 = vadd.f32 %v8143_v32, %v8130_v44 }
 0x5a8   : > { %v8117_v13 = vpop.f32.mrf.mxu0  ;;  %v8158_v24 = vadd.f32 %v8157_v16, %v8144_v9  ;;  %v3201_v9 = vld [vmem:[#allocation2 + $0x8] sm:$0xff] }
 0x5a9   : > { %v8118_v56 = vadd.f32 %v8117_v13, %v8104_v43 }
 0x5aa   : > { %v8131_v47 = vpop.f32.mrf.mxu1 }
 0x5ab   : > { %v8132_v20 = vadd.f32 %v8131_v47, %v8118_v56 }
 0x5ad   : > { %v8145_v4 = vpop.f32.mrf.mxu2 }
 0x5ae   : > { %v8159_v10 = vpop.f32.mrf.mxu3  ;;  %v8146_v37 = vadd.f32 %v8145_v4, %v8132_v20 }
 0x5b0   : > { %v8171_v18 = vpop.f32.mrf.mxu0  ;;  %v8160_v45 = vadd.f32 %v8159_v10, %v8146_v37 }
 0x5b1   : > { %v8172_v48 = vadd.f32 %v8171_v18, %v8158_v24 }
 0x5b8   : > { %v8173_v41 = vpop.f32.mrf.mxu0 }
 0x5b9   : > { %v8174_v62 = vadd.f32 %v8173_v41, %v8160_v45 }
 0x5ba   : > { %v8185_v40 = vpop.f32.mrf.mxu1 }
 0x5bb   : > { %v8186_v29 = vadd.f32 %v8185_v40, %v8172_v48 }
 0x5bf   : > { %v8199_v31 = vpop.f32.mrf.mxu2 }
 0x5c0   : > { %v8200_v35 = vadd.f32 %v8199_v31, %v8186_v29  ;;  %v3200_v31 = vld [vmem:[#allocation2] sm:$0xff] }
 0x5c2   : > { %v8213_v38 = vpop.f32.mrf.mxu3  ;;  %v8187_v0 = vpop.f32.mrf.mxu1 }
 0x5c3   : > { %v8214_v52 = vadd.f32 %v8213_v38, %v8200_v35  ;;  %v8188_v19 = vadd.f32 %v8187_v0, %v8174_v62 }
 0x5c7   : > { %v8201_v53 = vpop.f32.mrf.mxu2 }
 0x5c8   : > { %v8227_v17 = vpop.f32.mrf.mxu0  ;;  %v8202_v55 = vadd.f32 %v8201_v53, %v8188_v19 }
 0x5c9   : > { %v8228_v2 = vadd.f32 %v8227_v17, %v8214_v52 }
 0x5ca   : > { %v8215_v25 = vpop.f32.mrf.mxu3 }
 0x5cb   : > { %v8216_v51 = vadd.f32 %v8215_v25, %v8202_v55 }
 0x5d0   : > { %v8229_v63 = vpop.f32.mrf.mxu0 }
 0x5d1   : > { %v8230_v42 = vadd.f32 %v8229_v63, %v8216_v51 }
 0x5da   : > { %v8241_v34 = vpop.f32.mrf.mxu1 }
 0x5db   : > { %v8242_v26 = vadd.f32 %v8241_v34, %v8228_v2 }
 0x5df   : > { %v8255_v28 = vpop.f32.mrf.mxu2 }
 0x5e0   : > { %v8256_v8 = vadd.f32 %v8255_v28, %v8242_v26 }
 0x5e2   : > { %v8269_v6 = vpop.f32.mrf.mxu3  ;;  %v8243_v54 = vpop.f32.mrf.mxu1 }
 0x5e3   : > { %v8270_v5 = vadd.f32 %v8269_v6, %v8256_v8  ;;  %v8244_v36 = vadd.f32 %v8243_v54, %v8230_v42 }
 0x5e7   : > { %v8257_v46 = vpop.f32.mrf.mxu2 }
 0x5e8   : > { %v8283_v30 = vpop.f32.mrf.mxu0  ;;  %v8258_v13 = vadd.f32 %v8257_v46, %v8244_v36 }
 0x5e9   : > { %v8284_v14 = vadd.f32 %v8283_v30, %v8270_v5 }
 0x5ea   : > { %v8271_v12 = vpop.f32.mrf.mxu3 }
 0x5eb   : > { %v8272_v16 = vadd.f32 %v8271_v12, %v8258_v13 }
 0x5f0   : > { %v8285_v33 = vpop.f32.mrf.mxu0 }
 0x5f1   : > { %v8286_v47 = vadd.f32 %v8285_v33, %v8272_v16 }
 0x5fa   : > { %v8297_v49 = vpop.f32.mrf.mxu1 }
 0x5fb   : > { %v8298_v21 = vadd.f32 %v8297_v49, %v8284_v14 }
 0x5ff   : > { %v8311_v59 = vpop.f32.mrf.mxu2 }
 0x600   : > { %v8312_v22 = vadd.f32 %v8311_v59, %v8298_v21 }
 0x602   : > { %v8325_v32 = vpop.f32.mrf.mxu3  ;;  %v8299_v58 = vpop.f32.mrf.mxu1 }
 0x603   : > { %v8326_v50 = vadd.f32 %v8325_v32, %v8312_v22  ;;  %v8300_v7 = vadd.f32 %v8299_v58, %v8286_v47 }
 0x607   : > { %v8313_v23 = vpop.f32.mrf.mxu2 }
 0x608   : > { %v8339_v15 = vpop.f32.mrf.mxu0  ;;  %v8314_v10 = vadd.f32 %v8313_v23, %v8300_v7 }
 0x609   : > { %v8340_v4 = vadd.f32 %v8339_v15, %v8326_v50 }
 0x60a   : > { %v8327_v18 = vpop.f32.mrf.mxu3 }
 0x60b   : > { %v8328_v1 = vadd.f32 %v8327_v18, %v8314_v10 }
 0x610   : > { %v8341_v40 = vpop.f32.mrf.mxu0 }
 0x611   : > { %v8342_v3 = vadd.f32 %v8341_v40, %v8328_v1 }
 0x61a   : > { %v8353_v57 = vpop.f32.mrf.mxu1 }
 0x61b   : > { %v8354_v60 = vadd.f32 %v8353_v57, %v8340_v4 }
 0x61f   : > { %v8367_v39 = vpop.f32.mrf.mxu2 }
 0x620   : > { %v8368_v61 = vadd.f32 %v8367_v39, %v8354_v60  ;;  %v8381_v41 = vpop.f32.mrf.mxu3 }
 0x622   : > { %v8382_v11 = vadd.f32 %v8381_v41, %v8368_v61  ;;  %v8355_v27 = vpop.f32.mrf.mxu1 }
 0x623   : > { %v8356_v44 = vadd.f32 %v8355_v27, %v8342_v3 }
 0x624   : > { %v8386_v38 = vadd.f32 %v8382_v11, %v3200_v31 }
 0x626   : > { %8389 = vst.msk [vmem:[#allocation2] sm:$0xff] %vm8388_vm1, %v8386_v38 }
 0x627   : > { %v8369_v0 = vpop.f32.mrf.mxu2 }
 0x628   : > { %v8370_v43 = vadd.f32 %v8369_v0, %v8356_v44  ;;  %v8383_v17 = vpop.f32.mrf.mxu3 }
 0x62a   : > { %v8384_v56 = vadd.f32 %v8383_v17, %v8370_v43  ;;  %8394 = sbr.rel (%p10902_p13) target bundleno = 1645 (0x66d), region = 67 }
 0x62c   : > { %v8387_v53 = vadd.f32 %v8384_v56, %v3201_v9 }
 0x62e   : > { %8390 = vst.msk [vmem:[#allocation2 + $0x8] sm:$0xff] %vm8388_vm1, %v8387_v53 }
 0x62f   : > { %v8395_v24 = vld [vmem:[#allocation2] sm:$0x3]  ;;  %v11483_v25 = vld [vmem:[%s14384_s2] ss:$0 sm:$0xff]  ;;  %vm8405_vm2 = vcmask 254976   ;;  %v11575_v37 = vmov 0.0  }
 0x630   : > { %v8400_v20 = vadd.f32 %v11483_v25, %v8395_v24  ;;  %v11484_v48 = vld [vmem:[%s14384_s2] ss:$0 sm:$0xff]  ;;  %v8409_v34 = vld [vmem:[#allocation2 + $0x2] sm:$0x3]  ;;  %v8422_v62 = vld [vmem:[#allocation2 + $0x4] sm:$0x3] }
 0x631   : > { %v8414_v63 = vadd.f32 %v11484_v48, %v8409_v34  ;;  %v11485_v6 = vld [vmem:[%s14384_s2] ss:$0 sm:$0xff]  ;;  %v8435_v46 = vld [vmem:[#allocation2 + $0x6] sm:$0x3] }
 0x632   : > { %vm8402_vm3 = vcmp.ge.f32.partialorder %v8400_v20, 1.0  ;;  %v8427_v19 = vadd.f32 %v11485_v6, %v8422_v62  ;;  %v11486_v55 = vld [vmem:[%s14384_s2] ss:$0 sm:$0xff] }
 0x633   : > { %v10903_v29 = vsel %vm8402_vm3, 1.0, %v11575_v37  ;;  %v8440_v51 = vadd.f32 %v11486_v55, %v8435_v46  ;;  %v11487_v42 = vld [vmem:[%s14384_s2] ss:$0 sm:$0xff] }
 0x634   : > { %8406 = vst.msk [vmem:[%s14385_s3] sm:$0x3] %vm8405_vm2, %v10903_v29  ;;  %v8407_v28 = vsub.f32 1.0, %v10903_v29  ;;  %v11488_v13 = vld [vmem:[%s14384_s2] ss:$0 sm:$0xff] }
 0x635   : > { %v8448_v5 = vld [vmem:[#allocation2 + $0x8] sm:$0x3]  ;;  %v8461_v21 = vld [vmem:[#allocation2 + $0xa] sm:$0x3]  ;;  %v11489_v23 = vld [vmem:[%s14384_s2] ss:$0 sm:$0xff] }
 0x636   : > { %v8408_v45 = vmul.f32 %v8407_v28, %v8400_v20  ;;  %v8453_v36 = vadd.f32 %v11487_v42, %v8448_v5  ;;  %v8466_v22 = vadd.f32 %v11488_v13, %v8461_v21  ;;  %v8474_v50 = vld [vmem:[#allocation2 + $0xc] sm:$0x3]  ;;  %v11490_v60 = vld [vmem:[%s14384_s2] ss:$0 sm:$0xff]  ;;  %v8487_v39 = vld [vmem:[#allocation2 + $0xe] sm:$0x3] }
 0x637   : > { %v8479_v4 = vadd.f32 %v11489_v23, %v8474_v50  ;;  %v8492_v61 = vadd.f32 %v11490_v60, %v8487_v39 }
 0x638   : > { %v8415_v35 = vadd.f32 %v8414_v63, %v8408_v45 }
 0x63a   : > { %vm8416_vm4 = vcmp.ge.f32.partialorder %v8415_v35, 1.0 }
 0x63b   : > { %v10904_v52 = vsel %vm8416_vm4, 1.0, %v11575_v37 }
 0x63c   : > { %8419 = vst.msk [vmem:[%s14385_s3 + $0x2] sm:$0x3] %vm8405_vm2, %v10904_v52  ;;  %v8420_v54 = vsub.f32 1.0, %v10904_v52 }
 0x63e   : > { %v8421_v2 = vmul.f32 %v8420_v54, %v8415_v35 }
 0x640   : > { %v8428_v30 = vadd.f32 %v8427_v19, %v8421_v2 }
 0x642   : > { %vm8429_vm5 = vcmp.ge.f32.partialorder %v8428_v30, 1.0 }
 0x643   : > { %v10905_v26 = vsel %vm8429_vm5, 1.0, %v11575_v37 }
 0x644   : > { %8432 = vst.msk [vmem:[%s14385_s3 + $0x4] sm:$0x3] %vm8405_vm2, %v10905_v26  ;;  %v8433_v12 = vsub.f32 1.0, %v10905_v26 }
 0x646   : > { %v8434_v8 = vmul.f32 %v8433_v12, %v8428_v30 }
 0x648   : > { %v8441_v49 = vadd.f32 %v8440_v51, %v8434_v8 }
 0x64a   : > { %vm8442_vm6 = vcmp.ge.f32.partialorder %v8441_v49, 1.0 }
 0x64b   : > { %v10906_v59 = vsel %vm8442_vm6, 1.0, %v11575_v37 }
 0x64c   : > { %8445 = vst.msk [vmem:[%s14385_s3 + $0x6] sm:$0x3] %vm8405_vm2, %v10906_v59  ;;  %v8446_v33 = vsub.f32 1.0, %v10906_v59 }
 0x64e   : > { %v8447_v14 = vmul.f32 %v8446_v33, %v8441_v49 }
 0x650   : > { %v8454_v32 = vadd.f32 %v8453_v36, %v8447_v14 }
 0x652   : > { %vm8455_vm7 = vcmp.ge.f32.partialorder %v8454_v32, 1.0 }
 0x653   : > { %v10907_v58 = vsel %vm8455_vm7, 1.0, %v11575_v37 }
 0x654   : > { %8458 = vst.msk [vmem:[%s14385_s3 + $0x8] sm:$0x3] %vm8405_vm2, %v10907_v58  ;;  %v8459_v16 = vsub.f32 1.0, %v10907_v58 }
 0x656   : > { %v8460_v15 = vmul.f32 %v8459_v16, %v8454_v32 }
 0x658   : > { %v8467_v47 = vadd.f32 %v8466_v22, %v8460_v15 }
 0x65a   : > { %vm8468_vm8 = vcmp.ge.f32.partialorder %v8467_v47, 1.0 }
 0x65b   : > { %v10908_v18 = vsel %vm8468_vm8, 1.0, %v11575_v37 }
 0x65c   : > { %8471 = vst.msk [vmem:[%s14385_s3 + $0xa] sm:$0x3] %vm8405_vm2, %v10908_v18  ;;  %v8472_v7 = vsub.f32 1.0, %v10908_v18 }
 0x65e   : > { %v8473_v57 = vmul.f32 %v8472_v7, %v8467_v47 }
 0x660   : > { %v8480_v10 = vadd.f32 %v8479_v4, %v8473_v57 }
 0x662   : > { %vm8481_vm9 = vcmp.ge.f32.partialorder %v8480_v10, 1.0 }
 0x663   : > { %v10909_v40 = vsel %vm8481_vm9, 1.0, %v11575_v37 }
 0x664   : > { %8484 = vst.msk [vmem:[%s14385_s3 + $0xc] sm:$0x3] %vm8405_vm2, %v10909_v40  ;;  %v8485_v1 = vsub.f32 1.0, %v10909_v40 }
 0x666   : > { %v8486_v31 = vmul.f32 %v8485_v1, %v8480_v10 }
 0x668   : > { %v8493_v41 = vadd.f32 %v8492_v61, %v8486_v31 }
 0x66a   : > { %vm8494_vm10 = vcmp.ge.f32.partialorder %v8493_v41, 1.0 }
 0x66b   : > { %v10910_v11 = vsel %vm8494_vm10, 1.0, %v11575_v37 }
 0x66c   : > { %8497 = vst.msk [vmem:[%s14385_s3 + $0xe] sm:$0x3] %vm8405_vm2, %v10910_v11 }
 0x66d PF: > { %s16_s17 = sadd.s32 1, %s11569_s17   ;;  %s14547_s12 = smov %s11553_s13 }
 0x66e   : > { %p13_p0 = scmp.ge.s32.totalorder %s16_s17, 6   ;;  %s14548_s13 = smov %s11557_s14 }
 0x66f   : > { %s14549_s14 = smov %s11644_s24  ;;  %s14550_s15 = smov %s11565_s16 }
 0x670   : > { %s14551_s16 = smov %s14553_s19  ;;  %15 = sbr.rel (!%p13_p0) target bundleno = 4 (0x4), region = 135 }
 0x675   :  { %8517 = vsyncpa [#allocation6], 1 }
 0x676   :  { %8519 = vsyncpa [#allocation6 + $0x1], 1 }

</bundles_post_ra>
